<compile_context>
chip_gen: v6e
topology: v6e:2x2x1
jax: 0.10.0
libtpu: 0.0.40
codegen_flags: <defaults>
</compile_context>

<pallas_src>
import functools

import jax
import jax.numpy as jnp
from jax.experimental import pallas as pl
from jax.experimental.pallas import tpu as pltpu

K = 5  # ConvTranspose2d kernel_size


def _decoder_kernel(x_ref, w1_ref, b1_ref, w2_ref, b2_ref, o_ref,
                    xp_ref, sh1_ref, mid_ref, sh2_ref, *, dims):
    """Fused conv1 + ReLU + conv2 for the whole (lane-packed) batch.

    x_ref  : (N, Cin, H, W)        VMEM block (whole batch, NCHW)
    w1_ref : (Cin*Cmid*K*K,)       SMEM, spatially flipped, row-major (ci,co,kh,kw)
    b1_ref : (Cmid,)               SMEM
    w2_ref : (Cmid*Cout*K*K,)      SMEM, spatially flipped
    b2_ref : (Cout,)               SMEM
    o_ref  : (N, Cout, Ho2, Wo2)   VMEM block (NCHW output)
    xp_ref : (Cin,  Hp1, N*Wp1)    VMEM scratch -- zero-padded L1 input, lane-packed
    sh1_ref: (K,    Hp1, N*Wp1)    VMEM scratch -- K lane-shifted copies (L1)
    mid_ref: (Cmid, Hp2, N*Wp2)    VMEM scratch -- zero-padded ReLU(conv1), packed
    sh2_ref: (K,    Hp2, N*Wp2)    VMEM scratch -- K lane-shifted copies (L2)
    """
    N, Cin, Cmid, Cout, H, W = dims
    Ho1, Wo1 = H + K - 1, W + K - 1
    Ho2, Wo2 = Ho1 + K - 1, Wo1 + K - 1
    Wp1 = W + 2 * (K - 1)        # per-image slab width, layer-1 padded input
    Wp2 = Wo1 + 2 * (K - 1)      # per-image slab width, layer-2 padded input
    NW1 = N * Wp1
    NW2 = N * Wp2

    # ---- stage the batch into zeroed, lane-packed padded scratches ----------
    # (single grid step -> this init runs exactly once; zero halos are what
    #  implement the "full" correlation of ConvTranspose2d)
    xp_ref[...] = jnp.zeros_like(xp_ref)
    mid_ref[...] = jnp.zeros_like(mid_ref)
    for n in range(N):
        off = n * Wp1 + (K - 1)
        for ci in range(Cin):
            xp_ref[ci, K - 1:K - 1 + H, off:off + W] = x_ref[n, ci]

    # ---- layer 1: ConvTranspose2d(Cin -> Cmid, 5) + ReLU  (VPU FMAs) ---------
    # Bias hoisted into accumulator init.  Lanes beyond Wo1 inside each image
    # slab accumulate garbage from the neighbouring slab but are never read.
    acc1 = [jnp.full((Ho1, NW1), b1_ref[co], jnp.float32) for co in range(Cmid)]
    for ci in range(Cin):
        plane = xp_ref[ci]                                  # (Hp1, NW1)
        # Hoisted kw lane shifts: K shifted copies per channel (not K*K).
        sh1_ref[0] = plane
        for kw in range(1, K):
            sh1_ref[kw, :, :NW1 - kw] = plane[:, kw:]       # tail lanes stale, unused
        for kh in range(K):
            for kw in range(K):
                tap = sh1_ref[kw, kh:kh + Ho1, :]           # sublane-offset load
                for co in range(Cmid):
                    wsc = w1_ref[((ci * Cmid + co) * K + kh) * K + kw]
                    acc1[co] = acc1[co] + wsc * tap

    # ReLU + re-pack the valid (Ho1, Wo1) block of each image into the zeroed,
    # padded (slab width Wp2) layer-2 input.
    for co in range(Cmid):
        for n in range(N):
            mid_ref[co, K - 1:K - 1 + Ho1,
                    n * Wp2 + K - 1:n * Wp2 + K - 1 + Wo1] = jnp.maximum(
                        acc1[co][:, n * Wp1:n * Wp1 + Wo1], 0.0)

    # ---- layer 2: ConvTranspose2d(Cmid -> Cout, 5), no activation ------------
    acc2 = [jnp.full((Ho2, NW2), b2_ref[co], jnp.float32) for co in range(Cout)]
    for ci in range(Cmid):
        plane = mid_ref[ci]                                 # (Hp2, NW2)
        sh2_ref[0] = plane
        for kw in range(1, K):
            sh2_ref[kw, :, :NW2 - kw] = plane[:, kw:]
        for kh in range(K):
            for kw in range(K):
                tap = sh2_ref[kw, kh:kh + Ho2, :]
                for co in range(Cout):
                    wsc = w2_ref[((ci * Cout + co) * K + kh) * K + kw]
                    acc2[co] = acc2[co] + wsc * tap

    # Output written directly in NCHW -- unpack each image's slab.
    for n in range(N):
        for co in range(Cout):
            o_ref[n, co] = acc2[co][:, n * Wp2:n * Wp2 + Wo2].astype(o_ref.dtype)


def mnist_decoder_forward(inputs_nhwc, params):
    """Pallas MNISTDecoder.forward.  inputs: NHWC; returns NCHW (like PyTorch)."""
    # Matches the module's `inputs.permute(0, 3, 1, 2)` (tiny layout-plumbing op).
    x = jnp.transpose(inputs_nhwc, (0, 3, 1, 2)).astype(jnp.float32)  # (N,Cin,H,W)
    N, Cin, H, W = x.shape

    w1, b1 = params["w1"], params["b1"]       # (Cin, Cmid, K, K), (Cmid,)
    w2, b2 = params["w2"], params["b2"]       # (Cmid, Cout, K, K), (Cout,)
    Cmid, Cout = w1.shape[1], w2.shape[1]

    Ho1, Wo1 = H + K - 1, W + K - 1
    Ho2, Wo2 = Ho1 + K - 1, Wo1 + K - 1
    Hp1, Wp1 = H + 2 * (K - 1), W + 2 * (K - 1)
    Hp2, Wp2 = Ho1 + 2 * (K - 1), Wo1 + 2 * (K - 1)

    # Weight preprocessing (glue, one-time): spatial flip + flatten for SMEM.
    w1_flat = w1[:, :, ::-1, ::-1].reshape(-1).astype(jnp.float32)
    w2_flat = w2[:, :, ::-1, ::-1].reshape(-1).astype(jnp.float32)
    b1f = b1.astype(jnp.float32)
    b2f = b2.astype(jnp.float32)

    kern = functools.partial(_decoder_kernel,
                             dims=(N, Cin, Cmid, Cout, H, W))
    smem_spec = pl.BlockSpec(memory_space=pltpu.MemorySpace.SMEM)

    # Single grid step: the whole (lane-packed) batch is one program.  On
    # single-TC v5e/v6e a 2-step grid is just a serial loop with per-step
    # overhead; on v7x the 2-way split was judged marginal at this size.
    return pl.pallas_call(
        kern,
        out_shape=jax.ShapeDtypeStruct((N, Cout, Ho2, Wo2), jnp.float32),
        grid=(1,),
        in_specs=[
            pl.BlockSpec((N, Cin, H, W), lambda i: (0, 0, 0, 0)),
            smem_spec,   # w1 (flipped, flat)
            smem_spec,   # b1
            smem_spec,   # w2 (flipped, flat)
            smem_spec,   # b2
        ],
        out_specs=pl.BlockSpec((N, Cout, Ho2, Wo2), lambda i: (0, 0, 0, 0)),
        scratch_shapes=[
            pltpu.VMEM((Cin, Hp1, N * Wp1), jnp.float32),   # packed padded L1 input
            pltpu.VMEM((K, Hp1, N * Wp1), jnp.float32),     # K lane-shifted planes (L1)
            pltpu.VMEM((Cmid, Hp2, N * Wp2), jnp.float32),  # packed padded intermediate
            pltpu.VMEM((K, Hp2, N * Wp2), jnp.float32),     # K lane-shifted planes (L2)
        ],
        compiler_params=pltpu.CompilerParams(
            dimension_semantics=("arbitrary",)),
    )(x, w1_flat, b1f, w2_flat, b2f)


# ----------------------------- pure-JAX reference -----------------------------
def _ref_convT(x_nhwc, w_pt, b):
    w = jnp.transpose(w_pt[:, :, ::-1, ::-1], (2, 3, 0, 1))   # HWIO
    y = jax.lax.conv_general_dilated(
        x_nhwc, w, window_strides=(1, 1),
        padding=[(K - 1, K - 1), (K - 1, K - 1)],
        dimension_numbers=("NHWC", "HWIO", "NHWC"),
        precision=jax.lax.Precision.HIGHEST)
    return y + b.reshape(1, 1, 1, -1)


def ref_forward(inputs_nhwc, params):
    x = jax.nn.relu(_ref_convT(inputs_nhwc, params["w1"], params["b1"]))
    x = _ref_convT(x, params["w2"], params["b2"])
    return jnp.transpose(x, (0, 3, 1, 2))     # NHWC -> NCHW


# ----------------------------------- main -------------------------------------
if __name__ == "__main__":
    in_channels, out_channels = 4, 1
    mid_channels = in_channels // 2
    N, H, W = 2, 16, 16

    key = jax.random.PRNGKey(0)
    k_in, k_w1, k_b1, k_w2, k_b2 = jax.random.split(key, 5)

    inputs = jax.random.normal(k_in, (N, H, W, in_channels), jnp.float32)
    params = {
        # PyTorch ConvTranspose2d weight layout: (Cin, Cout, kH, kW)
        "w1": 0.1 * jax.random.normal(k_w1, (in_channels, mid_channels, K, K),
                                      jnp.float32),
        "b1": 0.1 * jax.random.normal(k_b1, (mid_channels,), jnp.float32),
        "w2": 0.1 * jax.random.normal(k_w2, (mid_channels, out_channels, K, K),
                                      jnp.float32),
        "b2": 0.1 * jax.random.normal(k_b2, (out_channels,), jnp.float32),
    }

    out = jax.block_until_ready(mnist_decoder_forward(inputs, params))
    ref = jax.block_until_ready(ref_forward(inputs, params))

    assert out.shape == (N, out_channels, H + 2 * (K - 1), W + 2 * (K - 1)), out.shape
    assert jnp.allclose(out, ref, atol=1e-4, rtol=1e-4), \
        float(jnp.max(jnp.abs(out - ref)))
    print("KERNEL_OK")
</pallas_src>

<mosaic_0001>
module attributes {stable_mosaic.version = 11 : i64} {
  func.func @_decoder_kernel(%arg0: i32, %arg1: memref<2x4x16x16xf32, #tpu.memory_space<vmem>>, %arg2: memref<200xf32, #tpu.memory_space<smem>>, %arg3: memref<2xf32, #tpu.memory_space<smem>>, %arg4: memref<50xf32, #tpu.memory_space<smem>>, %arg5: memref<1xf32, #tpu.memory_space<smem>>, %arg6: memref<2x1x24x24xf32, #tpu.memory_space<vmem>>, %arg7: memref<4x24x48xf32, #tpu.memory_space<vmem>>, %arg8: memref<5x24x48xf32, #tpu.memory_space<vmem>>, %arg9: memref<2x28x56xf32, #tpu.memory_space<vmem>>, %arg10: memref<5x28x56xf32, #tpu.memory_space<vmem>>) attributes {dimension_semantics = [#tpu.dimension_semantics<arbitrary>], iteration_bounds = array<i64: 1>, scalar_prefetch = 0 : i64, scratch_operands = 4 : i64, tpu.core_type = #tpu.core_type<tc>, window_params = [{pipeline_mode = #tpu.pipeline_mode<synchronous>, transform_indices = @transform_0, window_bounds = array<i64: 2, 4, 16, 16>}, {transform_indices = @transform_1, window_bounds = array<i64: 200>}, {transform_indices = @transform_2, window_bounds = array<i64: 2>}, {transform_indices = @transform_3, window_bounds = array<i64: 50>}, {transform_indices = @transform_4, window_bounds = array<i64: 1>}, {pipeline_mode = #tpu.pipeline_mode<synchronous>, transform_indices = @transform_5, window_bounds = array<i64: 2, 1, 24, 24>}]} {
    %cst = arith.constant 0.000000e+00 : f32
    %0 = vector.broadcast %cst : f32 to vector<4x24x48xf32>
    %c0 = arith.constant 0 : index
    %c0_0 = arith.constant 0 : index
    %c0_1 = arith.constant 0 : index
    %1 = vector.load %arg7[%c0, %c0_0, %c0_1] : memref<4x24x48xf32, #tpu.memory_space<vmem>>, vector<4x24x48xf32>
    tpu.vector_store %arg7[%c0, %c0_0, %c0_1], %0 {strides = array<i32>} : memref<4x24x48xf32, #tpu.memory_space<vmem>>, vector<4x24x48xf32>,
    %cst_2 = arith.constant 0.000000e+00 : f32
    %2 = vector.broadcast %cst_2 : f32 to vector<2x28x56xf32>
    %c0_3 = arith.constant 0 : index
    %c0_4 = arith.constant 0 : index
    %c0_5 = arith.constant 0 : index
    %3 = vector.load %arg9[%c0_3, %c0_4, %c0_5] : memref<2x28x56xf32, #tpu.memory_space<vmem>>, vector<2x28x56xf32>
    tpu.vector_store %arg9[%c0_3, %c0_4, %c0_5], %2 {strides = array<i32>} : memref<2x28x56xf32, #tpu.memory_space<vmem>>, vector<2x28x56xf32>,
    %c0_6 = arith.constant 0 : index
    %c0_7 = arith.constant 0 : index
    %c0_8 = arith.constant 0 : index
    %c0_9 = arith.constant 0 : index
    %4 = vector.load %arg1[%c0_6, %c0_7, %c0_8, %c0_9] : memref<2x4x16x16xf32, #tpu.memory_space<vmem>>, vector<1x1x16x16xf32>
    %5 = vector.shape_cast %4 : vector<1x1x16x16xf32> to vector<16x16xf32>
    %c0_10 = arith.constant 0 : index
    %c4 = arith.constant 4 : index
    %c4_11 = arith.constant 4 : index
    %6 = vector.load %arg7[%c0_10, %c4, %c4_11] : memref<4x24x48xf32, #tpu.memory_space<vmem>>, vector<1x16x16xf32>
    %7 = vector.shape_cast %6 : vector<1x16x16xf32> to vector<16x16xf32>
    %8 = vector.shape_cast %5 : vector<16x16xf32> to vector<1x16x16xf32>
    tpu.vector_store %arg7[%c0_10, %c4, %c4_11], %8 {strides = array<i32>} : memref<4x24x48xf32, #tpu.memory_space<vmem>>, vector<1x16x16xf32>,
    %c0_12 = arith.constant 0 : index
    %c1 = arith.constant 1 : index
    %c0_13 = arith.constant 0 : index
    %c0_14 = arith.constant 0 : index
    %9 = vector.load %arg1[%c0_12, %c1, %c0_13, %c0_14] : memref<2x4x16x16xf32, #tpu.memory_space<vmem>>, vector<1x1x16x16xf32>
    %10 = vector.shape_cast %9 : vector<1x1x16x16xf32> to vector<16x16xf32>
    %c1_15 = arith.constant 1 : index
    %c4_16 = arith.constant 4 : index
    %c4_17 = arith.constant 4 : index
    %11 = vector.load %arg7[%c1_15, %c4_16, %c4_17] : memref<4x24x48xf32, #tpu.memory_space<vmem>>, vector<1x16x16xf32>
    %12 = vector.shape_cast %11 : vector<1x16x16xf32> to vector<16x16xf32>
    %13 = vector.shape_cast %10 : vector<16x16xf32> to vector<1x16x16xf32>
    tpu.vector_store %arg7[%c1_15, %c4_16, %c4_17], %13 {strides = array<i32>} : memref<4x24x48xf32, #tpu.memory_space<vmem>>, vector<1x16x16xf32>,
    %c0_18 = arith.constant 0 : index
    %c2 = arith.constant 2 : index
    %c0_19 = arith.constant 0 : index
    %c0_20 = arith.constant 0 : index
    %14 = vector.load %arg1[%c0_18, %c2, %c0_19, %c0_20] : memref<2x4x16x16xf32, #tpu.memory_space<vmem>>, vector<1x1x16x16xf32>
    %15 = vector.shape_cast %14 : vector<1x1x16x16xf32> to vector<16x16xf32>
    %c2_21 = arith.constant 2 : index
    %c4_22 = arith.constant 4 : index
    %c4_23 = arith.constant 4 : index
    %16 = vector.load %arg7[%c2_21, %c4_22, %c4_23] : memref<4x24x48xf32, #tpu.memory_space<vmem>>, vector<1x16x16xf32>
    %17 = vector.shape_cast %16 : vector<1x16x16xf32> to vector<16x16xf32>
    %18 = vector.shape_cast %15 : vector<16x16xf32> to vector<1x16x16xf32>
    tpu.vector_store %arg7[%c2_21, %c4_22, %c4_23], %18 {strides = array<i32>} : memref<4x24x48xf32, #tpu.memory_space<vmem>>, vector<1x16x16xf32>,
    %c0_24 = arith.constant 0 : index
    %c3 = arith.constant 3 : index
    %c0_25 = arith.constant 0 : index
    %c0_26 = arith.constant 0 : index
    %19 = vector.load %arg1[%c0_24, %c3, %c0_25, %c0_26] : memref<2x4x16x16xf32, #tpu.memory_space<vmem>>, vector<1x1x16x16xf32>
    %20 = vector.shape_cast %19 : vector<1x1x16x16xf32> to vector<16x16xf32>
    %c3_27 = arith.constant 3 : index
    %c4_28 = arith.constant 4 : index
    %c4_29 = arith.constant 4 : index
    %21 = vector.load %arg7[%c3_27, %c4_28, %c4_29] : memref<4x24x48xf32, #tpu.memory_space<vmem>>, vector<1x16x16xf32>
    %22 = vector.shape_cast %21 : vector<1x16x16xf32> to vector<16x16xf32>
    %23 = vector.shape_cast %20 : vector<16x16xf32> to vector<1x16x16xf32>
    tpu.vector_store %arg7[%c3_27, %c4_28, %c4_29], %23 {strides = array<i32>} : memref<4x24x48xf32, #tpu.memory_space<vmem>>, vector<1x16x16xf32>,
    %c1_30 = arith.constant 1 : index
    %c0_31 = arith.constant 0 : index
    %c0_32 = arith.constant 0 : index
    %c0_33 = arith.constant 0 : index
    %24 = vector.load %arg1[%c1_30, %c0_31, %c0_32, %c0_33] : memref<2x4x16x16xf32, #tpu.memory_space<vmem>>, vector<1x1x16x16xf32>
    %25 = vector.shape_cast %24 : vector<1x1x16x16xf32> to vector<16x16xf32>
    %c0_34 = arith.constant 0 : index
    %c4_35 = arith.constant 4 : index
    %c28 = arith.constant 28 : index
    %26 = vector.load %arg7[%c0_34, %c4_35, %c28] : memref<4x24x48xf32, #tpu.memory_space<vmem>>, vector<1x16x16xf32>
    %27 = vector.shape_cast %26 : vector<1x16x16xf32> to vector<16x16xf32>
    %28 = vector.shape_cast %25 : vector<16x16xf32> to vector<1x16x16xf32>
    tpu.vector_store %arg7[%c0_34, %c4_35, %c28], %28 {strides = array<i32>} : memref<4x24x48xf32, #tpu.memory_space<vmem>>, vector<1x16x16xf32>,
    %c1_36 = arith.constant 1 : index
    %c1_37 = arith.constant 1 : index
    %c0_38 = arith.constant 0 : index
    %c0_39 = arith.constant 0 : index
    %29 = vector.load %arg1[%c1_36, %c1_37, %c0_38, %c0_39] : memref<2x4x16x16xf32, #tpu.memory_space<vmem>>, vector<1x1x16x16xf32>
    %30 = vector.shape_cast %29 : vector<1x1x16x16xf32> to vector<16x16xf32>
    %c1_40 = arith.constant 1 : index
    %c4_41 = arith.constant 4 : index
    %c28_42 = arith.constant 28 : index
    %31 = vector.load %arg7[%c1_40, %c4_41, %c28_42] : memref<4x24x48xf32, #tpu.memory_space<vmem>>, vector<1x16x16xf32>
    %32 = vector.shape_cast %31 : vector<1x16x16xf32> to vector<16x16xf32>
    %33 = vector.shape_cast %30 : vector<16x16xf32> to vector<1x16x16xf32>
    tpu.vector_store %arg7[%c1_40, %c4_41, %c28_42], %33 {strides = array<i32>} : memref<4x24x48xf32, #tpu.memory_space<vmem>>, vector<1x16x16xf32>,
    %c1_43 = arith.constant 1 : index
    %c2_44 = arith.constant 2 : index
    %c0_45 = arith.constant 0 : index
    %c0_46 = arith.constant 0 : index
    %34 = vector.load %arg1[%c1_43, %c2_44, %c0_45, %c0_46] : memref<2x4x16x16xf32, #tpu.memory_space<vmem>>, vector<1x1x16x16xf32>
    %35 = vector.shape_cast %34 : vector<1x1x16x16xf32> to vector<16x16xf32>
    %c2_47 = arith.constant 2 : index
    %c4_48 = arith.constant 4 : index
    %c28_49 = arith.constant 28 : index
    %36 = vector.load %arg7[%c2_47, %c4_48, %c28_49] : memref<4x24x48xf32, #tpu.memory_space<vmem>>, vector<1x16x16xf32>
    %37 = vector.shape_cast %36 : vector<1x16x16xf32> to vector<16x16xf32>
    %38 = vector.shape_cast %35 : vector<16x16xf32> to vector<1x16x16xf32>
    tpu.vector_store %arg7[%c2_47, %c4_48, %c28_49], %38 {strides = array<i32>} : memref<4x24x48xf32, #tpu.memory_space<vmem>>, vector<1x16x16xf32>,
    %c1_50 = arith.constant 1 : index
    %c3_51 = arith.constant 3 : index
    %c0_52 = arith.constant 0 : index
    %c0_53 = arith.constant 0 : index
    %39 = vector.load %arg1[%c1_50, %c3_51, %c0_52, %c0_53] : memref<2x4x16x16xf32, #tpu.memory_space<vmem>>, vector<1x1x16x16xf32>
    %40 = vector.shape_cast %39 : vector<1x1x16x16xf32> to vector<16x16xf32>
    %c3_54 = arith.constant 3 : index
    %c4_55 = arith.constant 4 : index
    %c28_56 = arith.constant 28 : index
    %41 = vector.load %arg7[%c3_54, %c4_55, %c28_56] : memref<4x24x48xf32, #tpu.memory_space<vmem>>, vector<1x16x16xf32>
    %42 = vector.shape_cast %41 : vector<1x16x16xf32> to vector<16x16xf32>
    %43 = vector.shape_cast %40 : vector<16x16xf32> to vector<1x16x16xf32>
    tpu.vector_store %arg7[%c3_54, %c4_55, %c28_56], %43 {strides = array<i32>} : memref<4x24x48xf32, #tpu.memory_space<vmem>>, vector<1x16x16xf32>,
    %c0_57 = arith.constant 0 : index
    %44 = memref.load %arg3[%c0_57] : memref<2xf32, #tpu.memory_space<smem>>
    %45 = vector.broadcast %44 : f32 to vector<20x48xf32>
    %c1_58 = arith.constant 1 : index
    %46 = memref.load %arg3[%c1_58] : memref<2xf32, #tpu.memory_space<smem>>
    %47 = vector.broadcast %46 : f32 to vector<20x48xf32>
    %c0_59 = arith.constant 0 : index
    %c0_60 = arith.constant 0 : index
    %c0_61 = arith.constant 0 : index
    %48 = vector.load %arg7[%c0_59, %c0_60, %c0_61] : memref<4x24x48xf32, #tpu.memory_space<vmem>>, vector<1x24x48xf32>
    %49 = vector.shape_cast %48 : vector<1x24x48xf32> to vector<24x48xf32>
    %c0_62 = arith.constant 0 : index
    %c0_63 = arith.constant 0 : index
    %c0_64 = arith.constant 0 : index
    %50 = vector.load %arg8[%c0_62, %c0_63, %c0_64] : memref<5x24x48xf32, #tpu.memory_space<vmem>>, vector<1x24x48xf32>
    %51 = vector.shape_cast %50 : vector<1x24x48xf32> to vector<24x48xf32>
    %52 = vector.shape_cast %49 : vector<24x48xf32> to vector<1x24x48xf32>
    tpu.vector_store %arg8[%c0_62, %c0_63, %c0_64], %52 {strides = array<i32>} : memref<5x24x48xf32, #tpu.memory_space<vmem>>, vector<1x24x48xf32>,
    %53 = vector.extract_strided_slice %49 {offsets = [0, 1], sizes = [24, 47], strides = [1, 1]} : vector<24x48xf32> to vector<24x47xf32>
    %c1_65 = arith.constant 1 : index
    %c0_66 = arith.constant 0 : index
    %c0_67 = arith.constant 0 : index
    %54 = vector.load %arg8[%c1_65, %c0_66, %c0_67] : memref<5x24x48xf32, #tpu.memory_space<vmem>>, vector<1x24x47xf32>
    %55 = vector.shape_cast %54 : vector<1x24x47xf32> to vector<24x47xf32>
    %56 = vector.shape_cast %53 : vector<24x47xf32> to vector<1x24x47xf32>
    tpu.vector_store %arg8[%c1_65, %c0_66, %c0_67], %56 {strides = array<i32>} : memref<5x24x48xf32, #tpu.memory_space<vmem>>, vector<1x24x47xf32>,
    %57 = vector.extract_strided_slice %49 {offsets = [0, 2], sizes = [24, 46], strides = [1, 1]} : vector<24x48xf32> to vector<24x46xf32>
    %c2_68 = arith.constant 2 : index
    %c0_69 = arith.constant 0 : index
    %c0_70 = arith.constant 0 : index
    %58 = vector.load %arg8[%c2_68, %c0_69, %c0_70] : memref<5x24x48xf32, #tpu.memory_space<vmem>>, vector<1x24x46xf32>
    %59 = vector.shape_cast %58 : vector<1x24x46xf32> to vector<24x46xf32>
    %60 = vector.shape_cast %57 : vector<24x46xf32> to vector<1x24x46xf32>
    tpu.vector_store %arg8[%c2_68, %c0_69, %c0_70], %60 {strides = array<i32>} : memref<5x24x48xf32, #tpu.memory_space<vmem>>, vector<1x24x46xf32>,
    %61 = vector.extract_strided_slice %49 {offsets = [0, 3], sizes = [24, 45], strides = [1, 1]} : vector<24x48xf32> to vector<24x45xf32>
    %c3_71 = arith.constant 3 : index
    %c0_72 = arith.constant 0 : index
    %c0_73 = arith.constant 0 : index
    %62 = vector.load %arg8[%c3_71, %c0_72, %c0_73] : memref<5x24x48xf32, #tpu.memory_space<vmem>>, vector<1x24x45xf32>
    %63 = vector.shape_cast %62 : vector<1x24x45xf32> to vector<24x45xf32>
    %64 = vector.shape_cast %61 : vector<24x45xf32> to vector<1x24x45xf32>
    tpu.vector_store %arg8[%c3_71, %c0_72, %c0_73], %64 {strides = array<i32>} : memref<5x24x48xf32, #tpu.memory_space<vmem>>, vector<1x24x45xf32>,
    %65 = vector.extract_strided_slice %49 {offsets = [0, 4], sizes = [24, 44], strides = [1, 1]} : vector<24x48xf32> to vector<24x44xf32>
    %c4_74 = arith.constant 4 : index
    %c0_75 = arith.constant 0 : index
    %c0_76 = arith.constant 0 : index
    %66 = vector.load %arg8[%c4_74, %c0_75, %c0_76] : memref<5x24x48xf32, #tpu.memory_space<vmem>>, vector<1x24x44xf32>
    %67 = vector.shape_cast %66 : vector<1x24x44xf32> to vector<24x44xf32>
    %68 = vector.shape_cast %65 : vector<24x44xf32> to vector<1x24x44xf32>
    tpu.vector_store %arg8[%c4_74, %c0_75, %c0_76], %68 {strides = array<i32>} : memref<5x24x48xf32, #tpu.memory_space<vmem>>, vector<1x24x44xf32>,
    %c0_77 = arith.constant 0 : index
    %c0_78 = arith.constant 0 : index
    %c0_79 = arith.constant 0 : index
    %69 = vector.load %arg8[%c0_77, %c0_78, %c0_79] : memref<5x24x48xf32, #tpu.memory_space<vmem>>, vector<1x20x48xf32>
    %70 = vector.shape_cast %69 : vector<1x20x48xf32> to vector<20x48xf32>
    %c0_80 = arith.constant 0 : index
    %71 = memref.load %arg2[%c0_80] : memref<200xf32, #tpu.memory_space<smem>>
    %72 = vector.broadcast %71 : f32 to vector<20x48xf32>
    %73 = arith.mulf %72, %70 : vector<20x48xf32>
    %74 = arith.addf %45, %73 : vector<20x48xf32>
    %c25 = arith.constant 25 : index
    %75 = memref.load %arg2[%c25] : memref<200xf32, #tpu.memory_space<smem>>
    %76 = vector.broadcast %75 : f32 to vector<20x48xf32>
    %77 = arith.mulf %76, %70 : vector<20x48xf32>
    %78 = arith.addf %47, %77 : vector<20x48xf32>
    %c1_81 = arith.constant 1 : index
    %c0_82 = arith.constant 0 : index
    %c0_83 = arith.constant 0 : index
    %79 = vector.load %arg8[%c1_81, %c0_82, %c0_83] : memref<5x24x48xf32, #tpu.memory_space<vmem>>, vector<1x20x48xf32>
    %80 = vector.shape_cast %79 : vector<1x20x48xf32> to vector<20x48xf32>
    %c1_84 = arith.constant 1 : index
    %81 = memref.load %arg2[%c1_84] : memref<200xf32, #tpu.memory_space<smem>>
    %82 = vector.broadcast %81 : f32 to vector<20x48xf32>
    %83 = arith.mulf %82, %80 : vector<20x48xf32>
    %84 = arith.addf %74, %83 : vector<20x48xf32>
    %c26 = arith.constant 26 : index
    %85 = memref.load %arg2[%c26] : memref<200xf32, #tpu.memory_space<smem>>
    %86 = vector.broadcast %85 : f32 to vector<20x48xf32>
    %87 = arith.mulf %86, %80 : vector<20x48xf32>
    %88 = arith.addf %78, %87 : vector<20x48xf32>
    %c2_85 = arith.constant 2 : index
    %c0_86 = arith.constant 0 : index
    %c0_87 = arith.constant 0 : index
    %89 = vector.load %arg8[%c2_85, %c0_86, %c0_87] : memref<5x24x48xf32, #tpu.memory_space<vmem>>, vector<1x20x48xf32>
    %90 = vector.shape_cast %89 : vector<1x20x48xf32> to vector<20x48xf32>
    %c2_88 = arith.constant 2 : index
    %91 = memref.load %arg2[%c2_88] : memref<200xf32, #tpu.memory_space<smem>>
    %92 = vector.broadcast %91 : f32 to vector<20x48xf32>
    %93 = arith.mulf %92, %90 : vector<20x48xf32>
    %94 = arith.addf %84, %93 : vector<20x48xf32>
    %c27 = arith.constant 27 : index
    %95 = memref.load %arg2[%c27] : memref<200xf32, #tpu.memory_space<smem>>
    %96 = vector.broadcast %95 : f32 to vector<20x48xf32>
    %97 = arith.mulf %96, %90 : vector<20x48xf32>
    %98 = arith.addf %88, %97 : vector<20x48xf32>
    %c3_89 = arith.constant 3 : index
    %c0_90 = arith.constant 0 : index
    %c0_91 = arith.constant 0 : index
    %99 = vector.load %arg8[%c3_89, %c0_90, %c0_91] : memref<5x24x48xf32, #tpu.memory_space<vmem>>, vector<1x20x48xf32>
    %100 = vector.shape_cast %99 : vector<1x20x48xf32> to vector<20x48xf32>
    %c3_92 = arith.constant 3 : index
    %101 = memref.load %arg2[%c3_92] : memref<200xf32, #tpu.memory_space<smem>>
    %102 = vector.broadcast %101 : f32 to vector<20x48xf32>
    %103 = arith.mulf %102, %100 : vector<20x48xf32>
    %104 = arith.addf %94, %103 : vector<20x48xf32>
    %c28_93 = arith.constant 28 : index
    %105 = memref.load %arg2[%c28_93] : memref<200xf32, #tpu.memory_space<smem>>
    %106 = vector.broadcast %105 : f32 to vector<20x48xf32>
    %107 = arith.mulf %106, %100 : vector<20x48xf32>
    %108 = arith.addf %98, %107 : vector<20x48xf32>
    %c4_94 = arith.constant 4 : index
    %c0_95 = arith.constant 0 : index
    %c0_96 = arith.constant 0 : index
    %109 = vector.load %arg8[%c4_94, %c0_95, %c0_96] : memref<5x24x48xf32, #tpu.memory_space<vmem>>, vector<1x20x48xf32>
    %110 = vector.shape_cast %109 : vector<1x20x48xf32> to vector<20x48xf32>
    %c4_97 = arith.constant 4 : index
    %111 = memref.load %arg2[%c4_97] : memref<200xf32, #tpu.memory_space<smem>>
    %112 = vector.broadcast %111 : f32 to vector<20x48xf32>
    %113 = arith.mulf %112, %110 : vector<20x48xf32>
    %114 = arith.addf %104, %113 : vector<20x48xf32>
    %c29 = arith.constant 29 : index
    %115 = memref.load %arg2[%c29] : memref<200xf32, #tpu.memory_space<smem>>
    %116 = vector.broadcast %115 : f32 to vector<20x48xf32>
    %117 = arith.mulf %116, %110 : vector<20x48xf32>
    %118 = arith.addf %108, %117 : vector<20x48xf32>
    %c0_98 = arith.constant 0 : index
    %c1_99 = arith.constant 1 : index
    %c0_100 = arith.constant 0 : index
    %119 = vector.load %arg8[%c0_98, %c1_99, %c0_100] : memref<5x24x48xf32, #tpu.memory_space<vmem>>, vector<1x20x48xf32>
    %120 = vector.shape_cast %119 : vector<1x20x48xf32> to vector<20x48xf32>
    %c5 = arith.constant 5 : index
    %121 = memref.load %arg2[%c5] : memref<200xf32, #tpu.memory_space<smem>>
    %122 = vector.broadcast %121 : f32 to vector<20x48xf32>
    %123 = arith.mulf %122, %120 : vector<20x48xf32>
    %124 = arith.addf %114, %123 : vector<20x48xf32>
    %c30 = arith.constant 30 : index
    %125 = memref.load %arg2[%c30] : memref<200xf32, #tpu.memory_space<smem>>
    %126 = vector.broadcast %125 : f32 to vector<20x48xf32>
    %127 = arith.mulf %126, %120 : vector<20x48xf32>
    %128 = arith.addf %118, %127 : vector<20x48xf32>
    %c1_101 = arith.constant 1 : index
    %c1_102 = arith.constant 1 : index
    %c0_103 = arith.constant 0 : index
    %129 = vector.load %arg8[%c1_101, %c1_102, %c0_103] : memref<5x24x48xf32, #tpu.memory_space<vmem>>, vector<1x20x48xf32>
    %130 = vector.shape_cast %129 : vector<1x20x48xf32> to vector<20x48xf32>
    %c6 = arith.constant 6 : index
    %131 = memref.load %arg2[%c6] : memref<200xf32, #tpu.memory_space<smem>>
    %132 = vector.broadcast %131 : f32 to vector<20x48xf32>
    %133 = arith.mulf %132, %130 : vector<20x48xf32>
    %134 = arith.addf %124, %133 : vector<20x48xf32>
    %c31 = arith.constant 31 : index
    %135 = memref.load %arg2[%c31] : memref<200xf32, #tpu.memory_space<smem>>
    %136 = vector.broadcast %135 : f32 to vector<20x48xf32>
    %137 = arith.mulf %136, %130 : vector<20x48xf32>
    %138 = arith.addf %128, %137 : vector<20x48xf32>
    %c2_104 = arith.constant 2 : index
    %c1_105 = arith.constant 1 : index
    %c0_106 = arith.constant 0 : index
    %139 = vector.load %arg8[%c2_104, %c1_105, %c0_106] : memref<5x24x48xf32, #tpu.memory_space<vmem>>, vector<1x20x48xf32>
    %140 = vector.shape_cast %139 : vector<1x20x48xf32> to vector<20x48xf32>
    %c7 = arith.constant 7 : index
    %141 = memref.load %arg2[%c7] : memref<200xf32, #tpu.memory_space<smem>>
    %142 = vector.broadcast %141 : f32 to vector<20x48xf32>
    %143 = arith.mulf %142, %140 : vector<20x48xf32>
    %144 = arith.addf %134, %143 : vector<20x48xf32>
    %c32 = arith.constant 32 : index
    %145 = memref.load %arg2[%c32] : memref<200xf32, #tpu.memory_space<smem>>
    %146 = vector.broadcast %145 : f32 to vector<20x48xf32>
    %147 = arith.mulf %146, %140 : vector<20x48xf32>
    %148 = arith.addf %138, %147 : vector<20x48xf32>
    %c3_107 = arith.constant 3 : index
    %c1_108 = arith.constant 1 : index
    %c0_109 = arith.constant 0 : index
    %149 = vector.load %arg8[%c3_107, %c1_108, %c0_109] : memref<5x24x48xf32, #tpu.memory_space<vmem>>, vector<1x20x48xf32>
    %150 = vector.shape_cast %149 : vector<1x20x48xf32> to vector<20x48xf32>
    %c8 = arith.constant 8 : index
    %151 = memref.load %arg2[%c8] : memref<200xf32, #tpu.memory_space<smem>>
    %152 = vector.broadcast %151 : f32 to vector<20x48xf32>
    %153 = arith.mulf %152, %150 : vector<20x48xf32>
    %154 = arith.addf %144, %153 : vector<20x48xf32>
    %c33 = arith.constant 33 : index
    %155 = memref.load %arg2[%c33] : memref<200xf32, #tpu.memory_space<smem>>
    %156 = vector.broadcast %155 : f32 to vector<20x48xf32>
    %157 = arith.mulf %156, %150 : vector<20x48xf32>
    %158 = arith.addf %148, %157 : vector<20x48xf32>
    %c4_110 = arith.constant 4 : index
    %c1_111 = arith.constant 1 : index
    %c0_112 = arith.constant 0 : index
    %159 = vector.load %arg8[%c4_110, %c1_111, %c0_112] : memref<5x24x48xf32, #tpu.memory_space<vmem>>, vector<1x20x48xf32>
    %160 = vector.shape_cast %159 : vector<1x20x48xf32> to vector<20x48xf32>
    %c9 = arith.constant 9 : index
    %161 = memref.load %arg2[%c9] : memref<200xf32, #tpu.memory_space<smem>>
    %162 = vector.broadcast %161 : f32 to vector<20x48xf32>
    %163 = arith.mulf %162, %160 : vector<20x48xf32>
    %164 = arith.addf %154, %163 : vector<20x48xf32>
    %c34 = arith.constant 34 : index
    %165 = memref.load %arg2[%c34] : memref<200xf32, #tpu.memory_space<smem>>
    %166 = vector.broadcast %165 : f32 to vector<20x48xf32>
    %167 = arith.mulf %166, %160 : vector<20x48xf32>
    %168 = arith.addf %158, %167 : vector<20x48xf32>
    %c0_113 = arith.constant 0 : index
    %c2_114 = arith.constant 2 : index
    %c0_115 = arith.constant 0 : index
    %169 = vector.load %arg8[%c0_113, %c2_114, %c0_115] : memref<5x24x48xf32, #tpu.memory_space<vmem>>, vector<1x20x48xf32>
    %170 = vector.shape_cast %169 : vector<1x20x48xf32> to vector<20x48xf32>
    %c10 = arith.constant 10 : index
    %171 = memref.load %arg2[%c10] : memref<200xf32, #tpu.memory_space<smem>>
    %172 = vector.broadcast %171 : f32 to vector<20x48xf32>
    %173 = arith.mulf %172, %170 : vector<20x48xf32>
    %174 = arith.addf %164, %173 : vector<20x48xf32>
    %c35 = arith.constant 35 : index
    %175 = memref.load %arg2[%c35] : memref<200xf32, #tpu.memory_space<smem>>
    %176 = vector.broadcast %175 : f32 to vector<20x48xf32>
    %177 = arith.mulf %176, %170 : vector<20x48xf32>
    %178 = arith.addf %168, %177 : vector<20x48xf32>
    %c1_116 = arith.constant 1 : index
    %c2_117 = arith.constant 2 : index
    %c0_118 = arith.constant 0 : index
    %179 = vector.load %arg8[%c1_116, %c2_117, %c0_118] : memref<5x24x48xf32, #tpu.memory_space<vmem>>, vector<1x20x48xf32>
    %180 = vector.shape_cast %179 : vector<1x20x48xf32> to vector<20x48xf32>
    %c11 = arith.constant 11 : index
    %181 = memref.load %arg2[%c11] : memref<200xf32, #tpu.memory_space<smem>>
    %182 = vector.broadcast %181 : f32 to vector<20x48xf32>
    %183 = arith.mulf %182, %180 : vector<20x48xf32>
    %184 = arith.addf %174, %183 : vector<20x48xf32>
    %c36 = arith.constant 36 : index
    %185 = memref.load %arg2[%c36] : memref<200xf32, #tpu.memory_space<smem>>
    %186 = vector.broadcast %185 : f32 to vector<20x48xf32>
    %187 = arith.mulf %186, %180 : vector<20x48xf32>
    %188 = arith.addf %178, %187 : vector<20x48xf32>
    %c2_119 = arith.constant 2 : index
    %c2_120 = arith.constant 2 : index
    %c0_121 = arith.constant 0 : index
    %189 = vector.load %arg8[%c2_119, %c2_120, %c0_121] : memref<5x24x48xf32, #tpu.memory_space<vmem>>, vector<1x20x48xf32>
    %190 = vector.shape_cast %189 : vector<1x20x48xf32> to vector<20x48xf32>
    %c12 = arith.constant 12 : index
    %191 = memref.load %arg2[%c12] : memref<200xf32, #tpu.memory_space<smem>>
    %192 = vector.broadcast %191 : f32 to vector<20x48xf32>
    %193 = arith.mulf %192, %190 : vector<20x48xf32>
    %194 = arith.addf %184, %193 : vector<20x48xf32>
    %c37 = arith.constant 37 : index
    %195 = memref.load %arg2[%c37] : memref<200xf32, #tpu.memory_space<smem>>
    %196 = vector.broadcast %195 : f32 to vector<20x48xf32>
    %197 = arith.mulf %196, %190 : vector<20x48xf32>
    %198 = arith.addf %188, %197 : vector<20x48xf32>
    %c3_122 = arith.constant 3 : index
    %c2_123 = arith.constant 2 : index
    %c0_124 = arith.constant 0 : index
    %199 = vector.load %arg8[%c3_122, %c2_123, %c0_124] : memref<5x24x48xf32, #tpu.memory_space<vmem>>, vector<1x20x48xf32>
    %200 = vector.shape_cast %199 : vector<1x20x48xf32> to vector<20x48xf32>
    %c13 = arith.constant 13 : index
    %201 = memref.load %arg2[%c13] : memref<200xf32, #tpu.memory_space<smem>>
    %202 = vector.broadcast %201 : f32 to vector<20x48xf32>
    %203 = arith.mulf %202, %200 : vector<20x48xf32>
    %204 = arith.addf %194, %203 : vector<20x48xf32>
    %c38 = arith.constant 38 : index
    %205 = memref.load %arg2[%c38] : memref<200xf32, #tpu.memory_space<smem>>
    %206 = vector.broadcast %205 : f32 to vector<20x48xf32>
    %207 = arith.mulf %206, %200 : vector<20x48xf32>
    %208 = arith.addf %198, %207 : vector<20x48xf32>
    %c4_125 = arith.constant 4 : index
    %c2_126 = arith.constant 2 : index
    %c0_127 = arith.constant 0 : index
    %209 = vector.load %arg8[%c4_125, %c2_126, %c0_127] : memref<5x24x48xf32, #tpu.memory_space<vmem>>, vector<1x20x48xf32>
    %210 = vector.shape_cast %209 : vector<1x20x48xf32> to vector<20x48xf32>
    %c14 = arith.constant 14 : index
    %211 = memref.load %arg2[%c14] : memref<200xf32, #tpu.memory_space<smem>>
    %212 = vector.broadcast %211 : f32 to vector<20x48xf32>
    %213 = arith.mulf %212, %210 : vector<20x48xf32>
    %214 = arith.addf %204, %213 : vector<20x48xf32>
    %c39 = arith.constant 39 : index
    %215 = memref.load %arg2[%c39] : memref<200xf32, #tpu.memory_space<smem>>
    %216 = vector.broadcast %215 : f32 to vector<20x48xf32>
    %217 = arith.mulf %216, %210 : vector<20x48xf32>
    %218 = arith.addf %208, %217 : vector<20x48xf32>
    %c0_128 = arith.constant 0 : index
    %c3_129 = arith.constant 3 : index
    %c0_130 = arith.constant 0 : index
    %219 = vector.load %arg8[%c0_128, %c3_129, %c0_130] : memref<5x24x48xf32, #tpu.memory_space<vmem>>, vector<1x20x48xf32>
    %220 = vector.shape_cast %219 : vector<1x20x48xf32> to vector<20x48xf32>
    %c15 = arith.constant 15 : index
    %221 = memref.load %arg2[%c15] : memref<200xf32, #tpu.memory_space<smem>>
    %222 = vector.broadcast %221 : f32 to vector<20x48xf32>
    %223 = arith.mulf %222, %220 : vector<20x48xf32>
    %224 = arith.addf %214, %223 : vector<20x48xf32>
    %c40 = arith.constant 40 : index
    %225 = memref.load %arg2[%c40] : memref<200xf32, #tpu.memory_space<smem>>
    %226 = vector.broadcast %225 : f32 to vector<20x48xf32>
    %227 = arith.mulf %226, %220 : vector<20x48xf32>
    %228 = arith.addf %218, %227 : vector<20x48xf32>
    %c1_131 = arith.constant 1 : index
    %c3_132 = arith.constant 3 : index
    %c0_133 = arith.constant 0 : index
    %229 = vector.load %arg8[%c1_131, %c3_132, %c0_133] : memref<5x24x48xf32, #tpu.memory_space<vmem>>, vector<1x20x48xf32>
    %230 = vector.shape_cast %229 : vector<1x20x48xf32> to vector<20x48xf32>
    %c16 = arith.constant 16 : index
    %231 = memref.load %arg2[%c16] : memref<200xf32, #tpu.memory_space<smem>>
    %232 = vector.broadcast %231 : f32 to vector<20x48xf32>
    %233 = arith.mulf %232, %230 : vector<20x48xf32>
    %234 = arith.addf %224, %233 : vector<20x48xf32>
    %c41 = arith.constant 41 : index
    %235 = memref.load %arg2[%c41] : memref<200xf32, #tpu.memory_space<smem>>
    %236 = vector.broadcast %235 : f32 to vector<20x48xf32>
    %237 = arith.mulf %236, %230 : vector<20x48xf32>
    %238 = arith.addf %228, %237 : vector<20x48xf32>
    %c2_134 = arith.constant 2 : index
    %c3_135 = arith.constant 3 : index
    %c0_136 = arith.constant 0 : index
    %239 = vector.load %arg8[%c2_134, %c3_135, %c0_136] : memref<5x24x48xf32, #tpu.memory_space<vmem>>, vector<1x20x48xf32>
    %240 = vector.shape_cast %239 : vector<1x20x48xf32> to vector<20x48xf32>
    %c17 = arith.constant 17 : index
    %241 = memref.load %arg2[%c17] : memref<200xf32, #tpu.memory_space<smem>>
    %242 = vector.broadcast %241 : f32 to vector<20x48xf32>
    %243 = arith.mulf %242, %240 : vector<20x48xf32>
    %244 = arith.addf %234, %243 : vector<20x48xf32>
    %c42 = arith.constant 42 : index
    %245 = memref.load %arg2[%c42] : memref<200xf32, #tpu.memory_space<smem>>
    %246 = vector.broadcast %245 : f32 to vector<20x48xf32>
    %247 = arith.mulf %246, %240 : vector<20x48xf32>
    %248 = arith.addf %238, %247 : vector<20x48xf32>
    %c3_137 = arith.constant 3 : index
    %c3_138 = arith.constant 3 : index
    %c0_139 = arith.constant 0 : index
    %249 = vector.load %arg8[%c3_137, %c3_138, %c0_139] : memref<5x24x48xf32, #tpu.memory_space<vmem>>, vector<1x20x48xf32>
    %250 = vector.shape_cast %249 : vector<1x20x48xf32> to vector<20x48xf32>
    %c18 = arith.constant 18 : index
    %251 = memref.load %arg2[%c18] : memref<200xf32, #tpu.memory_space<smem>>
    %252 = vector.broadcast %251 : f32 to vector<20x48xf32>
    %253 = arith.mulf %252, %250 : vector<20x48xf32>
    %254 = arith.addf %244, %253 : vector<20x48xf32>
    %c43 = arith.constant 43 : index
    %255 = memref.load %arg2[%c43] : memref<200xf32, #tpu.memory_space<smem>>
    %256 = vector.broadcast %255 : f32 to vector<20x48xf32>
    %257 = arith.mulf %256, %250 : vector<20x48xf32>
    %258 = arith.addf %248, %257 : vector<20x48xf32>
    %c4_140 = arith.constant 4 : index
    %c3_141 = arith.constant 3 : index
    %c0_142 = arith.constant 0 : index
    %259 = vector.load %arg8[%c4_140, %c3_141, %c0_142] : memref<5x24x48xf32, #tpu.memory_space<vmem>>, vector<1x20x48xf32>
    %260 = vector.shape_cast %259 : vector<1x20x48xf32> to vector<20x48xf32>
    %c19 = arith.constant 19 : index
    %261 = memref.load %arg2[%c19] : memref<200xf32, #tpu.memory_space<smem>>
    %262 = vector.broadcast %261 : f32 to vector<20x48xf32>
    %263 = arith.mulf %262, %260 : vector<20x48xf32>
    %264 = arith.addf %254, %263 : vector<20x48xf32>
    %c44 = arith.constant 44 : index
    %265 = memref.load %arg2[%c44] : memref<200xf32, #tpu.memory_space<smem>>
    %266 = vector.broadcast %265 : f32 to vector<20x48xf32>
    %267 = arith.mulf %266, %260 : vector<20x48xf32>
    %268 = arith.addf %258, %267 : vector<20x48xf32>
    %c0_143 = arith.constant 0 : index
    %c4_144 = arith.constant 4 : index
    %c0_145 = arith.constant 0 : index
    %269 = vector.load %arg8[%c0_143, %c4_144, %c0_145] : memref<5x24x48xf32, #tpu.memory_space<vmem>>, vector<1x20x48xf32>
    %270 = vector.shape_cast %269 : vector<1x20x48xf32> to vector<20x48xf32>
    %c20 = arith.constant 20 : index
    %271 = memref.load %arg2[%c20] : memref<200xf32, #tpu.memory_space<smem>>
    %272 = vector.broadcast %271 : f32 to vector<20x48xf32>
    %273 = arith.mulf %272, %270 : vector<20x48xf32>
    %274 = arith.addf %264, %273 : vector<20x48xf32>
    %c45 = arith.constant 45 : index
    %275 = memref.load %arg2[%c45] : memref<200xf32, #tpu.memory_space<smem>>
    %276 = vector.broadcast %275 : f32 to vector<20x48xf32>
    %277 = arith.mulf %276, %270 : vector<20x48xf32>
    %278 = arith.addf %268, %277 : vector<20x48xf32>
    %c1_146 = arith.constant 1 : index
    %c4_147 = arith.constant 4 : index
    %c0_148 = arith.constant 0 : index
    %279 = vector.load %arg8[%c1_146, %c4_147, %c0_148] : memref<5x24x48xf32, #tpu.memory_space<vmem>>, vector<1x20x48xf32>
    %280 = vector.shape_cast %279 : vector<1x20x48xf32> to vector<20x48xf32>
    %c21 = arith.constant 21 : index
    %281 = memref.load %arg2[%c21] : memref<200xf32, #tpu.memory_space<smem>>
    %282 = vector.broadcast %281 : f32 to vector<20x48xf32>
    %283 = arith.mulf %282, %280 : vector<20x48xf32>
    %284 = arith.addf %274, %283 : vector<20x48xf32>
    %c46 = arith.constant 46 : index
    %285 = memref.load %arg2[%c46] : memref<200xf32, #tpu.memory_space<smem>>
    %286 = vector.broadcast %285 : f32 to vector<20x48xf32>
    %287 = arith.mulf %286, %280 : vector<20x48xf32>
    %288 = arith.addf %278, %287 : vector<20x48xf32>
    %c2_149 = arith.constant 2 : index
    %c4_150 = arith.constant 4 : index
    %c0_151 = arith.constant 0 : index
    %289 = vector.load %arg8[%c2_149, %c4_150, %c0_151] : memref<5x24x48xf32, #tpu.memory_space<vmem>>, vector<1x20x48xf32>
    %290 = vector.shape_cast %289 : vector<1x20x48xf32> to vector<20x48xf32>
    %c22 = arith.constant 22 : index
    %291 = memref.load %arg2[%c22] : memref<200xf32, #tpu.memory_space<smem>>
    %292 = vector.broadcast %291 : f32 to vector<20x48xf32>
    %293 = arith.mulf %292, %290 : vector<20x48xf32>
    %294 = arith.addf %284, %293 : vector<20x48xf32>
    %c47 = arith.constant 47 : index
    %295 = memref.load %arg2[%c47] : memref<200xf32, #tpu.memory_space<smem>>
    %296 = vector.broadcast %295 : f32 to vector<20x48xf32>
    %297 = arith.mulf %296, %290 : vector<20x48xf32>
    %298 = arith.addf %288, %297 : vector<20x48xf32>
    %c3_152 = arith.constant 3 : index
    %c4_153 = arith.constant 4 : index
    %c0_154 = arith.constant 0 : index
    %299 = vector.load %arg8[%c3_152, %c4_153, %c0_154] : memref<5x24x48xf32, #tpu.memory_space<vmem>>, vector<1x20x48xf32>
    %300 = vector.shape_cast %299 : vector<1x20x48xf32> to vector<20x48xf32>
    %c23 = arith.constant 23 : index
    %301 = memref.load %arg2[%c23] : memref<200xf32, #tpu.memory_space<smem>>
    %302 = vector.broadcast %301 : f32 to vector<20x48xf32>
    %303 = arith.mulf %302, %300 : vector<20x48xf32>
    %304 = arith.addf %294, %303 : vector<20x48xf32>
    %c48 = arith.constant 48 : index
    %305 = memref.load %arg2[%c48] : memref<200xf32, #tpu.memory_space<smem>>
    %306 = vector.broadcast %305 : f32 to vector<20x48xf32>
    %307 = arith.mulf %306, %300 : vector<20x48xf32>
    %308 = arith.addf %298, %307 : vector<20x48xf32>
    %c4_155 = arith.constant 4 : index
    %c4_156 = arith.constant 4 : index
    %c0_157 = arith.constant 0 : index
    %309 = vector.load %arg8[%c4_155, %c4_156, %c0_157] : memref<5x24x48xf32, #tpu.memory_space<vmem>>, vector<1x20x48xf32>
    %310 = vector.shape_cast %309 : vector<1x20x48xf32> to vector<20x48xf32>
    %c24 = arith.constant 24 : index
    %311 = memref.load %arg2[%c24] : memref<200xf32, #tpu.memory_space<smem>>
    %312 = vector.broadcast %311 : f32 to vector<20x48xf32>
    %313 = arith.mulf %312, %310 : vector<20x48xf32>
    %314 = arith.addf %304, %313 : vector<20x48xf32>
    %c49 = arith.constant 49 : index
    %315 = memref.load %arg2[%c49] : memref<200xf32, #tpu.memory_space<smem>>
    %316 = vector.broadcast %315 : f32 to vector<20x48xf32>
    %317 = arith.mulf %316, %310 : vector<20x48xf32>
    %318 = arith.addf %308, %317 : vector<20x48xf32>
    %c1_158 = arith.constant 1 : index
    %c0_159 = arith.constant 0 : index
    %c0_160 = arith.constant 0 : index
    %319 = vector.load %arg7[%c1_158, %c0_159, %c0_160] : memref<4x24x48xf32, #tpu.memory_space<vmem>>, vector<1x24x48xf32>
    %320 = vector.shape_cast %319 : vector<1x24x48xf32> to vector<24x48xf32>
    %c0_161 = arith.constant 0 : index
    %c0_162 = arith.constant 0 : index
    %c0_163 = arith.constant 0 : index
    %321 = vector.load %arg8[%c0_161, %c0_162, %c0_163] : memref<5x24x48xf32, #tpu.memory_space<vmem>>, vector<1x24x48xf32>
    %322 = vector.shape_cast %321 : vector<1x24x48xf32> to vector<24x48xf32>
    %323 = vector.shape_cast %320 : vector<24x48xf32> to vector<1x24x48xf32>
    tpu.vector_store %arg8[%c0_161, %c0_162, %c0_163], %323 {strides = array<i32>} : memref<5x24x48xf32, #tpu.memory_space<vmem>>, vector<1x24x48xf32>,
    %324 = vector.extract_strided_slice %320 {offsets = [0, 1], sizes = [24, 47], strides = [1, 1]} : vector<24x48xf32> to vector<24x47xf32>
    %c1_164 = arith.constant 1 : index
    %c0_165 = arith.constant 0 : index
    %c0_166 = arith.constant 0 : index
    %325 = vector.load %arg8[%c1_164, %c0_165, %c0_166] : memref<5x24x48xf32, #tpu.memory_space<vmem>>, vector<1x24x47xf32>
    %326 = vector.shape_cast %325 : vector<1x24x47xf32> to vector<24x47xf32>
    %327 = vector.shape_cast %324 : vector<24x47xf32> to vector<1x24x47xf32>
    tpu.vector_store %arg8[%c1_164, %c0_165, %c0_166], %327 {strides = array<i32>} : memref<5x24x48xf32, #tpu.memory_space<vmem>>, vector<1x24x47xf32>,
    %328 = vector.extract_strided_slice %320 {offsets = [0, 2], sizes = [24, 46], strides = [1, 1]} : vector<24x48xf32> to vector<24x46xf32>
    %c2_167 = arith.constant 2 : index
    %c0_168 = arith.constant 0 : index
    %c0_169 = arith.constant 0 : index
    %329 = vector.load %arg8[%c2_167, %c0_168, %c0_169] : memref<5x24x48xf32, #tpu.memory_space<vmem>>, vector<1x24x46xf32>
    %330 = vector.shape_cast %329 : vector<1x24x46xf32> to vector<24x46xf32>
    %331 = vector.shape_cast %328 : vector<24x46xf32> to vector<1x24x46xf32>
    tpu.vector_store %arg8[%c2_167, %c0_168, %c0_169], %331 {strides = array<i32>} : memref<5x24x48xf32, #tpu.memory_space<vmem>>, vector<1x24x46xf32>,
    %332 = vector.extract_strided_slice %320 {offsets = [0, 3], sizes = [24, 45], strides = [1, 1]} : vector<24x48xf32> to vector<24x45xf32>
    %c3_170 = arith.constant 3 : index
    %c0_171 = arith.constant 0 : index
    %c0_172 = arith.constant 0 : index
    %333 = vector.load %arg8[%c3_170, %c0_171, %c0_172] : memref<5x24x48xf32, #tpu.memory_space<vmem>>, vector<1x24x45xf32>
    %334 = vector.shape_cast %333 : vector<1x24x45xf32> to vector<24x45xf32>
    %335 = vector.shape_cast %332 : vector<24x45xf32> to vector<1x24x45xf32>
    tpu.vector_store %arg8[%c3_170, %c0_171, %c0_172], %335 {strides = array<i32>} : memref<5x24x48xf32, #tpu.memory_space<vmem>>, vector<1x24x45xf32>,
    %336 = vector.extract_strided_slice %320 {offsets = [0, 4], sizes = [24, 44], strides = [1, 1]} : vector<24x48xf32> to vector<24x44xf32>
    %c4_173 = arith.constant 4 : index
    %c0_174 = arith.constant 0 : index
    %c0_175 = arith.constant 0 : index
    %337 = vector.load %arg8[%c4_173, %c0_174, %c0_175] : memref<5x24x48xf32, #tpu.memory_space<vmem>>, vector<1x24x44xf32>
    %338 = vector.shape_cast %337 : vector<1x24x44xf32> to vector<24x44xf32>
    %339 = vector.shape_cast %336 : vector<24x44xf32> to vector<1x24x44xf32>
    tpu.vector_store %arg8[%c4_173, %c0_174, %c0_175], %339 {strides = array<i32>} : memref<5x24x48xf32, #tpu.memory_space<vmem>>, vector<1x24x44xf32>,
    %c0_176 = arith.constant 0 : index
    %c0_177 = arith.constant 0 : index
    %c0_178 = arith.constant 0 : index
    %340 = vector.load %arg8[%c0_176, %c0_177, %c0_178] : memref<5x24x48xf32, #tpu.memory_space<vmem>>, vector<1x20x48xf32>
    %341 = vector.shape_cast %340 : vector<1x20x48xf32> to vector<20x48xf32>
    %c50 = arith.constant 50 : index
    %342 = memref.load %arg2[%c50] : memref<200xf32, #tpu.memory_space<smem>>
    %343 = vector.broadcast %342 : f32 to vector<20x48xf32>
    %344 = arith.mulf %343, %341 : vector<20x48xf32>
    %345 = arith.addf %314, %344 : vector<20x48xf32>
    %c75 = arith.constant 75 : index
    %346 = memref.load %arg2[%c75] : memref<200xf32, #tpu.memory_space<smem>>
    %347 = vector.broadcast %346 : f32 to vector<20x48xf32>
    %348 = arith.mulf %347, %341 : vector<20x48xf32>
    %349 = arith.addf %318, %348 : vector<20x48xf32>
    %c1_179 = arith.constant 1 : index
    %c0_180 = arith.constant 0 : index
    %c0_181 = arith.constant 0 : index
    %350 = vector.load %arg8[%c1_179, %c0_180, %c0_181] : memref<5x24x48xf32, #tpu.memory_space<vmem>>, vector<1x20x48xf32>
    %351 = vector.shape_cast %350 : vector<1x20x48xf32> to vector<20x48xf32>
    %c51 = arith.constant 51 : index
    %352 = memref.load %arg2[%c51] : memref<200xf32, #tpu.memory_space<smem>>
    %353 = vector.broadcast %352 : f32 to vector<20x48xf32>
    %354 = arith.mulf %353, %351 : vector<20x48xf32>
    %355 = arith.addf %345, %354 : vector<20x48xf32>
    %c76 = arith.constant 76 : index
    %356 = memref.load %arg2[%c76] : memref<200xf32, #tpu.memory_space<smem>>
    %357 = vector.broadcast %356 : f32 to vector<20x48xf32>
    %358 = arith.mulf %357, %351 : vector<20x48xf32>
    %359 = arith.addf %349, %358 : vector<20x48xf32>
    %c2_182 = arith.constant 2 : index
    %c0_183 = arith.constant 0 : index
    %c0_184 = arith.constant 0 : index
    %360 = vector.load %arg8[%c2_182, %c0_183, %c0_184] : memref<5x24x48xf32, #tpu.memory_space<vmem>>, vector<1x20x48xf32>
    %361 = vector.shape_cast %360 : vector<1x20x48xf32> to vector<20x48xf32>
    %c52 = arith.constant 52 : index
    %362 = memref.load %arg2[%c52] : memref<200xf32, #tpu.memory_space<smem>>
    %363 = vector.broadcast %362 : f32 to vector<20x48xf32>
    %364 = arith.mulf %363, %361 : vector<20x48xf32>
    %365 = arith.addf %355, %364 : vector<20x48xf32>
    %c77 = arith.constant 77 : index
    %366 = memref.load %arg2[%c77] : memref<200xf32, #tpu.memory_space<smem>>
    %367 = vector.broadcast %366 : f32 to vector<20x48xf32>
    %368 = arith.mulf %367, %361 : vector<20x48xf32>
    %369 = arith.addf %359, %368 : vector<20x48xf32>
    %c3_185 = arith.constant 3 : index
    %c0_186 = arith.constant 0 : index
    %c0_187 = arith.constant 0 : index
    %370 = vector.load %arg8[%c3_185, %c0_186, %c0_187] : memref<5x24x48xf32, #tpu.memory_space<vmem>>, vector<1x20x48xf32>
    %371 = vector.shape_cast %370 : vector<1x20x48xf32> to vector<20x48xf32>
    %c53 = arith.constant 53 : index
    %372 = memref.load %arg2[%c53] : memref<200xf32, #tpu.memory_space<smem>>
    %373 = vector.broadcast %372 : f32 to vector<20x48xf32>
    %374 = arith.mulf %373, %371 : vector<20x48xf32>
    %375 = arith.addf %365, %374 : vector<20x48xf32>
    %c78 = arith.constant 78 : index
    %376 = memref.load %arg2[%c78] : memref<200xf32, #tpu.memory_space<smem>>
    %377 = vector.broadcast %376 : f32 to vector<20x48xf32>
    %378 = arith.mulf %377, %371 : vector<20x48xf32>
    %379 = arith.addf %369, %378 : vector<20x48xf32>
    %c4_188 = arith.constant 4 : index
    %c0_189 = arith.constant 0 : index
    %c0_190 = arith.constant 0 : index
    %380 = vector.load %arg8[%c4_188, %c0_189, %c0_190] : memref<5x24x48xf32, #tpu.memory_space<vmem>>, vector<1x20x48xf32>
    %381 = vector.shape_cast %380 : vector<1x20x48xf32> to vector<20x48xf32>
    %c54 = arith.constant 54 : index
    %382 = memref.load %arg2[%c54] : memref<200xf32, #tpu.memory_space<smem>>
    %383 = vector.broadcast %382 : f32 to vector<20x48xf32>
    %384 = arith.mulf %383, %381 : vector<20x48xf32>
    %385 = arith.addf %375, %384 : vector<20x48xf32>
    %c79 = arith.constant 79 : index
    %386 = memref.load %arg2[%c79] : memref<200xf32, #tpu.memory_space<smem>>
    %387 = vector.broadcast %386 : f32 to vector<20x48xf32>
    %388 = arith.mulf %387, %381 : vector<20x48xf32>
    %389 = arith.addf %379, %388 : vector<20x48xf32>
    %c0_191 = arith.constant 0 : index
    %c1_192 = arith.constant 1 : index
    %c0_193 = arith.constant 0 : index
    %390 = vector.load %arg8[%c0_191, %c1_192, %c0_193] : memref<5x24x48xf32, #tpu.memory_space<vmem>>, vector<1x20x48xf32>
    %391 = vector.shape_cast %390 : vector<1x20x48xf32> to vector<20x48xf32>
    %c55 = arith.constant 55 : index
    %392 = memref.load %arg2[%c55] : memref<200xf32, #tpu.memory_space<smem>>
    %393 = vector.broadcast %392 : f32 to vector<20x48xf32>
    %394 = arith.mulf %393, %391 : vector<20x48xf32>
    %395 = arith.addf %385, %394 : vector<20x48xf32>
    %c80 = arith.constant 80 : index
    %396 = memref.load %arg2[%c80] : memref<200xf32, #tpu.memory_space<smem>>
    %397 = vector.broadcast %396 : f32 to vector<20x48xf32>
    %398 = arith.mulf %397, %391 : vector<20x48xf32>
    %399 = arith.addf %389, %398 : vector<20x48xf32>
    %c1_194 = arith.constant 1 : index
    %c1_195 = arith.constant 1 : index
    %c0_196 = arith.constant 0 : index
    %400 = vector.load %arg8[%c1_194, %c1_195, %c0_196] : memref<5x24x48xf32, #tpu.memory_space<vmem>>, vector<1x20x48xf32>
    %401 = vector.shape_cast %400 : vector<1x20x48xf32> to vector<20x48xf32>
    %c56 = arith.constant 56 : index
    %402 = memref.load %arg2[%c56] : memref<200xf32, #tpu.memory_space<smem>>
    %403 = vector.broadcast %402 : f32 to vector<20x48xf32>
    %404 = arith.mulf %403, %401 : vector<20x48xf32>
    %405 = arith.addf %395, %404 : vector<20x48xf32>
    %c81 = arith.constant 81 : index
    %406 = memref.load %arg2[%c81] : memref<200xf32, #tpu.memory_space<smem>>
    %407 = vector.broadcast %406 : f32 to vector<20x48xf32>
    %408 = arith.mulf %407, %401 : vector<20x48xf32>
    %409 = arith.addf %399, %408 : vector<20x48xf32>
    %c2_197 = arith.constant 2 : index
    %c1_198 = arith.constant 1 : index
    %c0_199 = arith.constant 0 : index
    %410 = vector.load %arg8[%c2_197, %c1_198, %c0_199] : memref<5x24x48xf32, #tpu.memory_space<vmem>>, vector<1x20x48xf32>
    %411 = vector.shape_cast %410 : vector<1x20x48xf32> to vector<20x48xf32>
    %c57 = arith.constant 57 : index
    %412 = memref.load %arg2[%c57] : memref<200xf32, #tpu.memory_space<smem>>
    %413 = vector.broadcast %412 : f32 to vector<20x48xf32>
    %414 = arith.mulf %413, %411 : vector<20x48xf32>
    %415 = arith.addf %405, %414 : vector<20x48xf32>
    %c82 = arith.constant 82 : index
    %416 = memref.load %arg2[%c82] : memref<200xf32, #tpu.memory_space<smem>>
    %417 = vector.broadcast %416 : f32 to vector<20x48xf32>
    %418 = arith.mulf %417, %411 : vector<20x48xf32>
    %419 = arith.addf %409, %418 : vector<20x48xf32>
    %c3_200 = arith.constant 3 : index
    %c1_201 = arith.constant 1 : index
    %c0_202 = arith.constant 0 : index
    %420 = vector.load %arg8[%c3_200, %c1_201, %c0_202] : memref<5x24x48xf32, #tpu.memory_space<vmem>>, vector<1x20x48xf32>
    %421 = vector.shape_cast %420 : vector<1x20x48xf32> to vector<20x48xf32>
    %c58 = arith.constant 58 : index
    %422 = memref.load %arg2[%c58] : memref<200xf32, #tpu.memory_space<smem>>
    %423 = vector.broadcast %422 : f32 to vector<20x48xf32>
    %424 = arith.mulf %423, %421 : vector<20x48xf32>
    %425 = arith.addf %415, %424 : vector<20x48xf32>
    %c83 = arith.constant 83 : index
    %426 = memref.load %arg2[%c83] : memref<200xf32, #tpu.memory_space<smem>>
    %427 = vector.broadcast %426 : f32 to vector<20x48xf32>
    %428 = arith.mulf %427, %421 : vector<20x48xf32>
    %429 = arith.addf %419, %428 : vector<20x48xf32>
    %c4_203 = arith.constant 4 : index
    %c1_204 = arith.constant 1 : index
    %c0_205 = arith.constant 0 : index
    %430 = vector.load %arg8[%c4_203, %c1_204, %c0_205] : memref<5x24x48xf32, #tpu.memory_space<vmem>>, vector<1x20x48xf32>
    %431 = vector.shape_cast %430 : vector<1x20x48xf32> to vector<20x48xf32>
    %c59 = arith.constant 59 : index
    %432 = memref.load %arg2[%c59] : memref<200xf32, #tpu.memory_space<smem>>
    %433 = vector.broadcast %432 : f32 to vector<20x48xf32>
    %434 = arith.mulf %433, %431 : vector<20x48xf32>
    %435 = arith.addf %425, %434 : vector<20x48xf32>
    %c84 = arith.constant 84 : index
    %436 = memref.load %arg2[%c84] : memref<200xf32, #tpu.memory_space<smem>>
    %437 = vector.broadcast %436 : f32 to vector<20x48xf32>
    %438 = arith.mulf %437, %431 : vector<20x48xf32>
    %439 = arith.addf %429, %438 : vector<20x48xf32>
    %c0_206 = arith.constant 0 : index
    %c2_207 = arith.constant 2 : index
    %c0_208 = arith.constant 0 : index
    %440 = vector.load %arg8[%c0_206, %c2_207, %c0_208] : memref<5x24x48xf32, #tpu.memory_space<vmem>>, vector<1x20x48xf32>
    %441 = vector.shape_cast %440 : vector<1x20x48xf32> to vector<20x48xf32>
    %c60 = arith.constant 60 : index
    %442 = memref.load %arg2[%c60] : memref<200xf32, #tpu.memory_space<smem>>
    %443 = vector.broadcast %442 : f32 to vector<20x48xf32>
    %444 = arith.mulf %443, %441 : vector<20x48xf32>
    %445 = arith.addf %435, %444 : vector<20x48xf32>
    %c85 = arith.constant 85 : index
    %446 = memref.load %arg2[%c85] : memref<200xf32, #tpu.memory_space<smem>>
    %447 = vector.broadcast %446 : f32 to vector<20x48xf32>
    %448 = arith.mulf %447, %441 : vector<20x48xf32>
    %449 = arith.addf %439, %448 : vector<20x48xf32>
    %c1_209 = arith.constant 1 : index
    %c2_210 = arith.constant 2 : index
    %c0_211 = arith.constant 0 : index
    %450 = vector.load %arg8[%c1_209, %c2_210, %c0_211] : memref<5x24x48xf32, #tpu.memory_space<vmem>>, vector<1x20x48xf32>
    %451 = vector.shape_cast %450 : vector<1x20x48xf32> to vector<20x48xf32>
    %c61 = arith.constant 61 : index
    %452 = memref.load %arg2[%c61] : memref<200xf32, #tpu.memory_space<smem>>
    %453 = vector.broadcast %452 : f32 to vector<20x48xf32>
    %454 = arith.mulf %453, %451 : vector<20x48xf32>
    %455 = arith.addf %445, %454 : vector<20x48xf32>
    %c86 = arith.constant 86 : index
    %456 = memref.load %arg2[%c86] : memref<200xf32, #tpu.memory_space<smem>>
    %457 = vector.broadcast %456 : f32 to vector<20x48xf32>
    %458 = arith.mulf %457, %451 : vector<20x48xf32>
    %459 = arith.addf %449, %458 : vector<20x48xf32>
    %c2_212 = arith.constant 2 : index
    %c2_213 = arith.constant 2 : index
    %c0_214 = arith.constant 0 : index
    %460 = vector.load %arg8[%c2_212, %c2_213, %c0_214] : memref<5x24x48xf32, #tpu.memory_space<vmem>>, vector<1x20x48xf32>
    %461 = vector.shape_cast %460 : vector<1x20x48xf32> to vector<20x48xf32>
    %c62 = arith.constant 62 : index
    %462 = memref.load %arg2[%c62] : memref<200xf32, #tpu.memory_space<smem>>
    %463 = vector.broadcast %462 : f32 to vector<20x48xf32>
    %464 = arith.mulf %463, %461 : vector<20x48xf32>
    %465 = arith.addf %455, %464 : vector<20x48xf32>
    %c87 = arith.constant 87 : index
    %466 = memref.load %arg2[%c87] : memref<200xf32, #tpu.memory_space<smem>>
    %467 = vector.broadcast %466 : f32 to vector<20x48xf32>
    %468 = arith.mulf %467, %461 : vector<20x48xf32>
    %469 = arith.addf %459, %468 : vector<20x48xf32>
    %c3_215 = arith.constant 3 : index
    %c2_216 = arith.constant 2 : index
    %c0_217 = arith.constant 0 : index
    %470 = vector.load %arg8[%c3_215, %c2_216, %c0_217] : memref<5x24x48xf32, #tpu.memory_space<vmem>>, vector<1x20x48xf32>
    %471 = vector.shape_cast %470 : vector<1x20x48xf32> to vector<20x48xf32>
    %c63 = arith.constant 63 : index
    %472 = memref.load %arg2[%c63] : memref<200xf32, #tpu.memory_space<smem>>
    %473 = vector.broadcast %472 : f32 to vector<20x48xf32>
    %474 = arith.mulf %473, %471 : vector<20x48xf32>
    %475 = arith.addf %465, %474 : vector<20x48xf32>
    %c88 = arith.constant 88 : index
    %476 = memref.load %arg2[%c88] : memref<200xf32, #tpu.memory_space<smem>>
    %477 = vector.broadcast %476 : f32 to vector<20x48xf32>
    %478 = arith.mulf %477, %471 : vector<20x48xf32>
    %479 = arith.addf %469, %478 : vector<20x48xf32>
    %c4_218 = arith.constant 4 : index
    %c2_219 = arith.constant 2 : index
    %c0_220 = arith.constant 0 : index
    %480 = vector.load %arg8[%c4_218, %c2_219, %c0_220] : memref<5x24x48xf32, #tpu.memory_space<vmem>>, vector<1x20x48xf32>
    %481 = vector.shape_cast %480 : vector<1x20x48xf32> to vector<20x48xf32>
    %c64 = arith.constant 64 : index
    %482 = memref.load %arg2[%c64] : memref<200xf32, #tpu.memory_space<smem>>
    %483 = vector.broadcast %482 : f32 to vector<20x48xf32>
    %484 = arith.mulf %483, %481 : vector<20x48xf32>
    %485 = arith.addf %475, %484 : vector<20x48xf32>
    %c89 = arith.constant 89 : index
    %486 = memref.load %arg2[%c89] : memref<200xf32, #tpu.memory_space<smem>>
    %487 = vector.broadcast %486 : f32 to vector<20x48xf32>
    %488 = arith.mulf %487, %481 : vector<20x48xf32>
    %489 = arith.addf %479, %488 : vector<20x48xf32>
    %c0_221 = arith.constant 0 : index
    %c3_222 = arith.constant 3 : index
    %c0_223 = arith.constant 0 : index
    %490 = vector.load %arg8[%c0_221, %c3_222, %c0_223] : memref<5x24x48xf32, #tpu.memory_space<vmem>>, vector<1x20x48xf32>
    %491 = vector.shape_cast %490 : vector<1x20x48xf32> to vector<20x48xf32>
    %c65 = arith.constant 65 : index
    %492 = memref.load %arg2[%c65] : memref<200xf32, #tpu.memory_space<smem>>
    %493 = vector.broadcast %492 : f32 to vector<20x48xf32>
    %494 = arith.mulf %493, %491 : vector<20x48xf32>
    %495 = arith.addf %485, %494 : vector<20x48xf32>
    %c90 = arith.constant 90 : index
    %496 = memref.load %arg2[%c90] : memref<200xf32, #tpu.memory_space<smem>>
    %497 = vector.broadcast %496 : f32 to vector<20x48xf32>
    %498 = arith.mulf %497, %491 : vector<20x48xf32>
    %499 = arith.addf %489, %498 : vector<20x48xf32>
    %c1_224 = arith.constant 1 : index
    %c3_225 = arith.constant 3 : index
    %c0_226 = arith.constant 0 : index
    %500 = vector.load %arg8[%c1_224, %c3_225, %c0_226] : memref<5x24x48xf32, #tpu.memory_space<vmem>>, vector<1x20x48xf32>
    %501 = vector.shape_cast %500 : vector<1x20x48xf32> to vector<20x48xf32>
    %c66 = arith.constant 66 : index
    %502 = memref.load %arg2[%c66] : memref<200xf32, #tpu.memory_space<smem>>
    %503 = vector.broadcast %502 : f32 to vector<20x48xf32>
    %504 = arith.mulf %503, %501 : vector<20x48xf32>
    %505 = arith.addf %495, %504 : vector<20x48xf32>
    %c91 = arith.constant 91 : index
    %506 = memref.load %arg2[%c91] : memref<200xf32, #tpu.memory_space<smem>>
    %507 = vector.broadcast %506 : f32 to vector<20x48xf32>
    %508 = arith.mulf %507, %501 : vector<20x48xf32>
    %509 = arith.addf %499, %508 : vector<20x48xf32>
    %c2_227 = arith.constant 2 : index
    %c3_228 = arith.constant 3 : index
    %c0_229 = arith.constant 0 : index
    %510 = vector.load %arg8[%c2_227, %c3_228, %c0_229] : memref<5x24x48xf32, #tpu.memory_space<vmem>>, vector<1x20x48xf32>
    %511 = vector.shape_cast %510 : vector<1x20x48xf32> to vector<20x48xf32>
    %c67 = arith.constant 67 : index
    %512 = memref.load %arg2[%c67] : memref<200xf32, #tpu.memory_space<smem>>
    %513 = vector.broadcast %512 : f32 to vector<20x48xf32>
    %514 = arith.mulf %513, %511 : vector<20x48xf32>
    %515 = arith.addf %505, %514 : vector<20x48xf32>
    %c92 = arith.constant 92 : index
    %516 = memref.load %arg2[%c92] : memref<200xf32, #tpu.memory_space<smem>>
    %517 = vector.broadcast %516 : f32 to vector<20x48xf32>
    %518 = arith.mulf %517, %511 : vector<20x48xf32>
    %519 = arith.addf %509, %518 : vector<20x48xf32>
    %c3_230 = arith.constant 3 : index
    %c3_231 = arith.constant 3 : index
    %c0_232 = arith.constant 0 : index
    %520 = vector.load %arg8[%c3_230, %c3_231, %c0_232] : memref<5x24x48xf32, #tpu.memory_space<vmem>>, vector<1x20x48xf32>
    %521 = vector.shape_cast %520 : vector<1x20x48xf32> to vector<20x48xf32>
    %c68 = arith.constant 68 : index
    %522 = memref.load %arg2[%c68] : memref<200xf32, #tpu.memory_space<smem>>
    %523 = vector.broadcast %522 : f32 to vector<20x48xf32>
    %524 = arith.mulf %523, %521 : vector<20x48xf32>
    %525 = arith.addf %515, %524 : vector<20x48xf32>
    %c93 = arith.constant 93 : index
    %526 = memref.load %arg2[%c93] : memref<200xf32, #tpu.memory_space<smem>>
    %527 = vector.broadcast %526 : f32 to vector<20x48xf32>
    %528 = arith.mulf %527, %521 : vector<20x48xf32>
    %529 = arith.addf %519, %528 : vector<20x48xf32>
    %c4_233 = arith.constant 4 : index
    %c3_234 = arith.constant 3 : index
    %c0_235 = arith.constant 0 : index
    %530 = vector.load %arg8[%c4_233, %c3_234, %c0_235] : memref<5x24x48xf32, #tpu.memory_space<vmem>>, vector<1x20x48xf32>
    %531 = vector.shape_cast %530 : vector<1x20x48xf32> to vector<20x48xf32>
    %c69 = arith.constant 69 : index
    %532 = memref.load %arg2[%c69] : memref<200xf32, #tpu.memory_space<smem>>
    %533 = vector.broadcast %532 : f32 to vector<20x48xf32>
    %534 = arith.mulf %533, %531 : vector<20x48xf32>
    %535 = arith.addf %525, %534 : vector<20x48xf32>
    %c94 = arith.constant 94 : index
    %536 = memref.load %arg2[%c94] : memref<200xf32, #tpu.memory_space<smem>>
    %537 = vector.broadcast %536 : f32 to vector<20x48xf32>
    %538 = arith.mulf %537, %531 : vector<20x48xf32>
    %539 = arith.addf %529, %538 : vector<20x48xf32>
    %c0_236 = arith.constant 0 : index
    %c4_237 = arith.constant 4 : index
    %c0_238 = arith.constant 0 : index
    %540 = vector.load %arg8[%c0_236, %c4_237, %c0_238] : memref<5x24x48xf32, #tpu.memory_space<vmem>>, vector<1x20x48xf32>
    %541 = vector.shape_cast %540 : vector<1x20x48xf32> to vector<20x48xf32>
    %c70 = arith.constant 70 : index
    %542 = memref.load %arg2[%c70] : memref<200xf32, #tpu.memory_space<smem>>
    %543 = vector.broadcast %542 : f32 to vector<20x48xf32>
    %544 = arith.mulf %543, %541 : vector<20x48xf32>
    %545 = arith.addf %535, %544 : vector<20x48xf32>
    %c95 = arith.constant 95 : index
    %546 = memref.load %arg2[%c95] : memref<200xf32, #tpu.memory_space<smem>>
    %547 = vector.broadcast %546 : f32 to vector<20x48xf32>
    %548 = arith.mulf %547, %541 : vector<20x48xf32>
    %549 = arith.addf %539, %548 : vector<20x48xf32>
    %c1_239 = arith.constant 1 : index
    %c4_240 = arith.constant 4 : index
    %c0_241 = arith.constant 0 : index
    %550 = vector.load %arg8[%c1_239, %c4_240, %c0_241] : memref<5x24x48xf32, #tpu.memory_space<vmem>>, vector<1x20x48xf32>
    %551 = vector.shape_cast %550 : vector<1x20x48xf32> to vector<20x48xf32>
    %c71 = arith.constant 71 : index
    %552 = memref.load %arg2[%c71] : memref<200xf32, #tpu.memory_space<smem>>
    %553 = vector.broadcast %552 : f32 to vector<20x48xf32>
    %554 = arith.mulf %553, %551 : vector<20x48xf32>
    %555 = arith.addf %545, %554 : vector<20x48xf32>
    %c96 = arith.constant 96 : index
    %556 = memref.load %arg2[%c96] : memref<200xf32, #tpu.memory_space<smem>>
    %557 = vector.broadcast %556 : f32 to vector<20x48xf32>
    %558 = arith.mulf %557, %551 : vector<20x48xf32>
    %559 = arith.addf %549, %558 : vector<20x48xf32>
    %c2_242 = arith.constant 2 : index
    %c4_243 = arith.constant 4 : index
    %c0_244 = arith.constant 0 : index
    %560 = vector.load %arg8[%c2_242, %c4_243, %c0_244] : memref<5x24x48xf32, #tpu.memory_space<vmem>>, vector<1x20x48xf32>
    %561 = vector.shape_cast %560 : vector<1x20x48xf32> to vector<20x48xf32>
    %c72 = arith.constant 72 : index
    %562 = memref.load %arg2[%c72] : memref<200xf32, #tpu.memory_space<smem>>
    %563 = vector.broadcast %562 : f32 to vector<20x48xf32>
    %564 = arith.mulf %563, %561 : vector<20x48xf32>
    %565 = arith.addf %555, %564 : vector<20x48xf32>
    %c97 = arith.constant 97 : index
    %566 = memref.load %arg2[%c97] : memref<200xf32, #tpu.memory_space<smem>>
    %567 = vector.broadcast %566 : f32 to vector<20x48xf32>
    %568 = arith.mulf %567, %561 : vector<20x48xf32>
    %569 = arith.addf %559, %568 : vector<20x48xf32>
    %c3_245 = arith.constant 3 : index
    %c4_246 = arith.constant 4 : index
    %c0_247 = arith.constant 0 : index
    %570 = vector.load %arg8[%c3_245, %c4_246, %c0_247] : memref<5x24x48xf32, #tpu.memory_space<vmem>>, vector<1x20x48xf32>
    %571 = vector.shape_cast %570 : vector<1x20x48xf32> to vector<20x48xf32>
    %c73 = arith.constant 73 : index
    %572 = memref.load %arg2[%c73] : memref<200xf32, #tpu.memory_space<smem>>
    %573 = vector.broadcast %572 : f32 to vector<20x48xf32>
    %574 = arith.mulf %573, %571 : vector<20x48xf32>
    %575 = arith.addf %565, %574 : vector<20x48xf32>
    %c98 = arith.constant 98 : index
    %576 = memref.load %arg2[%c98] : memref<200xf32, #tpu.memory_space<smem>>
    %577 = vector.broadcast %576 : f32 to vector<20x48xf32>
    %578 = arith.mulf %577, %571 : vector<20x48xf32>
    %579 = arith.addf %569, %578 : vector<20x48xf32>
    %c4_248 = arith.constant 4 : index
    %c4_249 = arith.constant 4 : index
    %c0_250 = arith.constant 0 : index
    %580 = vector.load %arg8[%c4_248, %c4_249, %c0_250] : memref<5x24x48xf32, #tpu.memory_space<vmem>>, vector<1x20x48xf32>
    %581 = vector.shape_cast %580 : vector<1x20x48xf32> to vector<20x48xf32>
    %c74 = arith.constant 74 : index
    %582 = memref.load %arg2[%c74] : memref<200xf32, #tpu.memory_space<smem>>
    %583 = vector.broadcast %582 : f32 to vector<20x48xf32>
    %584 = arith.mulf %583, %581 : vector<20x48xf32>
    %585 = arith.addf %575, %584 : vector<20x48xf32>
    %c99 = arith.constant 99 : index
    %586 = memref.load %arg2[%c99] : memref<200xf32, #tpu.memory_space<smem>>
    %587 = vector.broadcast %586 : f32 to vector<20x48xf32>
    %588 = arith.mulf %587, %581 : vector<20x48xf32>
    %589 = arith.addf %579, %588 : vector<20x48xf32>
    %c2_251 = arith.constant 2 : index
    %c0_252 = arith.constant 0 : index
    %c0_253 = arith.constant 0 : index
    %590 = vector.load %arg7[%c2_251, %c0_252, %c0_253] : memref<4x24x48xf32, #tpu.memory_space<vmem>>, vector<1x24x48xf32>
    %591 = vector.shape_cast %590 : vector<1x24x48xf32> to vector<24x48xf32>
    %c0_254 = arith.constant 0 : index
    %c0_255 = arith.constant 0 : index
    %c0_256 = arith.constant 0 : index
    %592 = vector.load %arg8[%c0_254, %c0_255, %c0_256] : memref<5x24x48xf32, #tpu.memory_space<vmem>>, vector<1x24x48xf32>
    %593 = vector.shape_cast %592 : vector<1x24x48xf32> to vector<24x48xf32>
    %594 = vector.shape_cast %591 : vector<24x48xf32> to vector<1x24x48xf32>
    tpu.vector_store %arg8[%c0_254, %c0_255, %c0_256], %594 {strides = array<i32>} : memref<5x24x48xf32, #tpu.memory_space<vmem>>, vector<1x24x48xf32>,
    %595 = vector.extract_strided_slice %591 {offsets = [0, 1], sizes = [24, 47], strides = [1, 1]} : vector<24x48xf32> to vector<24x47xf32>
    %c1_257 = arith.constant 1 : index
    %c0_258 = arith.constant 0 : index
    %c0_259 = arith.constant 0 : index
    %596 = vector.load %arg8[%c1_257, %c0_258, %c0_259] : memref<5x24x48xf32, #tpu.memory_space<vmem>>, vector<1x24x47xf32>
    %597 = vector.shape_cast %596 : vector<1x24x47xf32> to vector<24x47xf32>
    %598 = vector.shape_cast %595 : vector<24x47xf32> to vector<1x24x47xf32>
    tpu.vector_store %arg8[%c1_257, %c0_258, %c0_259], %598 {strides = array<i32>} : memref<5x24x48xf32, #tpu.memory_space<vmem>>, vector<1x24x47xf32>,
    %599 = vector.extract_strided_slice %591 {offsets = [0, 2], sizes = [24, 46], strides = [1, 1]} : vector<24x48xf32> to vector<24x46xf32>
    %c2_260 = arith.constant 2 : index
    %c0_261 = arith.constant 0 : index
    %c0_262 = arith.constant 0 : index
    %600 = vector.load %arg8[%c2_260, %c0_261, %c0_262] : memref<5x24x48xf32, #tpu.memory_space<vmem>>, vector<1x24x46xf32>
    %601 = vector.shape_cast %600 : vector<1x24x46xf32> to vector<24x46xf32>
    %602 = vector.shape_cast %599 : vector<24x46xf32> to vector<1x24x46xf32>
    tpu.vector_store %arg8[%c2_260, %c0_261, %c0_262], %602 {strides = array<i32>} : memref<5x24x48xf32, #tpu.memory_space<vmem>>, vector<1x24x46xf32>,
    %603 = vector.extract_strided_slice %591 {offsets = [0, 3], sizes = [24, 45], strides = [1, 1]} : vector<24x48xf32> to vector<24x45xf32>
    %c3_263 = arith.constant 3 : index
    %c0_264 = arith.constant 0 : index
    %c0_265 = arith.constant 0 : index
    %604 = vector.load %arg8[%c3_263, %c0_264, %c0_265] : memref<5x24x48xf32, #tpu.memory_space<vmem>>, vector<1x24x45xf32>
    %605 = vector.shape_cast %604 : vector<1x24x45xf32> to vector<24x45xf32>
    %606 = vector.shape_cast %603 : vector<24x45xf32> to vector<1x24x45xf32>
    tpu.vector_store %arg8[%c3_263, %c0_264, %c0_265], %606 {strides = array<i32>} : memref<5x24x48xf32, #tpu.memory_space<vmem>>, vector<1x24x45xf32>,
    %607 = vector.extract_strided_slice %591 {offsets = [0, 4], sizes = [24, 44], strides = [1, 1]} : vector<24x48xf32> to vector<24x44xf32>
    %c4_266 = arith.constant 4 : index
    %c0_267 = arith.constant 0 : index
    %c0_268 = arith.constant 0 : index
    %608 = vector.load %arg8[%c4_266, %c0_267, %c0_268] : memref<5x24x48xf32, #tpu.memory_space<vmem>>, vector<1x24x44xf32>
    %609 = vector.shape_cast %608 : vector<1x24x44xf32> to vector<24x44xf32>
    %610 = vector.shape_cast %607 : vector<24x44xf32> to vector<1x24x44xf32>
    tpu.vector_store %arg8[%c4_266, %c0_267, %c0_268], %610 {strides = array<i32>} : memref<5x24x48xf32, #tpu.memory_space<vmem>>, vector<1x24x44xf32>,
    %c0_269 = arith.constant 0 : index
    %c0_270 = arith.constant 0 : index
    %c0_271 = arith.constant 0 : index
    %611 = vector.load %arg8[%c0_269, %c0_270, %c0_271] : memref<5x24x48xf32, #tpu.memory_space<vmem>>, vector<1x20x48xf32>
    %612 = vector.shape_cast %611 : vector<1x20x48xf32> to vector<20x48xf32>
    %c100 = arith.constant 100 : index
    %613 = memref.load %arg2[%c100] : memref<200xf32, #tpu.memory_space<smem>>
    %614 = vector.broadcast %613 : f32 to vector<20x48xf32>
    %615 = arith.mulf %614, %612 : vector<20x48xf32>
    %616 = arith.addf %585, %615 : vector<20x48xf32>
    %c125 = arith.constant 125 : index
    %617 = memref.load %arg2[%c125] : memref<200xf32, #tpu.memory_space<smem>>
    %618 = vector.broadcast %617 : f32 to vector<20x48xf32>
    %619 = arith.mulf %618, %612 : vector<20x48xf32>
    %620 = arith.addf %589, %619 : vector<20x48xf32>
    %c1_272 = arith.constant 1 : index
    %c0_273 = arith.constant 0 : index
    %c0_274 = arith.constant 0 : index
    %621 = vector.load %arg8[%c1_272, %c0_273, %c0_274] : memref<5x24x48xf32, #tpu.memory_space<vmem>>, vector<1x20x48xf32>
    %622 = vector.shape_cast %621 : vector<1x20x48xf32> to vector<20x48xf32>
    %c101 = arith.constant 101 : index
    %623 = memref.load %arg2[%c101] : memref<200xf32, #tpu.memory_space<smem>>
    %624 = vector.broadcast %623 : f32 to vector<20x48xf32>
    %625 = arith.mulf %624, %622 : vector<20x48xf32>
    %626 = arith.addf %616, %625 : vector<20x48xf32>
    %c126 = arith.constant 126 : index
    %627 = memref.load %arg2[%c126] : memref<200xf32, #tpu.memory_space<smem>>
    %628 = vector.broadcast %627 : f32 to vector<20x48xf32>
    %629 = arith.mulf %628, %622 : vector<20x48xf32>
    %630 = arith.addf %620, %629 : vector<20x48xf32>
    %c2_275 = arith.constant 2 : index
    %c0_276 = arith.constant 0 : index
    %c0_277 = arith.constant 0 : index
    %631 = vector.load %arg8[%c2_275, %c0_276, %c0_277] : memref<5x24x48xf32, #tpu.memory_space<vmem>>, vector<1x20x48xf32>
    %632 = vector.shape_cast %631 : vector<1x20x48xf32> to vector<20x48xf32>
    %c102 = arith.constant 102 : index
    %633 = memref.load %arg2[%c102] : memref<200xf32, #tpu.memory_space<smem>>
    %634 = vector.broadcast %633 : f32 to vector<20x48xf32>
    %635 = arith.mulf %634, %632 : vector<20x48xf32>
    %636 = arith.addf %626, %635 : vector<20x48xf32>
    %c127 = arith.constant 127 : index
    %637 = memref.load %arg2[%c127] : memref<200xf32, #tpu.memory_space<smem>>
    %638 = vector.broadcast %637 : f32 to vector<20x48xf32>
    %639 = arith.mulf %638, %632 : vector<20x48xf32>
    %640 = arith.addf %630, %639 : vector<20x48xf32>
    %c3_278 = arith.constant 3 : index
    %c0_279 = arith.constant 0 : index
    %c0_280 = arith.constant 0 : index
    %641 = vector.load %arg8[%c3_278, %c0_279, %c0_280] : memref<5x24x48xf32, #tpu.memory_space<vmem>>, vector<1x20x48xf32>
    %642 = vector.shape_cast %641 : vector<1x20x48xf32> to vector<20x48xf32>
    %c103 = arith.constant 103 : index
    %643 = memref.load %arg2[%c103] : memref<200xf32, #tpu.memory_space<smem>>
    %644 = vector.broadcast %643 : f32 to vector<20x48xf32>
    %645 = arith.mulf %644, %642 : vector<20x48xf32>
    %646 = arith.addf %636, %645 : vector<20x48xf32>
    %c128 = arith.constant 128 : index
    %647 = memref.load %arg2[%c128] : memref<200xf32, #tpu.memory_space<smem>>
    %648 = vector.broadcast %647 : f32 to vector<20x48xf32>
    %649 = arith.mulf %648, %642 : vector<20x48xf32>
    %650 = arith.addf %640, %649 : vector<20x48xf32>
    %c4_281 = arith.constant 4 : index
    %c0_282 = arith.constant 0 : index
    %c0_283 = arith.constant 0 : index
    %651 = vector.load %arg8[%c4_281, %c0_282, %c0_283] : memref<5x24x48xf32, #tpu.memory_space<vmem>>, vector<1x20x48xf32>
    %652 = vector.shape_cast %651 : vector<1x20x48xf32> to vector<20x48xf32>
    %c104 = arith.constant 104 : index
    %653 = memref.load %arg2[%c104] : memref<200xf32, #tpu.memory_space<smem>>
    %654 = vector.broadcast %653 : f32 to vector<20x48xf32>
    %655 = arith.mulf %654, %652 : vector<20x48xf32>
    %656 = arith.addf %646, %655 : vector<20x48xf32>
    %c129 = arith.constant 129 : index
    %657 = memref.load %arg2[%c129] : memref<200xf32, #tpu.memory_space<smem>>
    %658 = vector.broadcast %657 : f32 to vector<20x48xf32>
    %659 = arith.mulf %658, %652 : vector<20x48xf32>
    %660 = arith.addf %650, %659 : vector<20x48xf32>
    %c0_284 = arith.constant 0 : index
    %c1_285 = arith.constant 1 : index
    %c0_286 = arith.constant 0 : index
    %661 = vector.load %arg8[%c0_284, %c1_285, %c0_286] : memref<5x24x48xf32, #tpu.memory_space<vmem>>, vector<1x20x48xf32>
    %662 = vector.shape_cast %661 : vector<1x20x48xf32> to vector<20x48xf32>
    %c105 = arith.constant 105 : index
    %663 = memref.load %arg2[%c105] : memref<200xf32, #tpu.memory_space<smem>>
    %664 = vector.broadcast %663 : f32 to vector<20x48xf32>
    %665 = arith.mulf %664, %662 : vector<20x48xf32>
    %666 = arith.addf %656, %665 : vector<20x48xf32>
    %c130 = arith.constant 130 : index
    %667 = memref.load %arg2[%c130] : memref<200xf32, #tpu.memory_space<smem>>
    %668 = vector.broadcast %667 : f32 to vector<20x48xf32>
    %669 = arith.mulf %668, %662 : vector<20x48xf32>
    %670 = arith.addf %660, %669 : vector<20x48xf32>
    %c1_287 = arith.constant 1 : index
    %c1_288 = arith.constant 1 : index
    %c0_289 = arith.constant 0 : index
    %671 = vector.load %arg8[%c1_287, %c1_288, %c0_289] : memref<5x24x48xf32, #tpu.memory_space<vmem>>, vector<1x20x48xf32>
    %672 = vector.shape_cast %671 : vector<1x20x48xf32> to vector<20x48xf32>
    %c106 = arith.constant 106 : index
    %673 = memref.load %arg2[%c106] : memref<200xf32, #tpu.memory_space<smem>>
    %674 = vector.broadcast %673 : f32 to vector<20x48xf32>
    %675 = arith.mulf %674, %672 : vector<20x48xf32>
    %676 = arith.addf %666, %675 : vector<20x48xf32>
    %c131 = arith.constant 131 : index
    %677 = memref.load %arg2[%c131] : memref<200xf32, #tpu.memory_space<smem>>
    %678 = vector.broadcast %677 : f32 to vector<20x48xf32>
    %679 = arith.mulf %678, %672 : vector<20x48xf32>
    %680 = arith.addf %670, %679 : vector<20x48xf32>
    %c2_290 = arith.constant 2 : index
    %c1_291 = arith.constant 1 : index
    %c0_292 = arith.constant 0 : index
    %681 = vector.load %arg8[%c2_290, %c1_291, %c0_292] : memref<5x24x48xf32, #tpu.memory_space<vmem>>, vector<1x20x48xf32>
    %682 = vector.shape_cast %681 : vector<1x20x48xf32> to vector<20x48xf32>
    %c107 = arith.constant 107 : index
    %683 = memref.load %arg2[%c107] : memref<200xf32, #tpu.memory_space<smem>>
    %684 = vector.broadcast %683 : f32 to vector<20x48xf32>
    %685 = arith.mulf %684, %682 : vector<20x48xf32>
    %686 = arith.addf %676, %685 : vector<20x48xf32>
    %c132 = arith.constant 132 : index
    %687 = memref.load %arg2[%c132] : memref<200xf32, #tpu.memory_space<smem>>
    %688 = vector.broadcast %687 : f32 to vector<20x48xf32>
    %689 = arith.mulf %688, %682 : vector<20x48xf32>
    %690 = arith.addf %680, %689 : vector<20x48xf32>
    %c3_293 = arith.constant 3 : index
    %c1_294 = arith.constant 1 : index
    %c0_295 = arith.constant 0 : index
    %691 = vector.load %arg8[%c3_293, %c1_294, %c0_295] : memref<5x24x48xf32, #tpu.memory_space<vmem>>, vector<1x20x48xf32>
    %692 = vector.shape_cast %691 : vector<1x20x48xf32> to vector<20x48xf32>
    %c108 = arith.constant 108 : index
    %693 = memref.load %arg2[%c108] : memref<200xf32, #tpu.memory_space<smem>>
    %694 = vector.broadcast %693 : f32 to vector<20x48xf32>
    %695 = arith.mulf %694, %692 : vector<20x48xf32>
    %696 = arith.addf %686, %695 : vector<20x48xf32>
    %c133 = arith.constant 133 : index
    %697 = memref.load %arg2[%c133] : memref<200xf32, #tpu.memory_space<smem>>
    %698 = vector.broadcast %697 : f32 to vector<20x48xf32>
    %699 = arith.mulf %698, %692 : vector<20x48xf32>
    %700 = arith.addf %690, %699 : vector<20x48xf32>
    %c4_296 = arith.constant 4 : index
    %c1_297 = arith.constant 1 : index
    %c0_298 = arith.constant 0 : index
    %701 = vector.load %arg8[%c4_296, %c1_297, %c0_298] : memref<5x24x48xf32, #tpu.memory_space<vmem>>, vector<1x20x48xf32>
    %702 = vector.shape_cast %701 : vector<1x20x48xf32> to vector<20x48xf32>
    %c109 = arith.constant 109 : index
    %703 = memref.load %arg2[%c109] : memref<200xf32, #tpu.memory_space<smem>>
    %704 = vector.broadcast %703 : f32 to vector<20x48xf32>
    %705 = arith.mulf %704, %702 : vector<20x48xf32>
    %706 = arith.addf %696, %705 : vector<20x48xf32>
    %c134 = arith.constant 134 : index
    %707 = memref.load %arg2[%c134] : memref<200xf32, #tpu.memory_space<smem>>
    %708 = vector.broadcast %707 : f32 to vector<20x48xf32>
    %709 = arith.mulf %708, %702 : vector<20x48xf32>
    %710 = arith.addf %700, %709 : vector<20x48xf32>
    %c0_299 = arith.constant 0 : index
    %c2_300 = arith.constant 2 : index
    %c0_301 = arith.constant 0 : index
    %711 = vector.load %arg8[%c0_299, %c2_300, %c0_301] : memref<5x24x48xf32, #tpu.memory_space<vmem>>, vector<1x20x48xf32>
    %712 = vector.shape_cast %711 : vector<1x20x48xf32> to vector<20x48xf32>
    %c110 = arith.constant 110 : index
    %713 = memref.load %arg2[%c110] : memref<200xf32, #tpu.memory_space<smem>>
    %714 = vector.broadcast %713 : f32 to vector<20x48xf32>
    %715 = arith.mulf %714, %712 : vector<20x48xf32>
    %716 = arith.addf %706, %715 : vector<20x48xf32>
    %c135 = arith.constant 135 : index
    %717 = memref.load %arg2[%c135] : memref<200xf32, #tpu.memory_space<smem>>
    %718 = vector.broadcast %717 : f32 to vector<20x48xf32>
    %719 = arith.mulf %718, %712 : vector<20x48xf32>
    %720 = arith.addf %710, %719 : vector<20x48xf32>
    %c1_302 = arith.constant 1 : index
    %c2_303 = arith.constant 2 : index
    %c0_304 = arith.constant 0 : index
    %721 = vector.load %arg8[%c1_302, %c2_303, %c0_304] : memref<5x24x48xf32, #tpu.memory_space<vmem>>, vector<1x20x48xf32>
    %722 = vector.shape_cast %721 : vector<1x20x48xf32> to vector<20x48xf32>
    %c111 = arith.constant 111 : index
    %723 = memref.load %arg2[%c111] : memref<200xf32, #tpu.memory_space<smem>>
    %724 = vector.broadcast %723 : f32 to vector<20x48xf32>
    %725 = arith.mulf %724, %722 : vector<20x48xf32>
    %726 = arith.addf %716, %725 : vector<20x48xf32>
    %c136 = arith.constant 136 : index
    %727 = memref.load %arg2[%c136] : memref<200xf32, #tpu.memory_space<smem>>
    %728 = vector.broadcast %727 : f32 to vector<20x48xf32>
    %729 = arith.mulf %728, %722 : vector<20x48xf32>
    %730 = arith.addf %720, %729 : vector<20x48xf32>
    %c2_305 = arith.constant 2 : index
    %c2_306 = arith.constant 2 : index
    %c0_307 = arith.constant 0 : index
    %731 = vector.load %arg8[%c2_305, %c2_306, %c0_307] : memref<5x24x48xf32, #tpu.memory_space<vmem>>, vector<1x20x48xf32>
    %732 = vector.shape_cast %731 : vector<1x20x48xf32> to vector<20x48xf32>
    %c112 = arith.constant 112 : index
    %733 = memref.load %arg2[%c112] : memref<200xf32, #tpu.memory_space<smem>>
    %734 = vector.broadcast %733 : f32 to vector<20x48xf32>
    %735 = arith.mulf %734, %732 : vector<20x48xf32>
    %736 = arith.addf %726, %735 : vector<20x48xf32>
    %c137 = arith.constant 137 : index
    %737 = memref.load %arg2[%c137] : memref<200xf32, #tpu.memory_space<smem>>
    %738 = vector.broadcast %737 : f32 to vector<20x48xf32>
    %739 = arith.mulf %738, %732 : vector<20x48xf32>
    %740 = arith.addf %730, %739 : vector<20x48xf32>
    %c3_308 = arith.constant 3 : index
    %c2_309 = arith.constant 2 : index
    %c0_310 = arith.constant 0 : index
    %741 = vector.load %arg8[%c3_308, %c2_309, %c0_310] : memref<5x24x48xf32, #tpu.memory_space<vmem>>, vector<1x20x48xf32>
    %742 = vector.shape_cast %741 : vector<1x20x48xf32> to vector<20x48xf32>
    %c113 = arith.constant 113 : index
    %743 = memref.load %arg2[%c113] : memref<200xf32, #tpu.memory_space<smem>>
    %744 = vector.broadcast %743 : f32 to vector<20x48xf32>
    %745 = arith.mulf %744, %742 : vector<20x48xf32>
    %746 = arith.addf %736, %745 : vector<20x48xf32>
    %c138 = arith.constant 138 : index
    %747 = memref.load %arg2[%c138] : memref<200xf32, #tpu.memory_space<smem>>
    %748 = vector.broadcast %747 : f32 to vector<20x48xf32>
    %749 = arith.mulf %748, %742 : vector<20x48xf32>
    %750 = arith.addf %740, %749 : vector<20x48xf32>
    %c4_311 = arith.constant 4 : index
    %c2_312 = arith.constant 2 : index
    %c0_313 = arith.constant 0 : index
    %751 = vector.load %arg8[%c4_311, %c2_312, %c0_313] : memref<5x24x48xf32, #tpu.memory_space<vmem>>, vector<1x20x48xf32>
    %752 = vector.shape_cast %751 : vector<1x20x48xf32> to vector<20x48xf32>
    %c114 = arith.constant 114 : index
    %753 = memref.load %arg2[%c114] : memref<200xf32, #tpu.memory_space<smem>>
    %754 = vector.broadcast %753 : f32 to vector<20x48xf32>
    %755 = arith.mulf %754, %752 : vector<20x48xf32>
    %756 = arith.addf %746, %755 : vector<20x48xf32>
    %c139 = arith.constant 139 : index
    %757 = memref.load %arg2[%c139] : memref<200xf32, #tpu.memory_space<smem>>
    %758 = vector.broadcast %757 : f32 to vector<20x48xf32>
    %759 = arith.mulf %758, %752 : vector<20x48xf32>
    %760 = arith.addf %750, %759 : vector<20x48xf32>
    %c0_314 = arith.constant 0 : index
    %c3_315 = arith.constant 3 : index
    %c0_316 = arith.constant 0 : index
    %761 = vector.load %arg8[%c0_314, %c3_315, %c0_316] : memref<5x24x48xf32, #tpu.memory_space<vmem>>, vector<1x20x48xf32>
    %762 = vector.shape_cast %761 : vector<1x20x48xf32> to vector<20x48xf32>
    %c115 = arith.constant 115 : index
    %763 = memref.load %arg2[%c115] : memref<200xf32, #tpu.memory_space<smem>>
    %764 = vector.broadcast %763 : f32 to vector<20x48xf32>
    %765 = arith.mulf %764, %762 : vector<20x48xf32>
    %766 = arith.addf %756, %765 : vector<20x48xf32>
    %c140 = arith.constant 140 : index
    %767 = memref.load %arg2[%c140] : memref<200xf32, #tpu.memory_space<smem>>
    %768 = vector.broadcast %767 : f32 to vector<20x48xf32>
    %769 = arith.mulf %768, %762 : vector<20x48xf32>
    %770 = arith.addf %760, %769 : vector<20x48xf32>
    %c1_317 = arith.constant 1 : index
    %c3_318 = arith.constant 3 : index
    %c0_319 = arith.constant 0 : index
    %771 = vector.load %arg8[%c1_317, %c3_318, %c0_319] : memref<5x24x48xf32, #tpu.memory_space<vmem>>, vector<1x20x48xf32>
    %772 = vector.shape_cast %771 : vector<1x20x48xf32> to vector<20x48xf32>
    %c116 = arith.constant 116 : index
    %773 = memref.load %arg2[%c116] : memref<200xf32, #tpu.memory_space<smem>>
    %774 = vector.broadcast %773 : f32 to vector<20x48xf32>
    %775 = arith.mulf %774, %772 : vector<20x48xf32>
    %776 = arith.addf %766, %775 : vector<20x48xf32>
    %c141 = arith.constant 141 : index
    %777 = memref.load %arg2[%c141] : memref<200xf32, #tpu.memory_space<smem>>
    %778 = vector.broadcast %777 : f32 to vector<20x48xf32>
    %779 = arith.mulf %778, %772 : vector<20x48xf32>
    %780 = arith.addf %770, %779 : vector<20x48xf32>
    %c2_320 = arith.constant 2 : index
    %c3_321 = arith.constant 3 : index
    %c0_322 = arith.constant 0 : index
    %781 = vector.load %arg8[%c2_320, %c3_321, %c0_322] : memref<5x24x48xf32, #tpu.memory_space<vmem>>, vector<1x20x48xf32>
    %782 = vector.shape_cast %781 : vector<1x20x48xf32> to vector<20x48xf32>
    %c117 = arith.constant 117 : index
    %783 = memref.load %arg2[%c117] : memref<200xf32, #tpu.memory_space<smem>>
    %784 = vector.broadcast %783 : f32 to vector<20x48xf32>
    %785 = arith.mulf %784, %782 : vector<20x48xf32>
    %786 = arith.addf %776, %785 : vector<20x48xf32>
    %c142 = arith.constant 142 : index
    %787 = memref.load %arg2[%c142] : memref<200xf32, #tpu.memory_space<smem>>
    %788 = vector.broadcast %787 : f32 to vector<20x48xf32>
    %789 = arith.mulf %788, %782 : vector<20x48xf32>
    %790 = arith.addf %780, %789 : vector<20x48xf32>
    %c3_323 = arith.constant 3 : index
    %c3_324 = arith.constant 3 : index
    %c0_325 = arith.constant 0 : index
    %791 = vector.load %arg8[%c3_323, %c3_324, %c0_325] : memref<5x24x48xf32, #tpu.memory_space<vmem>>, vector<1x20x48xf32>
    %792 = vector.shape_cast %791 : vector<1x20x48xf32> to vector<20x48xf32>
    %c118 = arith.constant 118 : index
    %793 = memref.load %arg2[%c118] : memref<200xf32, #tpu.memory_space<smem>>
    %794 = vector.broadcast %793 : f32 to vector<20x48xf32>
    %795 = arith.mulf %794, %792 : vector<20x48xf32>
    %796 = arith.addf %786, %795 : vector<20x48xf32>
    %c143 = arith.constant 143 : index
    %797 = memref.load %arg2[%c143] : memref<200xf32, #tpu.memory_space<smem>>
    %798 = vector.broadcast %797 : f32 to vector<20x48xf32>
    %799 = arith.mulf %798, %792 : vector<20x48xf32>
    %800 = arith.addf %790, %799 : vector<20x48xf32>
    %c4_326 = arith.constant 4 : index
    %c3_327 = arith.constant 3 : index
    %c0_328 = arith.constant 0 : index
    %801 = vector.load %arg8[%c4_326, %c3_327, %c0_328] : memref<5x24x48xf32, #tpu.memory_space<vmem>>, vector<1x20x48xf32>
    %802 = vector.shape_cast %801 : vector<1x20x48xf32> to vector<20x48xf32>
    %c119 = arith.constant 119 : index
    %803 = memref.load %arg2[%c119] : memref<200xf32, #tpu.memory_space<smem>>
    %804 = vector.broadcast %803 : f32 to vector<20x48xf32>
    %805 = arith.mulf %804, %802 : vector<20x48xf32>
    %806 = arith.addf %796, %805 : vector<20x48xf32>
    %c144 = arith.constant 144 : index
    %807 = memref.load %arg2[%c144] : memref<200xf32, #tpu.memory_space<smem>>
    %808 = vector.broadcast %807 : f32 to vector<20x48xf32>
    %809 = arith.mulf %808, %802 : vector<20x48xf32>
    %810 = arith.addf %800, %809 : vector<20x48xf32>
    %c0_329 = arith.constant 0 : index
    %c4_330 = arith.constant 4 : index
    %c0_331 = arith.constant 0 : index
    %811 = vector.load %arg8[%c0_329, %c4_330, %c0_331] : memref<5x24x48xf32, #tpu.memory_space<vmem>>, vector<1x20x48xf32>
    %812 = vector.shape_cast %811 : vector<1x20x48xf32> to vector<20x48xf32>
    %c120 = arith.constant 120 : index
    %813 = memref.load %arg2[%c120] : memref<200xf32, #tpu.memory_space<smem>>
    %814 = vector.broadcast %813 : f32 to vector<20x48xf32>
    %815 = arith.mulf %814, %812 : vector<20x48xf32>
    %816 = arith.addf %806, %815 : vector<20x48xf32>
    %c145 = arith.constant 145 : index
    %817 = memref.load %arg2[%c145] : memref<200xf32, #tpu.memory_space<smem>>
    %818 = vector.broadcast %817 : f32 to vector<20x48xf32>
    %819 = arith.mulf %818, %812 : vector<20x48xf32>
    %820 = arith.addf %810, %819 : vector<20x48xf32>
    %c1_332 = arith.constant 1 : index
    %c4_333 = arith.constant 4 : index
    %c0_334 = arith.constant 0 : index
    %821 = vector.load %arg8[%c1_332, %c4_333, %c0_334] : memref<5x24x48xf32, #tpu.memory_space<vmem>>, vector<1x20x48xf32>
    %822 = vector.shape_cast %821 : vector<1x20x48xf32> to vector<20x48xf32>
    %c121 = arith.constant 121 : index
    %823 = memref.load %arg2[%c121] : memref<200xf32, #tpu.memory_space<smem>>
    %824 = vector.broadcast %823 : f32 to vector<20x48xf32>
    %825 = arith.mulf %824, %822 : vector<20x48xf32>
    %826 = arith.addf %816, %825 : vector<20x48xf32>
    %c146 = arith.constant 146 : index
    %827 = memref.load %arg2[%c146] : memref<200xf32, #tpu.memory_space<smem>>
    %828 = vector.broadcast %827 : f32 to vector<20x48xf32>
    %829 = arith.mulf %828, %822 : vector<20x48xf32>
    %830 = arith.addf %820, %829 : vector<20x48xf32>
    %c2_335 = arith.constant 2 : index
    %c4_336 = arith.constant 4 : index
    %c0_337 = arith.constant 0 : index
    %831 = vector.load %arg8[%c2_335, %c4_336, %c0_337] : memref<5x24x48xf32, #tpu.memory_space<vmem>>, vector<1x20x48xf32>
    %832 = vector.shape_cast %831 : vector<1x20x48xf32> to vector<20x48xf32>
    %c122 = arith.constant 122 : index
    %833 = memref.load %arg2[%c122] : memref<200xf32, #tpu.memory_space<smem>>
    %834 = vector.broadcast %833 : f32 to vector<20x48xf32>
    %835 = arith.mulf %834, %832 : vector<20x48xf32>
    %836 = arith.addf %826, %835 : vector<20x48xf32>
    %c147 = arith.constant 147 : index
    %837 = memref.load %arg2[%c147] : memref<200xf32, #tpu.memory_space<smem>>
    %838 = vector.broadcast %837 : f32 to vector<20x48xf32>
    %839 = arith.mulf %838, %832 : vector<20x48xf32>
    %840 = arith.addf %830, %839 : vector<20x48xf32>
    %c3_338 = arith.constant 3 : index
    %c4_339 = arith.constant 4 : index
    %c0_340 = arith.constant 0 : index
    %841 = vector.load %arg8[%c3_338, %c4_339, %c0_340] : memref<5x24x48xf32, #tpu.memory_space<vmem>>, vector<1x20x48xf32>
    %842 = vector.shape_cast %841 : vector<1x20x48xf32> to vector<20x48xf32>
    %c123 = arith.constant 123 : index
    %843 = memref.load %arg2[%c123] : memref<200xf32, #tpu.memory_space<smem>>
    %844 = vector.broadcast %843 : f32 to vector<20x48xf32>
    %845 = arith.mulf %844, %842 : vector<20x48xf32>
    %846 = arith.addf %836, %845 : vector<20x48xf32>
    %c148 = arith.constant 148 : index
    %847 = memref.load %arg2[%c148] : memref<200xf32, #tpu.memory_space<smem>>
    %848 = vector.broadcast %847 : f32 to vector<20x48xf32>
    %849 = arith.mulf %848, %842 : vector<20x48xf32>
    %850 = arith.addf %840, %849 : vector<20x48xf32>
    %c4_341 = arith.constant 4 : index
    %c4_342 = arith.constant 4 : index
    %c0_343 = arith.constant 0 : index
    %851 = vector.load %arg8[%c4_341, %c4_342, %c0_343] : memref<5x24x48xf32, #tpu.memory_space<vmem>>, vector<1x20x48xf32>
    %852 = vector.shape_cast %851 : vector<1x20x48xf32> to vector<20x48xf32>
    %c124 = arith.constant 124 : index
    %853 = memref.load %arg2[%c124] : memref<200xf32, #tpu.memory_space<smem>>
    %854 = vector.broadcast %853 : f32 to vector<20x48xf32>
    %855 = arith.mulf %854, %852 : vector<20x48xf32>
    %856 = arith.addf %846, %855 : vector<20x48xf32>
    %c149 = arith.constant 149 : index
    %857 = memref.load %arg2[%c149] : memref<200xf32, #tpu.memory_space<smem>>
    %858 = vector.broadcast %857 : f32 to vector<20x48xf32>
    %859 = arith.mulf %858, %852 : vector<20x48xf32>
    %860 = arith.addf %850, %859 : vector<20x48xf32>
    %c3_344 = arith.constant 3 : index
    %c0_345 = arith.constant 0 : index
    %c0_346 = arith.constant 0 : index
    %861 = vector.load %arg7[%c3_344, %c0_345, %c0_346] : memref<4x24x48xf32, #tpu.memory_space<vmem>>, vector<1x24x48xf32>
    %862 = vector.shape_cast %861 : vector<1x24x48xf32> to vector<24x48xf32>
    %c0_347 = arith.constant 0 : index
    %c0_348 = arith.constant 0 : index
    %c0_349 = arith.constant 0 : index
    %863 = vector.load %arg8[%c0_347, %c0_348, %c0_349] : memref<5x24x48xf32, #tpu.memory_space<vmem>>, vector<1x24x48xf32>
    %864 = vector.shape_cast %863 : vector<1x24x48xf32> to vector<24x48xf32>
    %865 = vector.shape_cast %862 : vector<24x48xf32> to vector<1x24x48xf32>
    tpu.vector_store %arg8[%c0_347, %c0_348, %c0_349], %865 {strides = array<i32>} : memref<5x24x48xf32, #tpu.memory_space<vmem>>, vector<1x24x48xf32>,
    %866 = vector.extract_strided_slice %862 {offsets = [0, 1], sizes = [24, 47], strides = [1, 1]} : vector<24x48xf32> to vector<24x47xf32>
    %c1_350 = arith.constant 1 : index
    %c0_351 = arith.constant 0 : index
    %c0_352 = arith.constant 0 : index
    %867 = vector.load %arg8[%c1_350, %c0_351, %c0_352] : memref<5x24x48xf32, #tpu.memory_space<vmem>>, vector<1x24x47xf32>
    %868 = vector.shape_cast %867 : vector<1x24x47xf32> to vector<24x47xf32>
    %869 = vector.shape_cast %866 : vector<24x47xf32> to vector<1x24x47xf32>
    tpu.vector_store %arg8[%c1_350, %c0_351, %c0_352], %869 {strides = array<i32>} : memref<5x24x48xf32, #tpu.memory_space<vmem>>, vector<1x24x47xf32>,
    %870 = vector.extract_strided_slice %862 {offsets = [0, 2], sizes = [24, 46], strides = [1, 1]} : vector<24x48xf32> to vector<24x46xf32>
    %c2_353 = arith.constant 2 : index
    %c0_354 = arith.constant 0 : index
    %c0_355 = arith.constant 0 : index
    %871 = vector.load %arg8[%c2_353, %c0_354, %c0_355] : memref<5x24x48xf32, #tpu.memory_space<vmem>>, vector<1x24x46xf32>
    %872 = vector.shape_cast %871 : vector<1x24x46xf32> to vector<24x46xf32>
    %873 = vector.shape_cast %870 : vector<24x46xf32> to vector<1x24x46xf32>
    tpu.vector_store %arg8[%c2_353, %c0_354, %c0_355], %873 {strides = array<i32>} : memref<5x24x48xf32, #tpu.memory_space<vmem>>, vector<1x24x46xf32>,
    %874 = vector.extract_strided_slice %862 {offsets = [0, 3], sizes = [24, 45], strides = [1, 1]} : vector<24x48xf32> to vector<24x45xf32>
    %c3_356 = arith.constant 3 : index
    %c0_357 = arith.constant 0 : index
    %c0_358 = arith.constant 0 : index
    %875 = vector.load %arg8[%c3_356, %c0_357, %c0_358] : memref<5x24x48xf32, #tpu.memory_space<vmem>>, vector<1x24x45xf32>
    %876 = vector.shape_cast %875 : vector<1x24x45xf32> to vector<24x45xf32>
    %877 = vector.shape_cast %874 : vector<24x45xf32> to vector<1x24x45xf32>
    tpu.vector_store %arg8[%c3_356, %c0_357, %c0_358], %877 {strides = array<i32>} : memref<5x24x48xf32, #tpu.memory_space<vmem>>, vector<1x24x45xf32>,
    %878 = vector.extract_strided_slice %862 {offsets = [0, 4], sizes = [24, 44], strides = [1, 1]} : vector<24x48xf32> to vector<24x44xf32>
    %c4_359 = arith.constant 4 : index
    %c0_360 = arith.constant 0 : index
    %c0_361 = arith.constant 0 : index
    %879 = vector.load %arg8[%c4_359, %c0_360, %c0_361] : memref<5x24x48xf32, #tpu.memory_space<vmem>>, vector<1x24x44xf32>
    %880 = vector.shape_cast %879 : vector<1x24x44xf32> to vector<24x44xf32>
    %881 = vector.shape_cast %878 : vector<24x44xf32> to vector<1x24x44xf32>
    tpu.vector_store %arg8[%c4_359, %c0_360, %c0_361], %881 {strides = array<i32>} : memref<5x24x48xf32, #tpu.memory_space<vmem>>, vector<1x24x44xf32>,
    %c0_362 = arith.constant 0 : index
    %c0_363 = arith.constant 0 : index
    %c0_364 = arith.constant 0 : index
    %882 = vector.load %arg8[%c0_362, %c0_363, %c0_364] : memref<5x24x48xf32, #tpu.memory_space<vmem>>, vector<1x20x48xf32>
    %883 = vector.shape_cast %882 : vector<1x20x48xf32> to vector<20x48xf32>
    %c150 = arith.constant 150 : index
    %884 = memref.load %arg2[%c150] : memref<200xf32, #tpu.memory_space<smem>>
    %885 = vector.broadcast %884 : f32 to vector<20x48xf32>
    %886 = arith.mulf %885, %883 : vector<20x48xf32>
    %887 = arith.addf %856, %886 : vector<20x48xf32>
    %c175 = arith.constant 175 : index
    %888 = memref.load %arg2[%c175] : memref<200xf32, #tpu.memory_space<smem>>
    %889 = vector.broadcast %888 : f32 to vector<20x48xf32>
    %890 = arith.mulf %889, %883 : vector<20x48xf32>
    %891 = arith.addf %860, %890 : vector<20x48xf32>
    %c1_365 = arith.constant 1 : index
    %c0_366 = arith.constant 0 : index
    %c0_367 = arith.constant 0 : index
    %892 = vector.load %arg8[%c1_365, %c0_366, %c0_367] : memref<5x24x48xf32, #tpu.memory_space<vmem>>, vector<1x20x48xf32>
    %893 = vector.shape_cast %892 : vector<1x20x48xf32> to vector<20x48xf32>
    %c151 = arith.constant 151 : index
    %894 = memref.load %arg2[%c151] : memref<200xf32, #tpu.memory_space<smem>>
    %895 = vector.broadcast %894 : f32 to vector<20x48xf32>
    %896 = arith.mulf %895, %893 : vector<20x48xf32>
    %897 = arith.addf %887, %896 : vector<20x48xf32>
    %c176 = arith.constant 176 : index
    %898 = memref.load %arg2[%c176] : memref<200xf32, #tpu.memory_space<smem>>
    %899 = vector.broadcast %898 : f32 to vector<20x48xf32>
    %900 = arith.mulf %899, %893 : vector<20x48xf32>
    %901 = arith.addf %891, %900 : vector<20x48xf32>
    %c2_368 = arith.constant 2 : index
    %c0_369 = arith.constant 0 : index
    %c0_370 = arith.constant 0 : index
    %902 = vector.load %arg8[%c2_368, %c0_369, %c0_370] : memref<5x24x48xf32, #tpu.memory_space<vmem>>, vector<1x20x48xf32>
    %903 = vector.shape_cast %902 : vector<1x20x48xf32> to vector<20x48xf32>
    %c152 = arith.constant 152 : index
    %904 = memref.load %arg2[%c152] : memref<200xf32, #tpu.memory_space<smem>>
    %905 = vector.broadcast %904 : f32 to vector<20x48xf32>
    %906 = arith.mulf %905, %903 : vector<20x48xf32>
    %907 = arith.addf %897, %906 : vector<20x48xf32>
    %c177 = arith.constant 177 : index
    %908 = memref.load %arg2[%c177] : memref<200xf32, #tpu.memory_space<smem>>
    %909 = vector.broadcast %908 : f32 to vector<20x48xf32>
    %910 = arith.mulf %909, %903 : vector<20x48xf32>
    %911 = arith.addf %901, %910 : vector<20x48xf32>
    %c3_371 = arith.constant 3 : index
    %c0_372 = arith.constant 0 : index
    %c0_373 = arith.constant 0 : index
    %912 = vector.load %arg8[%c3_371, %c0_372, %c0_373] : memref<5x24x48xf32, #tpu.memory_space<vmem>>, vector<1x20x48xf32>
    %913 = vector.shape_cast %912 : vector<1x20x48xf32> to vector<20x48xf32>
    %c153 = arith.constant 153 : index
    %914 = memref.load %arg2[%c153] : memref<200xf32, #tpu.memory_space<smem>>
    %915 = vector.broadcast %914 : f32 to vector<20x48xf32>
    %916 = arith.mulf %915, %913 : vector<20x48xf32>
    %917 = arith.addf %907, %916 : vector<20x48xf32>
    %c178 = arith.constant 178 : index
    %918 = memref.load %arg2[%c178] : memref<200xf32, #tpu.memory_space<smem>>
    %919 = vector.broadcast %918 : f32 to vector<20x48xf32>
    %920 = arith.mulf %919, %913 : vector<20x48xf32>
    %921 = arith.addf %911, %920 : vector<20x48xf32>
    %c4_374 = arith.constant 4 : index
    %c0_375 = arith.constant 0 : index
    %c0_376 = arith.constant 0 : index
    %922 = vector.load %arg8[%c4_374, %c0_375, %c0_376] : memref<5x24x48xf32, #tpu.memory_space<vmem>>, vector<1x20x48xf32>
    %923 = vector.shape_cast %922 : vector<1x20x48xf32> to vector<20x48xf32>
    %c154 = arith.constant 154 : index
    %924 = memref.load %arg2[%c154] : memref<200xf32, #tpu.memory_space<smem>>
    %925 = vector.broadcast %924 : f32 to vector<20x48xf32>
    %926 = arith.mulf %925, %923 : vector<20x48xf32>
    %927 = arith.addf %917, %926 : vector<20x48xf32>
    %c179 = arith.constant 179 : index
    %928 = memref.load %arg2[%c179] : memref<200xf32, #tpu.memory_space<smem>>
    %929 = vector.broadcast %928 : f32 to vector<20x48xf32>
    %930 = arith.mulf %929, %923 : vector<20x48xf32>
    %931 = arith.addf %921, %930 : vector<20x48xf32>
    %c0_377 = arith.constant 0 : index
    %c1_378 = arith.constant 1 : index
    %c0_379 = arith.constant 0 : index
    %932 = vector.load %arg8[%c0_377, %c1_378, %c0_379] : memref<5x24x48xf32, #tpu.memory_space<vmem>>, vector<1x20x48xf32>
    %933 = vector.shape_cast %932 : vector<1x20x48xf32> to vector<20x48xf32>
    %c155 = arith.constant 155 : index
    %934 = memref.load %arg2[%c155] : memref<200xf32, #tpu.memory_space<smem>>
    %935 = vector.broadcast %934 : f32 to vector<20x48xf32>
    %936 = arith.mulf %935, %933 : vector<20x48xf32>
    %937 = arith.addf %927, %936 : vector<20x48xf32>
    %c180 = arith.constant 180 : index
    %938 = memref.load %arg2[%c180] : memref<200xf32, #tpu.memory_space<smem>>
    %939 = vector.broadcast %938 : f32 to vector<20x48xf32>
    %940 = arith.mulf %939, %933 : vector<20x48xf32>
    %941 = arith.addf %931, %940 : vector<20x48xf32>
    %c1_380 = arith.constant 1 : index
    %c1_381 = arith.constant 1 : index
    %c0_382 = arith.constant 0 : index
    %942 = vector.load %arg8[%c1_380, %c1_381, %c0_382] : memref<5x24x48xf32, #tpu.memory_space<vmem>>, vector<1x20x48xf32>
    %943 = vector.shape_cast %942 : vector<1x20x48xf32> to vector<20x48xf32>
    %c156 = arith.constant 156 : index
    %944 = memref.load %arg2[%c156] : memref<200xf32, #tpu.memory_space<smem>>
    %945 = vector.broadcast %944 : f32 to vector<20x48xf32>
    %946 = arith.mulf %945, %943 : vector<20x48xf32>
    %947 = arith.addf %937, %946 : vector<20x48xf32>
    %c181 = arith.constant 181 : index
    %948 = memref.load %arg2[%c181] : memref<200xf32, #tpu.memory_space<smem>>
    %949 = vector.broadcast %948 : f32 to vector<20x48xf32>
    %950 = arith.mulf %949, %943 : vector<20x48xf32>
    %951 = arith.addf %941, %950 : vector<20x48xf32>
    %c2_383 = arith.constant 2 : index
    %c1_384 = arith.constant 1 : index
    %c0_385 = arith.constant 0 : index
    %952 = vector.load %arg8[%c2_383, %c1_384, %c0_385] : memref<5x24x48xf32, #tpu.memory_space<vmem>>, vector<1x20x48xf32>
    %953 = vector.shape_cast %952 : vector<1x20x48xf32> to vector<20x48xf32>
    %c157 = arith.constant 157 : index
    %954 = memref.load %arg2[%c157] : memref<200xf32, #tpu.memory_space<smem>>
    %955 = vector.broadcast %954 : f32 to vector<20x48xf32>
    %956 = arith.mulf %955, %953 : vector<20x48xf32>
    %957 = arith.addf %947, %956 : vector<20x48xf32>
    %c182 = arith.constant 182 : index
    %958 = memref.load %arg2[%c182] : memref<200xf32, #tpu.memory_space<smem>>
    %959 = vector.broadcast %958 : f32 to vector<20x48xf32>
    %960 = arith.mulf %959, %953 : vector<20x48xf32>
    %961 = arith.addf %951, %960 : vector<20x48xf32>
    %c3_386 = arith.constant 3 : index
    %c1_387 = arith.constant 1 : index
    %c0_388 = arith.constant 0 : index
    %962 = vector.load %arg8[%c3_386, %c1_387, %c0_388] : memref<5x24x48xf32, #tpu.memory_space<vmem>>, vector<1x20x48xf32>
    %963 = vector.shape_cast %962 : vector<1x20x48xf32> to vector<20x48xf32>
    %c158 = arith.constant 158 : index
    %964 = memref.load %arg2[%c158] : memref<200xf32, #tpu.memory_space<smem>>
    %965 = vector.broadcast %964 : f32 to vector<20x48xf32>
    %966 = arith.mulf %965, %963 : vector<20x48xf32>
    %967 = arith.addf %957, %966 : vector<20x48xf32>
    %c183 = arith.constant 183 : index
    %968 = memref.load %arg2[%c183] : memref<200xf32, #tpu.memory_space<smem>>
    %969 = vector.broadcast %968 : f32 to vector<20x48xf32>
    %970 = arith.mulf %969, %963 : vector<20x48xf32>
    %971 = arith.addf %961, %970 : vector<20x48xf32>
    %c4_389 = arith.constant 4 : index
    %c1_390 = arith.constant 1 : index
    %c0_391 = arith.constant 0 : index
    %972 = vector.load %arg8[%c4_389, %c1_390, %c0_391] : memref<5x24x48xf32, #tpu.memory_space<vmem>>, vector<1x20x48xf32>
    %973 = vector.shape_cast %972 : vector<1x20x48xf32> to vector<20x48xf32>
    %c159 = arith.constant 159 : index
    %974 = memref.load %arg2[%c159] : memref<200xf32, #tpu.memory_space<smem>>
    %975 = vector.broadcast %974 : f32 to vector<20x48xf32>
    %976 = arith.mulf %975, %973 : vector<20x48xf32>
    %977 = arith.addf %967, %976 : vector<20x48xf32>
    %c184 = arith.constant 184 : index
    %978 = memref.load %arg2[%c184] : memref<200xf32, #tpu.memory_space<smem>>
    %979 = vector.broadcast %978 : f32 to vector<20x48xf32>
    %980 = arith.mulf %979, %973 : vector<20x48xf32>
    %981 = arith.addf %971, %980 : vector<20x48xf32>
    %c0_392 = arith.constant 0 : index
    %c2_393 = arith.constant 2 : index
    %c0_394 = arith.constant 0 : index
    %982 = vector.load %arg8[%c0_392, %c2_393, %c0_394] : memref<5x24x48xf32, #tpu.memory_space<vmem>>, vector<1x20x48xf32>
    %983 = vector.shape_cast %982 : vector<1x20x48xf32> to vector<20x48xf32>
    %c160 = arith.constant 160 : index
    %984 = memref.load %arg2[%c160] : memref<200xf32, #tpu.memory_space<smem>>
    %985 = vector.broadcast %984 : f32 to vector<20x48xf32>
    %986 = arith.mulf %985, %983 : vector<20x48xf32>
    %987 = arith.addf %977, %986 : vector<20x48xf32>
    %c185 = arith.constant 185 : index
    %988 = memref.load %arg2[%c185] : memref<200xf32, #tpu.memory_space<smem>>
    %989 = vector.broadcast %988 : f32 to vector<20x48xf32>
    %990 = arith.mulf %989, %983 : vector<20x48xf32>
    %991 = arith.addf %981, %990 : vector<20x48xf32>
    %c1_395 = arith.constant 1 : index
    %c2_396 = arith.constant 2 : index
    %c0_397 = arith.constant 0 : index
    %992 = vector.load %arg8[%c1_395, %c2_396, %c0_397] : memref<5x24x48xf32, #tpu.memory_space<vmem>>, vector<1x20x48xf32>
    %993 = vector.shape_cast %992 : vector<1x20x48xf32> to vector<20x48xf32>
    %c161 = arith.constant 161 : index
    %994 = memref.load %arg2[%c161] : memref<200xf32, #tpu.memory_space<smem>>
    %995 = vector.broadcast %994 : f32 to vector<20x48xf32>
    %996 = arith.mulf %995, %993 : vector<20x48xf32>
    %997 = arith.addf %987, %996 : vector<20x48xf32>
    %c186 = arith.constant 186 : index
    %998 = memref.load %arg2[%c186] : memref<200xf32, #tpu.memory_space<smem>>
    %999 = vector.broadcast %998 : f32 to vector<20x48xf32>
    %1000 = arith.mulf %999, %993 : vector<20x48xf32>
    %1001 = arith.addf %991, %1000 : vector<20x48xf32>
    %c2_398 = arith.constant 2 : index
    %c2_399 = arith.constant 2 : index
    %c0_400 = arith.constant 0 : index
    %1002 = vector.load %arg8[%c2_398, %c2_399, %c0_400] : memref<5x24x48xf32, #tpu.memory_space<vmem>>, vector<1x20x48xf32>
    %1003 = vector.shape_cast %1002 : vector<1x20x48xf32> to vector<20x48xf32>
    %c162 = arith.constant 162 : index
    %1004 = memref.load %arg2[%c162] : memref<200xf32, #tpu.memory_space<smem>>
    %1005 = vector.broadcast %1004 : f32 to vector<20x48xf32>
    %1006 = arith.mulf %1005, %1003 : vector<20x48xf32>
    %1007 = arith.addf %997, %1006 : vector<20x48xf32>
    %c187 = arith.constant 187 : index
    %1008 = memref.load %arg2[%c187] : memref<200xf32, #tpu.memory_space<smem>>
    %1009 = vector.broadcast %1008 : f32 to vector<20x48xf32>
    %1010 = arith.mulf %1009, %1003 : vector<20x48xf32>
    %1011 = arith.addf %1001, %1010 : vector<20x48xf32>
    %c3_401 = arith.constant 3 : index
    %c2_402 = arith.constant 2 : index
    %c0_403 = arith.constant 0 : index
    %1012 = vector.load %arg8[%c3_401, %c2_402, %c0_403] : memref<5x24x48xf32, #tpu.memory_space<vmem>>, vector<1x20x48xf32>
    %1013 = vector.shape_cast %1012 : vector<1x20x48xf32> to vector<20x48xf32>
    %c163 = arith.constant 163 : index
    %1014 = memref.load %arg2[%c163] : memref<200xf32, #tpu.memory_space<smem>>
    %1015 = vector.broadcast %1014 : f32 to vector<20x48xf32>
    %1016 = arith.mulf %1015, %1013 : vector<20x48xf32>
    %1017 = arith.addf %1007, %1016 : vector<20x48xf32>
    %c188 = arith.constant 188 : index
    %1018 = memref.load %arg2[%c188] : memref<200xf32, #tpu.memory_space<smem>>
    %1019 = vector.broadcast %1018 : f32 to vector<20x48xf32>
    %1020 = arith.mulf %1019, %1013 : vector<20x48xf32>
    %1021 = arith.addf %1011, %1020 : vector<20x48xf32>
    %c4_404 = arith.constant 4 : index
    %c2_405 = arith.constant 2 : index
    %c0_406 = arith.constant 0 : index
    %1022 = vector.load %arg8[%c4_404, %c2_405, %c0_406] : memref<5x24x48xf32, #tpu.memory_space<vmem>>, vector<1x20x48xf32>
    %1023 = vector.shape_cast %1022 : vector<1x20x48xf32> to vector<20x48xf32>
    %c164 = arith.constant 164 : index
    %1024 = memref.load %arg2[%c164] : memref<200xf32, #tpu.memory_space<smem>>
    %1025 = vector.broadcast %1024 : f32 to vector<20x48xf32>
    %1026 = arith.mulf %1025, %1023 : vector<20x48xf32>
    %1027 = arith.addf %1017, %1026 : vector<20x48xf32>
    %c189 = arith.constant 189 : index
    %1028 = memref.load %arg2[%c189] : memref<200xf32, #tpu.memory_space<smem>>
    %1029 = vector.broadcast %1028 : f32 to vector<20x48xf32>
    %1030 = arith.mulf %1029, %1023 : vector<20x48xf32>
    %1031 = arith.addf %1021, %1030 : vector<20x48xf32>
    %c0_407 = arith.constant 0 : index
    %c3_408 = arith.constant 3 : index
    %c0_409 = arith.constant 0 : index
    %1032 = vector.load %arg8[%c0_407, %c3_408, %c0_409] : memref<5x24x48xf32, #tpu.memory_space<vmem>>, vector<1x20x48xf32>
    %1033 = vector.shape_cast %1032 : vector<1x20x48xf32> to vector<20x48xf32>
    %c165 = arith.constant 165 : index
    %1034 = memref.load %arg2[%c165] : memref<200xf32, #tpu.memory_space<smem>>
    %1035 = vector.broadcast %1034 : f32 to vector<20x48xf32>
    %1036 = arith.mulf %1035, %1033 : vector<20x48xf32>
    %1037 = arith.addf %1027, %1036 : vector<20x48xf32>
    %c190 = arith.constant 190 : index
    %1038 = memref.load %arg2[%c190] : memref<200xf32, #tpu.memory_space<smem>>
    %1039 = vector.broadcast %1038 : f32 to vector<20x48xf32>
    %1040 = arith.mulf %1039, %1033 : vector<20x48xf32>
    %1041 = arith.addf %1031, %1040 : vector<20x48xf32>
    %c1_410 = arith.constant 1 : index
    %c3_411 = arith.constant 3 : index
    %c0_412 = arith.constant 0 : index
    %1042 = vector.load %arg8[%c1_410, %c3_411, %c0_412] : memref<5x24x48xf32, #tpu.memory_space<vmem>>, vector<1x20x48xf32>
    %1043 = vector.shape_cast %1042 : vector<1x20x48xf32> to vector<20x48xf32>
    %c166 = arith.constant 166 : index
    %1044 = memref.load %arg2[%c166] : memref<200xf32, #tpu.memory_space<smem>>
    %1045 = vector.broadcast %1044 : f32 to vector<20x48xf32>
    %1046 = arith.mulf %1045, %1043 : vector<20x48xf32>
    %1047 = arith.addf %1037, %1046 : vector<20x48xf32>
    %c191 = arith.constant 191 : index
    %1048 = memref.load %arg2[%c191] : memref<200xf32, #tpu.memory_space<smem>>
    %1049 = vector.broadcast %1048 : f32 to vector<20x48xf32>
    %1050 = arith.mulf %1049, %1043 : vector<20x48xf32>
    %1051 = arith.addf %1041, %1050 : vector<20x48xf32>
    %c2_413 = arith.constant 2 : index
    %c3_414 = arith.constant 3 : index
    %c0_415 = arith.constant 0 : index
    %1052 = vector.load %arg8[%c2_413, %c3_414, %c0_415] : memref<5x24x48xf32, #tpu.memory_space<vmem>>, vector<1x20x48xf32>
    %1053 = vector.shape_cast %1052 : vector<1x20x48xf32> to vector<20x48xf32>
    %c167 = arith.constant 167 : index
    %1054 = memref.load %arg2[%c167] : memref<200xf32, #tpu.memory_space<smem>>
    %1055 = vector.broadcast %1054 : f32 to vector<20x48xf32>
    %1056 = arith.mulf %1055, %1053 : vector<20x48xf32>
    %1057 = arith.addf %1047, %1056 : vector<20x48xf32>
    %c192 = arith.constant 192 : index
    %1058 = memref.load %arg2[%c192] : memref<200xf32, #tpu.memory_space<smem>>
    %1059 = vector.broadcast %1058 : f32 to vector<20x48xf32>
    %1060 = arith.mulf %1059, %1053 : vector<20x48xf32>
    %1061 = arith.addf %1051, %1060 : vector<20x48xf32>
    %c3_416 = arith.constant 3 : index
    %c3_417 = arith.constant 3 : index
    %c0_418 = arith.constant 0 : index
    %1062 = vector.load %arg8[%c3_416, %c3_417, %c0_418] : memref<5x24x48xf32, #tpu.memory_space<vmem>>, vector<1x20x48xf32>
    %1063 = vector.shape_cast %1062 : vector<1x20x48xf32> to vector<20x48xf32>
    %c168 = arith.constant 168 : index
    %1064 = memref.load %arg2[%c168] : memref<200xf32, #tpu.memory_space<smem>>
    %1065 = vector.broadcast %1064 : f32 to vector<20x48xf32>
    %1066 = arith.mulf %1065, %1063 : vector<20x48xf32>
    %1067 = arith.addf %1057, %1066 : vector<20x48xf32>
    %c193 = arith.constant 193 : index
    %1068 = memref.load %arg2[%c193] : memref<200xf32, #tpu.memory_space<smem>>
    %1069 = vector.broadcast %1068 : f32 to vector<20x48xf32>
    %1070 = arith.mulf %1069, %1063 : vector<20x48xf32>
    %1071 = arith.addf %1061, %1070 : vector<20x48xf32>
    %c4_419 = arith.constant 4 : index
    %c3_420 = arith.constant 3 : index
    %c0_421 = arith.constant 0 : index
    %1072 = vector.load %arg8[%c4_419, %c3_420, %c0_421] : memref<5x24x48xf32, #tpu.memory_space<vmem>>, vector<1x20x48xf32>
    %1073 = vector.shape_cast %1072 : vector<1x20x48xf32> to vector<20x48xf32>
    %c169 = arith.constant 169 : index
    %1074 = memref.load %arg2[%c169] : memref<200xf32, #tpu.memory_space<smem>>
    %1075 = vector.broadcast %1074 : f32 to vector<20x48xf32>
    %1076 = arith.mulf %1075, %1073 : vector<20x48xf32>
    %1077 = arith.addf %1067, %1076 : vector<20x48xf32>
    %c194 = arith.constant 194 : index
    %1078 = memref.load %arg2[%c194] : memref<200xf32, #tpu.memory_space<smem>>
    %1079 = vector.broadcast %1078 : f32 to vector<20x48xf32>
    %1080 = arith.mulf %1079, %1073 : vector<20x48xf32>
    %1081 = arith.addf %1071, %1080 : vector<20x48xf32>
    %c0_422 = arith.constant 0 : index
    %c4_423 = arith.constant 4 : index
    %c0_424 = arith.constant 0 : index
    %1082 = vector.load %arg8[%c0_422, %c4_423, %c0_424] : memref<5x24x48xf32, #tpu.memory_space<vmem>>, vector<1x20x48xf32>
    %1083 = vector.shape_cast %1082 : vector<1x20x48xf32> to vector<20x48xf32>
    %c170 = arith.constant 170 : index
    %1084 = memref.load %arg2[%c170] : memref<200xf32, #tpu.memory_space<smem>>
    %1085 = vector.broadcast %1084 : f32 to vector<20x48xf32>
    %1086 = arith.mulf %1085, %1083 : vector<20x48xf32>
    %1087 = arith.addf %1077, %1086 : vector<20x48xf32>
    %c195 = arith.constant 195 : index
    %1088 = memref.load %arg2[%c195] : memref<200xf32, #tpu.memory_space<smem>>
    %1089 = vector.broadcast %1088 : f32 to vector<20x48xf32>
    %1090 = arith.mulf %1089, %1083 : vector<20x48xf32>
    %1091 = arith.addf %1081, %1090 : vector<20x48xf32>
    %c1_425 = arith.constant 1 : index
    %c4_426 = arith.constant 4 : index
    %c0_427 = arith.constant 0 : index
    %1092 = vector.load %arg8[%c1_425, %c4_426, %c0_427] : memref<5x24x48xf32, #tpu.memory_space<vmem>>, vector<1x20x48xf32>
    %1093 = vector.shape_cast %1092 : vector<1x20x48xf32> to vector<20x48xf32>
    %c171 = arith.constant 171 : index
    %1094 = memref.load %arg2[%c171] : memref<200xf32, #tpu.memory_space<smem>>
    %1095 = vector.broadcast %1094 : f32 to vector<20x48xf32>
    %1096 = arith.mulf %1095, %1093 : vector<20x48xf32>
    %1097 = arith.addf %1087, %1096 : vector<20x48xf32>
    %c196 = arith.constant 196 : index
    %1098 = memref.load %arg2[%c196] : memref<200xf32, #tpu.memory_space<smem>>
    %1099 = vector.broadcast %1098 : f32 to vector<20x48xf32>
    %1100 = arith.mulf %1099, %1093 : vector<20x48xf32>
    %1101 = arith.addf %1091, %1100 : vector<20x48xf32>
    %c2_428 = arith.constant 2 : index
    %c4_429 = arith.constant 4 : index
    %c0_430 = arith.constant 0 : index
    %1102 = vector.load %arg8[%c2_428, %c4_429, %c0_430] : memref<5x24x48xf32, #tpu.memory_space<vmem>>, vector<1x20x48xf32>
    %1103 = vector.shape_cast %1102 : vector<1x20x48xf32> to vector<20x48xf32>
    %c172 = arith.constant 172 : index
    %1104 = memref.load %arg2[%c172] : memref<200xf32, #tpu.memory_space<smem>>
    %1105 = vector.broadcast %1104 : f32 to vector<20x48xf32>
    %1106 = arith.mulf %1105, %1103 : vector<20x48xf32>
    %1107 = arith.addf %1097, %1106 : vector<20x48xf32>
    %c197 = arith.constant 197 : index
    %1108 = memref.load %arg2[%c197] : memref<200xf32, #tpu.memory_space<smem>>
    %1109 = vector.broadcast %1108 : f32 to vector<20x48xf32>
    %1110 = arith.mulf %1109, %1103 : vector<20x48xf32>
    %1111 = arith.addf %1101, %1110 : vector<20x48xf32>
    %c3_431 = arith.constant 3 : index
    %c4_432 = arith.constant 4 : index
    %c0_433 = arith.constant 0 : index
    %1112 = vector.load %arg8[%c3_431, %c4_432, %c0_433] : memref<5x24x48xf32, #tpu.memory_space<vmem>>, vector<1x20x48xf32>
    %1113 = vector.shape_cast %1112 : vector<1x20x48xf32> to vector<20x48xf32>
    %c173 = arith.constant 173 : index
    %1114 = memref.load %arg2[%c173] : memref<200xf32, #tpu.memory_space<smem>>
    %1115 = vector.broadcast %1114 : f32 to vector<20x48xf32>
    %1116 = arith.mulf %1115, %1113 : vector<20x48xf32>
    %1117 = arith.addf %1107, %1116 : vector<20x48xf32>
    %c198 = arith.constant 198 : index
    %1118 = memref.load %arg2[%c198] : memref<200xf32, #tpu.memory_space<smem>>
    %1119 = vector.broadcast %1118 : f32 to vector<20x48xf32>
    %1120 = arith.mulf %1119, %1113 : vector<20x48xf32>
    %1121 = arith.addf %1111, %1120 : vector<20x48xf32>
    %c4_434 = arith.constant 4 : index
    %c4_435 = arith.constant 4 : index
    %c0_436 = arith.constant 0 : index
    %1122 = vector.load %arg8[%c4_434, %c4_435, %c0_436] : memref<5x24x48xf32, #tpu.memory_space<vmem>>, vector<1x20x48xf32>
    %1123 = vector.shape_cast %1122 : vector<1x20x48xf32> to vector<20x48xf32>
    %c174 = arith.constant 174 : index
    %1124 = memref.load %arg2[%c174] : memref<200xf32, #tpu.memory_space<smem>>
    %1125 = vector.broadcast %1124 : f32 to vector<20x48xf32>
    %1126 = arith.mulf %1125, %1123 : vector<20x48xf32>
    %1127 = arith.addf %1117, %1126 : vector<20x48xf32>
    %c199 = arith.constant 199 : index
    %1128 = memref.load %arg2[%c199] : memref<200xf32, #tpu.memory_space<smem>>
    %1129 = vector.broadcast %1128 : f32 to vector<20x48xf32>
    %1130 = arith.mulf %1129, %1123 : vector<20x48xf32>
    %1131 = arith.addf %1121, %1130 : vector<20x48xf32>
    %1132 = vector.extract_strided_slice %1127 {offsets = [0, 0], sizes = [20, 20], strides = [1, 1]} : vector<20x48xf32> to vector<20x20xf32>
    %cst_437 = arith.constant 0.000000e+00 : f32
    %1133 = vector.broadcast %cst_437 : f32 to vector<20x20xf32>
    %1134 = arith.maximumf %1132, %1133 : vector<20x20xf32>
    %c0_438 = arith.constant 0 : index
    %c4_439 = arith.constant 4 : index
    %c4_440 = arith.constant 4 : index
    %1135 = vector.load %arg9[%c0_438, %c4_439, %c4_440] : memref<2x28x56xf32, #tpu.memory_space<vmem>>, vector<1x20x20xf32>
    %1136 = vector.shape_cast %1135 : vector<1x20x20xf32> to vector<20x20xf32>
    %1137 = vector.shape_cast %1134 : vector<20x20xf32> to vector<1x20x20xf32>
    tpu.vector_store %arg9[%c0_438, %c4_439, %c4_440], %1137 {strides = array<i32>} : memref<2x28x56xf32, #tpu.memory_space<vmem>>, vector<1x20x20xf32>,
    %1138 = vector.extract_strided_slice %1127 {offsets = [0, 24], sizes = [20, 20], strides = [1, 1]} : vector<20x48xf32> to vector<20x20xf32>
    %cst_441 = arith.constant 0.000000e+00 : f32
    %1139 = vector.broadcast %cst_441 : f32 to vector<20x20xf32>
    %1140 = arith.maximumf %1138, %1139 : vector<20x20xf32>
    %c0_442 = arith.constant 0 : index
    %c4_443 = arith.constant 4 : index
    %c32_444 = arith.constant 32 : index
    %1141 = vector.load %arg9[%c0_442, %c4_443, %c32_444] : memref<2x28x56xf32, #tpu.memory_space<vmem>>, vector<1x20x20xf32>
    %1142 = vector.shape_cast %1141 : vector<1x20x20xf32> to vector<20x20xf32>
    %1143 = vector.shape_cast %1140 : vector<20x20xf32> to vector<1x20x20xf32>
    tpu.vector_store %arg9[%c0_442, %c4_443, %c32_444], %1143 {strides = array<i32>} : memref<2x28x56xf32, #tpu.memory_space<vmem>>, vector<1x20x20xf32>,
    %1144 = vector.extract_strided_slice %1131 {offsets = [0, 0], sizes = [20, 20], strides = [1, 1]} : vector<20x48xf32> to vector<20x20xf32>
    %cst_445 = arith.constant 0.000000e+00 : f32
    %1145 = vector.broadcast %cst_445 : f32 to vector<20x20xf32>
    %1146 = arith.maximumf %1144, %1145 : vector<20x20xf32>
    %c1_446 = arith.constant 1 : index
    %c4_447 = arith.constant 4 : index
    %c4_448 = arith.constant 4 : index
    %1147 = vector.load %arg9[%c1_446, %c4_447, %c4_448] : memref<2x28x56xf32, #tpu.memory_space<vmem>>, vector<1x20x20xf32>
    %1148 = vector.shape_cast %1147 : vector<1x20x20xf32> to vector<20x20xf32>
    %1149 = vector.shape_cast %1146 : vector<20x20xf32> to vector<1x20x20xf32>
    tpu.vector_store %arg9[%c1_446, %c4_447, %c4_448], %1149 {strides = array<i32>} : memref<2x28x56xf32, #tpu.memory_space<vmem>>, vector<1x20x20xf32>,
    %1150 = vector.extract_strided_slice %1131 {offsets = [0, 24], sizes = [20, 20], strides = [1, 1]} : vector<20x48xf32> to vector<20x20xf32>
    %cst_449 = arith.constant 0.000000e+00 : f32
    %1151 = vector.broadcast %cst_449 : f32 to vector<20x20xf32>
    %1152 = arith.maximumf %1150, %1151 : vector<20x20xf32>
    %c1_450 = arith.constant 1 : index
    %c4_451 = arith.constant 4 : index
    %c32_452 = arith.constant 32 : index
    %1153 = vector.load %arg9[%c1_450, %c4_451, %c32_452] : memref<2x28x56xf32, #tpu.memory_space<vmem>>, vector<1x20x20xf32>
    %1154 = vector.shape_cast %1153 : vector<1x20x20xf32> to vector<20x20xf32>
    %1155 = vector.shape_cast %1152 : vector<20x20xf32> to vector<1x20x20xf32>
    tpu.vector_store %arg9[%c1_450, %c4_451, %c32_452], %1155 {strides = array<i32>} : memref<2x28x56xf32, #tpu.memory_space<vmem>>, vector<1x20x20xf32>,
    %c0_453 = arith.constant 0 : index
    %1156 = memref.load %arg5[%c0_453] : memref<1xf32, #tpu.memory_space<smem>>
    %1157 = vector.broadcast %1156 : f32 to vector<24x56xf32>
    %c0_454 = arith.constant 0 : index
    %c0_455 = arith.constant 0 : index
    %c0_456 = arith.constant 0 : index
    %1158 = vector.load %arg9[%c0_454, %c0_455, %c0_456] : memref<2x28x56xf32, #tpu.memory_space<vmem>>, vector<1x28x56xf32>
    %1159 = vector.shape_cast %1158 : vector<1x28x56xf32> to vector<28x56xf32>
    %c0_457 = arith.constant 0 : index
    %c0_458 = arith.constant 0 : index
    %c0_459 = arith.constant 0 : index
    %1160 = vector.load %arg10[%c0_457, %c0_458, %c0_459] : memref<5x28x56xf32, #tpu.memory_space<vmem>>, vector<1x28x56xf32>
    %1161 = vector.shape_cast %1160 : vector<1x28x56xf32> to vector<28x56xf32>
    %1162 = vector.shape_cast %1159 : vector<28x56xf32> to vector<1x28x56xf32>
    tpu.vector_store %arg10[%c0_457, %c0_458, %c0_459], %1162 {strides = array<i32>} : memref<5x28x56xf32, #tpu.memory_space<vmem>>, vector<1x28x56xf32>,
    %1163 = vector.extract_strided_slice %1159 {offsets = [0, 1], sizes = [28, 55], strides = [1, 1]} : vector<28x56xf32> to vector<28x55xf32>
    %c1_460 = arith.constant 1 : index
    %c0_461 = arith.constant 0 : index
    %c0_462 = arith.constant 0 : index
    %1164 = vector.load %arg10[%c1_460, %c0_461, %c0_462] : memref<5x28x56xf32, #tpu.memory_space<vmem>>, vector<1x28x55xf32>
    %1165 = vector.shape_cast %1164 : vector<1x28x55xf32> to vector<28x55xf32>
    %1166 = vector.shape_cast %1163 : vector<28x55xf32> to vector<1x28x55xf32>
    tpu.vector_store %arg10[%c1_460, %c0_461, %c0_462], %1166 {strides = array<i32>} : memref<5x28x56xf32, #tpu.memory_space<vmem>>, vector<1x28x55xf32>,
    %1167 = vector.extract_strided_slice %1159 {offsets = [0, 2], sizes = [28, 54], strides = [1, 1]} : vector<28x56xf32> to vector<28x54xf32>
    %c2_463 = arith.constant 2 : index
    %c0_464 = arith.constant 0 : index
    %c0_465 = arith.constant 0 : index
    %1168 = vector.load %arg10[%c2_463, %c0_464, %c0_465] : memref<5x28x56xf32, #tpu.memory_space<vmem>>, vector<1x28x54xf32>
    %1169 = vector.shape_cast %1168 : vector<1x28x54xf32> to vector<28x54xf32>
    %1170 = vector.shape_cast %1167 : vector<28x54xf32> to vector<1x28x54xf32>
    tpu.vector_store %arg10[%c2_463, %c0_464, %c0_465], %1170 {strides = array<i32>} : memref<5x28x56xf32, #tpu.memory_space<vmem>>, vector<1x28x54xf32>,
    %1171 = vector.extract_strided_slice %1159 {offsets = [0, 3], sizes = [28, 53], strides = [1, 1]} : vector<28x56xf32> to vector<28x53xf32>
    %c3_466 = arith.constant 3 : index
    %c0_467 = arith.constant 0 : index
    %c0_468 = arith.constant 0 : index
    %1172 = vector.load %arg10[%c3_466, %c0_467, %c0_468] : memref<5x28x56xf32, #tpu.memory_space<vmem>>, vector<1x28x53xf32>
    %1173 = vector.shape_cast %1172 : vector<1x28x53xf32> to vector<28x53xf32>
    %1174 = vector.shape_cast %1171 : vector<28x53xf32> to vector<1x28x53xf32>
    tpu.vector_store %arg10[%c3_466, %c0_467, %c0_468], %1174 {strides = array<i32>} : memref<5x28x56xf32, #tpu.memory_space<vmem>>, vector<1x28x53xf32>,
    %1175 = vector.extract_strided_slice %1159 {offsets = [0, 4], sizes = [28, 52], strides = [1, 1]} : vector<28x56xf32> to vector<28x52xf32>
    %c4_469 = arith.constant 4 : index
    %c0_470 = arith.constant 0 : index
    %c0_471 = arith.constant 0 : index
    %1176 = vector.load %arg10[%c4_469, %c0_470, %c0_471] : memref<5x28x56xf32, #tpu.memory_space<vmem>>, vector<1x28x52xf32>
    %1177 = vector.shape_cast %1176 : vector<1x28x52xf32> to vector<28x52xf32>
    %1178 = vector.shape_cast %1175 : vector<28x52xf32> to vector<1x28x52xf32>
    tpu.vector_store %arg10[%c4_469, %c0_470, %c0_471], %1178 {strides = array<i32>} : memref<5x28x56xf32, #tpu.memory_space<vmem>>, vector<1x28x52xf32>,
    %c0_472 = arith.constant 0 : index
    %c0_473 = arith.constant 0 : index
    %c0_474 = arith.constant 0 : index
    %1179 = vector.load %arg10[%c0_472, %c0_473, %c0_474] : memref<5x28x56xf32, #tpu.memory_space<vmem>>, vector<1x24x56xf32>
    %1180 = vector.shape_cast %1179 : vector<1x24x56xf32> to vector<24x56xf32>
    %c0_475 = arith.constant 0 : index
    %1181 = memref.load %arg4[%c0_475] : memref<50xf32, #tpu.memory_space<smem>>
    %1182 = vector.broadcast %1181 : f32 to vector<24x56xf32>
    %1183 = arith.mulf %1182, %1180 : vector<24x56xf32>
    %1184 = arith.addf %1157, %1183 : vector<24x56xf32>
    %c1_476 = arith.constant 1 : index
    %c0_477 = arith.constant 0 : index
    %c0_478 = arith.constant 0 : index
    %1185 = vector.load %arg10[%c1_476, %c0_477, %c0_478] : memref<5x28x56xf32, #tpu.memory_space<vmem>>, vector<1x24x56xf32>
    %1186 = vector.shape_cast %1185 : vector<1x24x56xf32> to vector<24x56xf32>
    %c1_479 = arith.constant 1 : index
    %1187 = memref.load %arg4[%c1_479] : memref<50xf32, #tpu.memory_space<smem>>
    %1188 = vector.broadcast %1187 : f32 to vector<24x56xf32>
    %1189 = arith.mulf %1188, %1186 : vector<24x56xf32>
    %1190 = arith.addf %1184, %1189 : vector<24x56xf32>
    %c2_480 = arith.constant 2 : index
    %c0_481 = arith.constant 0 : index
    %c0_482 = arith.constant 0 : index
    %1191 = vector.load %arg10[%c2_480, %c0_481, %c0_482] : memref<5x28x56xf32, #tpu.memory_space<vmem>>, vector<1x24x56xf32>
    %1192 = vector.shape_cast %1191 : vector<1x24x56xf32> to vector<24x56xf32>
    %c2_483 = arith.constant 2 : index
    %1193 = memref.load %arg4[%c2_483] : memref<50xf32, #tpu.memory_space<smem>>
    %1194 = vector.broadcast %1193 : f32 to vector<24x56xf32>
    %1195 = arith.mulf %1194, %1192 : vector<24x56xf32>
    %1196 = arith.addf %1190, %1195 : vector<24x56xf32>
    %c3_484 = arith.constant 3 : index
    %c0_485 = arith.constant 0 : index
    %c0_486 = arith.constant 0 : index
    %1197 = vector.load %arg10[%c3_484, %c0_485, %c0_486] : memref<5x28x56xf32, #tpu.memory_space<vmem>>, vector<1x24x56xf32>
    %1198 = vector.shape_cast %1197 : vector<1x24x56xf32> to vector<24x56xf32>
    %c3_487 = arith.constant 3 : index
    %1199 = memref.load %arg4[%c3_487] : memref<50xf32, #tpu.memory_space<smem>>
    %1200 = vector.broadcast %1199 : f32 to vector<24x56xf32>
    %1201 = arith.mulf %1200, %1198 : vector<24x56xf32>
    %1202 = arith.addf %1196, %1201 : vector<24x56xf32>
    %c4_488 = arith.constant 4 : index
    %c0_489 = arith.constant 0 : index
    %c0_490 = arith.constant 0 : index
    %1203 = vector.load %arg10[%c4_488, %c0_489, %c0_490] : memref<5x28x56xf32, #tpu.memory_space<vmem>>, vector<1x24x56xf32>
    %1204 = vector.shape_cast %1203 : vector<1x24x56xf32> to vector<24x56xf32>
    %c4_491 = arith.constant 4 : index
    %1205 = memref.load %arg4[%c4_491] : memref<50xf32, #tpu.memory_space<smem>>
    %1206 = vector.broadcast %1205 : f32 to vector<24x56xf32>
    %1207 = arith.mulf %1206, %1204 : vector<24x56xf32>
    %1208 = arith.addf %1202, %1207 : vector<24x56xf32>
    %c0_492 = arith.constant 0 : index
    %c1_493 = arith.constant 1 : index
    %c0_494 = arith.constant 0 : index
    %1209 = vector.load %arg10[%c0_492, %c1_493, %c0_494] : memref<5x28x56xf32, #tpu.memory_space<vmem>>, vector<1x24x56xf32>
    %1210 = vector.shape_cast %1209 : vector<1x24x56xf32> to vector<24x56xf32>
    %c5_495 = arith.constant 5 : index
    %1211 = memref.load %arg4[%c5_495] : memref<50xf32, #tpu.memory_space<smem>>
    %1212 = vector.broadcast %1211 : f32 to vector<24x56xf32>
    %1213 = arith.mulf %1212, %1210 : vector<24x56xf32>
    %1214 = arith.addf %1208, %1213 : vector<24x56xf32>
    %c1_496 = arith.constant 1 : index
    %c1_497 = arith.constant 1 : index
    %c0_498 = arith.constant 0 : index
    %1215 = vector.load %arg10[%c1_496, %c1_497, %c0_498] : memref<5x28x56xf32, #tpu.memory_space<vmem>>, vector<1x24x56xf32>
    %1216 = vector.shape_cast %1215 : vector<1x24x56xf32> to vector<24x56xf32>
    %c6_499 = arith.constant 6 : index
    %1217 = memref.load %arg4[%c6_499] : memref<50xf32, #tpu.memory_space<smem>>
    %1218 = vector.broadcast %1217 : f32 to vector<24x56xf32>
    %1219 = arith.mulf %1218, %1216 : vector<24x56xf32>
    %1220 = arith.addf %1214, %1219 : vector<24x56xf32>
    %c2_500 = arith.constant 2 : index
    %c1_501 = arith.constant 1 : index
    %c0_502 = arith.constant 0 : index
    %1221 = vector.load %arg10[%c2_500, %c1_501, %c0_502] : memref<5x28x56xf32, #tpu.memory_space<vmem>>, vector<1x24x56xf32>
    %1222 = vector.shape_cast %1221 : vector<1x24x56xf32> to vector<24x56xf32>
    %c7_503 = arith.constant 7 : index
    %1223 = memref.load %arg4[%c7_503] : memref<50xf32, #tpu.memory_space<smem>>
    %1224 = vector.broadcast %1223 : f32 to vector<24x56xf32>
    %1225 = arith.mulf %1224, %1222 : vector<24x56xf32>
    %1226 = arith.addf %1220, %1225 : vector<24x56xf32>
    %c3_504 = arith.constant 3 : index
    %c1_505 = arith.constant 1 : index
    %c0_506 = arith.constant 0 : index
    %1227 = vector.load %arg10[%c3_504, %c1_505, %c0_506] : memref<5x28x56xf32, #tpu.memory_space<vmem>>, vector<1x24x56xf32>
    %1228 = vector.shape_cast %1227 : vector<1x24x56xf32> to vector<24x56xf32>
    %c8_507 = arith.constant 8 : index
    %1229 = memref.load %arg4[%c8_507] : memref<50xf32, #tpu.memory_space<smem>>
    %1230 = vector.broadcast %1229 : f32 to vector<24x56xf32>
    %1231 = arith.mulf %1230, %1228 : vector<24x56xf32>
    %1232 = arith.addf %1226, %1231 : vector<24x56xf32>
    %c4_508 = arith.constant 4 : index
    %c1_509 = arith.constant 1 : index
    %c0_510 = arith.constant 0 : index
    %1233 = vector.load %arg10[%c4_508, %c1_509, %c0_510] : memref<5x28x56xf32, #tpu.memory_space<vmem>>, vector<1x24x56xf32>
    %1234 = vector.shape_cast %1233 : vector<1x24x56xf32> to vector<24x56xf32>
    %c9_511 = arith.constant 9 : index
    %1235 = memref.load %arg4[%c9_511] : memref<50xf32, #tpu.memory_space<smem>>
    %1236 = vector.broadcast %1235 : f32 to vector<24x56xf32>
    %1237 = arith.mulf %1236, %1234 : vector<24x56xf32>
    %1238 = arith.addf %1232, %1237 : vector<24x56xf32>
    %c0_512 = arith.constant 0 : index
    %c2_513 = arith.constant 2 : index
    %c0_514 = arith.constant 0 : index
    %1239 = vector.load %arg10[%c0_512, %c2_513, %c0_514] : memref<5x28x56xf32, #tpu.memory_space<vmem>>, vector<1x24x56xf32>
    %1240 = vector.shape_cast %1239 : vector<1x24x56xf32> to vector<24x56xf32>
    %c10_515 = arith.constant 10 : index
    %1241 = memref.load %arg4[%c10_515] : memref<50xf32, #tpu.memory_space<smem>>
    %1242 = vector.broadcast %1241 : f32 to vector<24x56xf32>
    %1243 = arith.mulf %1242, %1240 : vector<24x56xf32>
    %1244 = arith.addf %1238, %1243 : vector<24x56xf32>
    %c1_516 = arith.constant 1 : index
    %c2_517 = arith.constant 2 : index
    %c0_518 = arith.constant 0 : index
    %1245 = vector.load %arg10[%c1_516, %c2_517, %c0_518] : memref<5x28x56xf32, #tpu.memory_space<vmem>>, vector<1x24x56xf32>
    %1246 = vector.shape_cast %1245 : vector<1x24x56xf32> to vector<24x56xf32>
    %c11_519 = arith.constant 11 : index
    %1247 = memref.load %arg4[%c11_519] : memref<50xf32, #tpu.memory_space<smem>>
    %1248 = vector.broadcast %1247 : f32 to vector<24x56xf32>
    %1249 = arith.mulf %1248, %1246 : vector<24x56xf32>
    %1250 = arith.addf %1244, %1249 : vector<24x56xf32>
    %c2_520 = arith.constant 2 : index
    %c2_521 = arith.constant 2 : index
    %c0_522 = arith.constant 0 : index
    %1251 = vector.load %arg10[%c2_520, %c2_521, %c0_522] : memref<5x28x56xf32, #tpu.memory_space<vmem>>, vector<1x24x56xf32>
    %1252 = vector.shape_cast %1251 : vector<1x24x56xf32> to vector<24x56xf32>
    %c12_523 = arith.constant 12 : index
    %1253 = memref.load %arg4[%c12_523] : memref<50xf32, #tpu.memory_space<smem>>
    %1254 = vector.broadcast %1253 : f32 to vector<24x56xf32>
    %1255 = arith.mulf %1254, %1252 : vector<24x56xf32>
    %1256 = arith.addf %1250, %1255 : vector<24x56xf32>
    %c3_524 = arith.constant 3 : index
    %c2_525 = arith.constant 2 : index
    %c0_526 = arith.constant 0 : index
    %1257 = vector.load %arg10[%c3_524, %c2_525, %c0_526] : memref<5x28x56xf32, #tpu.memory_space<vmem>>, vector<1x24x56xf32>
    %1258 = vector.shape_cast %1257 : vector<1x24x56xf32> to vector<24x56xf32>
    %c13_527 = arith.constant 13 : index
    %1259 = memref.load %arg4[%c13_527] : memref<50xf32, #tpu.memory_space<smem>>
    %1260 = vector.broadcast %1259 : f32 to vector<24x56xf32>
    %1261 = arith.mulf %1260, %1258 : vector<24x56xf32>
    %1262 = arith.addf %1256, %1261 : vector<24x56xf32>
    %c4_528 = arith.constant 4 : index
    %c2_529 = arith.constant 2 : index
    %c0_530 = arith.constant 0 : index
    %1263 = vector.load %arg10[%c4_528, %c2_529, %c0_530] : memref<5x28x56xf32, #tpu.memory_space<vmem>>, vector<1x24x56xf32>
    %1264 = vector.shape_cast %1263 : vector<1x24x56xf32> to vector<24x56xf32>
    %c14_531 = arith.constant 14 : index
    %1265 = memref.load %arg4[%c14_531] : memref<50xf32, #tpu.memory_space<smem>>
    %1266 = vector.broadcast %1265 : f32 to vector<24x56xf32>
    %1267 = arith.mulf %1266, %1264 : vector<24x56xf32>
    %1268 = arith.addf %1262, %1267 : vector<24x56xf32>
    %c0_532 = arith.constant 0 : index
    %c3_533 = arith.constant 3 : index
    %c0_534 = arith.constant 0 : index
    %1269 = vector.load %arg10[%c0_532, %c3_533, %c0_534] : memref<5x28x56xf32, #tpu.memory_space<vmem>>, vector<1x24x56xf32>
    %1270 = vector.shape_cast %1269 : vector<1x24x56xf32> to vector<24x56xf32>
    %c15_535 = arith.constant 15 : index
    %1271 = memref.load %arg4[%c15_535] : memref<50xf32, #tpu.memory_space<smem>>
    %1272 = vector.broadcast %1271 : f32 to vector<24x56xf32>
    %1273 = arith.mulf %1272, %1270 : vector<24x56xf32>
    %1274 = arith.addf %1268, %1273 : vector<24x56xf32>
    %c1_536 = arith.constant 1 : index
    %c3_537 = arith.constant 3 : index
    %c0_538 = arith.constant 0 : index
    %1275 = vector.load %arg10[%c1_536, %c3_537, %c0_538] : memref<5x28x56xf32, #tpu.memory_space<vmem>>, vector<1x24x56xf32>
    %1276 = vector.shape_cast %1275 : vector<1x24x56xf32> to vector<24x56xf32>
    %c16_539 = arith.constant 16 : index
    %1277 = memref.load %arg4[%c16_539] : memref<50xf32, #tpu.memory_space<smem>>
    %1278 = vector.broadcast %1277 : f32 to vector<24x56xf32>
    %1279 = arith.mulf %1278, %1276 : vector<24x56xf32>
    %1280 = arith.addf %1274, %1279 : vector<24x56xf32>
    %c2_540 = arith.constant 2 : index
    %c3_541 = arith.constant 3 : index
    %c0_542 = arith.constant 0 : index
    %1281 = vector.load %arg10[%c2_540, %c3_541, %c0_542] : memref<5x28x56xf32, #tpu.memory_space<vmem>>, vector<1x24x56xf32>
    %1282 = vector.shape_cast %1281 : vector<1x24x56xf32> to vector<24x56xf32>
    %c17_543 = arith.constant 17 : index
    %1283 = memref.load %arg4[%c17_543] : memref<50xf32, #tpu.memory_space<smem>>
    %1284 = vector.broadcast %1283 : f32 to vector<24x56xf32>
    %1285 = arith.mulf %1284, %1282 : vector<24x56xf32>
    %1286 = arith.addf %1280, %1285 : vector<24x56xf32>
    %c3_544 = arith.constant 3 : index
    %c3_545 = arith.constant 3 : index
    %c0_546 = arith.constant 0 : index
    %1287 = vector.load %arg10[%c3_544, %c3_545, %c0_546] : memref<5x28x56xf32, #tpu.memory_space<vmem>>, vector<1x24x56xf32>
    %1288 = vector.shape_cast %1287 : vector<1x24x56xf32> to vector<24x56xf32>
    %c18_547 = arith.constant 18 : index
    %1289 = memref.load %arg4[%c18_547] : memref<50xf32, #tpu.memory_space<smem>>
    %1290 = vector.broadcast %1289 : f32 to vector<24x56xf32>
    %1291 = arith.mulf %1290, %1288 : vector<24x56xf32>
    %1292 = arith.addf %1286, %1291 : vector<24x56xf32>
    %c4_548 = arith.constant 4 : index
    %c3_549 = arith.constant 3 : index
    %c0_550 = arith.constant 0 : index
    %1293 = vector.load %arg10[%c4_548, %c3_549, %c0_550] : memref<5x28x56xf32, #tpu.memory_space<vmem>>, vector<1x24x56xf32>
    %1294 = vector.shape_cast %1293 : vector<1x24x56xf32> to vector<24x56xf32>
    %c19_551 = arith.constant 19 : index
    %1295 = memref.load %arg4[%c19_551] : memref<50xf32, #tpu.memory_space<smem>>
    %1296 = vector.broadcast %1295 : f32 to vector<24x56xf32>
    %1297 = arith.mulf %1296, %1294 : vector<24x56xf32>
    %1298 = arith.addf %1292, %1297 : vector<24x56xf32>
    %c0_552 = arith.constant 0 : index
    %c4_553 = arith.constant 4 : index
    %c0_554 = arith.constant 0 : index
    %1299 = vector.load %arg10[%c0_552, %c4_553, %c0_554] : memref<5x28x56xf32, #tpu.memory_space<vmem>>, vector<1x24x56xf32>
    %1300 = vector.shape_cast %1299 : vector<1x24x56xf32> to vector<24x56xf32>
    %c20_555 = arith.constant 20 : index
    %1301 = memref.load %arg4[%c20_555] : memref<50xf32, #tpu.memory_space<smem>>
    %1302 = vector.broadcast %1301 : f32 to vector<24x56xf32>
    %1303 = arith.mulf %1302, %1300 : vector<24x56xf32>
    %1304 = arith.addf %1298, %1303 : vector<24x56xf32>
    %c1_556 = arith.constant 1 : index
    %c4_557 = arith.constant 4 : index
    %c0_558 = arith.constant 0 : index
    %1305 = vector.load %arg10[%c1_556, %c4_557, %c0_558] : memref<5x28x56xf32, #tpu.memory_space<vmem>>, vector<1x24x56xf32>
    %1306 = vector.shape_cast %1305 : vector<1x24x56xf32> to vector<24x56xf32>
    %c21_559 = arith.constant 21 : index
    %1307 = memref.load %arg4[%c21_559] : memref<50xf32, #tpu.memory_space<smem>>
    %1308 = vector.broadcast %1307 : f32 to vector<24x56xf32>
    %1309 = arith.mulf %1308, %1306 : vector<24x56xf32>
    %1310 = arith.addf %1304, %1309 : vector<24x56xf32>
    %c2_560 = arith.constant 2 : index
    %c4_561 = arith.constant 4 : index
    %c0_562 = arith.constant 0 : index
    %1311 = vector.load %arg10[%c2_560, %c4_561, %c0_562] : memref<5x28x56xf32, #tpu.memory_space<vmem>>, vector<1x24x56xf32>
    %1312 = vector.shape_cast %1311 : vector<1x24x56xf32> to vector<24x56xf32>
    %c22_563 = arith.constant 22 : index
    %1313 = memref.load %arg4[%c22_563] : memref<50xf32, #tpu.memory_space<smem>>
    %1314 = vector.broadcast %1313 : f32 to vector<24x56xf32>
    %1315 = arith.mulf %1314, %1312 : vector<24x56xf32>
    %1316 = arith.addf %1310, %1315 : vector<24x56xf32>
    %c3_564 = arith.constant 3 : index
    %c4_565 = arith.constant 4 : index
    %c0_566 = arith.constant 0 : index
    %1317 = vector.load %arg10[%c3_564, %c4_565, %c0_566] : memref<5x28x56xf32, #tpu.memory_space<vmem>>, vector<1x24x56xf32>
    %1318 = vector.shape_cast %1317 : vector<1x24x56xf32> to vector<24x56xf32>
    %c23_567 = arith.constant 23 : index
    %1319 = memref.load %arg4[%c23_567] : memref<50xf32, #tpu.memory_space<smem>>
    %1320 = vector.broadcast %1319 : f32 to vector<24x56xf32>
    %1321 = arith.mulf %1320, %1318 : vector<24x56xf32>
    %1322 = arith.addf %1316, %1321 : vector<24x56xf32>
    %c4_568 = arith.constant 4 : index
    %c4_569 = arith.constant 4 : index
    %c0_570 = arith.constant 0 : index
    %1323 = vector.load %arg10[%c4_568, %c4_569, %c0_570] : memref<5x28x56xf32, #tpu.memory_space<vmem>>, vector<1x24x56xf32>
    %1324 = vector.shape_cast %1323 : vector<1x24x56xf32> to vector<24x56xf32>
    %c24_571 = arith.constant 24 : index
    %1325 = memref.load %arg4[%c24_571] : memref<50xf32, #tpu.memory_space<smem>>
    %1326 = vector.broadcast %1325 : f32 to vector<24x56xf32>
    %1327 = arith.mulf %1326, %1324 : vector<24x56xf32>
    %1328 = arith.addf %1322, %1327 : vector<24x56xf32>
    %c1_572 = arith.constant 1 : index
    %c0_573 = arith.constant 0 : index
    %c0_574 = arith.constant 0 : index
    %1329 = vector.load %arg9[%c1_572, %c0_573, %c0_574] : memref<2x28x56xf32, #tpu.memory_space<vmem>>, vector<1x28x56xf32>
    %1330 = vector.shape_cast %1329 : vector<1x28x56xf32> to vector<28x56xf32>
    %c0_575 = arith.constant 0 : index
    %c0_576 = arith.constant 0 : index
    %c0_577 = arith.constant 0 : index
    %1331 = vector.load %arg10[%c0_575, %c0_576, %c0_577] : memref<5x28x56xf32, #tpu.memory_space<vmem>>, vector<1x28x56xf32>
    %1332 = vector.shape_cast %1331 : vector<1x28x56xf32> to vector<28x56xf32>
    %1333 = vector.shape_cast %1330 : vector<28x56xf32> to vector<1x28x56xf32>
    tpu.vector_store %arg10[%c0_575, %c0_576, %c0_577], %1333 {strides = array<i32>} : memref<5x28x56xf32, #tpu.memory_space<vmem>>, vector<1x28x56xf32>,
    %1334 = vector.extract_strided_slice %1330 {offsets = [0, 1], sizes = [28, 55], strides = [1, 1]} : vector<28x56xf32> to vector<28x55xf32>
    %c1_578 = arith.constant 1 : index
    %c0_579 = arith.constant 0 : index
    %c0_580 = arith.constant 0 : index
    %1335 = vector.load %arg10[%c1_578, %c0_579, %c0_580] : memref<5x28x56xf32, #tpu.memory_space<vmem>>, vector<1x28x55xf32>
    %1336 = vector.shape_cast %1335 : vector<1x28x55xf32> to vector<28x55xf32>
    %1337 = vector.shape_cast %1334 : vector<28x55xf32> to vector<1x28x55xf32>
    tpu.vector_store %arg10[%c1_578, %c0_579, %c0_580], %1337 {strides = array<i32>} : memref<5x28x56xf32, #tpu.memory_space<vmem>>, vector<1x28x55xf32>,
    %1338 = vector.extract_strided_slice %1330 {offsets = [0, 2], sizes = [28, 54], strides = [1, 1]} : vector<28x56xf32> to vector<28x54xf32>
    %c2_581 = arith.constant 2 : index
    %c0_582 = arith.constant 0 : index
    %c0_583 = arith.constant 0 : index
    %1339 = vector.load %arg10[%c2_581, %c0_582, %c0_583] : memref<5x28x56xf32, #tpu.memory_space<vmem>>, vector<1x28x54xf32>
    %1340 = vector.shape_cast %1339 : vector<1x28x54xf32> to vector<28x54xf32>
    %1341 = vector.shape_cast %1338 : vector<28x54xf32> to vector<1x28x54xf32>
    tpu.vector_store %arg10[%c2_581, %c0_582, %c0_583], %1341 {strides = array<i32>} : memref<5x28x56xf32, #tpu.memory_space<vmem>>, vector<1x28x54xf32>,
    %1342 = vector.extract_strided_slice %1330 {offsets = [0, 3], sizes = [28, 53], strides = [1, 1]} : vector<28x56xf32> to vector<28x53xf32>
    %c3_584 = arith.constant 3 : index
    %c0_585 = arith.constant 0 : index
    %c0_586 = arith.constant 0 : index
    %1343 = vector.load %arg10[%c3_584, %c0_585, %c0_586] : memref<5x28x56xf32, #tpu.memory_space<vmem>>, vector<1x28x53xf32>
    %1344 = vector.shape_cast %1343 : vector<1x28x53xf32> to vector<28x53xf32>
    %1345 = vector.shape_cast %1342 : vector<28x53xf32> to vector<1x28x53xf32>
    tpu.vector_store %arg10[%c3_584, %c0_585, %c0_586], %1345 {strides = array<i32>} : memref<5x28x56xf32, #tpu.memory_space<vmem>>, vector<1x28x53xf32>,
    %1346 = vector.extract_strided_slice %1330 {offsets = [0, 4], sizes = [28, 52], strides = [1, 1]} : vector<28x56xf32> to vector<28x52xf32>
    %c4_587 = arith.constant 4 : index
    %c0_588 = arith.constant 0 : index
    %c0_589 = arith.constant 0 : index
    %1347 = vector.load %arg10[%c4_587, %c0_588, %c0_589] : memref<5x28x56xf32, #tpu.memory_space<vmem>>, vector<1x28x52xf32>
    %1348 = vector.shape_cast %1347 : vector<1x28x52xf32> to vector<28x52xf32>
    %1349 = vector.shape_cast %1346 : vector<28x52xf32> to vector<1x28x52xf32>
    tpu.vector_store %arg10[%c4_587, %c0_588, %c0_589], %1349 {strides = array<i32>} : memref<5x28x56xf32, #tpu.memory_space<vmem>>, vector<1x28x52xf32>,
    %c0_590 = arith.constant 0 : index
    %c0_591 = arith.constant 0 : index
    %c0_592 = arith.constant 0 : index
    %1350 = vector.load %arg10[%c0_590, %c0_591, %c0_592] : memref<5x28x56xf32, #tpu.memory_space<vmem>>, vector<1x24x56xf32>
    %1351 = vector.shape_cast %1350 : vector<1x24x56xf32> to vector<24x56xf32>
    %c25_593 = arith.constant 25 : index
    %1352 = memref.load %arg4[%c25_593] : memref<50xf32, #tpu.memory_space<smem>>
    %1353 = vector.broadcast %1352 : f32 to vector<24x56xf32>
    %1354 = arith.mulf %1353, %1351 : vector<24x56xf32>
    %1355 = arith.addf %1328, %1354 : vector<24x56xf32>
    %c1_594 = arith.constant 1 : index
    %c0_595 = arith.constant 0 : index
    %c0_596 = arith.constant 0 : index
    %1356 = vector.load %arg10[%c1_594, %c0_595, %c0_596] : memref<5x28x56xf32, #tpu.memory_space<vmem>>, vector<1x24x56xf32>
    %1357 = vector.shape_cast %1356 : vector<1x24x56xf32> to vector<24x56xf32>
    %c26_597 = arith.constant 26 : index
    %1358 = memref.load %arg4[%c26_597] : memref<50xf32, #tpu.memory_space<smem>>
    %1359 = vector.broadcast %1358 : f32 to vector<24x56xf32>
    %1360 = arith.mulf %1359, %1357 : vector<24x56xf32>
    %1361 = arith.addf %1355, %1360 : vector<24x56xf32>
    %c2_598 = arith.constant 2 : index
    %c0_599 = arith.constant 0 : index
    %c0_600 = arith.constant 0 : index
    %1362 = vector.load %arg10[%c2_598, %c0_599, %c0_600] : memref<5x28x56xf32, #tpu.memory_space<vmem>>, vector<1x24x56xf32>
    %1363 = vector.shape_cast %1362 : vector<1x24x56xf32> to vector<24x56xf32>
    %c27_601 = arith.constant 27 : index
    %1364 = memref.load %arg4[%c27_601] : memref<50xf32, #tpu.memory_space<smem>>
    %1365 = vector.broadcast %1364 : f32 to vector<24x56xf32>
    %1366 = arith.mulf %1365, %1363 : vector<24x56xf32>
    %1367 = arith.addf %1361, %1366 : vector<24x56xf32>
    %c3_602 = arith.constant 3 : index
    %c0_603 = arith.constant 0 : index
    %c0_604 = arith.constant 0 : index
    %1368 = vector.load %arg10[%c3_602, %c0_603, %c0_604] : memref<5x28x56xf32, #tpu.memory_space<vmem>>, vector<1x24x56xf32>
    %1369 = vector.shape_cast %1368 : vector<1x24x56xf32> to vector<24x56xf32>
    %c28_605 = arith.constant 28 : index
    %1370 = memref.load %arg4[%c28_605] : memref<50xf32, #tpu.memory_space<smem>>
    %1371 = vector.broadcast %1370 : f32 to vector<24x56xf32>
    %1372 = arith.mulf %1371, %1369 : vector<24x56xf32>
    %1373 = arith.addf %1367, %1372 : vector<24x56xf32>
    %c4_606 = arith.constant 4 : index
    %c0_607 = arith.constant 0 : index
    %c0_608 = arith.constant 0 : index
    %1374 = vector.load %arg10[%c4_606, %c0_607, %c0_608] : memref<5x28x56xf32, #tpu.memory_space<vmem>>, vector<1x24x56xf32>
    %1375 = vector.shape_cast %1374 : vector<1x24x56xf32> to vector<24x56xf32>
    %c29_609 = arith.constant 29 : index
    %1376 = memref.load %arg4[%c29_609] : memref<50xf32, #tpu.memory_space<smem>>
    %1377 = vector.broadcast %1376 : f32 to vector<24x56xf32>
    %1378 = arith.mulf %1377, %1375 : vector<24x56xf32>
    %1379 = arith.addf %1373, %1378 : vector<24x56xf32>
    %c0_610 = arith.constant 0 : index
    %c1_611 = arith.constant 1 : index
    %c0_612 = arith.constant 0 : index
    %1380 = vector.load %arg10[%c0_610, %c1_611, %c0_612] : memref<5x28x56xf32, #tpu.memory_space<vmem>>, vector<1x24x56xf32>
    %1381 = vector.shape_cast %1380 : vector<1x24x56xf32> to vector<24x56xf32>
    %c30_613 = arith.constant 30 : index
    %1382 = memref.load %arg4[%c30_613] : memref<50xf32, #tpu.memory_space<smem>>
    %1383 = vector.broadcast %1382 : f32 to vector<24x56xf32>
    %1384 = arith.mulf %1383, %1381 : vector<24x56xf32>
    %1385 = arith.addf %1379, %1384 : vector<24x56xf32>
    %c1_614 = arith.constant 1 : index
    %c1_615 = arith.constant 1 : index
    %c0_616 = arith.constant 0 : index
    %1386 = vector.load %arg10[%c1_614, %c1_615, %c0_616] : memref<5x28x56xf32, #tpu.memory_space<vmem>>, vector<1x24x56xf32>
    %1387 = vector.shape_cast %1386 : vector<1x24x56xf32> to vector<24x56xf32>
    %c31_617 = arith.constant 31 : index
    %1388 = memref.load %arg4[%c31_617] : memref<50xf32, #tpu.memory_space<smem>>
    %1389 = vector.broadcast %1388 : f32 to vector<24x56xf32>
    %1390 = arith.mulf %1389, %1387 : vector<24x56xf32>
    %1391 = arith.addf %1385, %1390 : vector<24x56xf32>
    %c2_618 = arith.constant 2 : index
    %c1_619 = arith.constant 1 : index
    %c0_620 = arith.constant 0 : index
    %1392 = vector.load %arg10[%c2_618, %c1_619, %c0_620] : memref<5x28x56xf32, #tpu.memory_space<vmem>>, vector<1x24x56xf32>
    %1393 = vector.shape_cast %1392 : vector<1x24x56xf32> to vector<24x56xf32>
    %c32_621 = arith.constant 32 : index
    %1394 = memref.load %arg4[%c32_621] : memref<50xf32, #tpu.memory_space<smem>>
    %1395 = vector.broadcast %1394 : f32 to vector<24x56xf32>
    %1396 = arith.mulf %1395, %1393 : vector<24x56xf32>
    %1397 = arith.addf %1391, %1396 : vector<24x56xf32>
    %c3_622 = arith.constant 3 : index
    %c1_623 = arith.constant 1 : index
    %c0_624 = arith.constant 0 : index
    %1398 = vector.load %arg10[%c3_622, %c1_623, %c0_624] : memref<5x28x56xf32, #tpu.memory_space<vmem>>, vector<1x24x56xf32>
    %1399 = vector.shape_cast %1398 : vector<1x24x56xf32> to vector<24x56xf32>
    %c33_625 = arith.constant 33 : index
    %1400 = memref.load %arg4[%c33_625] : memref<50xf32, #tpu.memory_space<smem>>
    %1401 = vector.broadcast %1400 : f32 to vector<24x56xf32>
    %1402 = arith.mulf %1401, %1399 : vector<24x56xf32>
    %1403 = arith.addf %1397, %1402 : vector<24x56xf32>
    %c4_626 = arith.constant 4 : index
    %c1_627 = arith.constant 1 : index
    %c0_628 = arith.constant 0 : index
    %1404 = vector.load %arg10[%c4_626, %c1_627, %c0_628] : memref<5x28x56xf32, #tpu.memory_space<vmem>>, vector<1x24x56xf32>
    %1405 = vector.shape_cast %1404 : vector<1x24x56xf32> to vector<24x56xf32>
    %c34_629 = arith.constant 34 : index
    %1406 = memref.load %arg4[%c34_629] : memref<50xf32, #tpu.memory_space<smem>>
    %1407 = vector.broadcast %1406 : f32 to vector<24x56xf32>
    %1408 = arith.mulf %1407, %1405 : vector<24x56xf32>
    %1409 = arith.addf %1403, %1408 : vector<24x56xf32>
    %c0_630 = arith.constant 0 : index
    %c2_631 = arith.constant 2 : index
    %c0_632 = arith.constant 0 : index
    %1410 = vector.load %arg10[%c0_630, %c2_631, %c0_632] : memref<5x28x56xf32, #tpu.memory_space<vmem>>, vector<1x24x56xf32>
    %1411 = vector.shape_cast %1410 : vector<1x24x56xf32> to vector<24x56xf32>
    %c35_633 = arith.constant 35 : index
    %1412 = memref.load %arg4[%c35_633] : memref<50xf32, #tpu.memory_space<smem>>
    %1413 = vector.broadcast %1412 : f32 to vector<24x56xf32>
    %1414 = arith.mulf %1413, %1411 : vector<24x56xf32>
    %1415 = arith.addf %1409, %1414 : vector<24x56xf32>
    %c1_634 = arith.constant 1 : index
    %c2_635 = arith.constant 2 : index
    %c0_636 = arith.constant 0 : index
    %1416 = vector.load %arg10[%c1_634, %c2_635, %c0_636] : memref<5x28x56xf32, #tpu.memory_space<vmem>>, vector<1x24x56xf32>
    %1417 = vector.shape_cast %1416 : vector<1x24x56xf32> to vector<24x56xf32>
    %c36_637 = arith.constant 36 : index
    %1418 = memref.load %arg4[%c36_637] : memref<50xf32, #tpu.memory_space<smem>>
    %1419 = vector.broadcast %1418 : f32 to vector<24x56xf32>
    %1420 = arith.mulf %1419, %1417 : vector<24x56xf32>
    %1421 = arith.addf %1415, %1420 : vector<24x56xf32>
    %c2_638 = arith.constant 2 : index
    %c2_639 = arith.constant 2 : index
    %c0_640 = arith.constant 0 : index
    %1422 = vector.load %arg10[%c2_638, %c2_639, %c0_640] : memref<5x28x56xf32, #tpu.memory_space<vmem>>, vector<1x24x56xf32>
    %1423 = vector.shape_cast %1422 : vector<1x24x56xf32> to vector<24x56xf32>
    %c37_641 = arith.constant 37 : index
    %1424 = memref.load %arg4[%c37_641] : memref<50xf32, #tpu.memory_space<smem>>
    %1425 = vector.broadcast %1424 : f32 to vector<24x56xf32>
    %1426 = arith.mulf %1425, %1423 : vector<24x56xf32>
    %1427 = arith.addf %1421, %1426 : vector<24x56xf32>
    %c3_642 = arith.constant 3 : index
    %c2_643 = arith.constant 2 : index
    %c0_644 = arith.constant 0 : index
    %1428 = vector.load %arg10[%c3_642, %c2_643, %c0_644] : memref<5x28x56xf32, #tpu.memory_space<vmem>>, vector<1x24x56xf32>
    %1429 = vector.shape_cast %1428 : vector<1x24x56xf32> to vector<24x56xf32>
    %c38_645 = arith.constant 38 : index
    %1430 = memref.load %arg4[%c38_645] : memref<50xf32, #tpu.memory_space<smem>>
    %1431 = vector.broadcast %1430 : f32 to vector<24x56xf32>
    %1432 = arith.mulf %1431, %1429 : vector<24x56xf32>
    %1433 = arith.addf %1427, %1432 : vector<24x56xf32>
    %c4_646 = arith.constant 4 : index
    %c2_647 = arith.constant 2 : index
    %c0_648 = arith.constant 0 : index
    %1434 = vector.load %arg10[%c4_646, %c2_647, %c0_648] : memref<5x28x56xf32, #tpu.memory_space<vmem>>, vector<1x24x56xf32>
    %1435 = vector.shape_cast %1434 : vector<1x24x56xf32> to vector<24x56xf32>
    %c39_649 = arith.constant 39 : index
    %1436 = memref.load %arg4[%c39_649] : memref<50xf32, #tpu.memory_space<smem>>
    %1437 = vector.broadcast %1436 : f32 to vector<24x56xf32>
    %1438 = arith.mulf %1437, %1435 : vector<24x56xf32>
    %1439 = arith.addf %1433, %1438 : vector<24x56xf32>
    %c0_650 = arith.constant 0 : index
    %c3_651 = arith.constant 3 : index
    %c0_652 = arith.constant 0 : index
    %1440 = vector.load %arg10[%c0_650, %c3_651, %c0_652] : memref<5x28x56xf32, #tpu.memory_space<vmem>>, vector<1x24x56xf32>
    %1441 = vector.shape_cast %1440 : vector<1x24x56xf32> to vector<24x56xf32>
    %c40_653 = arith.constant 40 : index
    %1442 = memref.load %arg4[%c40_653] : memref<50xf32, #tpu.memory_space<smem>>
    %1443 = vector.broadcast %1442 : f32 to vector<24x56xf32>
    %1444 = arith.mulf %1443, %1441 : vector<24x56xf32>
    %1445 = arith.addf %1439, %1444 : vector<24x56xf32>
    %c1_654 = arith.constant 1 : index
    %c3_655 = arith.constant 3 : index
    %c0_656 = arith.constant 0 : index
    %1446 = vector.load %arg10[%c1_654, %c3_655, %c0_656] : memref<5x28x56xf32, #tpu.memory_space<vmem>>, vector<1x24x56xf32>
    %1447 = vector.shape_cast %1446 : vector<1x24x56xf32> to vector<24x56xf32>
    %c41_657 = arith.constant 41 : index
    %1448 = memref.load %arg4[%c41_657] : memref<50xf32, #tpu.memory_space<smem>>
    %1449 = vector.broadcast %1448 : f32 to vector<24x56xf32>
    %1450 = arith.mulf %1449, %1447 : vector<24x56xf32>
    %1451 = arith.addf %1445, %1450 : vector<24x56xf32>
    %c2_658 = arith.constant 2 : index
    %c3_659 = arith.constant 3 : index
    %c0_660 = arith.constant 0 : index
    %1452 = vector.load %arg10[%c2_658, %c3_659, %c0_660] : memref<5x28x56xf32, #tpu.memory_space<vmem>>, vector<1x24x56xf32>
    %1453 = vector.shape_cast %1452 : vector<1x24x56xf32> to vector<24x56xf32>
    %c42_661 = arith.constant 42 : index
    %1454 = memref.load %arg4[%c42_661] : memref<50xf32, #tpu.memory_space<smem>>
    %1455 = vector.broadcast %1454 : f32 to vector<24x56xf32>
    %1456 = arith.mulf %1455, %1453 : vector<24x56xf32>
    %1457 = arith.addf %1451, %1456 : vector<24x56xf32>
    %c3_662 = arith.constant 3 : index
    %c3_663 = arith.constant 3 : index
    %c0_664 = arith.constant 0 : index
    %1458 = vector.load %arg10[%c3_662, %c3_663, %c0_664] : memref<5x28x56xf32, #tpu.memory_space<vmem>>, vector<1x24x56xf32>
    %1459 = vector.shape_cast %1458 : vector<1x24x56xf32> to vector<24x56xf32>
    %c43_665 = arith.constant 43 : index
    %1460 = memref.load %arg4[%c43_665] : memref<50xf32, #tpu.memory_space<smem>>
    %1461 = vector.broadcast %1460 : f32 to vector<24x56xf32>
    %1462 = arith.mulf %1461, %1459 : vector<24x56xf32>
    %1463 = arith.addf %1457, %1462 : vector<24x56xf32>
    %c4_666 = arith.constant 4 : index
    %c3_667 = arith.constant 3 : index
    %c0_668 = arith.constant 0 : index
    %1464 = vector.load %arg10[%c4_666, %c3_667, %c0_668] : memref<5x28x56xf32, #tpu.memory_space<vmem>>, vector<1x24x56xf32>
    %1465 = vector.shape_cast %1464 : vector<1x24x56xf32> to vector<24x56xf32>
    %c44_669 = arith.constant 44 : index
    %1466 = memref.load %arg4[%c44_669] : memref<50xf32, #tpu.memory_space<smem>>
    %1467 = vector.broadcast %1466 : f32 to vector<24x56xf32>
    %1468 = arith.mulf %1467, %1465 : vector<24x56xf32>
    %1469 = arith.addf %1463, %1468 : vector<24x56xf32>
    %c0_670 = arith.constant 0 : index
    %c4_671 = arith.constant 4 : index
    %c0_672 = arith.constant 0 : index
    %1470 = vector.load %arg10[%c0_670, %c4_671, %c0_672] : memref<5x28x56xf32, #tpu.memory_space<vmem>>, vector<1x24x56xf32>
    %1471 = vector.shape_cast %1470 : vector<1x24x56xf32> to vector<24x56xf32>
    %c45_673 = arith.constant 45 : index
    %1472 = memref.load %arg4[%c45_673] : memref<50xf32, #tpu.memory_space<smem>>
    %1473 = vector.broadcast %1472 : f32 to vector<24x56xf32>
    %1474 = arith.mulf %1473, %1471 : vector<24x56xf32>
    %1475 = arith.addf %1469, %1474 : vector<24x56xf32>
    %c1_674 = arith.constant 1 : index
    %c4_675 = arith.constant 4 : index
    %c0_676 = arith.constant 0 : index
    %1476 = vector.load %arg10[%c1_674, %c4_675, %c0_676] : memref<5x28x56xf32, #tpu.memory_space<vmem>>, vector<1x24x56xf32>
    %1477 = vector.shape_cast %1476 : vector<1x24x56xf32> to vector<24x56xf32>
    %c46_677 = arith.constant 46 : index
    %1478 = memref.load %arg4[%c46_677] : memref<50xf32, #tpu.memory_space<smem>>
    %1479 = vector.broadcast %1478 : f32 to vector<24x56xf32>
    %1480 = arith.mulf %1479, %1477 : vector<24x56xf32>
    %1481 = arith.addf %1475, %1480 : vector<24x56xf32>
    %c2_678 = arith.constant 2 : index
    %c4_679 = arith.constant 4 : index
    %c0_680 = arith.constant 0 : index
    %1482 = vector.load %arg10[%c2_678, %c4_679, %c0_680] : memref<5x28x56xf32, #tpu.memory_space<vmem>>, vector<1x24x56xf32>
    %1483 = vector.shape_cast %1482 : vector<1x24x56xf32> to vector<24x56xf32>
    %c47_681 = arith.constant 47 : index
    %1484 = memref.load %arg4[%c47_681] : memref<50xf32, #tpu.memory_space<smem>>
    %1485 = vector.broadcast %1484 : f32 to vector<24x56xf32>
    %1486 = arith.mulf %1485, %1483 : vector<24x56xf32>
    %1487 = arith.addf %1481, %1486 : vector<24x56xf32>
    %c3_682 = arith.constant 3 : index
    %c4_683 = arith.constant 4 : index
    %c0_684 = arith.constant 0 : index
    %1488 = vector.load %arg10[%c3_682, %c4_683, %c0_684] : memref<5x28x56xf32, #tpu.memory_space<vmem>>, vector<1x24x56xf32>
    %1489 = vector.shape_cast %1488 : vector<1x24x56xf32> to vector<24x56xf32>
    %c48_685 = arith.constant 48 : index
    %1490 = memref.load %arg4[%c48_685] : memref<50xf32, #tpu.memory_space<smem>>
    %1491 = vector.broadcast %1490 : f32 to vector<24x56xf32>
    %1492 = arith.mulf %1491, %1489 : vector<24x56xf32>
    %1493 = arith.addf %1487, %1492 : vector<24x56xf32>
    %c4_686 = arith.constant 4 : index
    %c4_687 = arith.constant 4 : index
    %c0_688 = arith.constant 0 : index
    %1494 = vector.load %arg10[%c4_686, %c4_687, %c0_688] : memref<5x28x56xf32, #tpu.memory_space<vmem>>, vector<1x24x56xf32>
    %1495 = vector.shape_cast %1494 : vector<1x24x56xf32> to vector<24x56xf32>
    %c49_689 = arith.constant 49 : index
    %1496 = memref.load %arg4[%c49_689] : memref<50xf32, #tpu.memory_space<smem>>
    %1497 = vector.broadcast %1496 : f32 to vector<24x56xf32>
    %1498 = arith.mulf %1497, %1495 : vector<24x56xf32>
    %1499 = arith.addf %1493, %1498 : vector<24x56xf32>
    %1500 = vector.extract_strided_slice %1499 {offsets = [0, 0], sizes = [24, 24], strides = [1, 1]} : vector<24x56xf32> to vector<24x24xf32>
    %c0_690 = arith.constant 0 : index
    %c0_691 = arith.constant 0 : index
    %c0_692 = arith.constant 0 : index
    %c0_693 = arith.constant 0 : index
    %1501 = vector.load %arg6[%c0_690, %c0_691, %c0_692, %c0_693] : memref<2x1x24x24xf32, #tpu.memory_space<vmem>>, vector<1x1x24x24xf32>
    %1502 = vector.shape_cast %1501 : vector<1x1x24x24xf32> to vector<24x24xf32>
    %1503 = vector.shape_cast %1500 : vector<24x24xf32> to vector<1x1x24x24xf32>
    tpu.vector_store %arg6[%c0_690, %c0_691, %c0_692, %c0_693], %1503 {strides = array<i32>} : memref<2x1x24x24xf32, #tpu.memory_space<vmem>>, vector<1x1x24x24xf32>,
    %1504 = vector.extract_strided_slice %1499 {offsets = [0, 28], sizes = [24, 24], strides = [1, 1]} : vector<24x56xf32> to vector<24x24xf32>
    %c1_694 = arith.constant 1 : index
    %c0_695 = arith.constant 0 : index
    %c0_696 = arith.constant 0 : index
    %c0_697 = arith.constant 0 : index
    %1505 = vector.load %arg6[%c1_694, %c0_695, %c0_696, %c0_697] : memref<2x1x24x24xf32, #tpu.memory_space<vmem>>, vector<1x1x24x24xf32>
    %1506 = vector.shape_cast %1505 : vector<1x1x24x24xf32> to vector<24x24xf32>
    %1507 = vector.shape_cast %1504 : vector<24x24xf32> to vector<1x1x24x24xf32>
    tpu.vector_store %arg6[%c1_694, %c0_695, %c0_696, %c0_697], %1507 {strides = array<i32>} : memref<2x1x24x24xf32, #tpu.memory_space<vmem>>, vector<1x1x24x24xf32>,
    return
  }
  func.func @transform_0(%arg0: i32) -> (i32, i32, i32, i32) {
    %c0_i32 = arith.constant 0 : i32
    %c0_i32_0 = arith.constant 0 : i32
    %c0_i32_1 = arith.constant 0 : i32
    %c0_i32_2 = arith.constant 0 : i32
    %c0_i32_3 = arith.constant 0 : i32
    return %c0_i32, %c0_i32_0, %c0_i32_1, %c0_i32_2 : i32, i32, i32, i32
  }
  func.func @transform_1(%arg0: i32) -> i32 {
    %c0_i32 = arith.constant 0 : i32
    %c0_i32_0 = arith.constant 0 : i32
    return %c0_i32 : i32
  }
  func.func @transform_2(%arg0: i32) -> i32 {
    %c0_i32 = arith.constant 0 : i32
    %c0_i32_0 = arith.constant 0 : i32
    return %c0_i32 : i32
  }
  func.func @transform_3(%arg0: i32) -> i32 {
    %c0_i32 = arith.constant 0 : i32
    %c0_i32_0 = arith.constant 0 : i32
    return %c0_i32 : i32
  }
  func.func @transform_4(%arg0: i32) -> i32 {
    %c0_i32 = arith.constant 0 : i32
    %c0_i32_0 = arith.constant 0 : i32
    return %c0_i32 : i32
  }
  func.func @transform_5(%arg0: i32) -> (i32, i32, i32, i32) {
    %c0_i32 = arith.constant 0 : i32
    %c0_i32_0 = arith.constant 0 : i32
    %c0_i32_1 = arith.constant 0 : i32
    %c0_i32_2 = arith.constant 0 : i32
    %c0_i32_3 = arith.constant 0 : i32
    return %c0_i32, %c0_i32_0, %c0_i32_1, %c0_i32_2 : i32, i32, i32, i32
  }
}

</mosaic_0001>

<bundles_post_ra>
// kernel: tpu_custom_call.1
= control target key start
LH: loop header
LB: loop body
LE: loop exit
PB: predicated region body
PF: predicated region fallthrough
CT: control target
= control target key end

     0   :  { %s7195_s0 = inlined_call_operand.hbm [shape: f32[2,4,16,16], index: 0, kind: input, shape index: {}]   ;;  %s7196_s1 = inlined_call_operand.vmem [shape: f32[200], index: 1, kind: input, shape index: {}]   ;;  %s7197_s2 = inlined_call_operand.vmem [shape: f32[2], index: 2, kind: input, shape index: {}]   ;;  %s7198_s3 = inlined_call_operand.vmem [shape: f32[50], index: 3, kind: input, shape index: {}]   ;;  %s7199_s4 = inlined_call_operand.<no memory space> [shape: f32[1], index: 4, kind: input, shape index: {}]   ;;  %s7200_s5 = inlined_call_operand.hbm [shape: f32[2,1,24,24], index: 5, kind: output, shape index: {}]  }
   0x1   :  { %7470 = sst [smem:[#allocation193_spill]] %s7199_s4 }
   0x2   :  { %7471 = sst [smem:[#allocation194_spill]] %s7200_s5 }
   0x3   :  { %11 = vsyncpa [#allocation8], 0 }
   0x4   :  { %12 = vsyncpa [#allocation10], 0 }
   0x5   :  { %13 = vsyncpa [#allocation13], 0  ;;  %s43_s20 = sshll.u32 %s7197_s2, 4  ;;  %s44_s20 = int_to_ptr.vmem [resolvable:$true] %s43_s20 }
   0x6   :  { %14 = vsyncpa [#allocation9], 0  ;;  %s3447_s21 = scalar_lea.vmem %s44_s20, 16  ;;  %p3452_p1 = scmp.lt.s32.totalorder %s44_s20, %s44_s20 }
   0x7   :  { %p3448_p0 = scmp.ne.s32.totalorder %s44_s20, %s3447_s21  ;;  %p3453_p2 = scmp.lt.s32.totalorder %s3447_s21, %s3447_s21 }
   0x9   :  { %p3454_p3 = por %p3453_p2, %p3452_p1 }
   0xb   :  { %p3455_p4 = pnand %p3454_p3, %p3448_p0 }
   0xd   :  { %3458 = shalt.err (!%p3455_p4)
}
   0xe   :  { %s3531_s22 = smov [#allocation12]   ;;  %s3532_s23 = smov [#allocation7]  }
   0xf   :  { %46 = dma.vmem_to_smem %s44_s20, 16, %s3531_s22, [#allocation13]  }
  0x10   :  { %s20_s24 = sshll.u32 %s3532_s23, 4  ;;  %s21_s24 = int_to_ptr.vmem [resolvable:$true] %s20_s24 }
  0x11   :  { %s3467_s25 = scalar_lea.vmem %s21_s24, 2048  ;;  %p3472_p6 = scmp.lt.s32.totalorder %s21_s24, %s21_s24 }
  0x12   :  { %p3468_p5 = scmp.ne.s32.totalorder %s21_s24, %s3467_s25  ;;  %p3473_p7 = scmp.lt.s32.totalorder %s3467_s25, %s3467_s25 }
  0x14   :  { %p3474_p8 = por %p3473_p7, %p3472_p6 }
  0x16   :  { %p3475_p9 = pnand %p3474_p8, %p3468_p5 }
  0x18   :  { %3478 = shalt.err (!%p3475_p9)
}
  0x19   :  { %s7201_s2 = smov 128   ;;  %s7202_s26 = smov 8  }
  0x1a   :  { %26 = dma.hbm_to_vmem [thread:$0]  %s7195_s0, 2048, %s21_s24, [#allocation8], %s7201_s2, %s7201_s2, %s7202_s26  }
  0x1b   :  { %s33_s6 = sshll.u32 %s7196_s1, 4  ;;  %s53_s9 = sshll.u32 %s7198_s3, 4  ;;  %s34_s6 = int_to_ptr.vmem [resolvable:$true] %s33_s6  ;;  %s54_s9 = int_to_ptr.vmem [resolvable:$true] %s53_s9 }
  0x1c   :  { %s3479_s10 = scalar_lea.vmem %s34_s6, 32  ;;  %p3484_p11 = scmp.lt.s32.totalorder %s34_s6, %s34_s6 }
  0x1d   :  { %p3480_p10 = scmp.ne.s32.totalorder %s34_s6, %s3479_s10  ;;  %p3485_p12 = scmp.lt.s32.totalorder %s3479_s10, %s3479_s10 }
  0x1f   :  { %p3486_p13 = por %p3485_p12, %p3484_p11 }
  0x21   :  { %p3487_p0 = pnand %p3486_p13, %p3480_p10 }
  0x23   :  { %3490 = shalt.err (!%p3487_p0)
}
  0x24   :  { %s3535_s11 = smov [#allocation11]   ;;  %s3491_s0 = scalar_lea.vmem %s54_s9, 16 }
  0x25   :  { %36 = dma.vmem_to_smem %s34_s6, 32, %s3535_s11, [#allocation10]  }
  0x26   :  { %p3492_p1 = scmp.ne.s32.totalorder %s54_s9, %s3491_s0  ;;  %p3496_p2 = scmp.lt.s32.totalorder %s54_s9, %s54_s9 }
  0x27   :  { %p3497_p3 = scmp.lt.s32.totalorder %s3491_s0, %s3491_s0 }
  0x29   :  { %p3498_p4 = por %p3497_p3, %p3496_p2 }
  0x2b   :  { %p3499_p5 = pnand %p3498_p4, %p3492_p1 }
  0x2d   :  { %3502 = shalt.err (!%p3499_p5)
}
  0x2e   :  { %s3536_s1 = smov [#allocation14]  }
  0x2f   :  { %56 = dma.vmem_to_smem %s54_s9, 16, %s3536_s1, [#allocation13]  }
  0x30   :  { %3523 = dma.done.wait [#allocation8], 2048  }
  0x31   :  { %3524 = vsyncadd [#allocation8], 4294965248 }
  0x32   :  { %3525 = dma.done.wait [#allocation10], 32  }
  0x33   :  { %3526 = vsyncadd [#allocation10], 4294967264 }
  0x34   :  { %3527 = dma.done.wait [#allocation13], 32  }
  0x35   :  { %3528 = vsyncadd [#allocation13], 4294967264 }
  0x36   :  { %71 = sfence }
  0x37   :  { %v95_v0 = vld [vmem:[#allocation7] sm:$0xff]  ;;  %s7214_s3 = smov 4   ;;  %s7210_s12 = smov 28   ;;  %vm72_vm0 = vcmask 392192   ;;  %v96_v2 = vld [vmem:[#allocation7 + $0x8] sm:$0xff]  ;;  %v7216_v4 = vmov 0.0  }
  0x38   :  { %v151_v1 = vld [vmem:[#allocation7 + $0x40] sm:$0xff]  ;;  %99 = vrot.lane.b32.xlu0 %v95_v0, %s7214_s3  ;;  %v152_v3 = vld [vmem:[#allocation7 + $0x48] sm:$0xff]  ;;  %73 = vst.msk [vmem:[#allocation2] sm:$0xff] %vm72_vm0, %v7216_v4  ;;  %74 = vst.msk [vmem:[#allocation2 + $0x8] sm:$0xff] %vm72_vm0, %v7216_v4  ;;  %vm105_vm1 = vcmask 162848   ;;  %vm161_vm2 = vcmask 359648  }
  0x39   :  { %155 = vrot.lane.b32.xlu1 %v151_v1, %s7210_s12  ;;  %75 = vst.msk [vmem:[#allocation2 + $0x10] sm:$0xff] %vm72_vm0, %v7216_v4  ;;  %76 = vst.msk [vmem:[#allocation2 + $0x18] sm:$0xff] %vm72_vm0, %v7216_v4  ;;  %v109_v5 = vld [vmem:[#allocation7 + $0x10] sm:$0xff]  ;;  %v110_v6 = vld [vmem:[#allocation7 + $0x18] sm:$0xff]  ;;  %s7208_s13 = smov 127   ;;  %s3164_s14 = sld [smem:[#allocation11 + $0x19]] }
  0x3a   :  { %77 = vst.msk [vmem:[#allocation2 + $0x20] sm:$0xff] %vm72_vm0, %v7216_v4  ;;  %78 = vst.msk [vmem:[#allocation2 + $0x28] sm:$0xff] %vm72_vm0, %v7216_v4  ;;  %v165_v7 = vld [vmem:[#allocation7 + $0x50] sm:$0xff]  ;;  %v166_v8 = vld [vmem:[#allocation7 + $0x58] sm:$0xff]  ;;  %s3163_s15 = sld [smem:[#allocation12 + $0x1]]  ;;  %s7206_s16 = smov 126  }
  0x3b   :  { %79 = vst.msk [vmem:[#allocation2 + $0x30] sm:$0xff] %vm72_vm0, %v7216_v4  ;;  %80 = vst.msk [vmem:[#allocation2 + $0x38] sm:$0xff] %vm72_vm0, %v7216_v4  ;;  %s7204_s17 = smov 125   ;;  %s7212_s18 = smov 124   ;;  %v123_v42 = vld [vmem:[#allocation7 + $0x20] sm:$0xff]  ;;  %v124_v43 = vld [vmem:[#allocation7 + $0x28] sm:$0xff] }
  0x3c   :  { %81 = vst.msk [vmem:[#allocation2 + $0x40] sm:$0xff] %vm72_vm0, %v7216_v4  ;;  %82 = vst.msk [vmem:[#allocation2 + $0x48] sm:$0xff] %vm72_vm0, %v7216_v4  ;;  %101 = vrot.lane.b32.xlu0 %v96_v2, %s7214_s3  ;;  %v178_v44 = vld [vmem:[#allocation7 + $0x60] sm:$0xff]  ;;  %v179_v45 = vld [vmem:[#allocation7 + $0x68] sm:$0xff]  ;;  %s3696_s19 = sld [smem:[#allocation11]]  ;;  %s7480_s4 = smov 28  }
  0x3d   :  { %83 = vst.msk [vmem:[#allocation2 + $0x50] sm:$0xff] %vm72_vm0, %v7216_v4  ;;  %84 = vst.msk [vmem:[#allocation2 + $0x58] sm:$0xff] %vm72_vm0, %v7216_v4  ;;  %157 = vrot.lane.b32.xlu1 %v152_v3, %s7210_s12  ;;  %s3698_s20 = sld [smem:[#allocation12]]  ;;  %v137_v46 = vld [vmem:[#allocation7 + $0x30] sm:$0xff]  ;;  %v138_v47 = vld [vmem:[#allocation7 + $0x38] sm:$0xff]  ;;  %vm226_vm3 = vcmask 384000  }
  0x3e   :  { %s3700_s21 = sld [smem:[#allocation11 + $0x5]]  ;;  %v191_v48 = vld [vmem:[#allocation7 + $0x70] sm:$0xff]  ;;  %v192_v49 = vld [vmem:[#allocation7 + $0x78] sm:$0xff]  ;;  %vm240_vm4 = vcmask 375808   ;;  %vm254_vm5 = vcmask 367616   ;;  %vm268_vm6 = vcmask 359424  }
  0x3f   :  { %v3651_v25 = vstv %s3164_s14  ;;  %s3702_s22 = sld [smem:[#allocation11 + $0x1e]]  ;;  %vm85_vm7 = vcmask 457728   ;;  %vm89_vm8 = vcmask 453632   ;;  %vm2358_vm9 = vcmask 195616  }
  0x40   :  { %113 = vrot.lane.b32.xlu0 %v109_v5, %s7214_s3  ;;  %v3671_v37 = vstv %s3163_s15  ;;  %s3707_s23 = sld [smem:[#allocation11 + $0xa]]  ;;  %vm2372_vm10 = vcmask 425216   ;;  %vm2361_vm11 = vcmask 191520   ;;  %vm2375_vm12 = vcmask 421120  }
  0x41   :  { %115 = vrot.lane.b32.xlu1 %v110_v6, %s7214_s3  ;;  %s3709_s24 = sld [smem:[#allocation11 + $0x23]]  ;;  %vm2435_vm13 = vcmask 449536   ;;  %vm2454_vm14 = vcmask 441344   ;;  %vm2473_vm15 = vcmask 433152  }
  0x42   :  { %s3711_s25 = sld [smem:[#allocation11 + $0xf]]  ;;  %v276_v51 = vstv %s3696_s19 }
  0x43   :  { %s3713_s27 = sld [smem:[#allocation11 + $0x28]]  ;;  %v204_v50 = vstv %s3698_s20 }
  0x44   :  { %169 = vrot.lane.b32.xlu0 %v165_v7, %s7210_s12  ;;  %s3717_s28 = sld [smem:[#allocation11 + $0x14]]  ;;  %v3848_v52 = vstv %s3700_s21 }
  0x45   :  { %171 = vrot.lane.b32.xlu1 %v166_v8, %s7210_s12  ;;  %s3719_s29 = sld [smem:[#allocation11 + $0x2d]]  ;;  %v3851_v53 = vstv %s3702_s22 }
  0x46   :  { %s3721_s30 = sld [smem:[#allocation11 + $0x32]]  ;;  %v3856_v54 = vstv %s3707_s23 }
  0x47   :  { %s3723_s6 = sld [smem:[#allocation11 + $0x4b]]  ;;  %v3859_v55 = vstv %s3709_s24 }
  0x48   :  { %s3728_s7 = sld [smem:[#allocation11 + $0x37]]  ;;  %v3862_v56 = vstv %s3711_s25 }
  0x49   :  { %s3730_s8 = sld [smem:[#allocation11 + $0x50]]  ;;  %v3865_v57 = vstv %s3713_s27 }
  0x4a   :  { %s3732_s9 = sld [smem:[#allocation11 + $0x1]]  ;;  %v3870_v58 = vstv %s3717_s28 }
  0x4b   :  { %s3734_s10 = sld [smem:[#allocation11 + $0x1a]]  ;;  %v3873_v59 = vstv %s3719_s29 }
  0x4c   :  { %s3739_s11 = sld [smem:[#allocation11 + $0x6]]  ;;  %v3876_v60 = vstv %s3721_s30 }
  0x4d   :  { %s3741_s0 = sld [smem:[#allocation11 + $0x1f]]  ;;  %v3879_v61 = vstv %s3723_s6 }
  0x4e   :  { %s3743_s1 = sld [smem:[#allocation11 + $0xb]]  ;;  %v3889_v0 = vstv %s3728_s7 }
  0x4f   :  { %s3745_s14 = sld [smem:[#allocation11 + $0x24]]  ;;  %v3892_v1 = vstv %s3730_s8 }
  0x50   :  { %s3749_s15 = sld [smem:[#allocation11 + $0x10]]  ;;  %v3895_v2 = vstv %s3732_s9 }
  0x51   :  { %s3751_s2 = sld [smem:[#allocation11 + $0x29]]  ;;  %v3898_v3 = vstv %s3734_s10 }
  0x52   :  { %s3753_s26 = sld [smem:[#allocation11 + $0x15]]  ;;  %v3901_v5 = vstv %s3739_s11 }
  0x53   :  { %s3766_s5 = sld [smem:[#allocation11 + $0x20]]  ;;  %7513 = vst [vmem:[#allocation55_spill] sm:$0xff] %v3901_v5  ;;  %v3904_v6 = vstv %s3741_s0 }
  0x54   :  { %s3867_s19 = sld [smem:[#allocation11 + $0x47]]  ;;  %7514 = vst [vmem:[#allocation56_spill] sm:$0xff] %v3904_v6 }
  0x55   :  { %s3881_s20 = sld [smem:[#allocation11 + $0x60]] }
  0x56   :  { %7472 = sst [smem:[#allocation20_spill]] %s3749_s15 }
  0x57   :  { %7473 = sst [smem:[#allocation21_spill]] %s3751_s2 }
  0x58   :  { %7474 = sst [smem:[#allocation22_spill]] %s3753_s26 }
  0x59   :  { %7479 = sst [smem:[#allocation27_spill]] %s3766_s5 }
  0x5a   :  { %s3774_s26 = sld [smem:[#allocation11 + $0x11]] }
  0x5b   :  { %s3783_s5 = sld [smem:[#allocation11 + $0x3]] }
  0x5c   :  { %s3787_s2 = sld [smem:[#allocation11 + $0x8]] }
  0x5d   :  { %s3791_s15 = sld [smem:[#allocation11 + $0xd]] }
  0x5e   :  { %s7508_s21 = sld [smem:[#allocation20_spill]] }
  0x5f   :  { %s7509_s22 = sld [smem:[#allocation21_spill]] }
  0x60   :  { %7483 = sst [smem:[#allocation30_spill]] %s3774_s26 }
  0x61   :  { %7487 = sst [smem:[#allocation34_spill]] %s3783_s5 }
  0x62   :  { %7489 = sst [smem:[#allocation36_spill]] %s3787_s2 }
  0x63   :  { %7491 = sst [smem:[#allocation38_spill]] %s3791_s15 }
  0x64   :  { %s3795_s26 = sld [smem:[#allocation11 + $0x12]] }
  0x65   :  { %s3805_s5 = sld [smem:[#allocation11 + $0x1d]] }
  0x66   :  { %s3809_s2 = sld [smem:[#allocation11 + $0x22]] }
  0x67   :  { %s3813_s15 = sld [smem:[#allocation11 + $0x27]] }
  0x68   :  { %s3886_s23 = sld [smem:[#allocation11 + $0x34]] }
  0x69   :  { %s7510_s24 = sld [smem:[#allocation22_spill]] }
  0x6a   :  { %7492 = sst [smem:[#allocation39_spill]] %s3795_s26 }
  0x6b   :  { %7496 = sst [smem:[#allocation43_spill]] %s3805_s5 }
  0x6c   :  { %7497 = sst [smem:[#allocation44_spill]] %s3809_s2 }
  0x6d   :  { %7499 = sst [smem:[#allocation46_spill]] %s3813_s15 }
  0x6e   :  { %s3815_s26 = sld [smem:[#allocation11 + $0x13]] }
  0x6f   :  { %s3823_s5 = sld [smem:[#allocation11 + $0x3c]] }
  0x70   :  { %s3825_s2 = sld [smem:[#allocation11 + $0x55]] }
  0x71   :  { %s3829_s15 = sld [smem:[#allocation11 + $0x5a]] }
  0x72   :  { %s3906_s28 = sld [smem:[#allocation11 + $0x4d]] }
  0x73   :  { %s7517_s6 = sld [smem:[#allocation27_spill]] }
  0x74   :  { %7500 = sst [smem:[#allocation47_spill]] %s3815_s26 }
  0x75   :  { %7504 = sst [smem:[#allocation51_spill]] %s3823_s5 }
  0x76   :  { %7505 = sst [smem:[#allocation52_spill]] %s3825_s2 }
  0x77   :  { %s3831_s26 = sld [smem:[#allocation11 + $0x46]] }
  0x78   :  { %s3839_s5 = sld [smem:[#allocation11 + $0x3d]] }
  0x79   :  { %s3841_s2 = sld [smem:[#allocation11 + $0x56]] }
  0x7a   :  { %s3915_s7 = sld [smem:[#allocation11 + $0x3e]] }
  0x7b   :  { %s3929_s8 = sld [smem:[#allocation11 + $0x57]] }
  0x7c   :  { %s7521_s11 = sld [smem:[#allocation30_spill]] }
  0x7d   :  { %s3942_s0 = sld [smem:[#allocation11 + $0x43]] }
  0xaa   :  { %v100_v9 = vpop.permute.xlu0 %99 }
  0xab   :  { %v156_v10 = vpop.permute.xlu1 %155  ;;  %106 = vst.msk [vmem:[#allocation2 + $0x4] sm:$0xff] %vm105_vm1, %v100_v9 }
  0xac   :  { %162 = vst.msk [vmem:[#allocation2 + $0x4] sm:$0xff] %vm161_vm2, %v156_v10  ;;  %v3913_v10 = vstv %s3743_s1 }
  0xae   :  { %v102_v11 = vpop.permute.xlu0 %101 }
  0xaf   :  { %v158_v12 = vpop.permute.xlu1 %157  ;;  %107 = vst.msk [vmem:[#allocation2 + $0xc] sm:$0xff] %vm105_vm1, %v102_v11  ;;  %v3918_v11 = vstv %s3745_s14  ;;  %s3957_s14 = sld [smem:[#allocation11 + $0x5c]] }
  0xb0   :  { %163 = vst.msk [vmem:[#allocation2 + $0xc] sm:$0xff] %vm161_vm2, %v158_v12  ;;  %v3921_v12 = vstv %s7508_s21  ;;  %s3970_s21 = sld [smem:[#allocation11 + $0x48]] }
  0xb2   :  { %v114_v13 = vpop.permute.xlu0 %113 }
  0xb3   :  { %v116_v14 = vpop.permute.xlu1 %115  ;;  %v207_v15 = vld [vmem:[#allocation2] sm:$0xff]  ;;  %120 = vst.msk [vmem:[#allocation2 + $0x1c] sm:$0xff] %vm105_vm1, %v114_v13  ;;  %v3924_v13 = vstv %s7509_s22 }
  0xb4   :  { %121 = vst.msk [vmem:[#allocation2 + $0x24] sm:$0xff] %vm105_vm1, %v116_v14  ;;  %216 = vrot.lane.b32.xlu0 %v207_v15, %s7208_s13  ;;  %v3927_v14 = vstv %s7510_s24  ;;  %s3985_s24 = sld [smem:[#allocation11 + $0x61]] }
  0xb5   :  { %210 = vst.msk [vmem:[#allocation3] sm:$0xff] %vm72_vm0, %v207_v15  ;;  %7525 = sst [smem:[#allocation20_spill]] %s3957_s14 }
  0xb6   :  { %v170_v16 = vpop.permute.xlu0 %169  ;;  %7526 = sst [smem:[#allocation21_spill]] %s3970_s21 }
  0xb7   :  { %v172_v17 = vpop.permute.xlu1 %171  ;;  %v208_v18 = vld [vmem:[#allocation2 + $0x8] sm:$0xff]  ;;  %v209_v19 = vld [vmem:[#allocation2 + $0x10] sm:$0xff]  ;;  %175 = vst.msk [vmem:[#allocation2 + $0x1c] sm:$0xff] %vm161_vm2, %v170_v16 }
  0xb8   :  { %176 = vst.msk [vmem:[#allocation2 + $0x24] sm:$0xff] %vm161_vm2, %v172_v17  ;;  %218 = vrot.lane.b32.xlu1 %v208_v18, %s7208_s13  ;;  %220 = vrot.lane.b32.xlu0 %v209_v19, %s7208_s13 }
  0xb9   :  { %211 = vst.msk [vmem:[#allocation3 + $0x8] sm:$0xff] %vm72_vm0, %v208_v18  ;;  %212 = vst.msk [vmem:[#allocation3 + $0x10] sm:$0xff] %vm72_vm0, %v209_v19 }
  0xba   :  { %7528 = sst [smem:[#allocation22_spill]] %s3985_s24 }
  0xbc   :  { %230 = vrot.lane.b32.xlu1 %v207_v15, %s7206_s16  ;;  %232 = vrot.lane.b32.xlu0 %v208_v18, %s7206_s16  ;;  %v3661_v31 = vld [vmem:[#allocation3] sm:$0xff] }
  0xbd   :  { %v277_v62 = vmul.f32 %v276_v51, %v3661_v31  ;;  %v285_v63 = vmul.f32 %v3651_v25, %v3661_v31 }
  0xbe   :  { %v747_v30 = vld [vmem:[#allocation2 + $0x18] sm:$0xff] }
  0xbf   :  { %v3649_v24 = vld [vmem:[#allocation2 + $0x28] sm:$0xff]  ;;  %v748_v32 = vld [vmem:[#allocation2 + $0x20] sm:$0xff]  ;;  %v3937_v17 = vadd.f32 %v277_v62, %v204_v50 }
  0xc0   :  { %v3639_v20 = vld [vmem:[#allocation3 + $0x10] sm:$0xf]  ;;  %234 = vrot.lane.b32.xlu1 %v209_v19, %s7206_s16  ;;  %244 = vrot.lane.b32.xlu0 %v207_v15, %s7204_s17  ;;  %v3653_v26 = vld [vmem:[#allocation3 + $0x8] sm:$0xff]  ;;  %v3667_v35 = vld [vmem:[#allocation3 + $0x14] sm:$0xf] }
  0xc1   :  { %v3641_v21 = vld [vmem:[#allocation3 + $0x9] sm:$0xff]  ;;  %v3643_v22 = vld [vmem:[#allocation3 + $0x11] sm:$0xf]  ;;  %v287_v33 = vmul.f32 %v3651_v25, %v3639_v20  ;;  %v3669_v36 = vld [vmem:[#allocation3 + $0x1] sm:$0xff]  ;;  %v278_v7 = vmul.f32 %v276_v51, %v3653_v26  ;;  %v286_v8 = vmul.f32 %v3651_v25, %v3653_v26  ;;  %v279_v9 = vmul.f32 %v276_v51, %v3639_v20 }
  0xc2   :  { %v3645_v23 = vld [vmem:[#allocation3 + $0xa] sm:$0xff]  ;;  %v3655_v27 = vld [vmem:[#allocation3 + $0x12] sm:$0xf]  ;;  %v3673_v38 = vld [vmem:[#allocation3 + $0x2] sm:$0xff]  ;;  %v3955_v25 = vmul.f32 %v3848_v52, %v3641_v21 }
  0xc3   :  { %v3657_v28 = vld [vmem:[#allocation3 + $0xb] sm:$0xff]  ;;  %v3659_v29 = vld [vmem:[#allocation3 + $0x13] sm:$0xf]  ;;  %v3675_v39 = vld [vmem:[#allocation3 + $0x3] sm:$0xff]  ;;  %v3682_v41 = vadd.f32 %v287_v33, %v3671_v37  ;;  %v3959_v26 = vadd.f32 %v278_v7, %v204_v50  ;;  %v3964_v31 = vadd.f32 %v279_v9, %v204_v50  ;;  %v4061_v9 = vmul.f32 %v3856_v54, %v3673_v38 }
  0xc4   :  { %v3665_v34 = vld [vmem:[#allocation3 + $0xc] sm:$0xff]  ;;  %v3677_v40 = vld [vmem:[#allocation3 + $0x4] sm:$0xff]  ;;  %246 = vrot.lane.b32.xlu1 %v208_v18, %s7204_s17  ;;  %248 = vrot.lane.b32.xlu0 %v209_v19, %s7204_s17 }
  0xc5   :  { %752 = vst.msk [vmem:[#allocation3 + $0x10] sm:$0xff] %vm72_vm0, %v3649_v24  ;;  %750 = vst.msk [vmem:[#allocation3] sm:$0xff] %vm72_vm0, %v747_v30  ;;  %v4035_v51 = vmul.f32 %v3870_v58, %v3665_v34 }
  0xc6   :  { %751 = vst.msk [vmem:[#allocation3 + $0x8] sm:$0xff] %vm72_vm0, %v748_v32  ;;  %7548 = vst [vmem:[#allocation70_spill] sm:$0xff] %v4061_v9 }
  0xc7   :  { %7538 = vst [vmem:[#allocation64_spill] sm:$0xff] %v4035_v51 }
  0xc8   :  { %258 = vrot.lane.b32.xlu1 %v207_v15, %s7212_s18  ;;  %260 = vrot.lane.b32.xlu0 %v208_v18, %s7212_s18  ;;  %v3940_v18 = vadd.f32 %v285_v63, %v3671_v37  ;;  %v4044_v63 = vmul.f32 %v3870_v58, %v3667_v35 }
  0xca   :  { %7541 = vst [vmem:[#allocation66_spill] sm:$0xff] %v4044_v63 }
  0xcc   :  { %262 = vrot.lane.b32.xlu1 %v209_v19, %s7212_s18  ;;  %127 = vrot.lane.b32.xlu0 %v123_v42, %s7214_s3 }
  0xcd   :  { %v900_v63 = vld [vmem:[#allocation3 + $0x9] sm:$0xff] }
  0xd0   :  { %129 = vrot.lane.b32.xlu1 %v124_v43, %s7214_s3  ;;  %182 = vrot.lane.b32.xlu0 %v178_v44, %s7210_s12  ;;  %v3979_v43 = vstv %s7521_s11  ;;  %v3983_v44 = vmul.f32 %v3848_v52, %v3643_v22  ;;  %s7545_s11 = sld [smem:[#allocation36_spill]] }
  0xd4   :  { %184 = vrot.lane.b32.xlu1 %v179_v45, %s7210_s12  ;;  %756 = vrot.lane.b32.xlu0 %v747_v30, %s7208_s13  ;;  %s3764_s12 = sld [smem:[#allocation11 + $0x7]]  ;;  %v3996_v45 = vmul.f32 %v3856_v54, %v3645_v23 }
  0xd8   :  { %758 = vrot.lane.b32.xlu1 %v748_v32, %s7208_s13  ;;  %760 = vrot.lane.b32.xlu0 %v3649_v24, %s7208_s13  ;;  %s3762_s13 = sld [smem:[#allocation11 + $0x1b]] }
  0xda   :  { %7478 = sst [smem:[#allocation26_spill]] %s3764_s12 }
  0xdb   :  { %s3781_s12 = sld [smem:[#allocation11 + $0x2f]] }
  0xdc   :  { %768 = vrot.lane.b32.xlu1 %v747_v30, %s7206_s16  ;;  %770 = vrot.lane.b32.xlu0 %v748_v32, %s7206_s16  ;;  %s7516_s30 = sld [smem:[#allocation26_spill]] }
  0xde   :  { %7477 = sst [smem:[#allocation25_spill]] %s3762_s13 }
  0xdf   :  { %s3779_s13 = sld [smem:[#allocation11 + $0x16]] }
  0xe0   :  { %772 = vrot.lane.b32.xlu1 %v3649_v24, %s7206_s16  ;;  %780 = vrot.lane.b32.xlu0 %v747_v30, %s7204_s17  ;;  %s3760_s16 = sld [smem:[#allocation11 + $0x2]] }
  0xe1   :  { %7486 = sst [smem:[#allocation33_spill]] %s3781_s12 }
  0xe2   :  { %s3803_s12 = sld [smem:[#allocation11 + $0x4]]  ;;  %v3948_v20 = vstv %s7516_s30 }
  0xe3   :  { %s7515_s29 = sld [smem:[#allocation25_spill]]  ;;  %7523 = vst [vmem:[#allocation58_spill] sm:$0xff] %v3948_v20 }
  0xe4   :  { %782 = vrot.lane.b32.xlu1 %v748_v32, %s7204_s17  ;;  %784 = vrot.lane.b32.xlu0 %v3649_v24, %s7204_s17  ;;  %s3755_s17 = sld [smem:[#allocation11 + $0x2e]] }
  0xe5   :  { %7485 = sst [smem:[#allocation32_spill]] %s3779_s13 }
  0xe6   :  { %7476 = sst [smem:[#allocation24_spill]] %s3760_s16 }
  0xe7   :  { %s3776_s16 = sld [smem:[#allocation11 + $0x2a]] }
  0xe8   :  { %792 = vrot.lane.b32.xlu1 %v747_v30, %s7212_s18  ;;  %794 = vrot.lane.b32.xlu0 %v748_v32, %s7212_s18  ;;  %s3801_s13 = sld [smem:[#allocation11 + $0x30]]  ;;  %v3962_v30 = vadd.f32 %v286_v8, %v3671_v37  ;;  %v3968_v32 = vmul.f32 %v3851_v53, %v3641_v21  ;;  %v3992_v21 = vmul.f32 %v3851_v53, %v3643_v22  ;;  %v806_v8 = vld [vmem:[#allocation3 + $0x10] sm:$0xf] }
  0xe9   :  { %7495 = sst [smem:[#allocation42_spill]] %s3803_s12  ;;  %v3945_v19 = vstv %s7515_s29  ;;  %v4014_v22 = vmul.f32 %v3862_v56, %v3657_v28 }
  0xea   :  { %7475 = sst [smem:[#allocation23_spill]] %s3755_s17 }
  0xeb   :  { %s3770_s17 = sld [smem:[#allocation11 + $0xc]]  ;;  %7532 = vst [vmem:[#allocation60_spill] sm:$0xff] %v4014_v22  ;;  %v1186_v22 = vld [vmem:[#allocation3 + $0x14] sm:$0xf] }
  0xec   :  { %796 = vrot.lane.b32.xlu1 %v3649_v24, %s7212_s18  ;;  %141 = vrot.lane.b32.xlu0 %v137_v46, %s7214_s3  ;;  %s3772_s18 = sld [smem:[#allocation11 + $0x25]]  ;;  %v3951_v24 = vstv %s7517_s6  ;;  %v4000_v46 = vmul.f32 %v3856_v54, %v3655_v27  ;;  %v4082_v54 = vmul.f32 %v3870_v58, %v3677_v40  ;;  %v4100_v58 = vmul.f32 %v3848_v52, %v3669_v36 }
  0xed   :  { %7484 = sst [smem:[#allocation31_spill]] %s3776_s16  ;;  %7524 = vst [vmem:[#allocation59_spill] sm:$0xff] %v3951_v24 }
  0xee   :  { %s3797_s16 = sld [smem:[#allocation11 + $0x2b]]  ;;  %7555 = vst [vmem:[#allocation75_spill] sm:$0xff] %v4082_v54  ;;  %7562 = vst [vmem:[#allocation79_spill] sm:$0xff] %v4100_v58  ;;  %v4114_v54 = vmul.f32 %v3876_v60, %v806_v8 }
  0xef   :  { %7494 = sst [smem:[#allocation41_spill]] %s3801_s13 }
  0xf0   :  { %143 = vrot.lane.b32.xlu1 %v138_v47, %s7214_s3  ;;  %195 = vrot.lane.b32.xlu0 %v191_v48, %s7480_s4  ;;  %s3785_s3 = sld [smem:[#allocation11 + $0x1c]]  ;;  %v4006_v47 = vmul.f32 %v3859_v55, %v3645_v23  ;;  %v4010_v48 = vmul.f32 %v3859_v55, %v3655_v27  ;;  %v4027_v23 = vmul.f32 %v3865_v57, %v3657_v28 }
  0xf1   :  { %7481 = sst [smem:[#allocation28_spill]] %s3770_s17  ;;  %v4031_v27 = vmul.f32 %v3865_v57, %v3659_v29  ;;  %v4048_v28 = vmul.f32 %v3873_v59, %v3665_v34  ;;  %v4065_v34 = vmul.f32 %v3859_v55, %v3673_v38  ;;  %v4086_v38 = vmul.f32 %v3873_v59, %v3677_v40  ;;  %v804_v55 = vld [vmem:[#allocation3] sm:$0xff]  ;;  %7566 = vst [vmem:[#allocation83_spill] sm:$0xff] %v4114_v54 }
  0xf2   :  { %7482 = sst [smem:[#allocation29_spill]] %s3772_s18  ;;  %7535 = vst [vmem:[#allocation62_spill] sm:$0xff] %v4027_v23  ;;  %v4104_v40 = vmul.f32 %v3851_v53, %v3669_v36  ;;  %v4125_v36 = vmul.f32 %v3876_v60, %v804_v55 }
  0xf3   :  { %s3789_s17 = sld [smem:[#allocation11 + $0x21]]  ;;  %7537 = vst [vmem:[#allocation63_spill] sm:$0xff] %v4031_v27  ;;  %7542 = vst [vmem:[#allocation67_spill] sm:$0xff] %v4048_v28 }
  0xf4   :  { %197 = vrot.lane.b32.xlu1 %v192_v49, %s7480_s4  ;;  %s3793_s18 = sld [smem:[#allocation11 + $0x26]]  ;;  %v4018_v49 = vmul.f32 %v3862_v56, %v3659_v29  ;;  %v4052_v29 = vmul.f32 %v3873_v59, %v3667_v35  ;;  %7549 = vst [vmem:[#allocation71_spill] sm:$0xff] %v4065_v34  ;;  %v4069_v35 = vmul.f32 %v3862_v56, %v3675_v39  ;;  %7556 = vst [vmem:[#allocation76_spill] sm:$0xff] %v4086_v38  ;;  %v805_v56 = vld [vmem:[#allocation3 + $0x8] sm:$0xff] }
  0xf5   :  { %7493 = sst [smem:[#allocation40_spill]] %s3797_s16  ;;  %v4091_v34 = vstv %s7545_s11  ;;  %7563 = vst [vmem:[#allocation80_spill] sm:$0xff] %v4104_v40  ;;  %7571 = vst [vmem:[#allocation86_spill] sm:$0xff] %v4125_v36  ;;  %v4128_v53 = vmul.f32 %v3876_v60, %v805_v56 }
  0xf6   :  { %7488 = sst [smem:[#allocation35_spill]] %s3785_s3  ;;  %7533 = vst [vmem:[#allocation61_spill] sm:$0xff] %v4018_v49  ;;  %7543 = vst [vmem:[#allocation68_spill] sm:$0xff] %v4052_v29  ;;  %v4078_v29 = vmul.f32 %v3865_v57, %v3675_v39  ;;  %v899_v39 = vld [vmem:[#allocation3 + $0x1] sm:$0xff]  ;;  %v901_v57 = vld [vmem:[#allocation3 + $0x11] sm:$0xf] }
  0xf7   :  { %s3799_s4 = sld [smem:[#allocation11 + $0x17]]  ;;  %7550 = vst [vmem:[#allocation72_spill] sm:$0xff] %v4069_v35  ;;  %7559 = vst [vmem:[#allocation77_spill] sm:$0xff] %v4091_v34  ;;  %v4141_v40 = vmul.f32 %v3889_v0, %v901_v57  ;;  %v4144_v60 = vmul.f32 %v3892_v1, %v901_v57  ;;  %v4161_v57 = vmul.f32 %v3892_v1, %v900_v63 }
  0xf8   :  { %s3807_s3 = sld [smem:[#allocation11 + $0x9]]  ;;  %7554 = vst [vmem:[#allocation74_spill] sm:$0xff] %v4078_v29  ;;  %v4117_v29 = vmul.f32 %v3879_v61, %v806_v8  ;;  %7572 = vst [vmem:[#allocation87_spill] sm:$0xff] %v4128_v53  ;;  %v4136_v8 = vmul.f32 %v3879_v61, %v805_v56  ;;  %v4155_v56 = vmul.f32 %v3889_v0, %v900_v63 }
  0xf9   :  { %7490 = sst [smem:[#allocation37_spill]] %s3789_s17  ;;  %7580 = vst [vmem:[#allocation90_spill] sm:$0xff] %v4141_v40  ;;  %7581 = vst [vmem:[#allocation91_spill] sm:$0xff] %v4144_v60  ;;  %v4158_v40 = vmul.f32 %v3892_v1, %v899_v39  ;;  %v996_v1 = vld [vmem:[#allocation3 + $0x12] sm:$0xf] }
  0xfa   :  { %s3811_s17 = sld [smem:[#allocation11 + $0xe]]  ;;  %v4111_v38 = vstv %s3793_s18  ;;  %7567 = vst [vmem:[#allocation84_spill] sm:$0xff] %v4117_v29  ;;  %7576 = vst [vmem:[#allocation89_spill] sm:$0xff] %v4136_v8  ;;  %v1090_v29 = vld [vmem:[#allocation3 + $0xb] sm:$0xff] }
  0xfb   :  { %s3817_s16 = sld [smem:[#allocation11 + $0x2c]]  ;;  %7565 = vst [vmem:[#allocation82_spill] sm:$0xff] %v4111_v38  ;;  %7588 = vst [vmem:[#allocation94_spill] sm:$0xff] %v4155_v56 }
  0xfc   :  { %s3819_s13 = sld [smem:[#allocation11 + $0x18]]  ;;  %7589 = vst [vmem:[#allocation95_spill] sm:$0xff] %v4158_v40  ;;  %7590 = vst [vmem:[#allocation96_spill] sm:$0xff] %v4161_v57  ;;  %v1091_v40 = vld [vmem:[#allocation3 + $0x13] sm:$0xf]  ;;  %v995_v57 = vld [vmem:[#allocation3 + $0xa] sm:$0xff] }
  0xfd   :  { %s3821_s12 = sld [smem:[#allocation11 + $0x31]] }
  0xfe   :  { %s7511_s25 = sld [smem:[#allocation23_spill]]  ;;  %v4180_v63 = vstv %s3807_s3 }
  0xff   :  { %s7512_s27 = sld [smem:[#allocation24_spill]]  ;;  %7600 = vst [vmem:[#allocation101_spill] sm:$0xff] %v4180_v63 }
 0x100   :  { %7498 = sst [smem:[#allocation45_spill]] %s3811_s17 }
 0x101   :  { %7501 = sst [smem:[#allocation48_spill]] %s3817_s16 }
 0x102   :  { %7502 = sst [smem:[#allocation49_spill]] %s3819_s13 }
 0x103   :  { %7503 = sst [smem:[#allocation50_spill]] %s3821_s12 }
 0x104   :  { %s3827_s17 = sld [smem:[#allocation11 + $0x41]]  ;;  %v3932_v15 = vstv %s7511_s25 }
 0x105   :  { %s3833_s16 = sld [smem:[#allocation11 + $0x5f]]  ;;  %v3935_v16 = vstv %s7512_s27 }
 0x106   :  { %s3835_s13 = sld [smem:[#allocation11 + $0x33]]  ;;  %7520 = vst [vmem:[#allocation57_spill] sm:$0xff] %v3935_v16 }
 0x107   :  { %s3837_s12 = sld [smem:[#allocation11 + $0x4c]] }
 0x108   :  { %s7518_s9 = sld [smem:[#allocation28_spill]] }
 0x109   :  { %s7519_s10 = sld [smem:[#allocation29_spill]] }
 0x10a   :  { %7506 = sst [smem:[#allocation53_spill]] %s3827_s17 }
 0x10b   :  { %s3843_s17 = sld [smem:[#allocation11 + $0x42]] }
 0x10c   :  { %7507 = sst [smem:[#allocation54_spill]] %s3835_s13 }
 0x10d   :  { %s3853_s13 = sld [smem:[#allocation11 + $0x5b]] }
 0x10e   :  { %s7522_s1 = sld [smem:[#allocation31_spill]]  ;;  %v3973_v33 = vstv %s7518_s9 }
 0x10f   :  { %s7527_s22 = sld [smem:[#allocation32_spill]]  ;;  %v3976_v42 = vstv %s7519_s10 }
 0x110   :  { %s7529_s25 = sld [smem:[#allocation33_spill]] }
 0x111   :  { %s4002_s27 = sld [smem:[#allocation11 + $0x35]] }
 0x112   :  { %s7531_s29 = sld [smem:[#allocation34_spill]] }
 0x113   :  { %s4020_s30 = sld [smem:[#allocation11 + $0x4e]] }
 0x114   :  { %v3988_v37 = vstv %s7522_s1  ;;  %s7536_s6 = sld [smem:[#allocation35_spill]] }
 0x115   :  { %v4023_v50 = vstv %s7527_s22  ;;  %s4037_s9 = sld [smem:[#allocation11 + $0x3f]] }
 0x116   :  { %v4040_v62 = vstv %s7529_s25  ;;  %s4054_s10 = sld [smem:[#allocation11 + $0x58]] }
 0x117   :  { %7530 = sst [smem:[#allocation23_spill]] %s4002_s27  ;;  %7540 = vst [vmem:[#allocation65_spill] sm:$0xff] %v4040_v62 }
 0x118   :  { %s7546_s1 = sld [smem:[#allocation37_spill]]  ;;  %v4057_v7 = vstv %s7531_s29 }
 0x119   :  { %7534 = sst [smem:[#allocation24_spill]] %s4020_s30  ;;  %7547 = vst [vmem:[#allocation69_spill] sm:$0xff] %v4057_v7 }
 0x11a   :  { %s4071_s22 = sld [smem:[#allocation11 + $0x44]]  ;;  %v4074_v4 = vstv %s7536_s6 }
 0x11b   :  { %7539 = sst [smem:[#allocation25_spill]] %s4037_s9  ;;  %7552 = vst [vmem:[#allocation73_spill] sm:$0xff] %v4074_v4 }
 0x11c   :  { %7544 = sst [smem:[#allocation26_spill]] %s4054_s10 }
 0x11d   :  { %s7553_s25 = sld [smem:[#allocation38_spill]] }
 0x11e   :  { %s4088_s29 = sld [smem:[#allocation11 + $0x5d]]  ;;  %v4094_v9 = vstv %s7546_s1 }
 0x11f   :  { %s7558_s6 = sld [smem:[#allocation39_spill]]  ;;  %7560 = vst [vmem:[#allocation78_spill] sm:$0xff] %v4094_v9 }
 0x120   :  { %7551 = sst [smem:[#allocation27_spill]] %s4071_s22 }
 0x121   :  { %s4096_s22 = sld [smem:[#allocation11 + $0x49]] }
 0x122   :  { %s7568_s11 = sld [smem:[#allocation40_spill]] }
 0x123   :  { %v4108_v59 = vstv %s7553_s25  ;;  %s4119_s1 = sld [smem:[#allocation11 + $0x62]] }
 0x124   :  { %7557 = sst [smem:[#allocation28_spill]] %s4088_s29  ;;  %7564 = vst [vmem:[#allocation81_spill] sm:$0xff] %v4108_v59 }
 0x125   :  { %v4122_v52 = vstv %s7558_s6  ;;  %s4133_s18 = sld [smem:[#allocation11 + $0x36]] }
 0x126   :  { %v217_v35 = vpop.permute.xlu0 %216  ;;  %7570 = vst [vmem:[#allocation85_spill] sm:$0xff] %v4122_v52  ;;  %s7575_s25 = sld [smem:[#allocation41_spill]] }
 0x127   :  { %7561 = sst [smem:[#allocation29_spill]] %s4096_s22  ;;  %227 = vst.msk [vmem:[#allocation3 + $0x18] sm:$0xff] %vm226_vm3, %v217_v35  ;;  %v4131_v35 = vmul.f32 %v3879_v61, %v804_v55  ;;  %v4147_v55 = vmul.f32 %v3889_v0, %v899_v39 }
 0x128   :  { %s4138_s22 = sld [smem:[#allocation11 + $0x4f]]  ;;  %v4150_v61 = vstv %s7568_s11 }
 0x129   :  { %7569 = sst [smem:[#allocation30_spill]] %s4119_s1  ;;  %7573 = vst [vmem:[#allocation88_spill] sm:$0xff] %v4131_v35  ;;  %7582 = vst [vmem:[#allocation92_spill] sm:$0xff] %v4147_v55  ;;  %v4166_v55 = vstv %s3799_s4 }
 0x12a   :  { %s7577_s1 = sld [smem:[#allocation42_spill]]  ;;  %v219_v35 = vpop.permute.xlu1 %218  ;;  %v221_v36 = vpop.permute.xlu0 %220  ;;  %7585 = vst [vmem:[#allocation93_spill] sm:$0xff] %v4150_v61  ;;  %7593 = vst [vmem:[#allocation97_spill] sm:$0xff] %v4166_v55  ;;  %v1185_v55 = vld [vmem:[#allocation3 + $0xc] sm:$0xff] }
 0x12b   :  { %7574 = sst [smem:[#allocation31_spill]] %s4133_s18  ;;  %228 = vst.msk [vmem:[#allocation3 + $0x20] sm:$0xff] %vm226_vm3, %v219_v35  ;;  %229 = vst.msk [vmem:[#allocation3 + $0x28] sm:$0xff] %vm226_vm3, %v221_v36 }
 0x12c   :  { %s7579_s6 = sld [smem:[#allocation43_spill]]  ;;  %v4169_v60 = vstv %s7575_s25  ;;  %s7703_s25 = smov 126  }
 0x12d   :  { %s7583_s18 = sld [smem:[#allocation44_spill]]  ;;  %7595 = vst [vmem:[#allocation98_spill] sm:$0xff] %v4169_v60 }
 0x12e   :  { %7578 = sst [smem:[#allocation32_spill]] %s4138_s22  ;;  %v231_v28 = vpop.permute.xlu1 %230  ;;  %v233_v51 = vpop.permute.xlu0 %232  ;;  %v4216_v23 = vld [vmem:[#allocation3 + $0x18] sm:$0xff] }
 0x12f   :  { %s7584_s29 = sld [smem:[#allocation45_spill]]  ;;  %241 = vst.msk [vmem:[#allocation3 + $0x30] sm:$0xff] %vm240_vm4, %v231_v28  ;;  %242 = vst.msk [vmem:[#allocation3 + $0x38] sm:$0xff] %vm240_vm4, %v233_v51  ;;  %v304_v61 = vmul.f32 %v3898_v3, %v4216_v23 }
 0x130   :  { %s4152_s10 = sld [smem:[#allocation11 + $0x38]]  ;;  %v4172_v0 = vstv %s7577_s1 }
 0x131   :  { %s7587_s22 = sld [smem:[#allocation51_spill]]  ;;  %7597 = vst [vmem:[#allocation99_spill] sm:$0xff] %v4172_v0 }
 0x132   :  { %s7591_s9 = sld [smem:[#allocation46_spill]]  ;;  %v4175_v56 = vstv %s7579_s6  ;;  %s7708_s6 = smov 125  }
 0x133   :  { %s7592_s30 = sld [smem:[#allocation47_spill]]  ;;  %7598 = vst [vmem:[#allocation100_spill] sm:$0xff] %v4175_v56  ;;  %v4183_v39 = vstv %s7583_s18 }
 0x134   :  { %s7594_s11 = sld [smem:[#allocation52_spill]]  ;;  %7602 = vst [vmem:[#allocation102_spill] sm:$0xff] %v4183_v39 }
 0x135   :  { %s4177_s27 = sld [smem:[#allocation11 + $0x51]]  ;;  %v4186_v36 = vstv %s7584_s29 }
 0x136   :  { %7586 = sst [smem:[#allocation33_spill]] %s4152_s10  ;;  %7604 = vst [vmem:[#allocation103_spill] sm:$0xff] %v4186_v36 }
 0x137   :  { %s7596_s10 = sld [smem:[#allocation53_spill]]  ;;  %v4191_v35 = vstv %s7587_s22 }
 0x138   :  { %s7599_s24 = sld [smem:[#allocation48_spill]]  ;;  %7605 = vst [vmem:[#allocation104_spill] sm:$0xff] %v4191_v35  ;;  %v4194_v58 = vstv %s7591_s9  ;;  %v4247_v51 = vmul.f32 %v4191_v35, %v995_v57 }
 0x139   :  { %s7601_s21 = sld [smem:[#allocation49_spill]]  ;;  %7606 = vst [vmem:[#allocation105_spill] sm:$0xff] %v4194_v58  ;;  %v4197_v54 = vstv %s7592_s30 }
 0x13a   :  { %s7603_s14 = sld [smem:[#allocation50_spill]]  ;;  %7607 = vst [vmem:[#allocation106_spill] sm:$0xff] %v4197_v54  ;;  %v4202_v8 = vstv %s7594_s11  ;;  %v4221_v54 = vstv %s3829_s15  ;;  %7619 = vst [vmem:[#allocation118_spill] sm:$0xff] %v4247_v51  ;;  %s7724_s11 = smov 124  }
 0x13b   :  { %s4188_s4 = sld [smem:[#allocation11 + $0x39]]  ;;  %7608 = vst [vmem:[#allocation107_spill] sm:$0xff] %v4202_v8  ;;  %7613 = vst [vmem:[#allocation112_spill] sm:$0xff] %v4221_v54  ;;  %v4239_v52 = vmul.f32 %v4202_v8, %v996_v1  ;;  %v4250_v58 = vmul.f32 %v4202_v8, %v995_v57  ;;  %v4256_v36 = vmul.f32 %v4221_v54, %v1091_v40  ;;  %v4268_v57 = vld [vmem:[#allocation3 + $0x28] sm:$0xf] }
 0x13c   :  { %s4199_s1 = sld [smem:[#allocation11 + $0x52]] }
 0x13d   :  { %v4205_v53 = vstv %s7596_s10  ;;  %s4218_s3 = sld [smem:[#allocation11 + $0x3a]]  ;;  %7617 = vst [vmem:[#allocation116_spill] sm:$0xff] %v4239_v52  ;;  %7620 = vst [vmem:[#allocation119_spill] sm:$0xff] %v4250_v58  ;;  %v4323_v52 = vstv %s3886_s23 }
 0x13e   :  { %7609 = vst [vmem:[#allocation108_spill] sm:$0xff] %v4205_v53  ;;  %v4208_v27 = vstv %s7599_s24  ;;  %s4227_s24 = sld [smem:[#allocation11 + $0x53]]  ;;  %v4242_v28 = vmul.f32 %v4205_v53, %v1091_v40  ;;  %7621 = vst [vmem:[#allocation120_spill] sm:$0xff] %v4256_v36  ;;  %v245_v40 = vpop.permute.xlu0 %244  ;;  %v306_v36 = vmul.f32 %v3898_v3, %v4268_v57 }
 0x13f   :  { %7610 = vst [vmem:[#allocation109_spill] sm:$0xff] %v4208_v27  ;;  %v4211_v49 = vstv %s7601_s21  ;;  %v4236_v27 = vstv %s3833_s16  ;;  %s4244_s15 = sld [smem:[#allocation11 + $0x64]]  ;;  %255 = vst.msk [vmem:[#allocation3 + $0x48] sm:$0xff] %vm254_vm5, %v245_v40 }
 0x140   :  { %7611 = vst [vmem:[#allocation110_spill] sm:$0xff] %v4211_v49  ;;  %v4214_v60 = vstv %s7603_s14  ;;  %v4230_v49 = vmul.f32 %v4191_v35, %v996_v1  ;;  %7616 = vst [vmem:[#allocation115_spill] sm:$0xff] %v4236_v27  ;;  %s7622_s16 = sld [smem:[#allocation54_spill]]  ;;  %v4261_v1 = vmul.f32 %v4205_v53, %v1090_v29  ;;  %v4266_v35 = vld [vmem:[#allocation3 + $0x20] sm:$0xff]  ;;  %v4276_v53 = vmul.f32 %v4236_v27, %v1186_v22 }
 0x141   :  { %7612 = vst [vmem:[#allocation111_spill] sm:$0xff] %v4214_v60  ;;  %v4233_v60 = vstv %s3831_s26  ;;  %7618 = vst [vmem:[#allocation117_spill] sm:$0xff] %v4242_v28  ;;  %s4258_s26 = sld [smem:[#allocation11 + $0x7d]]  ;;  %v4264_v28 = vmul.f32 %v4221_v54, %v1090_v29  ;;  %v4282_v54 = vmul.f32 %v4236_v27, %v1185_v55  ;;  %v305_v8 = vmul.f32 %v3898_v3, %v4266_v35 }
 0x142   :  { %7614 = vst [vmem:[#allocation113_spill] sm:$0xff] %v4230_v49  ;;  %7615 = vst [vmem:[#allocation114_spill] sm:$0xff] %v4233_v60  ;;  %v4253_v49 = vadd.f32 %v304_v61, %v3940_v18  ;;  %v235_v18 = vpop.permute.xlu1 %234  ;;  %s4270_s14 = sld [smem:[#allocation11 + $0x3b]]  ;;  %v4273_v61 = vmul.f32 %v4233_v60, %v1186_v22  ;;  %v4279_v29 = vmul.f32 %v4233_v60, %v1185_v55  ;;  %v4294_v60 = vstv %s3837_s12 }
 0x143   :  { %7623 = vst [vmem:[#allocation121_spill] sm:$0xff] %v4261_v1  ;;  %7624 = vst [vmem:[#allocation122_spill] sm:$0xff] %v4264_v28  ;;  %s4296_s21 = sld [smem:[#allocation11 + $0x54]]  ;;  %v4299_v55 = vstv %s3839_s5  ;;  %v4302_v27 = vstv %s3841_s2  ;;  %v4308_v3 = vstv %s3853_s13  ;;  %v309_v40 = vadd.f32 %v306_v36, %v3682_v41  ;;  %v249_v1 = vpop.permute.xlu0 %248 }
 0x144   :  { %7625 = vst [vmem:[#allocation123_spill] sm:$0xff] %v4273_v61  ;;  %7626 = vst [vmem:[#allocation124_spill] sm:$0xff] %v4276_v53  ;;  %v4305_v53 = vstv %s3843_s17  ;;  %s4310_s30 = sld [smem:[#allocation11 + $0x40]]  ;;  %v4315_v61 = vstv %s3867_s19  ;;  %v4329_v41 = vstv %s3915_s7  ;;  %v4339_v36 = vstv %s3942_s0 }
 0x145   :  { %7627 = vst [vmem:[#allocation125_spill] sm:$0xff] %v4279_v29  ;;  %7628 = vst [vmem:[#allocation126_spill] sm:$0xff] %v4282_v54  ;;  %s7635_s12 = sld [smem:[#allocation20_spill]]  ;;  %v4318_v54 = vstv %s3881_s20  ;;  %v311_v29 = vld [vmem:[#allocation3 + $0x38] sm:$0xff] }
 0x146   :  { %243 = vst.msk [vmem:[#allocation3 + $0x40] sm:$0xff] %vm240_vm4, %v235_v18  ;;  %v4291_v22 = vstv %s7622_s16  ;;  %7630 = vst [vmem:[#allocation128_spill] sm:$0xff] %v4294_v60  ;;  %v308_v18 = vadd.f32 %v305_v8, %v3962_v30  ;;  %s7636_s9 = sld [smem:[#allocation21_spill]]  ;;  %v247_v28 = vpop.permute.xlu1 %246  ;;  %v4326_v30 = vstv %s3906_s28  ;;  %v4332_v8 = vstv %s3929_s8 }
 0x147   :  { %7629 = vst [vmem:[#allocation127_spill] sm:$0xff] %v4291_v22  ;;  %7631 = vst [vmem:[#allocation129_spill] sm:$0xff] %v4299_v55  ;;  %s7638_s5 = sld [smem:[#allocation22_spill]] }
 0x148   :  { %7632 = vst [vmem:[#allocation130_spill] sm:$0xff] %v4302_v27  ;;  %7633 = vst [vmem:[#allocation131_spill] sm:$0xff] %v4305_v53  ;;  %s4320_s2 = sld [smem:[#allocation11 + $0x59]]  ;;  %v4407_v53 = vstv %s4270_s14 }
 0x149   :  { %7634 = vst [vmem:[#allocation132_spill] sm:$0xff] %v4308_v3  ;;  %7637 = vst [vmem:[#allocation133_spill] sm:$0xff] %v4315_v61  ;;  %s7640_s17 = sld [smem:[#allocation23_spill]] }
 0x14a   :  { %7639 = vst [vmem:[#allocation134_spill] sm:$0xff] %v4318_v54  ;;  %s7641_s13 = sld [smem:[#allocation24_spill]]  ;;  %7643 = vst [vmem:[#allocation135_spill] sm:$0xff] %v4323_v52  ;;  %v259_v54 = vpop.permute.xlu1 %258  ;;  %v4421_v60 = vstv %s4310_s30 }
 0x14b   :  { %s7642_s10 = sld [smem:[#allocation25_spill]]  ;;  %7645 = vst [vmem:[#allocation136_spill] sm:$0xff] %v4326_v30  ;;  %7647 = vst [vmem:[#allocation137_spill] sm:$0xff] %v4329_v41  ;;  %v4342_v58 = vstv %s7635_s12 }
 0x14c   :  { %s7644_s22 = sld [smem:[#allocation26_spill]]  ;;  %7649 = vst [vmem:[#allocation138_spill] sm:$0xff] %v4332_v8  ;;  %256 = vst.msk [vmem:[#allocation3 + $0x50] sm:$0xff] %vm254_vm5, %v247_v28  ;;  %v4345_v51 = vstv %s7636_s9  ;;  %v324_v8 = vmul.f32 %v3945_v19, %v311_v29 }
 0x14d   :  { %s7646_s29 = sld [smem:[#allocation27_spill]]  ;;  %257 = vst.msk [vmem:[#allocation3 + $0x58] sm:$0xff] %vm254_vm5, %v249_v1  ;;  %7651 = vst [vmem:[#allocation139_spill] sm:$0xff] %v4339_v36  ;;  %v4348_v30 = vstv %s7638_s5 }
 0x14e   :  { %s7648_s19 = sld [smem:[#allocation28_spill]]  ;;  %7652 = vst [vmem:[#allocation140_spill] sm:$0xff] %v4342_v58  ;;  %7654 = vst [vmem:[#allocation141_spill] sm:$0xff] %v4345_v51  ;;  %v327_v52 = vadd.f32 %v324_v8, %v308_v18  ;;  %v296_v18 = vmul.f32 %v3895_v2, %v4216_v23  ;;  %v4410_v23 = vstv %s4244_s15  ;;  %v263_v27 = vpop.permute.xlu1 %262 }
 0x14f   :  { %s7650_s20 = sld [smem:[#allocation29_spill]]  ;;  %7656 = vst [vmem:[#allocation142_spill] sm:$0xff] %v4348_v30  ;;  %v4354_v41 = vstv %s7640_s17  ;;  %269 = vst.msk [vmem:[#allocation3 + $0x60] sm:$0xff] %vm268_vm6, %v259_v54  ;;  %v388_v54 = vld [vmem:[#allocation3 + $0x29] sm:$0xf] }
 0x150   :  { %s4334_s18 = sld [smem:[#allocation11 + $0x45]]  ;;  %7658 = vst [vmem:[#allocation143_spill] sm:$0xff] %v4354_v41  ;;  %v4357_v28 = vstv %s7641_s13  ;;  %v312_v41 = vld [vmem:[#allocation3 + $0x40] sm:$0xf]  ;;  %7675 = vst [vmem:[#allocation159_spill] sm:$0xff] %v4407_v53 }
 0x151   :  { %s7653_s23 = sld [smem:[#allocation30_spill]]  ;;  %7659 = vst [vmem:[#allocation144_spill] sm:$0xff] %v4357_v28  ;;  %v4360_v1 = vstv %s7642_s10  ;;  %v261_v28 = vpop.permute.xlu0 %260  ;;  %7676 = vst [vmem:[#allocation160_spill] sm:$0xff] %v4410_v23  ;;  %v673_v53 = vld [vmem:[#allocation3 + $0x2c] sm:$0xf] }
 0x152   :  { %s7655_s28 = sld [smem:[#allocation31_spill]]  ;;  %7660 = vst [vmem:[#allocation145_spill] sm:$0xff] %v4360_v1  ;;  %v4363_v36 = vstv %s7644_s22  ;;  %270 = vst.msk [vmem:[#allocation3 + $0x68] sm:$0xff] %vm268_vm6, %v261_v28  ;;  %v482_v28 = vld [vmem:[#allocation3 + $0x22] sm:$0xff] }
 0x153   :  { %s7657_s7 = sld [smem:[#allocation32_spill]]  ;;  %7662 = vst [vmem:[#allocation146_spill] sm:$0xff] %v4363_v36  ;;  %v4366_v58 = vstv %s7646_s29  ;;  %7679 = vst [vmem:[#allocation163_spill] sm:$0xff] %v4421_v60  ;;  %v316_v60 = vmul.f32 %v3935_v16, %v311_v29  ;;  %v672_v29 = vld [vmem:[#allocation3 + $0x24] sm:$0xff]  ;;  %v4459_v62 = vmul.f32 %v3918_v11, %v482_v28 }
 0x154   :  { %s4350_s8 = sld [smem:[#allocation11 + $0x5e]]  ;;  %7663 = vst [vmem:[#allocation147_spill] sm:$0xff] %v4366_v58  ;;  %v4369_v51 = vstv %s7648_s19  ;;  %v4404_v58 = vstv %s4227_s24  ;;  %271 = vst.msk [vmem:[#allocation3 + $0x70] sm:$0xff] %vm268_vm6, %v263_v27  ;;  %v4446_v27 = vmul.f32 %v3904_v6, %v388_v54 }
 0x155   :  { %s7661_s0 = sld [smem:[#allocation33_spill]]  ;;  %7664 = vst [vmem:[#allocation148_spill] sm:$0xff] %v4369_v51  ;;  %v4372_v30 = vstv %s7650_s20  ;;  %v325_v51 = vmul.f32 %v3945_v19, %v312_v41  ;;  %7674 = vst [vmem:[#allocation158_spill] sm:$0xff] %v4404_v58  ;;  %v128_v55 = vpop.permute.xlu0 %127  ;;  %v4418_v58 = vstv %s4296_s21 }
 0x156   :  { %7665 = vst [vmem:[#allocation149_spill] sm:$0xff] %v4372_v30  ;;  %v4392_v30 = vstv %s4177_s27  ;;  %7678 = vst [vmem:[#allocation162_spill] sm:$0xff] %v4418_v58  ;;  %v4434_v23 = vstv %s4334_s18  ;;  %v4440_v58 = vmul.f32 %v3901_v5, %v388_v54  ;;  %v130_v54 = vpop.permute.xlu1 %129  ;;  %s7698_s27 = smov 127   ;;  %s5153_s24 = sld [smem:[#allocation11 + $0x63]] }
 0x157   :  { %v4375_v61 = vstv %s7653_s23  ;;  %7670 = vst [vmem:[#allocation154_spill] sm:$0xff] %v4392_v30  ;;  %v328_v3 = vadd.f32 %v325_v51, %v309_v40  ;;  %v4413_v30 = vstv %s4258_s26  ;;  %v4424_v51 = vstv %s4320_s2  ;;  %134 = vst.msk [vmem:[#allocation2 + $0x34] sm:$0xff] %vm105_vm1, %v128_v55  ;;  %v577_v55 = vld [vmem:[#allocation3 + $0x23] sm:$0xff]  ;;  %s5163_s15 = sld [smem:[#allocation11 + $0x6e]] }
 0x158   :  { %7666 = vst [vmem:[#allocation150_spill] sm:$0xff] %v4375_v61  ;;  %v4378_v1 = vstv %s7655_s28  ;;  %v4395_v61 = vstv %s4188_s4  ;;  %7677 = vst [vmem:[#allocation161_spill] sm:$0xff] %v4413_v30  ;;  %v298_v40 = vmul.f32 %v3895_v2, %v4268_v57  ;;  %v4449_v57 = vmul.f32 %v3913_v10, %v482_v28  ;;  %v4485_v28 = vld [vmem:[#allocation3 + $0x19] sm:$0xff]  ;;  %s5133_s4 = sld [smem:[#allocation11 + $0x69]] }
 0x159   :  { %7667 = vst [vmem:[#allocation151_spill] sm:$0xff] %v4378_v1  ;;  %v4381_v36 = vstv %s7657_s7  ;;  %7671 = vst [vmem:[#allocation155_spill] sm:$0xff] %v4395_v61  ;;  %v4398_v1 = vstv %s4199_s1  ;;  %v483_v61 = vld [vmem:[#allocation3 + $0x2a] sm:$0xf]  ;;  %v183_v38 = vpop.permute.xlu0 %182  ;;  %s5139_s1 = sld [smem:[#allocation11 + $0x82]] }
 0x15a   :  { %7668 = vst [vmem:[#allocation152_spill] sm:$0xff] %v4381_v36  ;;  %7672 = vst [vmem:[#allocation156_spill] sm:$0xff] %v4398_v1  ;;  %v4401_v36 = vstv %s4218_s3  ;;  %v297_v1 = vmul.f32 %v3895_v2, %v4266_v35  ;;  %v4431_v35 = vadd.f32 %v296_v18, %v3937_v17  ;;  %v4437_v30 = vstv %s4350_s8  ;;  %v578_v18 = vld [vmem:[#allocation3 + $0x2b] sm:$0xf]  ;;  %s5147_s3 = sld [smem:[#allocation11 + $0x4a]] }
 0x15b   :  { %v4389_v8 = vstv %s7661_s0  ;;  %7673 = vst [vmem:[#allocation157_spill] sm:$0xff] %v4401_v36  ;;  %v331_v36 = vld [vmem:[#allocation3 + $0x58] sm:$0xf]  ;;  %7680 = vst [vmem:[#allocation164_spill] sm:$0xff] %v4424_v51  ;;  %v4452_v17 = vmul.f32 %v3913_v10, %v483_v61  ;;  %v301_v59 = vadd.f32 %v298_v40, %v3964_v31  ;;  %v4474_v31 = vmul.f32 %v3924_v13, %v577_v55  ;;  %s5169_s26 = sld [smem:[#allocation11 + $0x73]] }
 0x15c   :  { %7669 = vst [vmem:[#allocation153_spill] sm:$0xff] %v4389_v8  ;;  %v330_v8 = vld [vmem:[#allocation3 + $0x50] sm:$0xff]  ;;  %7681 = vst [vmem:[#allocation165_spill] sm:$0xff] %v4431_v35  ;;  %v344_v2 = vmul.f32 %v4074_v4, %v331_v36  ;;  %v4488_v40 = vmul.f32 %v3932_v15, %v672_v29  ;;  %s5178_s16 = sld [smem:[#allocation11 + $0x78]] }
 0x15d   :  { %7682 = vst [vmem:[#allocation166_spill] sm:$0xff] %v4434_v23  ;;  %7683 = vst [vmem:[#allocation167_spill] sm:$0xff] %v4437_v30  ;;  %v343_v51 = vmul.f32 %v4074_v4, %v330_v8  ;;  %v317_v30 = vmul.f32 %v3935_v16, %v312_v41  ;;  %v300_v23 = vadd.f32 %v297_v1, %v3959_v26  ;;  %v349_v16 = vld [vmem:[#allocation3 + $0x68] sm:$0xff]  ;;  %s5184_s14 = sld [smem:[#allocation11 + $0x65]] }
 0x15e   :  { %7684 = vst [vmem:[#allocation168_spill] sm:$0xff] %v4452_v17  ;;  %v335_v35 = vmul.f32 %v4057_v7, %v330_v8  ;;  %v347_v22 = vadd.f32 %v344_v2, %v328_v3  ;;  %v4462_v17 = vmul.f32 %v3918_v11, %v483_v61  ;;  %v336_v41 = vmul.f32 %v4057_v7, %v331_v36  ;;  %v387_v1 = vld [vmem:[#allocation3 + $0x21] sm:$0xff]  ;;  %s5190_s21 = sld [smem:[#allocation11 + $0x7e]] }
 0x15f   :  { %v346_v4 = vadd.f32 %v343_v51, %v327_v52  ;;  %135 = vst.msk [vmem:[#allocation2 + $0x3c] sm:$0xff] %vm105_vm1, %v130_v54  ;;  %v4468_v26 = vmul.f32 %v3921_v12, %v577_v55  ;;  %v4471_v52 = vmul.f32 %v3921_v12, %v578_v18  ;;  %v319_v3 = vadd.f32 %v316_v60, %v300_v23  ;;  %v481_v51 = vld [vmem:[#allocation3 + $0x1a] sm:$0xff]  ;;  %v350_v55 = vld [vmem:[#allocation3 + $0x70] sm:$0xf]  ;;  %s5194_s30 = sld [smem:[#allocation11 + $0x66]] }
 0x160   :  { %188 = vst.msk [vmem:[#allocation2 + $0x34] sm:$0xff] %vm161_vm2, %v183_v38  ;;  %v4477_v61 = vmul.f32 %v3924_v13, %v578_v18  ;;  %v4480_v36 = vmul.f32 %v3927_v14, %v672_v29  ;;  %v4483_v8 = vmul.f32 %v3927_v14, %v673_v53  ;;  %v320_v38 = vadd.f32 %v317_v30, %v301_v59  ;;  %v185_v18 = vpop.permute.xlu1 %184  ;;  %v576_v54 = vld [vmem:[#allocation3 + $0x1b] sm:$0xff]  ;;  %s5201_s12 = sld [smem:[#allocation11 + $0x7f]] }
 0x161   :  { %7685 = vst [vmem:[#allocation169_spill] sm:$0xff] %v4471_v52  ;;  %7689 = vst [vmem:[#allocation173_spill] sm:$0xff] %v4485_v28  ;;  %v338_v2 = vadd.f32 %v335_v35, %v319_v3  ;;  %v354_v60 = vmul.f32 %v4172_v0, %v349_v16  ;;  %v362_v23 = vmul.f32 %v4175_v56, %v349_v16  ;;  %v4492_v7 = vld [vmem:[#allocation3 + $0x1c] sm:$0xff]  ;;  %s5207_s9 = sld [smem:[#allocation11 + $0x67]] }
 0x162   :  { %7686 = vst [vmem:[#allocation170_spill] sm:$0xff] %v4477_v61  ;;  %7687 = vst [vmem:[#allocation171_spill] sm:$0xff] %v4480_v36  ;;  %v757_v36 = vpop.permute.xlu0 %756  ;;  %v339_v59 = vadd.f32 %v336_v41, %v320_v38  ;;  %v355_v30 = vmul.f32 %v4172_v0, %v350_v55  ;;  %v363_v29 = vmul.f32 %v4175_v56, %v350_v55  ;;  %v406_v35 = vld [vmem:[#allocation3 + $0x39] sm:$0xff]  ;;  %v407_v16 = vld [vmem:[#allocation3 + $0x41] sm:$0xf]  ;;  %s5217_s5 = sld [smem:[#allocation11 + $0x80]] }
 0x163   :  { %7688 = vst [vmem:[#allocation172_spill] sm:$0xff] %v4483_v8  ;;  %7690 = vst [vmem:[#allocation174_spill] sm:$0xff] %v4488_v40  ;;  %v4495_v8 = vmul.f32 %v3932_v15, %v673_v53  ;;  %v392_v3 = vmul.f32 %v3901_v5, %v387_v1  ;;  %v400_v28 = vmul.f32 %v3904_v6, %v387_v1  ;;  %v4503_v52 = vld [vmem:[#allocation3 + $0x2] sm:$0xff]  ;;  %v4515_v56 = vld [vmem:[#allocation3 + $0x3a] sm:$0xff]  ;;  %s5223_s2 = sld [smem:[#allocation11 + $0x68]] }
 0x164   :  { %189 = vst.msk [vmem:[#allocation2 + $0x3c] sm:$0xff] %vm161_vm2, %v185_v18  ;;  %v357_v40 = vadd.f32 %v354_v60, %v338_v2  ;;  %v365_v61 = vadd.f32 %v362_v23, %v346_v4  ;;  %7691 = vst [vmem:[#allocation175_spill] sm:$0xff] %v4503_v52  ;;  %v4505_v53 = vld [vmem:[#allocation3 + $0x3] sm:$0xff]  ;;  %v358_v38 = vadd.f32 %v355_v30, %v339_v59  ;;  %v425_v5 = vld [vmem:[#allocation3 + $0x51] sm:$0xff]  ;;  %s5229_s17 = sld [smem:[#allocation11 + $0x81]] }
 0x165   :  { %765 = vst.msk [vmem:[#allocation3 + $0x18] sm:$0xff] %vm226_vm3, %v757_v36  ;;  %7692 = vst [vmem:[#allocation176_spill] sm:$0xff] %v4505_v53  ;;  %v4507_v41 = vld [vmem:[#allocation3 + $0x4] sm:$0xff]  ;;  %v366_v55 = vadd.f32 %v363_v29, %v347_v22  ;;  %v4510_v18 = vmul.f32 %v3913_v10, %v481_v51  ;;  %v4513_v36 = vmul.f32 %v3918_v11, %v481_v51  ;;  %v759_v22 = vpop.permute.xlu1 %758  ;;  %v426_v59 = vld [vmem:[#allocation3 + $0x59] sm:$0xf]  ;;  %s5235_s13 = sld [smem:[#allocation11 + $0x6a]] }
 0x166   :  { %7693 = vst [vmem:[#allocation177_spill] sm:$0xff] %v4507_v41  ;;  %v376_v1 = vadd.f32 %v3955_v25, %v357_v40  ;;  %v384_v4 = vadd.f32 %v3968_v32, %v365_v61  ;;  %v4520_v2 = vmul.f32 %v3921_v12, %v576_v54  ;;  %v4523_v60 = vmul.f32 %v3924_v13, %v576_v54  ;;  %v761_v10 = vpop.permute.xlu0 %760  ;;  %v4537_v12 = vld [vmem:[#allocation3 + $0x30] sm:$0xff]  ;;  %s5241_s10 = sld [smem:[#allocation11 + $0x83]] }
 0x167   :  { %7694 = vst [vmem:[#allocation178_spill] sm:$0xff] %v4510_v18  ;;  %7695 = vst [vmem:[#allocation179_spill] sm:$0xff] %v4513_v36  ;;  %v4525_v23 = vld [vmem:[#allocation2 + $0x30] sm:$0xff]  ;;  %v411_v11 = vmul.f32 %v3948_v20, %v406_v35  ;;  %v412_v51 = vmul.f32 %v3948_v20, %v407_v16  ;;  %v377_v30 = vadd.f32 %v3983_v44, %v358_v38  ;;  %v502_v18 = vld [vmem:[#allocation3 + $0x42] sm:$0xf]  ;;  %s5247_s22 = sld [smem:[#allocation11 + $0x6b]] }
 0x168   :  { %7696 = vst [vmem:[#allocation180_spill] sm:$0xff] %v4520_v2  ;;  %7697 = vst [vmem:[#allocation181_spill] sm:$0xff] %v4523_v60  ;;  %v385_v25 = vadd.f32 %v3992_v21, %v366_v55  ;;  %1288 = vrot.lane.b32.xlu0 %v4525_v23, %s7698_s27  ;;  %v419_v13 = vmul.f32 %v3951_v24, %v406_v35  ;;  %v420_v32 = vmul.f32 %v3951_v24, %v407_v16  ;;  %v444_v40 = vld [vmem:[#allocation3 + $0x69] sm:$0xff]  ;;  %v4541_v21 = vld [vmem:[#allocation3 + $0x31] sm:$0xff]  ;;  %s5255_s29 = sld [smem:[#allocation11 + $0x84]] }
 0x169   :  { %766 = vst.msk [vmem:[#allocation3 + $0x20] sm:$0xff] %vm226_vm3, %v759_v22  ;;  %767 = vst.msk [vmem:[#allocation3 + $0x28] sm:$0xff] %vm226_vm3, %v761_v10  ;;  %v395_v61 = vadd.f32 %v392_v3, %v376_v1  ;;  %v403_v44 = vadd.f32 %v400_v28, %v384_v4  ;;  %v4543_v54 = vld [vmem:[#allocation3 + $0x32] sm:$0xff]  ;;  %v4549_v38 = vmul.f32 %v3973_v33, %v4515_v56  ;;  %v596_v55 = vld [vmem:[#allocation3 + $0x3b] sm:$0xff]  ;;  %v769_v52 = vpop.permute.xlu1 %768  ;;  %s5259_s19 = sld [smem:[#allocation11 + $0x6c]] }
 0x16a   :  { %1282 = vst.msk [vmem:[#allocation3] sm:$0xff] %vm72_vm0, %v4525_v23  ;;  %7699 = vst [vmem:[#allocation182_spill] sm:$0xff] %v4541_v21  ;;  %v4545_v29 = vld [vmem:[#allocation3 + $0x33] sm:$0xff]  ;;  %v4551_v22 = vld [vmem:[#allocation3 + $0x3c] sm:$0xff]  ;;  %v430_v35 = vmul.f32 %v4091_v34, %v425_v5  ;;  %v396_v16 = vadd.f32 %v4440_v58, %v377_v30  ;;  %v404_v28 = vadd.f32 %v4446_v27, %v385_v25  ;;  %v771_v36 = vpop.permute.xlu0 %770  ;;  %s5265_s20 = sld [smem:[#allocation11 + $0x85]] }
 0x16b   :  { %v4556_v3 = vld [vmem:[#allocation3 + $0x34] sm:$0xff]  ;;  %v431_v1 = vmul.f32 %v4091_v34, %v426_v59  ;;  %v438_v4 = vmul.f32 %v4094_v9, %v425_v5  ;;  %v414_v10 = vadd.f32 %v411_v11, %v395_v61  ;;  %v422_v41 = vadd.f32 %v419_v13, %v403_v44  ;;  %v4562_v2 = vld [vmem:[#allocation2 + $0x40] sm:$0xff]  ;;  %v634_v0 = vld [vmem:[#allocation3 + $0x6b] sm:$0xff]  ;;  %s5272_s18 = sld [smem:[#allocation11 + $0x96]] }
 0x16c   :  { %v445_v53 = vld [vmem:[#allocation3 + $0x71] sm:$0xf]  ;;  %v4560_v60 = vld [vmem:[#allocation2 + $0x38] sm:$0xff]  ;;  %v439_v58 = vmul.f32 %v4094_v9, %v426_v59  ;;  %v415_v30 = vadd.f32 %v412_v51, %v396_v16  ;;  %v423_v27 = vadd.f32 %v420_v32, %v404_v28  ;;  %v449_v25 = vmul.f32 %v4180_v63, %v444_v40  ;;  %777 = vst.msk [vmem:[#allocation3 + $0x30] sm:$0xff] %vm240_vm4, %v769_v52  ;;  %v597_v5 = vld [vmem:[#allocation3 + $0x43] sm:$0xf] }
 0x16d   :  { %1290 = vrot.lane.b32.xlu1 %v4560_v60, %s7698_s27  ;;  %1283 = vst.msk [vmem:[#allocation3 + $0x8] sm:$0xff] %vm72_vm0, %v4560_v60  ;;  %1284 = vst.msk [vmem:[#allocation3 + $0x10] sm:$0xff] %vm72_vm0, %v4562_v2  ;;  %v433_v11 = vadd.f32 %v430_v35, %v414_v10  ;;  %v441_v59 = vadd.f32 %v438_v4, %v422_v41  ;;  %v457_v51 = vmul.f32 %v4183_v39, %v444_v40  ;;  %v692_v52 = vld [vmem:[#allocation3 + $0x44] sm:$0xf]  ;;  %v4581_v28 = vld [vmem:[#allocation3 + $0x48] sm:$0xff]  ;;  %v773_v4 = vpop.permute.xlu1 %772  ;;  %s5279_s23 = sld [smem:[#allocation11 + $0x9b]] }
 0x16e   :  { %778 = vst.msk [vmem:[#allocation3 + $0x38] sm:$0xff] %vm240_vm4, %v771_v36  ;;  %v323_v13 = vmul.f32 %v3945_v19, %v4537_v12  ;;  %1292 = vrot.lane.b32.xlu0 %v4562_v2, %s7698_s27  ;;  %v434_v32 = vadd.f32 %v431_v1, %v415_v30  ;;  %v442_v61 = vadd.f32 %v439_v58, %v423_v27  ;;  %v4583_v36 = vld [vmem:[#allocation3 + $0x49] sm:$0xff]  ;;  %v781_v30 = vpop.permute.xlu0 %780  ;;  %779 = vst.msk [vmem:[#allocation3 + $0x40] sm:$0xff] %vm240_vm4, %v773_v4  ;;  %v540_v24 = vld [vmem:[#allocation3 + $0x72] sm:$0xf]  ;;  %s5284_s28 = sld [smem:[#allocation11 + $0xa0]] }
 0x16f   :  { %v450_v44 = vmul.f32 %v4180_v63, %v445_v53  ;;  %v458_v16 = vmul.f32 %v4183_v39, %v445_v53  ;;  %7700 = vst [vmem:[#allocation183_spill] sm:$0xff] %v4583_v36  ;;  %v507_v41 = vmul.f32 %v3973_v33, %v502_v18  ;;  %v452_v40 = vadd.f32 %v449_v25, %v433_v11  ;;  %v4589_v10 = vld [vmem:[#allocation3 + $0x4a] sm:$0xff]  ;;  %v4653_v20 = vld [vmem:[#allocation3 + $0x62] sm:$0xff]  ;;  %v7714_v21 = vld [vmem:[#allocation105_spill] sm:$0xff]  ;;  %s5286_s7 = sld [smem:[#allocation11 + $0xa5]] }
 0x170   :  { %v460_v35 = vadd.f32 %v457_v51, %v441_v59  ;;  %v4587_v19 = vadd.f32 %v323_v13, %v4253_v49  ;;  %v4591_v1 = vld [vmem:[#allocation3 + $0x4b] sm:$0xff]  ;;  %v514_v53 = vmul.f32 %v3976_v42, %v4515_v56  ;;  %v515_v27 = vmul.f32 %v3976_v42, %v502_v18  ;;  %v521_v13 = vld [vmem:[#allocation3 + $0x5a] sm:$0xf]  ;;  %s5290_s8 = sld [smem:[#allocation11 + $0x6d]] }
 0x171   :  { %7701 = vst [vmem:[#allocation184_spill] sm:$0xff] %v4591_v1  ;;  %v4593_v58 = vld [vmem:[#allocation3 + $0x4c] sm:$0xff]  ;;  %v453_v39 = vadd.f32 %v450_v44, %v434_v32  ;;  %v461_v63 = vadd.f32 %v458_v16, %v442_v61  ;;  %1300 = vrot.lane.b32.xlu1 %v4525_v23, %s7703_s25  ;;  %v4603_v49 = vmul.f32 %v3979_v43, %v596_v55  ;;  %v616_v16 = vld [vmem:[#allocation3 + $0x5b] sm:$0xf]  ;;  %v783_v4 = vpop.permute.xlu1 %782  ;;  %v4659_v1 = vld [vmem:[#allocation3 + $0x64] sm:$0xff]  ;;  %s5304_s0 = sld [smem:[#allocation11 + $0x6f]] }
 0x172   :  { %7702 = vst [vmem:[#allocation185_spill] sm:$0xff] %v4593_v58  ;;  %789 = vst.msk [vmem:[#allocation3 + $0x48] sm:$0xff] %vm254_vm5, %v781_v30  ;;  %v4606_v25 = vmul.f32 %v3979_v43, %v597_v5  ;;  %v471_v11 = vadd.f32 %v3996_v45, %v452_v40  ;;  %v479_v56 = vadd.f32 %v4006_v47, %v460_v35  ;;  %1302 = vrot.lane.b32.xlu0 %v4560_v60, %s7703_s25  ;;  %v520_v51 = vld [vmem:[#allocation3 + $0x52] sm:$0xff]  ;;  %v711_v40 = vld [vmem:[#allocation3 + $0x5c] sm:$0xf]  ;;  %v785_v30 = vpop.permute.xlu0 %784 }
 0x173   :  { %v4613_v18 = vmul.f32 %v3988_v37, %v596_v55  ;;  %v4616_v59 = vmul.f32 %v3988_v37, %v597_v5  ;;  %v615_v32 = vld [vmem:[#allocation3 + $0x53] sm:$0xff]  ;;  %v472_v61 = vadd.f32 %v4000_v46, %v453_v39  ;;  %v480_v44 = vadd.f32 %v4010_v48, %v461_v63  ;;  %v539_v36 = vld [vmem:[#allocation3 + $0x6a] sm:$0xff]  ;;  %7715 = vst [vmem:[#allocation186_spill] sm:$0xff] %v4659_v1 }
 0x174   :  { %v4622_v45 = vmul.f32 %v4023_v50, %v4551_v22  ;;  %v4625_v47 = vmul.f32 %v4023_v50, %v692_v52  ;;  %v710_v55 = vld [vmem:[#allocation3 + $0x54] sm:$0xff]  ;;  %v490_v5 = vadd.f32 %v4449_v57, %v471_v11  ;;  %v498_v35 = vadd.f32 %v4459_v62, %v479_v56  ;;  %v7707_v11 = vld [vmem:[#allocation82_spill] sm:$0xff]  ;;  %7929 = sst [smem:[#allocation34_spill]] %s5284_s28 }
 0x175   :  { %v7704_v46 = vld [vmem:[#allocation65_spill] sm:$0xff]  ;;  %v7705_v63 = vld [vmem:[#allocation168_spill] sm:$0xff]  ;;  %v499_v34 = vadd.f32 %v4462_v17, %v480_v44  ;;  %790 = vst.msk [vmem:[#allocation3 + $0x50] sm:$0xff] %vm254_vm5, %v783_v4  ;;  %1304 = vrot.lane.b32.xlu1 %v4562_v2, %s7703_s25  ;;  %791 = vst.msk [vmem:[#allocation3 + $0x58] sm:$0xff] %vm254_vm5, %v785_v30  ;;  %v534_v44 = vmul.f32 %v7707_v11, %v521_v13  ;;  %v552_v6 = vmul.f32 %v7714_v21, %v539_v36  ;;  %v793_v58 = vpop.permute.xlu1 %792  ;;  %7930 = sst [smem:[#allocation35_spill]] %s5286_s7 }
 0x176   :  { %v4631_v39 = vmul.f32 %v7704_v46, %v4551_v22  ;;  %v4634_v48 = vmul.f32 %v7704_v46, %v692_v52  ;;  %v491_v9 = vadd.f32 %v7705_v63, %v472_v61  ;;  %v7706_v62 = vld [vmem:[#allocation81_spill] sm:$0xff]  ;;  %v533_v22 = vmul.f32 %v7707_v11, %v520_v51  ;;  %1312 = vrot.lane.b32.xlu0 %v4525_v23, %s7708_s6  ;;  %v4647_v17 = vld [vmem:[#allocation3 + $0x60] sm:$0xff]  ;;  %s5387_s7 = sld [smem:[#allocation11 + $0x7a]] }
 0x177   :  { %v525_v57 = vmul.f32 %v7706_v62, %v520_v51  ;;  %v509_v56 = vadd.f32 %v4549_v38, %v490_v5  ;;  %v517_v52 = vadd.f32 %v514_v53, %v498_v35  ;;  %7709 = vst [vmem:[#allocation65_spill] sm:$0xff] %v4647_v17  ;;  %v526_v61 = vmul.f32 %v7706_v62, %v521_v13  ;;  %v4651_v30 = vld [vmem:[#allocation3 + $0x61] sm:$0xff]  ;;  %v729_v17 = vld [vmem:[#allocation3 + $0x6c] sm:$0xff]  ;;  %v795_v13 = vpop.permute.xlu0 %794  ;;  %s5402_s28 = sld [smem:[#allocation11 + $0x7b]] }
 0x178   :  { %v510_v4 = vadd.f32 %v507_v41, %v491_v9  ;;  %v518_v63 = vadd.f32 %v515_v27, %v499_v34  ;;  %7710 = vst [vmem:[#allocation168_spill] sm:$0xff] %v4651_v30  ;;  %7711 = vst [vmem:[#allocation81_spill] sm:$0xff] %v4653_v20  ;;  %v4655_v51 = vld [vmem:[#allocation3 + $0x63] sm:$0xff]  ;;  %v553_v27 = vmul.f32 %v7714_v21, %v540_v24 }
 0x179   :  { %7712 = vst [vmem:[#allocation82_spill] sm:$0xff] %v4655_v51  ;;  %v528_v38 = vadd.f32 %v525_v57, %v509_v56  ;;  %v536_v53 = vadd.f32 %v533_v22, %v517_v52  ;;  %v7713_v5 = vld [vmem:[#allocation103_spill] sm:$0xff]  ;;  %801 = vst.msk [vmem:[#allocation3 + $0x60] sm:$0xff] %vm268_vm6, %v793_v58  ;;  %1314 = vrot.lane.b32.xlu1 %v4560_v60, %s7708_s6  ;;  %v7719_v51 = vld [vmem:[#allocation60_spill] sm:$0xff] }
 0x17a   :  { %v544_v35 = vmul.f32 %v7713_v5, %v539_v36  ;;  %v529_v9 = vadd.f32 %v526_v61, %v510_v4  ;;  %v537_v34 = vadd.f32 %v534_v44, %v518_v63  ;;  %v545_v41 = vmul.f32 %v7713_v5, %v540_v24  ;;  %802 = vst.msk [vmem:[#allocation3 + $0x68] sm:$0xff] %vm268_vm6, %v795_v13  ;;  %v7716_v36 = vld [vmem:[#allocation85_spill] sm:$0xff]  ;;  %v7720_v5 = vld [vmem:[#allocation62_spill] sm:$0xff] }
 0x17b   :  { %v620_v57 = vmul.f32 %v7716_v36, %v615_v32  ;;  %v621_v22 = vmul.f32 %v7716_v36, %v616_v16  ;;  %v555_v52 = vadd.f32 %v552_v6, %v536_v53  ;;  %1316 = vrot.lane.b32.xlu0 %v4562_v2, %s7708_s6  ;;  %v7717_v61 = vld [vmem:[#allocation93_spill] sm:$0xff]  ;;  %v635_v6 = vld [vmem:[#allocation3 + $0x73] sm:$0xf]  ;;  %v142_v20 = vpop.permute.xlu0 %141  ;;  %v7721_v30 = vld [vmem:[#allocation98_spill] sm:$0xff] }
 0x17c   :  { %v547_v56 = vadd.f32 %v544_v35, %v528_v38  ;;  %v628_v44 = vmul.f32 %v7717_v61, %v615_v32  ;;  %v629_v24 = vmul.f32 %v7717_v61, %v616_v16  ;;  %v548_v4 = vadd.f32 %v545_v41, %v529_v9  ;;  %v7718_v63 = vld [vmem:[#allocation97_spill] sm:$0xff]  ;;  %v730_v53 = vld [vmem:[#allocation3 + $0x74] sm:$0xf]  ;;  %v797_v35 = vpop.permute.xlu1 %796  ;;  %v7723_v41 = vld [vmem:[#allocation63_spill] sm:$0xff]  ;;  %148 = vst.msk [vmem:[#allocation2 + $0x4c] sm:$0xff] %vm105_vm1, %v142_v20 }
 0x17d   :  { %v556_v58 = vadd.f32 %v553_v27, %v537_v34  ;;  %v4674_v1 = vmul.f32 %v7718_v63, %v710_v55  ;;  %v4677_v13 = vmul.f32 %v7718_v63, %v711_v40  ;;  %v574_v38 = vadd.f32 %v7720_v5, %v555_v52  ;;  %v7722_v9 = vld [vmem:[#allocation61_spill] sm:$0xff]  ;;  %803 = vst.msk [vmem:[#allocation3 + $0x70] sm:$0xff] %vm268_vm6, %v797_v35  ;;  %v7729_v20 = vld [vmem:[#allocation106_spill] sm:$0xff] }
 0x17e   :  { %v566_v21 = vadd.f32 %v7719_v51, %v547_v56  ;;  %v4682_v32 = vmul.f32 %v7721_v30, %v710_v55  ;;  %v4685_v16 = vmul.f32 %v7721_v30, %v711_v40  ;;  %v567_v34 = vadd.f32 %v7722_v9, %v548_v4  ;;  %1324 = vrot.lane.b32.xlu1 %v4525_v23, %s7724_s11  ;;  %v7727_v56 = vld [vmem:[#allocation169_spill] sm:$0xff]  ;;  %v7728_v23 = vld [vmem:[#allocation170_spill] sm:$0xff] }
 0x17f   :  { %v575_v27 = vadd.f32 %v7723_v41, %v556_v58  ;;  %v593_v5 = vadd.f32 %v4474_v31, %v574_v38  ;;  %v4697_v55 = vmul.f32 %v3927_v14, %v4492_v7  ;;  %v4701_v40 = vmul.f32 %v3932_v15, %v4492_v7  ;;  %1326 = vrot.lane.b32.xlu0 %v4560_v60, %s7724_s11  ;;  %v823_v7 = vld [vmem:[#allocation3 + $0x18] sm:$0xff]  ;;  %v196_v9 = vpop.permute.xlu0 %195  ;;  %v7731_v41 = vld [vmem:[#allocation110_spill] sm:$0xff] }
 0x180   :  { %v585_v51 = vadd.f32 %v4468_v26, %v566_v21  ;;  %v586_v52 = vadd.f32 %v7727_v56, %v567_v34  ;;  %v639_v58 = vmul.f32 %v7729_v20, %v634_v0  ;;  %v640_v26 = vmul.f32 %v7729_v20, %v635_v6  ;;  %v7730_v21 = vld [vmem:[#allocation109_spill] sm:$0xff]  ;;  %v144_v35 = vpop.permute.xlu1 %143  ;;  %201 = vst.msk [vmem:[#allocation2 + $0x4c] sm:$0xff] %vm161_vm2, %v196_v9  ;;  %v7736_v9 = vld [vmem:[#allocation128_spill] sm:$0xff] }
 0x181   :  { %7725 = vst [vmem:[#allocation85_spill] sm:$0xff] %v4697_v55  ;;  %7726 = vst [vmem:[#allocation93_spill] sm:$0xff] %v4701_v40  ;;  %v594_v4 = vadd.f32 %v7728_v23, %v575_v27  ;;  %v612_v14 = vadd.f32 %v4613_v18, %v593_v5  ;;  %v647_v38 = vmul.f32 %v7730_v21, %v634_v0  ;;  %v7732_v56 = vld [vmem:[#allocation57_spill] sm:$0xff]  ;;  %v4816_v40 = vld [vmem:[#allocation3 + $0x9] sm:$0xff] }
 0x182   :  { %v604_v31 = vadd.f32 %v4603_v49, %v585_v51  ;;  %v648_v15 = vmul.f32 %v7730_v21, %v635_v6  ;;  %v605_v60 = vadd.f32 %v4606_v25, %v586_v52  ;;  %v4716_v27 = vmul.f32 %v7731_v41, %v729_v17  ;;  %149 = vst.msk [vmem:[#allocation2 + $0x54] sm:$0xff] %vm105_vm1, %v144_v35  ;;  %v7733_v25 = vld [vmem:[#allocation111_spill] sm:$0xff]  ;;  %v7848_v55 = vld [vmem:[#allocation96_spill] sm:$0xff] }
 0x183   :  { %v613_v34 = vadd.f32 %v4616_v59, %v594_v4  ;;  %v315_v23 = vmul.f32 %v7732_v56, %v4537_v12  ;;  %1328 = vrot.lane.b32.xlu1 %v4562_v2, %s7724_s11  ;;  %v631_v49 = vadd.f32 %v628_v44, %v612_v14  ;;  %v4725_v18 = vmul.f32 %v7731_v41, %v730_v53  ;;  %v7734_v12 = vld [vmem:[#allocation127_spill] sm:$0xff]  ;;  %v824_v4 = vld [vmem:[#allocation3 + $0x20] sm:$0xff] }
 0x184   :  { %v623_v0 = vadd.f32 %v620_v57, %v604_v31  ;;  %v4728_v59 = vmul.f32 %v7733_v25, %v729_v17  ;;  %v624_v6 = vadd.f32 %v621_v22, %v605_v60  ;;  %v4731_v5 = vmul.f32 %v7733_v25, %v730_v53  ;;  %v825_v44 = vld [vmem:[#allocation3 + $0x28] sm:$0xf]  ;;  %v198_v17 = vpop.permute.xlu1 %197  ;;  %v7738_v60 = vld [vmem:[#allocation165_spill] sm:$0xff]  ;;  %7761 = vst [vmem:[#allocation128_spill] sm:$0xff] %v4816_v40 }
 0x185   :  { %v632_v51 = vadd.f32 %v629_v24, %v613_v34  ;;  %v4734_v52 = vmul.f32 %v7734_v12, %v823_v7  ;;  %v650_v35 = vadd.f32 %v647_v38, %v631_v49  ;;  %v4737_v57 = vmul.f32 %v7736_v9, %v823_v7  ;;  %v1014_v14 = vld [vmem:[#allocation3 + $0x22] sm:$0xff]  ;;  %v1015_v53 = vld [vmem:[#allocation3 + $0x2a] sm:$0xf]  ;;  %202 = vst.msk [vmem:[#allocation2 + $0x54] sm:$0xff] %vm161_vm2, %v198_v17  ;;  %v7739_v38 = vld [vmem:[#allocation64_spill] sm:$0xff] }
 0x186   :  { %v642_v2 = vadd.f32 %v639_v58, %v623_v0  ;;  %v4741_v31 = vmul.f32 %v3973_v33, %v4543_v54  ;;  %v643_v22 = vadd.f32 %v640_v26, %v624_v6  ;;  %v4744_v34 = vadd.f32 %v315_v23, %v7738_v60  ;;  %v7740_v56 = vld [vmem:[#allocation67_spill] sm:$0xff]  ;;  %v7742_v49 = vld [vmem:[#allocation66_spill] sm:$0xff] }
 0x187   :  { %7735 = vst [vmem:[#allocation97_spill] sm:$0xff] %v4734_v52  ;;  %7737 = vst [vmem:[#allocation60_spill] sm:$0xff] %v4737_v57  ;;  %v651_v24 = vadd.f32 %v648_v15, %v632_v51  ;;  %v4748_v58 = vmul.f32 %v3976_v42, %v4543_v54  ;;  %v669_v0 = vadd.f32 %v7740_v56, %v650_v35  ;;  %v4759_v15 = vld [vmem:[#allocation3] sm:$0xff]  ;;  %v7743_v51 = vld [vmem:[#allocation68_spill] sm:$0xff]  ;;  %vm2439_vm1 = vcmask 445440  }
 0x188   :  { %v661_v7 = vadd.f32 %v7739_v38, %v642_v2  ;;  %v4754_v33 = vmul.f32 %v7734_v12, %v824_v4  ;;  %v4757_v26 = vmul.f32 %v7736_v9, %v824_v4  ;;  %7741 = vst [vmem:[#allocation62_spill] sm:$0xff] %v4759_v15  ;;  %v1109_v23 = vld [vmem:[#allocation3 + $0x23] sm:$0xff]  ;;  %v662_v6 = vadd.f32 %v7742_v49, %v643_v22  ;;  %v1110_v35 = vld [vmem:[#allocation3 + $0x2b] sm:$0xf]  ;;  %v7748_v57 = vld [vmem:[#allocation129_spill] sm:$0xff] }
 0x189   :  { %v670_v42 = vadd.f32 %v7743_v51, %v651_v24  ;;  %v4764_v54 = vmul.f32 %v7734_v12, %v825_v44  ;;  %v4767_v2 = vmul.f32 %v7736_v9, %v825_v44  ;;  %v4769_v17 = vld [vmem:[#allocation3 + $0x2] sm:$0xff]  ;;  %v4776_v52 = vmul.f32 %v7748_v57, %v1014_v14  ;;  %v7751_v44 = vld [vmem:[#allocation172_spill] sm:$0xff] }
 0x18a   :  { %7744 = vst [vmem:[#allocation98_spill] sm:$0xff] %v4769_v17  ;;  %v4771_v60 = vld [vmem:[#allocation3 + $0x3] sm:$0xff]  ;;  %v4779_v22 = vmul.f32 %v7748_v57, %v1015_v53  ;;  %v681_v49 = vadd.f32 %v7751_v44, %v662_v6  ;;  %v7758_v17 = vld [vmem:[#allocation73_spill] sm:$0xff]  ;;  %v4814_v57 = vld [vmem:[#allocation3 + $0x10] sm:$0xf]  ;;  %vm2458_vm2 = vcmask 437248  }
 0x18b   :  { %7745 = vst [vmem:[#allocation61_spill] sm:$0xff] %v4771_v60  ;;  %v7746_v4 = vld [vmem:[#allocation171_spill] sm:$0xff]  ;;  %v7747_v56 = vld [vmem:[#allocation174_spill] sm:$0xff]  ;;  %v689_v51 = vadd.f32 %v4495_v8, %v670_v42  ;;  %v4806_v42 = vld [vmem:[#allocation3 + $0x13] sm:$0xf] }
 0x18c   :  { %v680_v38 = vadd.f32 %v7746_v4, %v661_v7  ;;  %v688_v15 = vadd.f32 %v7747_v56, %v669_v0  ;;  %v4781_v12 = vld [vmem:[#allocation3 + $0x4] sm:$0xff]  ;;  %v1205_v56 = vld [vmem:[#allocation3 + $0x2c] sm:$0xf]  ;;  %7756 = vst [vmem:[#allocation109_spill] sm:$0xff] %v4806_v42  ;;  %7760 = vst [vmem:[#allocation127_spill] sm:$0xff] %v4814_v57 }
 0x18d   :  { %7749 = vst [vmem:[#allocation63_spill] sm:$0xff] %v4781_v12  ;;  %v4783_v24 = vld [vmem:[#allocation2 + $0x48] sm:$0xff]  ;;  %v7752_v60 = vld [vmem:[#allocation130_spill] sm:$0xff]  ;;  %v7795_v57 = vld [vmem:[#allocation144_spill] sm:$0xff] }
 0x18e   :  { %v4785_v9 = vld [vmem:[#allocation3 + $0x1] sm:$0xff]  ;;  %v4790_v7 = vmul.f32 %v7752_v60, %v1014_v14  ;;  %v4793_v0 = vmul.f32 %v7752_v60, %v1015_v53  ;;  %1820 = vrot.lane.b32.xlu0 %v4783_v24, %s7698_s27  ;;  %v699_v12 = vadd.f32 %v4622_v45, %v680_v38  ;;  %v707_v6 = vadd.f32 %v4631_v39, %v688_v15  ;;  %v4804_v14 = vld [vmem:[#allocation3 + $0x12] sm:$0xf] }
 0x18f   :  { %7750 = vst [vmem:[#allocation169_spill] sm:$0xff] %v4785_v9  ;;  %v1204_v4 = vld [vmem:[#allocation3 + $0x24] sm:$0xff]  ;;  %1814 = vst.msk [vmem:[#allocation3] sm:$0xff] %vm72_vm0, %v4783_v24  ;;  %v4808_v53 = vld [vmem:[#allocation3 + $0x14] sm:$0xf]  ;;  %v342_v9 = vmul.f32 %v7758_v17, %v4581_v28  ;;  %v700_v45 = vadd.f32 %v4625_v47, %v681_v49  ;;  %v708_v39 = vadd.f32 %v4634_v48, %v689_v51 }
 0x190   :  { %v7753_v44 = vld [vmem:[#allocation131_spill] sm:$0xff]  ;;  %7755 = vst [vmem:[#allocation106_spill] sm:$0xff] %v4804_v14  ;;  %7757 = vst [vmem:[#allocation110_spill] sm:$0xff] %v4808_v53  ;;  %v7763_v38 = vld [vmem:[#allocation132_spill] sm:$0xff]  ;;  %v726_v40 = vadd.f32 %v4682_v32, %v707_v6 }
 0x191   :  { %v4802_v8 = vmul.f32 %v7753_v44, %v1109_v23  ;;  %v4812_v60 = vld [vmem:[#allocation3 + $0x8] sm:$0xff]  ;;  %v4821_v15 = vmul.f32 %v7753_v44, %v1110_v35  ;;  %v4824_v42 = vmul.f32 %v7763_v38, %v1109_v23  ;;  %v4826_v53 = vld [vmem:[#allocation3 + $0x11] sm:$0xf]  ;;  %v4835_v47 = vmul.f32 %v7763_v38, %v1110_v35  ;;  %v7769_v48 = vld [vmem:[#allocation133_spill] sm:$0xff] }
 0x192   :  { %7759 = vst [vmem:[#allocation57_spill] sm:$0xff] %v4812_v60  ;;  %7765 = vst [vmem:[#allocation67_spill] sm:$0xff] %v4826_v53  ;;  %v4828_v14 = vld [vmem:[#allocation3 + $0xa] sm:$0xff]  ;;  %v718_v60 = vadd.f32 %v4674_v1, %v699_v12  ;;  %v4838_v49 = vmul.f32 %v7769_v48, %v1204_v4  ;;  %v4842_v23 = vld [vmem:[#allocation2 + $0x58] sm:$0xff]  ;;  %v4849_v1 = vmul.f32 %v7769_v48, %v1205_v56 }
 0x193   :  { %7754 = vst [vmem:[#allocation170_spill] sm:$0xff] %v4802_v8  ;;  %7762 = vst [vmem:[#allocation165_spill] sm:$0xff] %v4821_v15  ;;  %v4830_v17 = vld [vmem:[#allocation3 + $0xb] sm:$0xff]  ;;  %v7773_v32 = vld [vmem:[#allocation134_spill] sm:$0xff]  ;;  %1824 = vrot.lane.b32.xlu0 %v4842_v23, %s7698_s27  ;;  %v4873_v53 = vmul.f32 %v3979_v43, %v4545_v29 }
 0x194   :  { %7764 = vst [vmem:[#allocation64_spill] sm:$0xff] %v4824_v42  ;;  %7766 = vst [vmem:[#allocation66_spill] sm:$0xff] %v4828_v14  ;;  %v4840_v51 = vld [vmem:[#allocation2 + $0x50] sm:$0xff]  ;;  %v719_v14 = vadd.f32 %v4677_v13, %v700_v45  ;;  %v4852_v12 = vmul.f32 %v7773_v32, %v1204_v4  ;;  %v737_v13 = vadd.f32 %v4716_v27, %v718_v60  ;;  %v843_v45 = vld [vmem:[#allocation3 + $0x38] sm:$0xff] }
 0x195   :  { %7767 = vst [vmem:[#allocation68_spill] sm:$0xff] %v4830_v17  ;;  %7768 = vst [vmem:[#allocation171_spill] sm:$0xff] %v4835_v47  ;;  %v4844_v44 = vld [vmem:[#allocation3 + $0xc] sm:$0xff]  ;;  %v727_v17 = vadd.f32 %v4685_v16, %v708_v39  ;;  %1822 = vrot.lane.b32.xlu1 %v4840_v51, %s7698_s27  ;;  %v745_v16 = vadd.f32 %v4728_v59, %v726_v40  ;;  %v4863_v6 = vmul.f32 %v7773_v32, %v1205_v56  ;;  %v844_v4 = vld [vmem:[#allocation3 + $0x40] sm:$0xf]  ;;  %s5379_s27 = sld [smem:[#allocation11 + $0x79]] }
 0x196   :  { %7770 = vst [vmem:[#allocation174_spill] sm:$0xff] %v4838_v49  ;;  %7771 = vst [vmem:[#allocation172_spill] sm:$0xff] %v4844_v44  ;;  %v842_v35 = vld [vmem:[#allocation3 + $0x30] sm:$0xff]  ;;  %v4866_v39 = vadd.f32 %v342_v9, %v4587_v19  ;;  %v4877_v40 = vmul.f32 %v3988_v37, %v4545_v29  ;;  %v4881_v27 = vmul.f32 %v4023_v50, %v4556_v3  ;;  %v1033_v59 = vld [vmem:[#allocation3 + $0x3a] sm:$0xff] }
 0x197   :  { %7772 = vst [vmem:[#allocation73_spill] sm:$0xff] %v4849_v1  ;;  %7774 = vst [vmem:[#allocation187_spill] sm:$0xff] %v4852_v12  ;;  %v746_v44 = vadd.f32 %v4731_v5, %v727_v17  ;;  %v738_v19 = vadd.f32 %v4725_v18, %v719_v14  ;;  %v4886_v60 = vmul.f32 %v7704_v46, %v4556_v3  ;;  %v7778_v5 = vld [vmem:[#allocation135_spill] sm:$0xff]  ;;  %v7780_v43 = vld [vmem:[#allocation136_spill] sm:$0xff]  ;;  %1834 = vrot.lane.b32.xlu0 %v4840_v51, %s7703_s25 }
 0x198   :  { %1815 = vst.msk [vmem:[#allocation3 + $0x8] sm:$0xff] %vm72_vm0, %v4840_v51  ;;  %1816 = vst.msk [vmem:[#allocation3 + $0x10] sm:$0xff] %vm72_vm0, %v4842_v23  ;;  %v4889_v9 = vmul.f32 %v7778_v5, %v842_v35  ;;  %v4892_v56 = vmul.f32 %v7780_v43, %v842_v35  ;;  %v1034_v17 = vld [vmem:[#allocation3 + $0x42] sm:$0xf]  ;;  %v7782_v37 = vld [vmem:[#allocation84_spill] sm:$0xff]  ;;  %v848_v32 = vmul.f32 %v7778_v5, %v843_v45  ;;  %vm2492_vm0 = vcmask 424960  }
 0x199   :  { %7775 = vst [vmem:[#allocation188_spill] sm:$0xff] %v4863_v6  ;;  %7776 = vst [vmem:[#allocation189_spill] sm:$0xff] %v4881_v27  ;;  %v822_v29 = vadd.f32 %v7782_v37, %v746_v44  ;;  %v856_v50 = vmul.f32 %v7780_v43, %v843_v45  ;;  %v849_v48 = vmul.f32 %v7778_v5, %v844_v4  ;;  %v1128_v18 = vld [vmem:[#allocation3 + $0x3b] sm:$0xff]  ;;  %v1129_v14 = vld [vmem:[#allocation3 + $0x43] sm:$0xf]  ;;  %1832 = vrot.lane.b32.xlu1 %v4783_v24, %s7703_s25 }
 0x19a   :  { %7777 = vst [vmem:[#allocation190_spill] sm:$0xff] %v4886_v60  ;;  %7779 = vst [vmem:[#allocation135_spill] sm:$0xff] %v4889_v9  ;;  %v7783_v3 = vld [vmem:[#allocation87_spill] sm:$0xff]  ;;  %v7784_v38 = vld [vmem:[#allocation89_spill] sm:$0xff]  ;;  %v857_v35 = vmul.f32 %v7780_v43, %v844_v4 }
 0x19b   :  { %7781 = vst [vmem:[#allocation136_spill] sm:$0xff] %v4892_v56  ;;  %v813_v46 = vadd.f32 %v7783_v3, %v737_v13  ;;  %v821_v6 = vadd.f32 %v7784_v38, %v745_v16  ;;  %v7785_v1 = vld [vmem:[#allocation137_spill] sm:$0xff]  ;;  %v841_v45 = vadd.f32 %v4767_v2, %v822_v29  ;;  %v7786_v37 = vld [vmem:[#allocation138_spill] sm:$0xff]  ;;  %v7787_v4 = vld [vmem:[#allocation83_spill] sm:$0xff]  ;;  %1844 = vrot.lane.b32.xlu0 %v4783_v24, %s7708_s6 }
 0x19c   :  { %v4904_v12 = vmul.f32 %v7785_v1, %v1033_v59  ;;  %v863_v44 = vld [vmem:[#allocation3 + $0x58] sm:$0xf]  ;;  %v4910_v5 = vmul.f32 %v7785_v1, %v1034_v17  ;;  %v4913_v49 = vmul.f32 %v7786_v37, %v1033_v59  ;;  %v4916_v13 = vmul.f32 %v7786_v37, %v1034_v17  ;;  %v1223_v38 = vld [vmem:[#allocation3 + $0x3c] sm:$0xff]  ;;  %v1224_v16 = vld [vmem:[#allocation3 + $0x44] sm:$0xf] }
 0x19d   :  { %v814_v43 = vadd.f32 %v7787_v4, %v738_v19  ;;  %v7788_v3 = vld [vmem:[#allocation139_spill] sm:$0xff]  ;;  %v7791_v2 = vld [vmem:[#allocation140_spill] sm:$0xff]  ;;  %v860_v1 = vadd.f32 %v857_v35, %v841_v45  ;;  %v7794_v17 = vld [vmem:[#allocation69_spill] sm:$0xff]  ;;  %v876_v47 = vmul.f32 %v7795_v57, %v863_v44  ;;  %1836 = vrot.lane.b32.xlu1 %v4842_v23, %s7703_s25  ;;  %v832_v19 = vadd.f32 %v4754_v33, %v813_v46  ;;  %s5369_s25 = sld [smem:[#allocation11 + $0x77]] }
 0x19e   :  { %v4920_v56 = vmul.f32 %v7788_v3, %v1128_v18  ;;  %v4923_v9 = vmul.f32 %v7788_v3, %v1129_v14  ;;  %v4926_v29 = vmul.f32 %v7791_v2, %v1128_v18  ;;  %v4929_v59 = vmul.f32 %v7791_v2, %v1129_v14  ;;  %v7796_v3 = vld [vmem:[#allocation141_spill] sm:$0xff]  ;;  %v7799_v14 = vld [vmem:[#allocation142_spill] sm:$0xff]  ;;  %v7843_v42 = vld [vmem:[#allocation71_spill] sm:$0xff] }
 0x19f   :  { %v334_v37 = vmul.f32 %v7794_v17, %v4581_v28  ;;  %v840_v4 = vadd.f32 %v4757_v26, %v821_v6  ;;  %v4942_v18 = vmul.f32 %v7796_v3, %v1224_v16  ;;  %v4947_v28 = vmul.f32 %v7799_v14, %v1223_v38  ;;  %v861_v26 = vld [vmem:[#allocation3 + $0x48] sm:$0xff]  ;;  %v7802_v17 = vld [vmem:[#allocation184_spill] sm:$0xff]  ;;  %1848 = vrot.lane.b32.xlu0 %v4842_v23, %s7708_s6  ;;  %v958_v15 = vld [vmem:[#allocation3 + $0x59] sm:$0xf] }
 0x1a0   :  { %7789 = vst [vmem:[#allocation84_spill] sm:$0xff] %v4920_v56  ;;  %7790 = vst [vmem:[#allocation87_spill] sm:$0xff] %v4923_v9  ;;  %v4939_v9 = vmul.f32 %v7796_v3, %v1223_v38  ;;  %v4950_v35 = vmul.f32 %v7799_v14, %v1224_v16  ;;  %v4954_v33 = vmul.f32 %v7706_v62, %v4589_v10  ;;  %v862_v14 = vld [vmem:[#allocation3 + $0x50] sm:$0xff]  ;;  %v7803_v62 = vld [vmem:[#allocation185_spill] sm:$0xff] }
 0x1a1   :  { %7792 = vst [vmem:[#allocation89_spill] sm:$0xff] %v4926_v29  ;;  %7793 = vst [vmem:[#allocation83_spill] sm:$0xff] %v4929_v59  ;;  %v4956_v6 = vadd.f32 %v876_v47, %v860_v1  ;;  %v833_v46 = vadd.f32 %v4764_v54, %v814_v43  ;;  %v4961_v45 = vmul.f32 %v7707_v11, %v4589_v10  ;;  %v1052_v54 = vld [vmem:[#allocation3 + $0x52] sm:$0xff]  ;;  %v7806_v43 = vld [vmem:[#allocation99_spill] sm:$0xff]  ;;  %1846 = vrot.lane.b32.xlu1 %v4840_v51, %s7708_s6  ;;  %s5361_s6 = sld [smem:[#allocation11 + $0x76]] }
 0x1a2   :  { %7797 = vst [vmem:[#allocation69_spill] sm:$0xff] %v4939_v9  ;;  %7798 = vst [vmem:[#allocation144_spill] sm:$0xff] %v4942_v18  ;;  %v4965_v38 = vmul.f32 %v7716_v36, %v7802_v17  ;;  %v4969_v16 = vmul.f32 %v7717_v61, %v7802_v17  ;;  %v4973_v3 = vmul.f32 %v7718_v63, %v7803_v62  ;;  %v7805_v1 = vld [vmem:[#allocation65_spill] sm:$0xff]  ;;  %v7807_v11 = vld [vmem:[#allocation100_spill] sm:$0xff] }
 0x1a3   :  { %7800 = vst [vmem:[#allocation191_spill] sm:$0xff] %v4947_v28  ;;  %7801 = vst [vmem:[#allocation192_spill] sm:$0xff] %v4950_v35  ;;  %v337_v47 = vadd.f32 %v334_v37, %v4744_v34  ;;  %v353_v10 = vmul.f32 %v7806_v43, %v7805_v1  ;;  %v361_v2 = vmul.f32 %v7807_v11, %v7805_v1  ;;  %v7809_v63 = vld [vmem:[#allocation143_spill] sm:$0xff]  ;;  %v1053_v1 = vld [vmem:[#allocation3 + $0x5a] sm:$0xf]  ;;  %1858 = vrot.lane.b32.xlu0 %v4840_v51, %s7724_s11 }
 0x1a4   :  { %7804 = vst [vmem:[#allocation184_spill] sm:$0xff] %v4973_v3  ;;  %v851_v36 = vadd.f32 %v848_v32, %v832_v19  ;;  %v859_v61 = vadd.f32 %v856_v50, %v840_v4  ;;  %v4984_v17 = vmul.f32 %v7721_v30, %v7803_v62  ;;  %v4987_v35 = vmul.f32 %v7809_v63, %v861_v26  ;;  %v7812_v4 = vld [vmem:[#allocation145_spill] sm:$0xff]  ;;  %v7813_v28 = vld [vmem:[#allocation79_spill] sm:$0xff] }
 0x1a5   :  { %v4992_v34 = vmul.f32 %v7795_v57, %v861_v26  ;;  %v867_v37 = vmul.f32 %v7809_v63, %v862_v14  ;;  %v356_v43 = vadd.f32 %v353_v10, %v337_v47  ;;  %v364_v32 = vadd.f32 %v361_v2, %v4866_v39  ;;  %v1147_v11 = vld [vmem:[#allocation3 + $0x53] sm:$0xff]  ;;  %v1148_v18 = vld [vmem:[#allocation3 + $0x5b] sm:$0xf]  ;;  %v7816_v59 = vld [vmem:[#allocation55_spill] sm:$0xff]  ;;  %1856 = vrot.lane.b32.xlu1 %v4783_v24, %s7724_s11 }
 0x1a6   :  { %7808 = vst [vmem:[#allocation185_spill] sm:$0xff] %v4984_v17  ;;  %7810 = vst [vmem:[#allocation65_spill] sm:$0xff] %v4987_v35  ;;  %v852_v50 = vadd.f32 %v849_v48, %v833_v46  ;;  %v875_v19 = vmul.f32 %v7795_v57, %v862_v14  ;;  %v868_v30 = vmul.f32 %v7809_v63, %v863_v44  ;;  %v7814_v26 = vld [vmem:[#allocation80_spill] sm:$0xff]  ;;  %v7815_v35 = vld [vmem:[#allocation173_spill] sm:$0xff] }
 0x1a7   :  { %7811 = vst [vmem:[#allocation99_spill] sm:$0xff] %v4992_v34  ;;  %v4999_v62 = vmul.f32 %v7812_v4, %v1052_v54  ;;  %v375_v9 = vadd.f32 %v7813_v28, %v356_v43  ;;  %v383_v34 = vadd.f32 %v7814_v26, %v364_v32  ;;  %v391_v29 = vmul.f32 %v7816_v59, %v7815_v35  ;;  %v7817_v47 = vld [vmem:[#allocation56_spill] sm:$0xff]  ;;  %v7818_v2 = vld [vmem:[#allocation146_spill] sm:$0xff]  ;;  %v7839_v56 = vld [vmem:[#allocation151_spill] sm:$0xff] }
 0x1a8   :  { %v399_v39 = vmul.f32 %v7817_v47, %v7815_v35  ;;  %v870_v57 = vadd.f32 %v867_v37, %v851_v36  ;;  %v878_v48 = vadd.f32 %v875_v19, %v859_v61  ;;  %v5010_v44 = vmul.f32 %v7812_v4, %v1053_v1  ;;  %v7819_v59 = vld [vmem:[#allocation182_spill] sm:$0xff]  ;;  %v7821_v35 = vld [vmem:[#allocation59_spill] sm:$0xff]  ;;  %v957_v3 = vld [vmem:[#allocation3 + $0x51] sm:$0xff] }
 0x1a9   :  { %v5013_v14 = vmul.f32 %v7818_v2, %v1052_v54  ;;  %v394_v28 = vadd.f32 %v391_v29, %v375_v9  ;;  %v7820_v10 = vld [vmem:[#allocation58_spill] sm:$0xff]  ;;  %v418_v43 = vmul.f32 %v7821_v35, %v7819_v59  ;;  %v871_v24 = vadd.f32 %v868_v30, %v852_v50  ;;  %v7822_v61 = vld [vmem:[#allocation147_spill] sm:$0xff]  ;;  %1860 = vrot.lane.b32.xlu1 %v4842_v23, %s7724_s11  ;;  %s5332_s11 = sld [smem:[#allocation11 + $0x72]] }
 0x1aa   :  { %v402_v46 = vadd.f32 %v399_v39, %v383_v34  ;;  %v410_v63 = vmul.f32 %v7820_v10, %v7819_v59  ;;  %v5022_v36 = vmul.f32 %v7818_v2, %v1053_v1  ;;  %v5025_v37 = vmul.f32 %v7822_v61, %v1147_v11  ;;  %v919_v32 = vld [vmem:[#allocation3 + $0x21] sm:$0xff]  ;;  %v7826_v34 = vld [vmem:[#allocation77_spill] sm:$0xff]  ;;  %v920_v39 = vld [vmem:[#allocation3 + $0x29] sm:$0xf] }
 0x1ab   :  { %v5028_v54 = vmul.f32 %v7822_v61, %v1148_v18  ;;  %v7825_v29 = vld [vmem:[#allocation183_spill] sm:$0xff]  ;;  %v7827_v26 = vld [vmem:[#allocation78_spill] sm:$0xff]  ;;  %v7828_v1 = vld [vmem:[#allocation148_spill] sm:$0xff] }
 0x1ac   :  { %7823 = vst [vmem:[#allocation100_spill] sm:$0xff] %v5025_v37  ;;  %v413_v51 = vadd.f32 %v410_v63, %v394_v28  ;;  %v421_v9 = vadd.f32 %v418_v43, %v402_v46  ;;  %v429_v19 = vmul.f32 %v7826_v34, %v7825_v29  ;;  %v437_v47 = vmul.f32 %v7827_v26, %v7825_v29  ;;  %v7831_v59 = vld [vmem:[#allocation168_spill] sm:$0xff]  ;;  %v7832_v10 = vld [vmem:[#allocation101_spill] sm:$0xff]  ;;  %v7833_v46 = vld [vmem:[#allocation102_spill] sm:$0xff] }
 0x1ad   :  { %7824 = vst [vmem:[#allocation143_spill] sm:$0xff] %v5028_v54  ;;  %v5037_v50 = vmul.f32 %v7828_v1, %v1147_v11  ;;  %v5040_v30 = vmul.f32 %v7828_v1, %v1148_v18  ;;  %v448_v28 = vmul.f32 %v7832_v10, %v7831_v59  ;;  %v456_v63 = vmul.f32 %v7833_v46, %v7831_v59  ;;  %v881_v35 = vld [vmem:[#allocation3 + $0x68] sm:$0xff]  ;;  %v938_v43 = vld [vmem:[#allocation3 + $0x39] sm:$0xff]  ;;  %v939_v34 = vld [vmem:[#allocation3 + $0x41] sm:$0xf] }
 0x1ae   :  { %v432_v29 = vadd.f32 %v429_v19, %v413_v51  ;;  %v440_v26 = vadd.f32 %v437_v47, %v421_v9  ;;  %v7834_v61 = vld [vmem:[#allocation81_spill] sm:$0xff]  ;;  %v7835_v2 = vld [vmem:[#allocation103_spill] sm:$0xff]  ;;  %v882_v54 = vld [vmem:[#allocation3 + $0x70] sm:$0xf]  ;;  %v886_v51 = vmul.f32 %v7839_v56, %v881_v35 }
 0x1af   :  { %7829 = vst [vmem:[#allocation79_spill] sm:$0xff] %v5037_v50  ;;  %7830 = vst [vmem:[#allocation80_spill] sm:$0xff] %v5040_v30  ;;  %v543_v23 = vmul.f32 %v7835_v2, %v7834_v61  ;;  %v7836_v11 = vld [vmem:[#allocation105_spill] sm:$0xff]  ;;  %v7838_v10 = vld [vmem:[#allocation154_spill] sm:$0xff] }
 0x1b0   :  { %v551_v4 = vmul.f32 %v7836_v11, %v7834_v61  ;;  %v7837_v18 = vld [vmem:[#allocation153_spill] sm:$0xff]  ;;  %v932_v50 = vmul.f32 %v7838_v10, %v919_v32  ;;  %v933_v59 = vmul.f32 %v7838_v10, %v920_v39  ;;  %v451_v46 = vadd.f32 %v448_v28, %v432_v29  ;;  %v7840_v9 = vld [vmem:[#allocation152_spill] sm:$0xff]  ;;  %v7841_v47 = vld [vmem:[#allocation155_spill] sm:$0xff] }
 0x1b1   :  { %v924_v1 = vmul.f32 %v7837_v18, %v919_v32  ;;  %v925_v30 = vmul.f32 %v7837_v18, %v920_v39  ;;  %v459_v37 = vadd.f32 %v456_v63, %v440_v26  ;;  %v894_v19 = vmul.f32 %v7840_v9, %v881_v35  ;;  %v7842_v18 = vld [vmem:[#allocation70_spill] sm:$0xff]  ;;  %v7844_v29 = vld [vmem:[#allocation156_spill] sm:$0xff]  ;;  %v7846_v27 = vld [vmem:[#allocation179_spill] sm:$0xff] }
 0x1b2   :  { %v943_v2 = vmul.f32 %v7841_v47, %v938_v43  ;;  %v944_v17 = vmul.f32 %v7841_v47, %v939_v34  ;;  %v887_v61 = vmul.f32 %v7839_v56, %v882_v54  ;;  %v895_v11 = vmul.f32 %v7840_v9, %v882_v54  ;;  %v7845_v47 = vld [vmem:[#allocation178_spill] sm:$0xff] }
 0x1b3   :  { %v470_v32 = vadd.f32 %v7842_v18, %v451_v46  ;;  %v478_v39 = vadd.f32 %v7843_v42, %v459_v37  ;;  %v889_v28 = vadd.f32 %v886_v51, %v870_v57  ;;  %v897_v63 = vadd.f32 %v894_v19, %v878_v48  ;;  %v7847_v54 = vld [vmem:[#allocation94_spill] sm:$0xff]  ;;  %v7849_v18 = vld [vmem:[#allocation157_spill] sm:$0xff]  ;;  %v7851_v37 = vld [vmem:[#allocation91_spill] sm:$0xff] }
 0x1b4   :  { %v951_v26 = vmul.f32 %v7844_v29, %v938_v43  ;;  %v952_v35 = vmul.f32 %v7844_v29, %v939_v34  ;;  %v890_v10 = vadd.f32 %v887_v61, %v871_v24  ;;  %v898_v8 = vadd.f32 %v895_v11, %v4956_v6  ;;  %v7850_v57 = vld [vmem:[#allocation90_spill] sm:$0xff]  ;;  %v976_v19 = vld [vmem:[#allocation3 + $0x69] sm:$0xff] }
 0x1b5   :  { %v489_v60 = vadd.f32 %v7845_v47, %v470_v32  ;;  %v497_v56 = vadd.f32 %v7846_v27, %v478_v39  ;;  %v908_v9 = vadd.f32 %v7847_v54, %v889_v28  ;;  %v916_v25 = vadd.f32 %v7848_v55, %v897_v63  ;;  %v7852_v27 = vld [vmem:[#allocation158_spill] sm:$0xff] }
 0x1b6   :  { %v962_v46 = vmul.f32 %v7849_v18, %v957_v3  ;;  %v963_v42 = vmul.f32 %v7849_v18, %v958_v15  ;;  %v909_v48 = vadd.f32 %v7850_v57, %v890_v10  ;;  %v917_v43 = vadd.f32 %v7851_v37, %v898_v8  ;;  %v977_v8 = vld [vmem:[#allocation3 + $0x71] sm:$0xf]  ;;  %v7857_v37 = vld [vmem:[#allocation149_spill] sm:$0xff] }
 0x1b7   :  { %v508_v24 = vadd.f32 %v4741_v31, %v489_v60  ;;  %v516_v6 = vadd.f32 %v4748_v58, %v497_v56  ;;  %v927_v34 = vadd.f32 %v924_v1, %v908_v9  ;;  %v935_v51 = vadd.f32 %v932_v50, %v916_v25  ;;  %v7853_v60 = vld [vmem:[#allocation159_spill] sm:$0xff]  ;;  %v7854_v56 = vld [vmem:[#allocation162_spill] sm:$0xff]  ;;  %v1242_v1 = vld [vmem:[#allocation3 + $0x54] sm:$0xff] }
 0x1b8   :  { %v970_v47 = vmul.f32 %v7852_v27, %v957_v3  ;;  %v971_v61 = vmul.f32 %v7852_v27, %v958_v15  ;;  %v928_v55 = vadd.f32 %v925_v30, %v909_v48  ;;  %v936_v11 = vadd.f32 %v933_v59, %v917_v43  ;;  %v1243_v50 = vld [vmem:[#allocation3 + $0x5c] sm:$0xf] }
 0x1b9   :  { %v527_v32 = vadd.f32 %v4954_v33, %v508_v24  ;;  %v535_v39 = vadd.f32 %v4961_v45, %v516_v6  ;;  %v946_v10 = vadd.f32 %v943_v2, %v927_v34  ;;  %v954_v28 = vadd.f32 %v951_v26, %v935_v51  ;;  %v7855_v2 = vld [vmem:[#allocation72_spill] sm:$0xff]  ;;  %v7859_v6 = vld [vmem:[#allocation181_spill] sm:$0xff]  ;;  %v7860_v51 = vld [vmem:[#allocation118_spill] sm:$0xff] }
 0x1ba   :  { %v947_v63 = vadd.f32 %v944_v17, %v928_v55  ;;  %v955_v31 = vadd.f32 %v952_v35, %v936_v11  ;;  %v981_v58 = vmul.f32 %v7853_v60, %v976_v19  ;;  %v989_v25 = vmul.f32 %v7854_v56, %v976_v19  ;;  %v7856_v17 = vld [vmem:[#allocation74_spill] sm:$0xff] }
 0x1bb   :  { %v546_v3 = vadd.f32 %v543_v23, %v527_v32  ;;  %v554_v9 = vadd.f32 %v551_v4, %v535_v39  ;;  %v965_v15 = vadd.f32 %v962_v46, %v946_v10  ;;  %v973_v30 = vadd.f32 %v970_v47, %v954_v28  ;;  %v7861_v47 = vld [vmem:[#allocation119_spill] sm:$0xff]  ;;  %v7862_v55 = vld [vmem:[#allocation150_spill] sm:$0xff]  ;;  %v7863_v39 = vld [vmem:[#allocation113_spill] sm:$0xff] }
 0x1bc   :  { %v966_v59 = vadd.f32 %v963_v42, %v947_v63  ;;  %v974_v54 = vadd.f32 %v971_v61, %v955_v31  ;;  %v982_v33 = vmul.f32 %v7853_v60, %v977_v8  ;;  %v990_v45 = vmul.f32 %v7854_v56, %v977_v8  ;;  %v7858_v42 = vld [vmem:[#allocation180_spill] sm:$0xff] }
 0x1bd   :  { %v565_v26 = vadd.f32 %v7855_v2, %v546_v3  ;;  %v573_v35 = vadd.f32 %v7856_v17, %v554_v9  ;;  %v984_v57 = vadd.f32 %v981_v58, %v965_v15  ;;  %v992_v48 = vadd.f32 %v989_v25, %v973_v30  ;;  %v7864_v28 = vld [vmem:[#allocation116_spill] sm:$0xff]  ;;  %v7865_v9 = vld [vmem:[#allocation82_spill] sm:$0xff]  ;;  %v7868_v17 = vld [vmem:[#allocation75_spill] sm:$0xff] }
 0x1be   :  { %v5086_v43 = vmul.f32 %v7857_v37, %v1242_v1  ;;  %v5089_v23 = vmul.f32 %v7857_v37, %v1243_v50  ;;  %v985_v4 = vadd.f32 %v982_v33, %v966_v59  ;;  %v993_v46 = vadd.f32 %v990_v45, %v974_v54  ;;  %v1071_v3 = vld [vmem:[#allocation3 + $0x6a] sm:$0xff] }
 0x1bf   :  { %v584_v24 = vadd.f32 %v7858_v42, %v565_v26  ;;  %v592_v34 = vadd.f32 %v7859_v6, %v573_v35  ;;  %v1003_v19 = vadd.f32 %v7860_v51, %v984_v57  ;;  %v1011_v61 = vadd.f32 %v7861_v47, %v992_v48  ;;  %v7866_v33 = vld [vmem:[#allocation163_spill] sm:$0xff]  ;;  %v7869_v35 = vld [vmem:[#allocation76_spill] sm:$0xff]  ;;  %v880_v48 = vld [vmem:[#allocation3 + $0x60] sm:$0xff] }
 0x1c0   :  { %v5096_v11 = vmul.f32 %v7862_v55, %v1242_v1  ;;  %v5099_v32 = vmul.f32 %v7862_v55, %v1243_v50  ;;  %v1004_v10 = vadd.f32 %v7863_v39, %v985_v4  ;;  %v1012_v8 = vadd.f32 %v7864_v28, %v993_v46  ;;  %v7870_v42 = vld [vmem:[#allocation186_spill] sm:$0xff]  ;;  %v7873_v51 = vld [vmem:[#allocation93_spill] sm:$0xff] }
 0x1c1   :  { %v603_v63 = vadd.f32 %v4873_v53, %v584_v24  ;;  %v611_v31 = vadd.f32 %v4877_v40, %v592_v34  ;;  %v1022_v58 = vadd.f32 %v4776_v52, %v1003_v19  ;;  %v1030_v25 = vadd.f32 %v4790_v7, %v1011_v61  ;;  %v1072_v7 = vld [vmem:[#allocation3 + $0x72] sm:$0xf]  ;;  %v918_v47 = vld [vmem:[#allocation3 + $0x19] sm:$0xff] }
 0x1c2   :  { %v638_v1 = vmul.f32 %v7729_v20, %v7865_v9  ;;  %v646_v50 = vmul.f32 %v7730_v21, %v7865_v9  ;;  %v1023_v15 = vadd.f32 %v4779_v22, %v1004_v10  ;;  %v1031_v30 = vadd.f32 %v4793_v0, %v1012_v8  ;;  %v7867_v21 = vld [vmem:[#allocation164_spill] sm:$0xff]  ;;  %v7874_v61 = vld [vmem:[#allocation121_spill] sm:$0xff]  ;;  %v7875_v10 = vld [vmem:[#allocation122_spill] sm:$0xff] }
 0x1c3   :  { %v622_v59 = vadd.f32 %v4965_v38, %v603_v63  ;;  %v630_v53 = vadd.f32 %v4969_v16, %v611_v31  ;;  %v1041_v40 = vadd.f32 %v4904_v12, %v1022_v58  ;;  %v1049_v52 = vadd.f32 %v4913_v49, %v1030_v25  ;;  %v1166_v8 = vld [vmem:[#allocation3 + $0x6b] sm:$0xff]  ;;  %v7878_v25 = vld [vmem:[#allocation117_spill] sm:$0xff] }
 0x1c4   :  { %v1042_v54 = vadd.f32 %v4910_v5, %v1023_v15  ;;  %v1050_v20 = vadd.f32 %v4916_v13, %v1031_v30  ;;  %v1076_v45 = vmul.f32 %v7866_v33, %v1071_v3  ;;  %v1084_v2 = vmul.f32 %v7867_v21, %v1071_v3  ;;  %v7877_v31 = vld [vmem:[#allocation152_spill] sm:$0xff]  ;;  %v7881_v30 = vld [vmem:[#allocation190_spill] sm:$0xff] }
 0x1c5   :  { %v641_v22 = vadd.f32 %v638_v1, %v622_v59  ;;  %v649_v26 = vadd.f32 %v646_v50, %v630_v53  ;;  %v1060_v0 = vadd.f32 %v4999_v62, %v1041_v40  ;;  %v1068_v38 = vadd.f32 %v5013_v14, %v1049_v52  ;;  %v7871_v14 = vld [vmem:[#allocation111_spill] sm:$0xff]  ;;  %v7879_v9 = vld [vmem:[#allocation120_spill] sm:$0xff]  ;;  %v7880_v50 = vld [vmem:[#allocation189_spill] sm:$0xff] }
 0x1c6   :  { %v1061_v16 = vadd.f32 %v5010_v44, %v1042_v54  ;;  %v1069_v12 = vadd.f32 %v5022_v36, %v1050_v20  ;;  %v1077_v49 = vmul.f32 %v7866_v33, %v1072_v7  ;;  %v1085_v5 = vmul.f32 %v7867_v21, %v1072_v7  ;;  %v7872_v36 = vld [vmem:[#allocation85_spill] sm:$0xff]  ;;  %v7882_v53 = vld [vmem:[#allocation170_spill] sm:$0xff]  ;;  %v7883_v52 = vld [vmem:[#allocation64_spill] sm:$0xff] }
 0x1c7   :  { %v660_v13 = vadd.f32 %v7868_v17, %v641_v22  ;;  %v668_v57 = vadd.f32 %v7869_v35, %v649_v26  ;;  %v1079_v4 = vadd.f32 %v1076_v45, %v1060_v0  ;;  %v1087_v46 = vadd.f32 %v1084_v2, %v1068_v38  ;;  %v7884_v54 = vld [vmem:[#allocation153_spill] sm:$0xff]  ;;  %v7886_v22 = vld [vmem:[#allocation171_spill] sm:$0xff]  ;;  %v7887_v0 = vld [vmem:[#allocation166_spill] sm:$0xff] }
 0x1c8   :  { %v733_v62 = vmul.f32 %v7731_v41, %v7870_v42  ;;  %v741_v24 = vmul.f32 %v7871_v14, %v7870_v42  ;;  %v1080_v44 = vadd.f32 %v1077_v49, %v1061_v16  ;;  %v1088_v6 = vadd.f32 %v1085_v5, %v1069_v12  ;;  %v7876_v41 = vld [vmem:[#allocation151_spill] sm:$0xff]  ;;  %v7885_v45 = vld [vmem:[#allocation165_spill] sm:$0xff]  ;;  %v7888_v16 = vld [vmem:[#allocation184_spill] sm:$0xff] }
 0x1c9   :  { %v679_v34 = vadd.f32 %v7872_v36, %v660_v13  ;;  %v687_v19 = vadd.f32 %v7873_v51, %v668_v57  ;;  %v1098_v39 = vadd.f32 %v7874_v61, %v1079_v4  ;;  %v1106_v28 = vadd.f32 %v7875_v10, %v1087_v46  ;;  %v7889_v49 = vld [vmem:[#allocation185_spill] sm:$0xff]  ;;  %v7890_v17 = vld [vmem:[#allocation84_spill] sm:$0xff]  ;;  %v7892_v4 = vld [vmem:[#allocation87_spill] sm:$0xff] }
 0x1ca   :  { %v5142_v63 = vmul.f32 %v7876_v41, %v880_v48  ;;  %v5145_v58 = vmul.f32 %v7877_v31, %v880_v48  ;;  %v1099_v3 = vadd.f32 %v7878_v25, %v1080_v44  ;;  %v1107_v1 = vadd.f32 %v7879_v9, %v1088_v6  ;;  %v7891_v35 = vld [vmem:[#allocation89_spill] sm:$0xff]  ;;  %v1167_v48 = vld [vmem:[#allocation3 + $0x73] sm:$0xf]  ;;  %v7893_v42 = vld [vmem:[#allocation83_spill] sm:$0xff] }
 0x1cb   :  { %v698_v15 = vadd.f32 %v7880_v50, %v679_v34  ;;  %v706_v59 = vadd.f32 %v7881_v30, %v687_v19  ;;  %v1117_v40 = vadd.f32 %v7882_v53, %v1098_v39  ;;  %v1125_v7 = vadd.f32 %v7883_v52, %v1106_v28  ;;  %v7894_v44 = vld [vmem:[#allocation167_spill] sm:$0xff]  ;;  %v7896_v34 = vld [vmem:[#allocation161_spill] sm:$0xff]  ;;  %v7897_v10 = vld [vmem:[#allocation100_spill] sm:$0xff] }
 0x1cc   :  { %v5158_v20 = vmul.f32 %v7884_v54, %v918_v47  ;;  %v1118_v2 = vadd.f32 %v7885_v45, %v1099_v3  ;;  %v1126_v26 = vadd.f32 %v7886_v22, %v1107_v1  ;;  %v1171_v38 = vmul.f32 %v7887_v0, %v1166_v8  ;;  %v7895_v36 = vld [vmem:[#allocation127_spill] sm:$0xff]  ;;  %v5180_v19 = vld [vmem:[#allocation3 + $0x31] sm:$0xff] }
 0x1cd   :  { %v717_v12 = vadd.f32 %v7888_v16, %v698_v15  ;;  %v725_v5 = vadd.f32 %v7889_v49, %v706_v59  ;;  %v1136_v13 = vadd.f32 %v7890_v17, %v1117_v40  ;;  %v1144_v57 = vadd.f32 %v7891_v35, %v1125_v7  ;;  %v7898_v41 = vld [vmem:[#allocation79_spill] sm:$0xff]  ;;  %v7900_v9 = vld [vmem:[#allocation80_spill] sm:$0xff]  ;;  %v7901_v15 = vld [vmem:[#allocation86_spill] sm:$0xff] }
 0x1ce   :  { %v1137_v46 = vadd.f32 %v7892_v4, %v1118_v2  ;;  %v1145_v14 = vadd.f32 %v7893_v42, %v1126_v26  ;;  %v1179_v6 = vmul.f32 %v7894_v44, %v1166_v8  ;;  %v5176_v51 = vmul.f32 %v7896_v34, %v7895_v36  ;;  %v7899_v25 = vld [vmem:[#allocation143_spill] sm:$0xff]  ;;  %v7903_v40 = vld [vmem:[#allocation154_spill] sm:$0xff]  ;;  %v7905_v22 = vld [vmem:[#allocation97_spill] sm:$0xff] }
 0x1cf   :  { %v736_v61 = vadd.f32 %v733_v62, %v717_v12  ;;  %v744_v39 = vadd.f32 %v741_v24, %v725_v5  ;;  %v1155_v28 = vadd.f32 %v7897_v10, %v1136_v13  ;;  %v1163_v31 = vadd.f32 %v7898_v41, %v1144_v57  ;;  %v7902_v62 = vld [vmem:[#allocation88_spill] sm:$0xff]  ;;  %v7904_v7 = vld [vmem:[#allocation155_spill] sm:$0xff]  ;;  %v7907_v49 = vld [vmem:[#allocation125_spill] sm:$0xff] }
 0x1d0   :  { %v1156_v3 = vadd.f32 %v7899_v25, %v1137_v46  ;;  %v1164_v8 = vadd.f32 %v7900_v9, %v1145_v14  ;;  %v1172_v1 = vmul.f32 %v7887_v0, %v1167_v48  ;;  %v1180_v50 = vmul.f32 %v7894_v44, %v1167_v48  ;;  %v7906_v16 = vld [vmem:[#allocation60_spill] sm:$0xff]  ;;  %v7908_v5 = vld [vmem:[#allocation126_spill] sm:$0xff]  ;;  %v7909_v48 = vld [vmem:[#allocation123_spill] sm:$0xff] }
 0x1d1   :  { %v812_v30 = vadd.f32 %v7901_v15, %v736_v61  ;;  %v820_v24 = vadd.f32 %v7902_v62, %v744_v39  ;;  %v1174_v59 = vadd.f32 %v1171_v38, %v1155_v28  ;;  %v1182_v53 = vadd.f32 %v1179_v6, %v1163_v31  ;;  %v1261_v13 = vld [vmem:[#allocation3 + $0x6c] sm:$0xff]  ;;  %v1262_v35 = vld [vmem:[#allocation3 + $0x74] sm:$0xf]  ;;  %v7913_v10 = vld [vmem:[#allocation174_spill] sm:$0xff] }
 0x1d2   :  { %v931_v52 = vmul.f32 %v7903_v40, %v918_v47  ;;  %v5199_v54 = vmul.f32 %v7904_v7, %v5180_v19  ;;  %v1175_v45 = vadd.f32 %v1172_v1, %v1156_v3  ;;  %v1183_v2 = vadd.f32 %v1180_v50, %v1164_v8  ;;  %v7910_v46 = vld [vmem:[#allocation124_spill] sm:$0xff]  ;;  %v7911_v14 = vld [vmem:[#allocation135_spill] sm:$0xff]  ;;  %v7915_v25 = vld [vmem:[#allocation73_spill] sm:$0xff] }
 0x1d3   :  { %v831_v26 = vadd.f32 %v7905_v22, %v812_v30  ;;  %v839_v12 = vadd.f32 %v7906_v16, %v820_v24  ;;  %v1193_v38 = vadd.f32 %v7907_v49, %v1174_v59  ;;  %v1201_v17 = vadd.f32 %v7908_v5, %v1182_v53  ;;  %v7912_v61 = vld [vmem:[#allocation136_spill] sm:$0xff]  ;;  %v7914_v41 = vld [vmem:[#allocation187_spill] sm:$0xff]  ;;  %v7917_v15 = vld [vmem:[#allocation65_spill] sm:$0xff] }
 0x1d4   :  { %v5210_v47 = vstv %s5147_s3  ;;  %v5213_v57 = vstv %s5153_s24  ;;  %v1194_v4 = vadd.f32 %v7909_v48, %v1175_v45  ;;  %v1202_v42 = vadd.f32 %v7910_v46, %v1183_v2  ;;  %v7916_v9 = vld [vmem:[#allocation188_spill] sm:$0xff]  ;;  %v7918_v62 = vld [vmem:[#allocation99_spill] sm:$0xff]  ;;  %v7919_v59 = vld [vmem:[#allocation69_spill] sm:$0xff]  ;;  %s5314_s3 = sld [smem:[#allocation11 + $0x70]] }
 0x1d5   :  { %v850_v6 = vadd.f32 %v7911_v14, %v831_v26  ;;  %v858_v39 = vadd.f32 %v7912_v61, %v839_v12  ;;  %v1212_v28 = vadd.f32 %v7913_v10, %v1193_v38  ;;  %v1220_v31 = vadd.f32 %v7914_v41, %v1201_v17  ;;  %v7920_v40 = vld [vmem:[#allocation191_spill] sm:$0xff]  ;;  %v7921_v45 = vld [vmem:[#allocation144_spill] sm:$0xff]  ;;  %v7923_v46 = vld [vmem:[#allocation57_spill] sm:$0xff]  ;;  %s5324_s24 = sld [smem:[#allocation11 + $0x71]] }
 0x1d6   :  { %v1213_v3 = vadd.f32 %v7915_v25, %v1194_v4  ;;  %v1221_v8 = vadd.f32 %v7916_v9, %v1202_v42  ;;  %v1266_v1 = vmul.f32 %v5210_v47, %v1261_v13  ;;  %v1267_v50 = vmul.f32 %v5210_v47, %v1262_v35  ;;  %v7922_v22 = vld [vmem:[#allocation192_spill] sm:$0xff]  ;;  %v7926_v14 = vld [vmem:[#allocation95_spill] sm:$0xff] }
 0x1d7   :  { %v869_v30 = vadd.f32 %v7917_v15, %v850_v6  ;;  %v877_v24 = vadd.f32 %v7918_v62, %v858_v39  ;;  %v1231_v53 = vadd.f32 %v7919_v59, %v1212_v28  ;;  %v1239_v7 = vadd.f32 %v7920_v40, %v1220_v31  ;;  %v956_v61 = vld [vmem:[#allocation3 + $0x49] sm:$0xff] }
 0x1d8   :  { %v1232_v2 = vadd.f32 %v7921_v45, %v1213_v3  ;;  %v1240_v26 = vadd.f32 %v7922_v22, %v1221_v8  ;;  %v1274_v16 = vmul.f32 %v5213_v57, %v1261_v13  ;;  %v1275_v12 = vmul.f32 %v5213_v57, %v1262_v35  ;;  %v7924_v13 = vld [vmem:[#allocation160_spill] sm:$0xff]  ;;  %v975_v3 = vld [vmem:[#allocation3 + $0x61] sm:$0xff] }
 0x1d9   :  { %v888_v49 = vadd.f32 %v5142_v63, %v869_v30  ;;  %v896_v38 = vadd.f32 %v5145_v58, %v877_v24  ;;  %v1250_v5 = vadd.f32 %v5086_v43, %v1231_v53  ;;  %v1258_v17 = vadd.f32 %v5096_v11, %v1239_v7  ;;  %v7925_v63 = vld [vmem:[#allocation92_spill] sm:$0xff]  ;;  %v1013_v8 = vld [vmem:[#allocation3 + $0x1a] sm:$0xff] }
 0x1da   :  { %v1251_v48 = vadd.f32 %v5089_v23, %v1232_v2  ;;  %v1259_v4 = vadd.f32 %v5099_v32, %v1240_v26  ;;  %v1342_v42 = vmul.f32 %v7924_v13, %v7923_v46  ;;  %v1350_v35 = vmul.f32 %v7896_v34, %v7923_v46  ;;  %v1108_v30 = vld [vmem:[#allocation3 + $0x1b] sm:$0xff]  ;;  %v7932_v62 = vld [vmem:[#allocation104_spill] sm:$0xff] }
 0x1db   :  { %v907_v58 = vadd.f32 %v7925_v63, %v888_v49  ;;  %v915_v43 = vadd.f32 %v7926_v14, %v896_v38  ;;  %v1269_v6 = vadd.f32 %v1266_v1, %v1250_v5  ;;  %v1277_v11 = vadd.f32 %v1274_v16, %v1258_v17  ;;  %v7934_v59 = vld [vmem:[#allocation176_spill] sm:$0xff]  ;;  %v7937_v26 = vld [vmem:[#allocation177_spill] sm:$0xff]  ;;  %v7938_v16 = vld [vmem:[#allocation114_spill] sm:$0xff] }
 0x1dc   :  { %v950_v23 = vmul.f32 %v7844_v29, %v5180_v19  ;;  %v1270_v32 = vadd.f32 %v1267_v50, %v1251_v48  ;;  %v1278_v39 = vadd.f32 %v1275_v12, %v1259_v4  ;;  %v1343_v10 = vmul.f32 %v7924_v13, %v7895_v36  ;;  %v7935_v53 = vld [vmem:[#allocation108_spill] sm:$0xff]  ;;  %v7939_v49 = vld [vmem:[#allocation115_spill] sm:$0xff]  ;;  %v7940_v5 = vld [vmem:[#allocation129_spill] sm:$0xff] }
 0x1dd   :  { %v926_v28 = vadd.f32 %v5158_v20, %v907_v58  ;;  %v934_v41 = vadd.f32 %v931_v52, %v915_v43  ;;  %v5268_v31 = vadd.f32 %v1342_v42, %v1269_v6  ;;  %v5270_v25 = vadd.f32 %v1350_v35, %v1277_v11  ;;  %v7936_v7 = vld [vmem:[#allocation112_spill] sm:$0xff]  ;;  %v7941_v48 = vld [vmem:[#allocation130_spill] sm:$0xff]  ;;  %v7943_v63 = vld [vmem:[#allocation131_spill] sm:$0xff] }
 0x1de   :  { %v5274_v9 = vadd.f32 %v1343_v10, %v1270_v32  ;;  %v5277_v29 = vadd.f32 %v5176_v51, %v1278_v39  ;;  %v961_v20 = vmul.f32 %v7849_v18, %v956_v61  ;;  %v969_v52 = vmul.f32 %v7852_v27, %v956_v61  ;;  %v7933_v27 = vld [vmem:[#allocation107_spill] sm:$0xff]  ;;  %v1032_v45 = vld [vmem:[#allocation3 + $0x32] sm:$0xff]  ;;  %v7946_v10 = vld [vmem:[#allocation134_spill] sm:$0xff] }
 0x1df   :  { %7927 = vst [vmem:[#allocation173_spill] sm:$0xff] %v5270_v25  ;;  %v945_v36 = vadd.f32 %v5199_v54, %v926_v28  ;;  %v953_v19 = vadd.f32 %v950_v23, %v934_v41  ;;  %v980_v15 = vmul.f32 %v7853_v60, %v975_v3  ;;  %v988_v51 = vmul.f32 %v7854_v56, %v975_v3  ;;  %v7931_v54 = vld [vmem:[#allocation175_spill] sm:$0xff]  ;;  %v1203_v56 = vld [vmem:[#allocation3 + $0x1c] sm:$0xff]  ;;  %v1127_v46 = vld [vmem:[#allocation3 + $0x33] sm:$0xff] }
 0x1e0   :  { %7928 = vst [vmem:[#allocation55_spill] sm:$0xff] %v5277_v29  ;;  %v999_v18 = vmul.f32 %v7932_v62, %v7931_v54  ;;  %v1007_v24 = vmul.f32 %v7933_v27, %v7931_v54  ;;  %v5298_v40 = vmul.f32 %v7935_v53, %v7934_v59  ;;  %v5302_v60 = vmul.f32 %v7936_v7, %v7934_v59  ;;  %v7944_v14 = vld [vmem:[#allocation132_spill] sm:$0xff]  ;;  %v7945_v32 = vld [vmem:[#allocation133_spill] sm:$0xff]  ;;  %v1289_v62 = vpop.permute.xlu0 %1288 }
 0x1e1   :  { %v964_v1 = vadd.f32 %v961_v20, %v945_v36  ;;  %v972_v50 = vadd.f32 %v969_v52, %v953_v19  ;;  %v5308_v12 = vmul.f32 %v7938_v16, %v7937_v26  ;;  %v5312_v38 = vmul.f32 %v7939_v49, %v7937_v26  ;;  %v1222_v6 = vld [vmem:[#allocation3 + $0x34] sm:$0xff]  ;;  %v1051_v11 = vld [vmem:[#allocation3 + $0x4a] sm:$0xff]  ;;  %v7948_v36 = vld [vmem:[#allocation138_spill] sm:$0xff]  ;;  %1297 = vst.msk [vmem:[#allocation3 + $0x18] sm:$0xff] %vm226_vm3, %v1289_v62 }
 0x1e2   :  { %v1018_v17 = vmul.f32 %v7940_v5, %v1013_v8  ;;  %v1026_v4 = vmul.f32 %v7941_v48, %v1013_v8  ;;  %v5319_v42 = vstv %s5133_s4  ;;  %v5322_v35 = vstv %s5139_s1  ;;  %v7947_v41 = vld [vmem:[#allocation137_spill] sm:$0xff]  ;;  %v1146_v20 = vld [vmem:[#allocation3 + $0x4b] sm:$0xff]  ;;  %s5342_s4 = sld [smem:[#allocation11 + $0x74]] }
 0x1e3   :  { %v983_v2 = vadd.f32 %v980_v15, %v964_v1  ;;  %v991_v22 = vadd.f32 %v988_v51, %v972_v50  ;;  %7942 = vst [vmem:[#allocation56_spill] sm:$0xff] %v5322_v35  ;;  %v5327_v58 = vmul.f32 %v7943_v63, %v1108_v30  ;;  %v5330_v43 = vmul.f32 %v7944_v14, %v1108_v30  ;;  %v7949_v52 = vld [vmem:[#allocation139_spill] sm:$0xff]  ;;  %v7950_v1 = vld [vmem:[#allocation140_spill] sm:$0xff]  ;;  %s5350_s1 = sld [smem:[#allocation11 + $0x75]]  ;;  %v7953_v53 = vld [vmem:[#allocation145_spill] sm:$0xff] }
 0x1e4   :  { %v5335_v39 = vmul.f32 %v7945_v32, %v1203_v56  ;;  %v5338_v28 = vmul.f32 %v7946_v10, %v1203_v56  ;;  %v1037_v3 = vmul.f32 %v7947_v41, %v1032_v45  ;;  %v1045_v19 = vmul.f32 %v7948_v36, %v1032_v45  ;;  %v1241_v15 = vld [vmem:[#allocation3 + $0x4c] sm:$0xff]  ;;  %v1070_v51 = vld [vmem:[#allocation3 + $0x62] sm:$0xff] }
 0x1e5   :  { %v1002_v61 = vadd.f32 %v999_v18, %v983_v2  ;;  %v1010_v23 = vadd.f32 %v1007_v24, %v991_v22  ;;  %v5345_v8 = vmul.f32 %v7949_v52, %v1127_v46  ;;  %v5348_v50 = vmul.f32 %v7950_v1, %v1127_v46  ;;  %v7951_v18 = vld [vmem:[#allocation141_spill] sm:$0xff]  ;;  %v7952_v24 = vld [vmem:[#allocation142_spill] sm:$0xff]  ;;  %v7955_v22 = vld [vmem:[#allocation147_spill] sm:$0xff] }
 0x1e6   :  { %v5353_v27 = vmul.f32 %v7951_v18, %v1222_v6  ;;  %v5356_v59 = vmul.f32 %v7952_v24, %v1222_v6  ;;  %v1056_v7 = vmul.f32 %v7953_v53, %v1051_v11  ;;  %v7954_v56 = vld [vmem:[#allocation146_spill] sm:$0xff]  ;;  %v5364_v26 = vmul.f32 %v7955_v22, %v1146_v20  ;;  %v7956_v16 = vld [vmem:[#allocation148_spill] sm:$0xff] }
 0x1e7   :  { %v1021_v30 = vadd.f32 %v1018_v17, %v1002_v61  ;;  %v1029_v54 = vadd.f32 %v1026_v4, %v1010_v23  ;;  %v1064_v45 = vmul.f32 %v7954_v56, %v1051_v11  ;;  %v1165_v2 = vld [vmem:[#allocation3 + $0x63] sm:$0xff]  ;;  %v5367_v49 = vmul.f32 %v7956_v16, %v1146_v20  ;;  %v7962_v56 = vld [vmem:[#allocation169_spill] sm:$0xff] }
 0x1e8   :  { %v1260_v5 = vld [vmem:[#allocation3 + $0x64] sm:$0xff]  ;;  %v5372_v4 = vmul.f32 %v7857_v37, %v1241_v15  ;;  %v5375_v46 = vmul.f32 %v7862_v55, %v1241_v15  ;;  %v1075_v63 = vmul.f32 %v7866_v33, %v1070_v51  ;;  %v1083_v14 = vmul.f32 %v7867_v21, %v1070_v51  ;;  %v1291_v37 = vpop.permute.xlu1 %1290 }
 0x1e9   :  { %v1040_v17 = vadd.f32 %v1037_v3, %v1021_v30  ;;  %v1048_v48 = vadd.f32 %v1045_v19, %v1029_v54  ;;  %v5382_v61 = vmul.f32 %v7887_v0, %v1165_v2  ;;  %v5385_v23 = vmul.f32 %v7894_v44, %v1165_v2  ;;  %1298 = vst.msk [vmem:[#allocation3 + $0x20] sm:$0xff] %vm226_vm3, %v1291_v37  ;;  %v1293_v44 = vpop.permute.xlu0 %1292  ;;  %v7958_v41 = vld [vmem:[#allocation62_spill] sm:$0xff]  ;;  %v7963_v2 = vld [vmem:[#allocation128_spill] sm:$0xff] }
 0x1ea   :  { %v5390_v55 = vmul.f32 %v5210_v47, %v1260_v5  ;;  %v5393_v33 = vmul.f32 %v5213_v57, %v1260_v5  ;;  %v5396_v21 = vstv %s5184_s14  ;;  %v5399_v0 = vstv %s5190_s21  ;;  %1299 = vst.msk [vmem:[#allocation3 + $0x28] sm:$0xff] %vm226_vm3, %v1293_v44  ;;  %s5413_s14 = sld [smem:[#allocation11 + $0x7c]] }
 0x1eb   :  { %v1059_v6 = vadd.f32 %v1056_v7, %v1040_v17  ;;  %v1067_v11 = vadd.f32 %v1064_v45, %v1048_v48  ;;  %7957 = vst [vmem:[#allocation182_spill] sm:$0xff] %v5399_v0  ;;  %v5406_v47 = vmul.f32 %v7924_v13, %v7958_v41  ;;  %v5410_v57 = vmul.f32 %v7896_v34, %v7958_v41  ;;  %s5427_s21 = sld [smem:[#allocation11 + $0x97]] }
 0x1ec   :  { %v5416_v3 = vstv %s5194_s30  ;;  %v5419_v36 = vstv %s5201_s12  ;;  %v5422_v19 = vstv %s5207_s9  ;;  %v5425_v13 = vstv %s5217_s5  ;;  %v1301_v52 = vpop.permute.xlu1 %1300  ;;  %s5437_s30 = sld [smem:[#allocation11 + $0x98]] }
 0x1ed   :  { %v1078_v32 = vadd.f32 %v1075_v63, %v1059_v6  ;;  %v1086_v10 = vadd.f32 %v1083_v14, %v1067_v11  ;;  %7959 = vst [vmem:[#allocation58_spill] sm:$0xff] %v5419_v36  ;;  %7960 = vst [vmem:[#allocation59_spill] sm:$0xff] %v5425_v13  ;;  %v5432_v1 = vstv %s5223_s2  ;;  %v5435_v15 = vstv %s5229_s17  ;;  %v1303_v51 = vpop.permute.xlu0 %1302  ;;  %s5452_s12 = sld [smem:[#allocation11 + $0x99]]  ;;  %v7966_v14 = vld [vmem:[#allocation66_spill] sm:$0xff] }
 0x1ee   :  { %7961 = vst [vmem:[#allocation183_spill] sm:$0xff] %v5435_v15  ;;  %1309 = vst.msk [vmem:[#allocation3 + $0x30] sm:$0xff] %vm240_vm4, %v1301_v52  ;;  %v5441_v30 = vstv %s5235_s13  ;;  %v5444_v54 = vstv %s5241_s10  ;;  %v5450_v62 = vstv %s5255_s29  ;;  %v5458_v24 = vstv %s5259_s19  ;;  %s5463_s9 = sld [smem:[#allocation11 + $0x9a]] }
 0x1ef   :  { %v1097_v34 = vadd.f32 %v5298_v40, %v1078_v32  ;;  %v1105_v20 = vadd.f32 %v5302_v60, %v1086_v10  ;;  %v5447_v40 = vstv %s5247_s22  ;;  %1310 = vst.msk [vmem:[#allocation3 + $0x38] sm:$0xff] %vm240_vm4, %v1303_v51  ;;  %v5461_v53 = vstv %s5163_s15  ;;  %s5480_s15 = sld [smem:[#allocation11 + $0x9c]] }
 0x1f0   :  { %v5466_v7 = vstv %s5265_s20  ;;  %v5470_v45 = vmul.f32 %v5319_v42, %v7962_v56  ;;  %v1305_v17 = vpop.permute.xlu1 %1304  ;;  %v5486_v48 = vmul.f32 %v5322_v35, %v7962_v56  ;;  %v5489_v63 = vstv %s5169_s26  ;;  %s5491_s5 = sld [smem:[#allocation11 + $0x9d]] }
 0x1f1   :  { %v1116_v60 = vadd.f32 %v5327_v58, %v1097_v34  ;;  %v1124_v18 = vadd.f32 %v5330_v43, %v1105_v20  ;;  %v5474_v58 = vmul.f32 %v5319_v42, %v7963_v2  ;;  %v7964_v43 = vld [vmem:[#allocation67_spill] sm:$0xff]  ;;  %1311 = vst.msk [vmem:[#allocation3 + $0x40] sm:$0xff] %vm240_vm4, %v1305_v17  ;;  %v5503_v6 = vmul.f32 %v5461_v53, %v7966_v14  ;;  %s5508_s26 = sld [smem:[#allocation11 + $0x9e]] }
 0x1f2   :  { %v5478_v22 = vmul.f32 %v5319_v42, %v7964_v43  ;;  %v1313_v42 = vpop.permute.xlu0 %1312  ;;  %v5506_v11 = vstv %s5304_s0  ;;  %v5514_v32 = vstv %s5314_s3  ;;  %v5517_v10 = vstv %s5178_s16  ;;  %s5519_s2 = sld [smem:[#allocation11 + $0x9f]]  ;;  %v5521_v41 = vld [vmem:[#allocation3 + $0x29] sm:$0xf] }
 0x1f3   :  { %v1135_v16 = vadd.f32 %v5345_v8, %v1116_v60  ;;  %v1143_v5 = vadd.f32 %v5348_v50, %v1124_v18  ;;  %v5496_v8 = vmul.f32 %v5322_v35, %v7963_v2  ;;  %v5499_v50 = vstv %s5290_s8  ;;  %1321 = vst.msk [vmem:[#allocation3 + $0x48] sm:$0xff] %vm254_vm5, %v1313_v42  ;;  %s5536_s17 = sld [smem:[#allocation11 + $0xa1]]  ;;  %v1869_v2 = vld [vmem:[#allocation3 + $0x8] sm:$0xff]  ;;  %v7970_v42 = vld [vmem:[#allocation172_spill] sm:$0xff] }
 0x1f4   :  { %v5524_v34 = vstv %s5324_s24  ;;  %v5527_v20 = vstv %s5332_s11  ;;  %v5534_v52 = vstv %s5342_s4  ;;  %v1315_v18 = vpop.permute.xlu1 %1314  ;;  %v5542_v56 = vmul.f32 %v5444_v54, %v5521_v41  ;;  %s5547_s11 = sld [smem:[#allocation11 + $0xa2]]  ;;  %v1964_v35 = vld [vmem:[#allocation3 + $0x9] sm:$0xff] }
 0x1f5   :  { %7965 = vst [vmem:[#allocation77_spill] sm:$0xff] %v5496_v8  ;;  %v1154_v37 = vadd.f32 %v5364_v26, %v1135_v16  ;;  %v1162_v44 = vadd.f32 %v5367_v49, %v1143_v5  ;;  %v7967_v26 = vld [vmem:[#allocation68_spill] sm:$0xff]  ;;  %v5545_v16 = vstv %s5272_s18  ;;  %1322 = vst.msk [vmem:[#allocation3 + $0x50] sm:$0xff] %vm254_vm5, %v1315_v18  ;;  %v5551_v5 = vstv %s5350_s1  ;;  %s5563_s16 = sld [smem:[#allocation11 + $0xa3]] }
 0x1f6   :  { %v5531_v49 = vmul.f32 %v5489_v63, %v7967_v26  ;;  %7968 = vst [vmem:[#allocation78_spill] sm:$0xff] %v5542_v56  ;;  %v5557_v17 = vstv %s5369_s25  ;;  %v5569_v18 = vstv %s5379_s27  ;;  %v5572_v43 = vstv %s5279_s23  ;;  %s7974_s25 = sld [smem:[#allocation34_spill]] }
 0x1f7   :  { %v1173_v51 = vadd.f32 %v5382_v61, %v1154_v37  ;;  %v1181_v60 = vadd.f32 %v5385_v23, %v1162_v44  ;;  %v1317_v61 = vpop.permute.xlu0 %1316  ;;  %v5554_v23 = vstv %s5361_s6  ;;  %7969 = vst [vmem:[#allocation168_spill] sm:$0xff] %v5557_v17  ;;  %v5561_v37 = vmul.f32 %v5517_v10, %v7970_v42  ;;  %7972 = vst [vmem:[#allocation102_spill] sm:$0xff] %v5572_v43  ;;  %s5586_s6 = sld [smem:[#allocation11 + $0xa4]] }
 0x1f8   :  { %1323 = vst.msk [vmem:[#allocation3 + $0x58] sm:$0xff] %vm254_vm5, %v1317_v61  ;;  %v5575_v29 = vstv %s5387_s7  ;;  %v5578_v42 = vstv %s5402_s28  ;;  %v5581_v26 = vstv %s5413_s14  ;;  %v5590_v61 = vld [vmem:[#allocation3 + $0x20] sm:$0xff]  ;;  %v5593_v14 = vstv %s5427_s21  ;;  %s7987_s27 = sld [smem:[#allocation35_spill]] }
 0x1f9   :  { %7971 = vst [vmem:[#allocation101_spill] sm:$0xff] %v5561_v37  ;;  %v1192_v44 = vadd.f32 %v5308_v12, %v1173_v51  ;;  %v1200_v56 = vadd.f32 %v5312_v38, %v1181_v60  ;;  %7973 = vst [vmem:[#allocation81_spill] sm:$0xff] %v5578_v42  ;;  %v5584_v12 = vmul.f32 %v5545_v16, %v1869_v2  ;;  %v1325_v60 = vpop.permute.xlu1 %1324  ;;  %v5596_v8 = vstv %s5437_s30  ;;  %s5646_s13 = sld [smem:[#allocation11 + $0xaa]] }
 0x1fa   :  { %7975 = vst [vmem:[#allocation103_spill] sm:$0xff] %v5581_v26  ;;  %7977 = vst [vmem:[#allocation70_spill] sm:$0xff] %v5590_v61  ;;  %v5600_v2 = vstv %s5452_s12  ;;  %s5660_s10 = sld [smem:[#allocation11 + $0xa6]] }
 0x1fb   :  { %7976 = vst [vmem:[#allocation105_spill] sm:$0xff] %v5584_v12  ;;  %v1211_v38 = vadd.f32 %v5335_v39, %v1192_v44  ;;  %v1219_v51 = vadd.f32 %v5338_v28, %v1200_v56  ;;  %7978 = vst [vmem:[#allocation71_spill] sm:$0xff] %v5593_v14  ;;  %v1327_v25 = vpop.permute.xlu0 %1326  ;;  %v5603_v12 = vstv %s5463_s9  ;;  %v5606_v39 = vmul.f32 %v5572_v43, %v1964_v35  ;;  %v2059_v28 = vld [vmem:[#allocation3 + $0xa] sm:$0xff]  ;;  %v1355_v35 = vld [vmem:[#allocation3 + $0x18] sm:$0xff]  ;;  %s5668_s22 = sld [smem:[#allocation11 + $0xa7]] }
 0x1fc   :  { %7979 = vst [vmem:[#allocation156_spill] sm:$0xff] %v5596_v8  ;;  %1333 = vst.msk [vmem:[#allocation3 + $0x60] sm:$0xff] %vm268_vm6, %v1325_v60  ;;  %v5609_v56 = vstv %s7974_s25  ;;  %v5613_v8 = vld [vmem:[#allocation3 + $0x41] sm:$0xf]  ;;  %v5616_v60 = vld [vmem:[#allocation3 + $0x38] sm:$0xff]  ;;  %s5679_s29 = sld [smem:[#allocation11 + $0xa8]] }
 0x1fd   :  { %7980 = vst [vmem:[#allocation178_spill] sm:$0xff] %v5600_v2  ;;  %7981 = vst [vmem:[#allocation179_spill] sm:$0xff] %v5603_v12  ;;  %v1230_v44 = vadd.f32 %v5353_v27, %v1211_v38  ;;  %v1238_v37 = vadd.f32 %v5356_v59, %v1219_v51  ;;  %v5619_v2 = vstv %s5480_s15  ;;  %v5622_v12 = vstv %s5491_s5  ;;  %v1329_v14 = vpop.permute.xlu1 %1328  ;;  %v5674_v17 = vld [vmem:[#allocation3 + $0x50] sm:$0xff]  ;;  %s5692_s19 = sld [smem:[#allocation11 + $0xa9]] }
 0x1fe   :  { %7982 = vst [vmem:[#allocation94_spill] sm:$0xff] %v5606_v39  ;;  %1334 = vst.msk [vmem:[#allocation3 + $0x68] sm:$0xff] %vm268_vm6, %v1327_v25  ;;  %v5626_v39 = vmul.f32 %v5450_v62, %v5613_v8  ;;  %v1361_v27 = vmul.f32 %v5396_v21, %v5590_v61  ;;  %v5631_v59 = vstv %s5508_s26  ;;  %v5634_v25 = vstv %s5519_s2  ;;  %s5699_s20 = sld [smem:[#allocation11 + $0xab]] }
 0x1ff   :  { %7983 = vst [vmem:[#allocation96_spill] sm:$0xff] %v5616_v60  ;;  %7984 = vst [vmem:[#allocation157_spill] sm:$0xff] %v5619_v2  ;;  %v1249_v38 = vadd.f32 %v5372_v4, %v1230_v44  ;;  %v1257_v51 = vadd.f32 %v5375_v46, %v1238_v37  ;;  %v1374_v2 = vld [vmem:[#allocation3 + $0x30] sm:$0xff]  ;;  %v5641_v26 = vmul.f32 %v5609_v56, %v2059_v28  ;;  %v5655_v4 = vstv %s5563_s16  ;;  %s5728_s18 = sld [smem:[#allocation11 + $0xac]] }
 0x200   :  { %7985 = vst [vmem:[#allocation90_spill] sm:$0xff] %v5622_v12  ;;  %7986 = vst [vmem:[#allocation91_spill] sm:$0xff] %v5626_v39  ;;  %v5638_v12 = vld [vmem:[#allocation3 + $0x28] sm:$0xf]  ;;  %v5644_v39 = vstv %s5536_s17  ;;  %v5658_v46 = vstv %s7987_s27  ;;  %v1360_v44 = vmul.f32 %v5396_v21, %v1355_v35  ;;  %v1364_v61 = vadd.f32 %v1361_v27, %v5268_v31  ;;  %s5740_s23 = sld [smem:[#allocation11 + $0xad]] }
 0x201   :  { %7988 = vst [vmem:[#allocation158_spill] sm:$0xff] %v5631_v59  ;;  %7989 = vst [vmem:[#allocation159_spill] sm:$0xff] %v5634_v25  ;;  %v1380_v25 = vmul.f32 %v5416_v3, %v5616_v60  ;;  %v5652_v59 = vstv %s5547_s11  ;;  %v1268_v37 = vadd.f32 %v5390_v55, %v1249_v38  ;;  %v1276_v28 = vadd.f32 %v5393_v33, %v1257_v51  ;;  %v2154_v60 = vld [vmem:[#allocation3 + $0xb] sm:$0xff]  ;;  %s5752_s28 = sld [smem:[#allocation11 + $0xae]] }
 0x202   :  { %7990 = vst [vmem:[#allocation162_spill] sm:$0xff] %v5638_v12  ;;  %7991 = vst [vmem:[#allocation72_spill] sm:$0xff] %v5641_v26  ;;  %v5666_v26 = vld [vmem:[#allocation3 + $0x40] sm:$0xf]  ;;  %v5677_v55 = vstv %s5586_s6  ;;  %v1362_v33 = vmul.f32 %v5396_v21, %v5638_v12  ;;  %v1387_v51 = vmul.f32 %v5419_v36, %v1374_v2  ;;  %v1399_v42 = vmul.f32 %v5422_v19, %v5674_v17  ;;  %s6142_s7 = sld [smem:[#allocation11 + $0x87]] }
 0x203   :  { %7992 = vst [vmem:[#allocation74_spill] sm:$0xff] %v5644_v39  ;;  %1335 = vst.msk [vmem:[#allocation3 + $0x70] sm:$0xff] %vm268_vm6, %v1329_v14  ;;  %v1368_v14 = vmul.f32 %v5399_v0, %v1355_v35  ;;  %v5671_v39 = vld [vmem:[#allocation3 + $0x59] sm:$0xf]  ;;  %v1344_v35 = vadd.f32 %v5406_v47, %v1268_v37  ;;  %v1352_v38 = vadd.f32 %v5410_v57, %v1276_v28  ;;  %v1412_v27 = vld [vmem:[#allocation3 + $0x60] sm:$0xff]  ;;  %s6156_s8 = sld [smem:[#allocation11 + $0x86]] }
 0x204   :  { %7993 = vst [vmem:[#allocation149_spill] sm:$0xff] %v5652_v59  ;;  %7994 = vst [vmem:[#allocation180_spill] sm:$0xff] %v5655_v4  ;;  %v1379_v59 = vmul.f32 %v5416_v3, %v1374_v2  ;;  %v1393_v4 = vld [vmem:[#allocation3 + $0x48] sm:$0xff]  ;;  %v5686_v0 = vld [vmem:[#allocation3 + $0x58] sm:$0xf]  ;;  %v5690_v31 = vmul.f32 %v5466_v7, %v5671_v39  ;;  %v5697_v21 = vmul.f32 %v5658_v46, %v2154_v60  ;;  %s6183_s0 = sld [smem:[#allocation11 + $0x88]] }
 0x205   :  { %7995 = vst [vmem:[#allocation181_spill] sm:$0xff] %v5666_v26  ;;  %7996 = vst [vmem:[#allocation118_spill] sm:$0xff] %v5674_v17  ;;  %v1381_v47 = vmul.f32 %v5416_v3, %v5666_v26  ;;  %v1363_v57 = vadd.f32 %v1360_v44, %v1344_v35  ;;  %v1371_v2 = vadd.f32 %v1368_v14, %v1352_v38  ;;  %v5711_v12 = vld [vmem:[#allocation3 + $0x1c] sm:$0xff]  ;;  %s6219_s3 = sld [smem:[#allocation11 + $0x89]] }
 0x206   :  { %7997 = vst [vmem:[#allocation119_spill] sm:$0xff] %v5677_v55  ;;  %7998 = vst [vmem:[#allocation150_spill] sm:$0xff] %v5686_v0  ;;  %v1383_v55 = vadd.f32 %v1380_v25, %v1364_v61  ;;  %v1398_v37 = vmul.f32 %v5422_v19, %v1393_v4  ;;  %v1406_v28 = vmul.f32 %v5425_v13, %v1393_v4  ;;  %v5707_v61 = vld [vmem:[#allocation3 + $0x1a] sm:$0xff]  ;;  %s6231_s24 = sld [smem:[#allocation11 + $0x8a]] }
 0x207   :  { %7999 = vst [vmem:[#allocation113_spill] sm:$0xff] %v5690_v31  ;;  %8000 = vst [vmem:[#allocation116_spill] sm:$0xff] %v5697_v21  ;;  %v5705_v31 = vld [vmem:[#allocation3 + $0x68] sm:$0xff]  ;;  %v5709_v25 = vld [vmem:[#allocation3 + $0x1b] sm:$0xff]  ;;  %v1365_v3 = vadd.f32 %v1362_v33, %v5274_v9  ;;  %v1400_v44 = vmul.f32 %v5422_v19, %v5686_v0  ;;  %v1382_v14 = vadd.f32 %v1379_v59, %v1363_v57  ;;  %v5726_v19 = vstv %s5646_s13  ;;  %s6262_s4 = sld [smem:[#allocation11 + $0x8c]] }
 0x208   :  { %8001 = vst [vmem:[#allocation82_spill] sm:$0xff] %v5705_v31  ;;  %8002 = vst [vmem:[#allocation163_spill] sm:$0xff] %v5707_v61  ;;  %v1402_v60 = vadd.f32 %v1399_v42, %v1383_v55  ;;  %v1418_v21 = vmul.f32 %v5432_v1, %v5705_v31  ;;  %v1390_v4 = vadd.f32 %v1387_v51, %v1371_v2  ;;  %v1450_v26 = vld [vmem:[#allocation3 + $0x19] sm:$0xff]  ;;  %v5720_v13 = vld [vmem:[#allocation3 + $0x21] sm:$0xff]  ;;  %v1821_v42 = vpop.permute.xlu0 %1820  ;;  %v5735_v0 = vstv %s5660_s10  ;;  %s6272_s1 = sld [smem:[#allocation11 + $0x8b]] }
 0x209   :  { %8003 = vst [vmem:[#allocation164_spill] sm:$0xff] %v5709_v25  ;;  %8004 = vst [vmem:[#allocation75_spill] sm:$0xff] %v5711_v12  ;;  %v1417_v35 = vmul.f32 %v5432_v1, %v1412_v27  ;;  %v1425_v38 = vmul.f32 %v5435_v15, %v1412_v27  ;;  %v2249_v33 = vld [vmem:[#allocation3 + $0xc] sm:$0xff]  ;;  %v1384_v59 = vadd.f32 %v1381_v47, %v1365_v3  ;;  %v5732_v2 = vld [vmem:[#allocation3 + $0x39] sm:$0xff]  ;;  %v5738_v15 = vstv %s5668_s22  ;;  %s6290_s14 = sld [smem:[#allocation11 + $0x8d]] }
 0x20a   :  { %v5722_v55 = vld [vmem:[#allocation3 + $0x70] sm:$0xf]  ;;  %1829 = vst.msk [vmem:[#allocation3 + $0x18] sm:$0xff] %vm226_vm3, %v1821_v42  ;;  %v1421_v9 = vadd.f32 %v1418_v21, %v1402_v60  ;;  %v1401_v27 = vadd.f32 %v1398_v37, %v1382_v14  ;;  %v1409_v57 = vadd.f32 %v1406_v28, %v1390_v4  ;;  %8006 = vst [vmem:[#allocation186_spill] sm:$0xff] %v5735_v0  ;;  %v5742_v21 = vld [vmem:[#allocation3 + $0x2a] sm:$0xf]  ;;  %v1823_v42 = vpop.permute.xlu1 %1822  ;;  %v5761_v31 = vstv %s5692_s19 }
 0x20b   :  { %8005 = vst [vmem:[#allocation76_spill] sm:$0xff] %v5722_v55  ;;  %v1419_v51 = vmul.f32 %v5432_v1, %v5722_v55  ;;  %8007 = vst [vmem:[#allocation111_spill] sm:$0xff] %v5738_v15  ;;  %v1456_v60 = vmul.f32 %v5441_v30, %v5720_v13  ;;  %v5747_v3 = vld [vmem:[#allocation3 + $0x22] sm:$0xff]  ;;  %v5750_v1 = vstv %s5679_s29  ;;  %v1403_v37 = vadd.f32 %v1400_v44, %v1384_v59  ;;  %v5754_v4 = vld [vmem:[#allocation3 + $0x51] sm:$0xff]  ;;  %s6318_s21 = sld [smem:[#allocation11 + $0x8e]] }
 0x20c   :  { %8008 = vst [vmem:[#allocation85_spill] sm:$0xff] %v5742_v21  ;;  %v1440_v47 = vadd.f32 %v5474_v58, %v1421_v9  ;;  %8009 = vst [vmem:[#allocation93_spill] sm:$0xff] %v5747_v3  ;;  %v1420_v28 = vadd.f32 %v1417_v35, %v1401_v27  ;;  %v1428_v14 = vadd.f32 %v1425_v38, %v1409_v57  ;;  %v5756_v55 = vld [vmem:[#allocation3 + $0x23] sm:$0xff]  ;;  %v5766_v9 = vld [vmem:[#allocation3 + $0x2b] sm:$0xf]  ;;  %v1825_v38 = vpop.permute.xlu0 %1824  ;;  %v5774_v27 = vstv %s5699_s20  ;;  %s6330_s30 = sld [smem:[#allocation11 + $0x8f]] }
 0x20d   :  { %8010 = vst [vmem:[#allocation121_spill] sm:$0xff] %v5750_v1  ;;  %8011 = vst [vmem:[#allocation122_spill] sm:$0xff] %v5754_v4  ;;  %v5758_v15 = vld [vmem:[#allocation3 + $0x24] sm:$0xff]  ;;  %v5764_v58 = vmul.f32 %v5726_v19, %v2249_v33  ;;  %v5768_v1 = vld [vmem:[#allocation3 + $0x2c] sm:$0xf]  ;;  %v1475_v35 = vmul.f32 %v5447_v40, %v5732_v2  ;;  %v1422_v57 = vadd.f32 %v1419_v51, %v1403_v37  ;;  %s6356_s12 = sld [smem:[#allocation11 + $0x91]] }
 0x20e   :  { %8012 = vst [vmem:[#allocation151_spill] sm:$0xff] %v5758_v15  ;;  %8013 = vst [vmem:[#allocation152_spill] sm:$0xff] %v5761_v31  ;;  %v1469_v44 = vld [vmem:[#allocation3 + $0x31] sm:$0xff]  ;;  %v1459_v59 = vadd.f32 %v1456_v60, %v1440_v47  ;;  %v1439_v31 = vadd.f32 %v5470_v45, %v1420_v28  ;;  %v1447_v33 = vadd.f32 %v5486_v48, %v1428_v14  ;;  %v5780_v36 = vld [vmem:[#allocation3 + $0x69] sm:$0xff]  ;;  %s6365_s9 = sld [smem:[#allocation11 + $0x90]] }
 0x20f   :  { %8014 = vst [vmem:[#allocation117_spill] sm:$0xff] %v5764_v58  ;;  %8015 = vst [vmem:[#allocation120_spill] sm:$0xff] %v5766_v9  ;;  %v1455_v58 = vmul.f32 %v5441_v30, %v1450_v26  ;;  %v1463_v17 = vmul.f32 %v5444_v54, %v1450_v26  ;;  %v5783_v0 = vld [vmem:[#allocation3 + $0x32] sm:$0xff]  ;;  %v1457_v60 = vmul.f32 %v5441_v30, %v5521_v41  ;;  %v1488_v47 = vld [vmem:[#allocation3 + $0x49] sm:$0xff]  ;;  %s6384_s15 = sld [smem:[#allocation11 + $0x92]] }
 0x210   :  { %8016 = vst [vmem:[#allocation189_spill] sm:$0xff] %v5768_v1  ;;  %1830 = vst.msk [vmem:[#allocation3 + $0x20] sm:$0xff] %vm226_vm3, %v1823_v42  ;;  %v1494_v51 = vmul.f32 %v5458_v24, %v5754_v4  ;;  %v1478_v45 = vadd.f32 %v1475_v35, %v1459_v59  ;;  %v1441_v48 = vadd.f32 %v5478_v22, %v1422_v57  ;;  %v5790_v37 = vld [vmem:[#allocation3 + $0x33] sm:$0xff]  ;;  %v5800_v41 = vld [vmem:[#allocation3 + $0x61] sm:$0xff]  ;;  %v1835_v22 = vpop.permute.xlu0 %1834  ;;  %s6412_s5 = sld [smem:[#allocation11 + $0x93]] }
 0x211   :  { %8017 = vst [vmem:[#allocation190_spill] sm:$0xff] %v5774_v27  ;;  %8018 = vst [vmem:[#allocation170_spill] sm:$0xff] %v5780_v36  ;;  %v5792_v28 = vld [vmem:[#allocation3 + $0x34] sm:$0xff]  ;;  %v1458_v26 = vadd.f32 %v1455_v58, %v1439_v31  ;;  %v1466_v14 = vadd.f32 %v1463_v17, %v1447_v33  ;;  %v1474_v42 = vmul.f32 %v5447_v40, %v1469_v44  ;;  %v1833_v27 = vpop.permute.xlu1 %1832  ;;  %v1963_v9 = vld [vmem:[#allocation3 + $0x1] sm:$0xff]  ;;  %s6424_s26 = sld [smem:[#allocation11 + $0x94]] }
 0x212   :  { %1831 = vst.msk [vmem:[#allocation3 + $0x28] sm:$0xff] %vm226_vm3, %v1825_v38  ;;  %8019 = vst [vmem:[#allocation64_spill] sm:$0xff] %v5783_v0  ;;  %v1482_v38 = vmul.f32 %v5450_v62, %v1469_v44  ;;  %v5796_v1 = vld [vmem:[#allocation3 + $0x3a] sm:$0xff]  ;;  %v1476_v30 = vmul.f32 %v5447_v40, %v5613_v8  ;;  %v1497_v31 = vadd.f32 %v1494_v51, %v1478_v45  ;;  %v5816_v51 = vstv %s5740_s23  ;;  %v5821_v4 = vld [vmem:[#allocation3 + $0x42] sm:$0xf]  ;;  %s6443_s2 = sld [smem:[#allocation11 + $0x95]] }
 0x213   :  { %8020 = vst [vmem:[#allocation153_spill] sm:$0xff] %v5790_v37  ;;  %8021 = vst [vmem:[#allocation165_spill] sm:$0xff] %v5792_v28  ;;  %v1513_v17 = vmul.f32 %v5499_v50, %v5780_v36  ;;  %v5805_v58 = vld [vmem:[#allocation3 + $0x3b] sm:$0xff]  ;;  %v1460_v35 = vadd.f32 %v1457_v60, %v1441_v48  ;;  %v1477_v59 = vadd.f32 %v1474_v42, %v1458_v26  ;;  %v5819_v45 = vstv %s5752_s28  ;;  %v5823_v60 = vld [vmem:[#allocation3 + $0x43] sm:$0xf]  ;;  %s6453_s17 = sld [smem:[#allocation11 + $0xaf]] }
 0x214   :  { %8022 = vst [vmem:[#allocation171_spill] sm:$0xff] %v5796_v1  ;;  %8023 = vst [vmem:[#allocation166_spill] sm:$0xff] %v5800_v41  ;;  %v5807_v44 = vld [vmem:[#allocation3 + $0x3c] sm:$0xff]  ;;  %v1485_v57 = vadd.f32 %v1482_v38, %v1466_v14  ;;  %v1493_v40 = vmul.f32 %v5458_v24, %v1488_v47  ;;  %v1501_v8 = vmul.f32 %v5466_v7, %v1488_v47  ;;  %v5825_v48 = vld [vmem:[#allocation3 + $0x44] sm:$0xf]  ;;  %s6470_s11 = sld [smem:[#allocation11 + $0xb0]] }
 0x215   :  { %1841 = vst.msk [vmem:[#allocation3 + $0x30] sm:$0xff] %vm240_vm4, %v1833_v27  ;;  %8024 = vst [vmem:[#allocation184_spill] sm:$0xff] %v5807_v44  ;;  %v1516_v33 = vadd.f32 %v1513_v17, %v1497_v31  ;;  %v5813_v27 = vstv %s5728_s18  ;;  %v1868_v36 = vld [vmem:[#allocation3] sm:$0xff]  ;;  %v1837_v47 = vpop.permute.xlu1 %1836  ;;  %v1512_v42 = vmul.f32 %v5499_v50, %v5800_v41  ;;  %v1479_v38 = vadd.f32 %v1476_v30, %v1460_v35  ;;  %v5833_v31 = vld [vmem:[#allocation3 + $0x4b] sm:$0xff]  ;;  %s6485_s16 = sld [smem:[#allocation11 + $0xb1]]  ;;  %s8180_s18 = smov 4  }
 0x216   :  { %1842 = vst.msk [vmem:[#allocation3 + $0x38] sm:$0xff] %vm240_vm4, %v1835_v22  ;;  %8025 = vst [vmem:[#allocation185_spill] sm:$0xff] %v5813_v27  ;;  %v1496_v26 = vadd.f32 %v1493_v40, %v1477_v59  ;;  %v5827_v14 = vadd.f32 %v1501_v8, %v1485_v57  ;;  %v5831_v22 = vld [vmem:[#allocation3 + $0x4a] sm:$0xff]  ;;  %v1551_v27 = vmul.f32 %v5506_v11, %v5747_v3  ;;  %v8035_v59 = vld [vmem:[#allocation98_spill] sm:$0xff]  ;;  %s6502_s25 = sld [smem:[#allocation11 + $0xb2]]  ;;  %vm2477_vm3 = vcmask 429056  }
 0x217   :  { %8026 = vst [vmem:[#allocation84_spill] sm:$0xff] %v5816_v51  ;;  %8027 = vst [vmem:[#allocation89_spill] sm:$0xff] %v5819_v45  ;;  %v5835_v17 = vld [vmem:[#allocation3 + $0x4c] sm:$0xff]  ;;  %v1845_v45 = vpop.permute.xlu0 %1844  ;;  %v1535_v51 = vadd.f32 %v5503_v6, %v1516_v33  ;;  %v1531_v57 = vmul.f32 %v5461_v53, %v8035_v59  ;;  %v8036_v40 = vld [vmem:[#allocation61_spill] sm:$0xff]  ;;  %v1495_v35 = vmul.f32 %v5458_v24, %v5671_v39  ;;  %s6517_s6 = sld [smem:[#allocation11 + $0xb3]] }
 0x218   :  { %8028 = vst [vmem:[#allocation87_spill] sm:$0xff] %v5821_v4  ;;  %8029 = vst [vmem:[#allocation83_spill] sm:$0xff] %v5823_v60  ;;  %v5845_v30 = vmul.f32 %v5489_v63, %v8036_v40  ;;  %v5850_v8 = vld [vmem:[#allocation3 + $0x71] sm:$0xf]  ;;  %v1515_v33 = vadd.f32 %v1512_v42, %v1496_v26  ;;  %v5859_v59 = vmul.f32 %v5545_v16, %v1868_v36  ;;  %v2058_v41 = vld [vmem:[#allocation3 + $0x2] sm:$0xff]  ;;  %s6529_s27 = sld [smem:[#allocation11 + $0xb4]] }
 0x219   :  { %8030 = vst [vmem:[#allocation167_spill] sm:$0xff] %v5825_v48  ;;  %8031 = vst [vmem:[#allocation127_spill] sm:$0xff] %v5827_v14  ;;  %v5852_v6 = vld [vmem:[#allocation3 + $0x52] sm:$0xff]  ;;  %v8038_v14 = vld [vmem:[#allocation63_spill] sm:$0xff]  ;;  %v1554_v40 = vadd.f32 %v1551_v27, %v1535_v51  ;;  %v1570_v3 = vmul.f32 %v5514_v32, %v5796_v1  ;;  %v1550_v24 = vmul.f32 %v5506_v11, %v5707_v61  ;;  %v1847_v42 = vpop.permute.xlu1 %1846  ;;  %s6540_s13 = sld [smem:[#allocation11 + $0xb5]] }
 0x21a   :  { %8032 = vst [vmem:[#allocation161_spill] sm:$0xff] %v5831_v22  ;;  %8033 = vst [vmem:[#allocation100_spill] sm:$0xff] %v5833_v31  ;;  %v5866_v39 = vmul.f32 %v5572_v43, %v1963_v9  ;;  %v2248_v26 = vld [vmem:[#allocation3 + $0x4] sm:$0xff]  ;;  %v5872_v36 = vld [vmem:[#allocation3 + $0x54] sm:$0xff]  ;;  %v5876_v27 = vmul.f32 %v5534_v52, %v5709_v25  ;;  %v5880_v51 = vmul.f32 %v5569_v18, %v5711_v12  ;;  %s6550_s10 = sld [smem:[#allocation11 + $0xb6]] }
 0x21b   :  { %8034 = vst [vmem:[#allocation79_spill] sm:$0xff] %v5835_v17  ;;  %1843 = vst.msk [vmem:[#allocation3 + $0x40] sm:$0xff] %vm240_vm4, %v1837_v47  ;;  %v5856_v47 = vmul.f32 %v5517_v10, %v8038_v14  ;;  %v5868_v48 = vld [vmem:[#allocation3 + $0x6a] sm:$0xff]  ;;  %v5870_v14 = vld [vmem:[#allocation3 + $0x53] sm:$0xff]  ;;  %v1498_v9 = vadd.f32 %v1495_v35, %v1479_v38  ;;  %v1573_v43 = vadd.f32 %v1570_v3, %v1554_v40  ;;  %s6562_s22 = sld [smem:[#allocation11 + $0xb7]]  ;;  %vm2496_vm4 = vcmask 420864  }
 0x21c   :  { %1853 = vst.msk [vmem:[#allocation3 + $0x48] sm:$0xff] %vm254_vm5, %v1845_v45  ;;  %8037 = vst [vmem:[#allocation143_spill] sm:$0xff] %v5850_v8  ;;  %v2153_v45 = vld [vmem:[#allocation3 + $0x3] sm:$0xff]  ;;  %v5882_v61 = vld [vmem:[#allocation3 + $0x5a] sm:$0xf]  ;;  %v1514_v12 = vmul.f32 %v5499_v50, %v5850_v8  ;;  %v1569_v35 = vmul.f32 %v5514_v32, %v5783_v0  ;;  %v5903_v3 = vmul.f32 %v5726_v19, %v2248_v26  ;;  %s6586_s29 = sld [smem:[#allocation11 + $0xb8]] }
 0x21d   :  { %8039 = vst [vmem:[#allocation80_spill] sm:$0xff] %v5856_v47  ;;  %8040 = vst [vmem:[#allocation86_spill] sm:$0xff] %v5859_v59  ;;  %v1534_v59 = vadd.f32 %v1531_v57, %v1515_v33  ;;  %v5884_v1 = vld [vmem:[#allocation3 + $0x5b] sm:$0xf]  ;;  %v1849_v47 = vpop.permute.xlu0 %1848  ;;  %v1589_v57 = vmul.f32 %v5524_v34, %v5852_v6  ;;  %v5892_v33 = vmul.f32 %v5609_v56, %v2058_v41  ;;  %v5909_v41 = vld [vmem:[#allocation3 + $0x62] sm:$0xff]  ;;  %s6592_s19 = sld [smem:[#allocation11 + $0xb9]] }
 0x21e   :  { %8041 = vst [vmem:[#allocation88_spill] sm:$0xff] %v5866_v39  ;;  %8042 = vst [vmem:[#allocation154_spill] sm:$0xff] %v5870_v14  ;;  %v5886_v39 = vld [vmem:[#allocation3 + $0x5c] sm:$0xf]  ;;  %v5900_v25 = vmul.f32 %v5658_v46, %v2153_v45  ;;  %v5907_v40 = vmul.f32 %v5444_v54, %v5720_v13  ;;  %v1608_v50 = vmul.f32 %v5527_v20, %v5868_v48  ;;  %v1857_v45 = vpop.permute.xlu1 %1856  ;;  %v8052_v54 = vld [vmem:[#allocation106_spill] sm:$0xff]  ;;  %s6601_s20 = sld [smem:[#allocation11 + $0xba]] }
 0x21f   :  { %8043 = vst [vmem:[#allocation155_spill] sm:$0xff] %v5872_v36  ;;  %8044 = vst [vmem:[#allocation97_spill] sm:$0xff] %v5882_v61  ;;  %v1553_v38 = vadd.f32 %v1550_v24, %v1534_v59  ;;  %v1517_v59 = vadd.f32 %v1514_v12, %v1498_v9  ;;  %v5915_v24 = vld [vmem:[#allocation3 + $0x64] sm:$0xff]  ;;  %v1646_v26 = vmul.f32 %v5534_v52, %v5756_v55  ;;  %v5930_v0 = vld [vmem:[#allocation3 + $0x6c] sm:$0xff]  ;;  %s6621_s23 = sld [smem:[#allocation11 + $0xbb]] }
 0x220   :  { %8045 = vst [vmem:[#allocation60_spill] sm:$0xff] %v5884_v1  ;;  %8046 = vst [vmem:[#allocation125_spill] sm:$0xff] %v5886_v39  ;;  %v1588_v13 = vmul.f32 %v5524_v34, %v5831_v22  ;;  %v5924_v12 = vld [vmem:[#allocation3 + $0x6b] sm:$0xff]  ;;  %v5928_v9 = vmul.f32 %v5569_v18, %v5758_v15  ;;  %s6632_s28 = sld [smem:[#allocation11 + $0xbc]] }
 0x221   :  { %1854 = vst.msk [vmem:[#allocation3 + $0x50] sm:$0xff] %vm254_vm5, %v1847_v42  ;;  %1855 = vst.msk [vmem:[#allocation3 + $0x58] sm:$0xff] %vm254_vm5, %v1849_v47  ;;  %v1592_v42 = vadd.f32 %v1589_v57, %v1573_v43  ;;  %v5913_v47 = vld [vmem:[#allocation3 + $0x63] sm:$0xff]  ;;  %v1572_v8 = vadd.f32 %v1569_v35, %v1553_v38  ;;  %v1859_v43 = vpop.permute.xlu0 %1858  ;;  %v1664_v38 = vmul.f32 %v5551_v5, %v5790_v37  ;;  %v8090_v15 = vld [vmem:[#allocation96_spill] sm:$0xff]  ;;  %vm3124_vm5 = vcmask 195584  }
 0x222   :  { %8047 = vst [vmem:[#allocation126_spill] sm:$0xff] %v5900_v25  ;;  %8048 = vst [vmem:[#allocation123_spill] sm:$0xff] %v5903_v3  ;;  %v1533_v3 = vmul.f32 %v5461_v53, %v8052_v54  ;;  %v5936_v35 = vmul.f32 %v5575_v29, %v5792_v28  ;;  %v5945_v54 = vmul.f32 %v5450_v62, %v5732_v2 }
 0x223   :  { %8049 = vst [vmem:[#allocation124_spill] sm:$0xff] %v5909_v41  ;;  %8050 = vst [vmem:[#allocation135_spill] sm:$0xff] %v5913_v47  ;;  %v1611_v57 = vadd.f32 %v1608_v50, %v1592_v42  ;;  %v1591_v53 = vadd.f32 %v1588_v13, %v1572_v8  ;;  %v1607_v42 = vmul.f32 %v5527_v20, %v5909_v41  ;;  %v1861_v8 = vpop.permute.xlu1 %1860  ;;  %v5954_v13 = vld [vmem:[#allocation3 + $0x72] sm:$0xf] }
 0x224   :  { %8051 = vst [vmem:[#allocation136_spill] sm:$0xff] %v5915_v24  ;;  %1865 = vst.msk [vmem:[#allocation3 + $0x60] sm:$0xff] %vm268_vm6, %v1857_v45  ;;  %v1536_v50 = vadd.f32 %v1533_v3, %v1517_v59  ;;  %v1552_v45 = vmul.f32 %v5506_v11, %v5742_v21  ;;  %v1665_v28 = vmul.f32 %v5551_v5, %v5805_v58  ;;  %v5956_v3 = vld [vmem:[#allocation3 + $0x73] sm:$0xf]  ;;  %v8059_v21 = vld [vmem:[#allocation122_spill] sm:$0xff] }
 0x225   :  { %8053 = vst [vmem:[#allocation174_spill] sm:$0xff] %v5924_v12  ;;  %8054 = vst [vmem:[#allocation187_spill] sm:$0xff] %v5930_v0  ;;  %v1630_v37 = vadd.f32 %v5531_v49, %v1611_v57  ;;  %v5958_v59 = vld [vmem:[#allocation3 + $0x74] sm:$0xf]  ;;  %v1610_v11 = vadd.f32 %v1607_v42, %v1591_v53  ;;  %v1683_v62 = vmul.f32 %v5554_v23, %v5833_v31  ;;  %v8058_v49 = vld [vmem:[#allocation81_spill] sm:$0xff] }
 0x226   :  { %1866 = vst.msk [vmem:[#allocation3 + $0x68] sm:$0xff] %vm268_vm6, %v1859_v43  ;;  %v5952_v43 = vmul.f32 %v5575_v29, %v5807_v44  ;;  %8055 = vst [vmem:[#allocation73_spill] sm:$0xff] %v5954_v13  ;;  %v5964_v2 = vmul.f32 %v8058_v49, %v5835_v17  ;;  %v1555_v57 = vadd.f32 %v1552_v45, %v1536_v50  ;;  %v8060_v42 = vld [vmem:[#allocation168_spill] sm:$0xff]  ;;  %v8061_v50 = vld [vmem:[#allocation103_spill] sm:$0xff] }
 0x227   :  { %8056 = vst [vmem:[#allocation188_spill] sm:$0xff] %v5956_v3  ;;  %8057 = vst [vmem:[#allocation65_spill] sm:$0xff] %v5958_v59  ;;  %v5968_v41 = vmul.f32 %v5466_v7, %v8059_v21  ;;  %v1649_v22 = vadd.f32 %v1646_v26, %v1630_v37  ;;  %v1684_v44 = vmul.f32 %v5554_v23, %v5870_v14 }
 0x228   :  { %v5974_v25 = vmul.f32 %v8058_v49, %v5872_v36  ;;  %1867 = vst.msk [vmem:[#allocation3 + $0x70] sm:$0xff] %vm268_vm6, %v1861_v8  ;;  %v1629_v53 = vadd.f32 %v5845_v30, %v1610_v11  ;;  %v1702_v17 = vmul.f32 %v8060_v42, %v5913_v47  ;;  %v5982_v45 = vmul.f32 %v8061_v50, %v5915_v24  ;;  %v5992_v8 = vld [vmem:[#allocation3 + $0x18] sm:$0xff] }
 0x229   :  { %v1571_v7 = vmul.f32 %v5514_v32, %v5821_v4  ;;  %v1668_v21 = vadd.f32 %v1665_v28, %v1649_v22  ;;  %v1703_v37 = vmul.f32 %v8060_v42, %v5924_v12  ;;  %v5990_v26 = vmul.f32 %v8061_v50, %v5930_v0  ;;  %8062 = vst [vmem:[#allocation99_spill] sm:$0xff] %v5992_v8  ;;  %v8063_v32 = vld [vmem:[#allocation109_spill] sm:$0xff]  ;;  %v8064_v4 = vld [vmem:[#allocation120_spill] sm:$0xff] }
 0x22a   :  { %v1590_v30 = vmul.f32 %v5524_v34, %v5882_v61  ;;  %v1648_v11 = vadd.f32 %v5876_v27, %v1629_v53  ;;  %v1609_v47 = vmul.f32 %v5527_v20, %v5954_v13  ;;  %v1628_v28 = vmul.f32 %v5489_v63, %v8063_v32  ;;  %v1870_v27 = vld [vmem:[#allocation3 + $0x10] sm:$0xf]  ;;  %v8066_v20 = vld [vmem:[#allocation71_spill] sm:$0xff] }
 0x22b   :  { %v1574_v24 = vadd.f32 %v1571_v7, %v1555_v57  ;;  %v1687_v22 = vadd.f32 %v1684_v44, %v1668_v21  ;;  %v1647_v31 = vmul.f32 %v5534_v52, %v8064_v4  ;;  %v6005_v0 = vmul.f32 %v5551_v5, %v5823_v60  ;;  %v6011_v57 = vld [vmem:[#allocation3 + $0x20] sm:$0xff]  ;;  %v1965_v44 = vld [vmem:[#allocation3 + $0x11] sm:$0xf]  ;;  %v8071_v4 = vld [vmem:[#allocation167_spill] sm:$0xff] }
 0x22c   :  { %v6009_v34 = vmul.f32 %v5554_v23, %v5884_v1  ;;  %8065 = vst [vmem:[#allocation69_spill] sm:$0xff] %v6011_v57  ;;  %v1667_v53 = vadd.f32 %v1664_v38, %v1648_v11  ;;  %v6015_v7 = vmul.f32 %v8066_v20, %v5992_v8  ;;  %v6019_v63 = vmul.f32 %v8060_v42, %v5956_v3  ;;  %v8067_v52 = vld [vmem:[#allocation110_spill] sm:$0xff]  ;;  %v8070_v38 = vld [vmem:[#allocation189_spill] sm:$0xff] }
 0x22d   :  { %v6023_v5 = vmul.f32 %v5517_v10, %v8067_v52  ;;  %v1706_v21 = vadd.f32 %v1703_v37, %v1687_v22  ;;  %v6025_v23 = vld [vmem:[#allocation3 + $0x19] sm:$0xff]  ;;  %v1593_v60 = vadd.f32 %v1590_v30, %v1574_v24  ;;  %v6031_v11 = vmul.f32 %v5569_v18, %v8070_v38  ;;  %v6037_v42 = vld [vmem:[#allocation3 + $0x21] sm:$0xff] }
 0x22e   :  { %8068 = vst [vmem:[#allocation191_spill] sm:$0xff] %v6025_v23  ;;  %v6027_v1 = vld [vmem:[#allocation3 + $0x1a] sm:$0xff]  ;;  %v6035_v32 = vmul.f32 %v5575_v29, %v8071_v4  ;;  %8072 = vst [vmem:[#allocation192_spill] sm:$0xff] %v6037_v42  ;;  %v6039_v3 = vld [vmem:[#allocation3 + $0x22] sm:$0xff]  ;;  %v1686_v37 = vadd.f32 %v1683_v62, %v1667_v53  ;;  %v6045_v22 = vmul.f32 %v8058_v49, %v5886_v39 }
 0x22f   :  { %8069 = vst [vmem:[#allocation144_spill] sm:$0xff] %v6027_v1  ;;  %8073 = vst [vmem:[#allocation57_spill] sm:$0xff] %v6039_v3  ;;  %v6041_v10 = vld [vmem:[#allocation3 + $0x23] sm:$0xff]  ;;  %v6049_v24 = vmul.f32 %v8061_v50, %v5958_v59  ;;  %v6052_v18 = vmul.f32 %v5545_v16, %v1870_v27  ;;  %v8075_v29 = vld [vmem:[#allocation101_spill] sm:$0xff]  ;;  %v6057_v4 = vmul.f32 %v8066_v20, %v6011_v57 }
 0x230   :  { %8074 = vst [vmem:[#allocation160_spill] sm:$0xff] %v6041_v10  ;;  %v1725_v30 = vadd.f32 %v8075_v29, %v1706_v21  ;;  %v6059_v38 = vld [vmem:[#allocation3 + $0x24] sm:$0xff]  ;;  %v6061_v62 = vld [vmem:[#allocation3 + $0x1b] sm:$0xff]  ;;  %v1705_v59 = vadd.f32 %v1702_v17, %v1686_v37  ;;  %v1612_v13 = vadd.f32 %v1609_v47, %v1593_v60  ;;  %v8087_v60 = vld [vmem:[#allocation80_spill] sm:$0xff] }
 0x231   :  { %8076 = vst [vmem:[#allocation92_spill] sm:$0xff] %v6059_v38  ;;  %8077 = vst [vmem:[#allocation95_spill] sm:$0xff] %v6061_v62  ;;  %v8078_v53 = vld [vmem:[#allocation102_spill] sm:$0xff]  ;;  %v8081_v16 = vld [vmem:[#allocation157_spill] sm:$0xff] }
 0x232   :  { %v6064_v49 = vmul.f32 %v8078_v53, %v1965_v44  ;;  %v8079_v39 = vld [vmem:[#allocation70_spill] sm:$0xff]  ;;  %v6070_v27 = vmul.f32 %v8081_v16, %v6025_v23  ;;  %v1744_v61 = vadd.f32 %v5928_v9, %v1725_v30  ;;  %v6079_v8 = vmul.f32 %v8081_v16, %v6037_v42  ;;  %v1889_v53 = vld [vmem:[#allocation3 + $0x28] sm:$0xf]  ;;  %v6099_v42 = vld [vmem:[#allocation3 + $0x30] sm:$0xff] }
 0x233   :  { %v8080_v52 = vld [vmem:[#allocation182_spill] sm:$0xff]  ;;  %v1724_v47 = vadd.f32 %v8087_v60, %v1705_v59  ;;  %v1631_v30 = vadd.f32 %v1628_v28, %v1612_v13  ;;  %8088 = vst [vmem:[#allocation107_spill] sm:$0xff] %v6099_v42  ;;  %v8089_v57 = vld [vmem:[#allocation173_spill] sm:$0xff] }
 0x234   :  { %v1369_v50 = vmul.f32 %v8080_v52, %v8079_v39  ;;  %v8082_v21 = vld [vmem:[#allocation74_spill] sm:$0xff]  ;;  %v1984_v52 = vld [vmem:[#allocation3 + $0x29] sm:$0xf]  ;;  %v6106_v59 = vld [vmem:[#allocation3 + $0x38] sm:$0xff] }
 0x235   :  { %v6074_v29 = vmul.f32 %v8082_v21, %v6027_v1  ;;  %v6083_v44 = vmul.f32 %v8082_v21, %v6039_v3  ;;  %v8083_v17 = vld [vmem:[#allocation186_spill] sm:$0xff]  ;;  %v1763_v3 = vadd.f32 %v5952_v43, %v1744_v61  ;;  %v1743_v60 = vadd.f32 %v5880_v51, %v1724_v47  ;;  %v2079_v43 = vld [vmem:[#allocation3 + $0x2a] sm:$0xf] }
 0x236   :  { %v6087_v39 = vmul.f32 %v8083_v17, %v6041_v10  ;;  %v2267_v37 = vld [vmem:[#allocation3 + $0x1c] sm:$0xff]  ;;  %v6096_v9 = vmul.f32 %v8083_v17, %v6061_v62  ;;  %v2060_v10 = vld [vmem:[#allocation3 + $0x12] sm:$0xf]  ;;  %v1372_v36 = vadd.f32 %v1369_v50, %v8089_v57  ;;  %v1650_v28 = vadd.f32 %v1647_v31, %v1631_v30  ;;  %v8097_v51 = vld [vmem:[#allocation183_spill] sm:$0xff] }
 0x237   :  { %v8085_v1 = vld [vmem:[#allocation190_spill] sm:$0xff]  ;;  %v6113_v61 = vmul.f32 %v8066_v20, %v1889_v53  ;;  %v1782_v57 = vadd.f32 %v5974_v25, %v1763_v3  ;;  %v6116_v50 = vld [vmem:[#allocation3 + $0x31] sm:$0xff]  ;;  %v6134_v3 = vmul.f32 %v5609_v56, %v2060_v10 }
 0x238   :  { %8084 = vst [vmem:[#allocation175_spill] sm:$0xff] %v6087_v39  ;;  %v6091_v23 = vmul.f32 %v8085_v1, %v6059_v38  ;;  %v8091_v39 = vld [vmem:[#allocation58_spill] sm:$0xff]  ;;  %v6110_v13 = vmul.f32 %v8085_v1, %v2267_v37  ;;  %8094 = vst [vmem:[#allocation176_spill] sm:$0xff] %v6116_v50  ;;  %v1762_v37 = vadd.f32 %v5936_v35, %v1743_v60  ;;  %v8098_v31 = vld [vmem:[#allocation156_spill] sm:$0xff] }
 0x239   :  { %v1388_v12 = vmul.f32 %v8091_v39, %v8090_v15  ;;  %v8092_v38 = vld [vmem:[#allocation118_spill] sm:$0xff]  ;;  %v6118_v15 = vld [vmem:[#allocation3 + $0x32] sm:$0xff]  ;;  %v1911_v20 = vmul.f32 %v8098_v31, %v6099_v42  ;;  %v1669_v25 = vadd.f32 %v6005_v0, %v1650_v28 }
 0x23a   :  { %8086 = vst [vmem:[#allocation104_spill] sm:$0xff] %v6091_v23  ;;  %v8093_v23 = vld [vmem:[#allocation59_spill] sm:$0xff]  ;;  %8095 = vst [vmem:[#allocation108_spill] sm:$0xff] %v6118_v15  ;;  %v6128_v53 = vld [vmem:[#allocation3 + $0x33] sm:$0xff]  ;;  %v1781_v0 = vadd.f32 %v5964_v2, %v1762_v37 }
 0x23b   :  { %v1407_v14 = vmul.f32 %v8093_v23, %v8092_v38  ;;  %v6121_v38 = vmul.f32 %v8081_v16, %v1984_v52  ;;  %v1391_v62 = vadd.f32 %v1388_v12, %v1372_v36  ;;  %v8096_v23 = vld [vmem:[#allocation82_spill] sm:$0xff]  ;;  %8099 = vst [vmem:[#allocation112_spill] sm:$0xff] %v6128_v53  ;;  %v6130_v30 = vld [vmem:[#allocation3 + $0x34] sm:$0xff]  ;;  %v1801_v52 = vadd.f32 %v5990_v26, %v1782_v57  ;;  %v8107_v2 = vld [vmem:[#allocation111_spill] sm:$0xff] }
 0x23c   :  { %v1426_v47 = vmul.f32 %v8097_v51, %v8096_v23  ;;  %8100 = vst [vmem:[#allocation177_spill] sm:$0xff] %v6130_v30  ;;  %v1912_v36 = vmul.f32 %v8098_v31, %v6106_v59  ;;  %v6140_v12 = vmul.f32 %v8082_v21, %v2079_v43  ;;  %v2155_v35 = vld [vmem:[#allocation3 + $0x13] sm:$0xf]  ;;  %v2174_v23 = vld [vmem:[#allocation3 + $0x2b] sm:$0xf]  ;;  %v6144_v60 = vld [vmem:[#allocation3 + $0x39] sm:$0xff]  ;;  %v1688_v21 = vadd.f32 %v6009_v34, %v1669_v25 }
 0x23d   :  { %v1410_v16 = vadd.f32 %v1407_v14, %v1391_v62  ;;  %8101 = vst [vmem:[#allocation114_spill] sm:$0xff] %v6144_v60  ;;  %v8102_v56 = vld [vmem:[#allocation90_spill] sm:$0xff]  ;;  %v8103_v26 = vld [vmem:[#allocation149_spill] sm:$0xff]  ;;  %v2250_v43 = vld [vmem:[#allocation3 + $0x14] sm:$0xf]  ;;  %v6165_v37 = vmul.f32 %v8107_v2, %v6128_v53  ;;  %v1800_v25 = vadd.f32 %v5982_v45, %v1781_v0  ;;  %v6181_v1 = vmul.f32 %v8083_v17, %v2174_v23 }
 0x23e   :  { %v6149_v10 = vmul.f32 %v8102_v56, %v6116_v50  ;;  %v6153_v28 = vmul.f32 %v8103_v26, %v6118_v15  ;;  %v8104_v14 = vld [vmem:[#allocation105_spill] sm:$0xff]  ;;  %v6171_v39 = vld [vmem:[#allocation3 + $0x50] sm:$0xff]  ;;  %v6192_v53 = vld [vmem:[#allocation3 + $0x40] sm:$0xf]  ;;  %v6195_v45 = vmul.f32 %v5726_v19, %v2250_v43 }
 0x23f   :  { %v1877_v62 = vadd.f32 %v8104_v14, %v1801_v52  ;;  %v6159_v57 = vld [vmem:[#allocation3 + $0x3a] sm:$0xff]  ;;  %v1429_v15 = vadd.f32 %v1426_v47, %v1410_v16  ;;  %v1707_v52 = vadd.f32 %v6019_v63, %v1688_v21  ;;  %v6178_v14 = vmul.f32 %v5658_v46, %v2155_v35  ;;  %v6190_v16 = vld [vmem:[#allocation3 + $0x48] sm:$0xff]  ;;  %8111 = vst [vmem:[#allocation132_spill] sm:$0xff] %v6192_v53 }
 0x240   :  { %8105 = vst [vmem:[#allocation115_spill] sm:$0xff] %v6159_v57  ;;  %v6161_v42 = vld [vmem:[#allocation3 + $0x3b] sm:$0xff]  ;;  %v6188_v47 = vmul.f32 %v8102_v56, %v6144_v60  ;;  %8110 = vst [vmem:[#allocation131_spill] sm:$0xff] %v6190_v16  ;;  %v6198_v35 = vld [vmem:[#allocation3 + $0x68] sm:$0xff]  ;;  %v6202_v17 = vmul.f32 %v8103_v26, %v6159_v57 }
 0x241   :  { %8106 = vst [vmem:[#allocation129_spill] sm:$0xff] %v6161_v42  ;;  %v8108_v50 = vld [vmem:[#allocation185_spill] sm:$0xff]  ;;  %v8113_v23 = vld [vmem:[#allocation86_spill] sm:$0xff]  ;;  %v1726_v21 = vadd.f32 %v6023_v5, %v1707_v52 }
 0x242   :  { %v6169_v51 = vmul.f32 %v8108_v50, %v6130_v30  ;;  %v6173_v34 = vld [vmem:[#allocation3 + $0x3c] sm:$0xff]  ;;  %v1896_v30 = vadd.f32 %v6057_v4, %v1877_v62  ;;  %v6206_v4 = vmul.f32 %v8107_v2, %v6161_v42  ;;  %v1876_v0 = vadd.f32 %v8113_v23, %v1800_v25  ;;  %v6251_v42 = vld [vmem:[#allocation3 + $0x49] sm:$0xff] }
 0x243   :  { %8109 = vst [vmem:[#allocation130_spill] sm:$0xff] %v6173_v34  ;;  %v8112_v46 = vld [vmem:[#allocation77_spill] sm:$0xff]  ;;  %v6210_v62 = vld [vmem:[#allocation3 + $0x41] sm:$0xf]  ;;  %8120 = vst [vmem:[#allocation139_spill] sm:$0xff] %v6251_v42 }
 0x244   :  { %v1448_v63 = vadd.f32 %v8112_v46, %v1429_v15  ;;  %8114 = vst [vmem:[#allocation133_spill] sm:$0xff] %v6210_v62  ;;  %v1915_v19 = vadd.f32 %v1912_v36, %v1896_v30  ;;  %v8115_v43 = vld [vmem:[#allocation178_spill] sm:$0xff]  ;;  %v6216_v46 = vmul.f32 %v8108_v50, %v6173_v34  ;;  %v1895_v25 = vadd.f32 %v6015_v7, %v1876_v0 }
 0x245   :  { %v1931_v15 = vmul.f32 %v8115_v43, %v6171_v39  ;;  %v1930_v5 = vmul.f32 %v8115_v43, %v6190_v16  ;;  %v1745_v30 = vadd.f32 %v6031_v11, %v1726_v21  ;;  %v6227_v36 = vmul.f32 %v8098_v31, %v6192_v53  ;;  %v6229_v52 = vld [vmem:[#allocation3 + $0x42] sm:$0xf]  ;;  %v6253_v16 = vld [vmem:[#allocation3 + $0x4a] sm:$0xff] }
 0x246   :  { %v1467_v57 = vadd.f32 %v5907_v40, %v1448_v63  ;;  %8116 = vst [vmem:[#allocation134_spill] sm:$0xff] %v6229_v52  ;;  %v8117_v63 = vld [vmem:[#allocation179_spill] sm:$0xff]  ;;  %v6235_v34 = vld [vmem:[#allocation3 + $0x60] sm:$0xff]  ;;  %v6239_v7 = vmul.f32 %v8102_v56, %v6210_v62  ;;  %v1914_v0 = vadd.f32 %v1911_v20, %v1895_v25  ;;  %v6246_v53 = vstv %s6156_s8  ;;  %8121 = vst [vmem:[#allocation140_spill] sm:$0xff] %v6253_v16  ;;  %s6657_s8 = sld [smem:[#allocation11 + $0xbd]] }
 0x247   :  { %v1934_v40 = vadd.f32 %v1931_v15, %v1915_v19  ;;  %v1950_v23 = vmul.f32 %v8117_v63, %v6198_v35  ;;  %8118 = vst [vmem:[#allocation137_spill] sm:$0xff] %v6235_v34  ;;  %v1764_v31 = vadd.f32 %v6035_v32, %v1745_v30  ;;  %v6243_v21 = vld [vmem:[#allocation3 + $0x43] sm:$0xf]  ;;  %v6249_v19 = vstv %s6142_s7  ;;  %s8188_s7 = smov 8  }
 0x248   :  { %v1486_v11 = vadd.f32 %v5945_v54, %v1467_v57  ;;  %8119 = vst [vmem:[#allocation138_spill] sm:$0xff] %v6243_v21  ;;  %v6257_v56 = vmul.f32 %v8103_v26, %v6229_v52  ;;  %v8122_v20 = vld [vmem:[#allocation170_spill] sm:$0xff]  ;;  %v6264_v57 = vld [vmem:[#allocation3 + $0x51] sm:$0xff]  ;;  %v1933_v25 = vadd.f32 %v1930_v5, %v1914_v0  ;;  %v1949_v30 = vmul.f32 %v8117_v63, %v6235_v34 }
 0x249   :  { %v1953_v15 = vadd.f32 %v1950_v23, %v1934_v40  ;;  %v1521_v32 = vmul.f32 %v6246_v53, %v8122_v20  ;;  %8123 = vst [vmem:[#allocation141_spill] sm:$0xff] %v6264_v57  ;;  %v1783_v40 = vadd.f32 %v6045_v22, %v1764_v31  ;;  %v6270_v23 = vstv %s6183_s0  ;;  %v8124_v26 = vld [vmem:[#allocation94_spill] sm:$0xff]  ;;  %v6281_v5 = vld [vmem:[#allocation3 + $0x52] sm:$0xff]  ;;  %s6661_s0 = sld [smem:[#allocation11 + $0xbe]] }
 0x24a   :  { %v1505_v54 = vadd.f32 %v5968_v41, %v1486_v11  ;;  %v6277_v41 = vmul.f32 %v8107_v2, %v6243_v21  ;;  %v8125_v20 = vld [vmem:[#allocation66_spill] sm:$0xff]  ;;  %8126 = vst [vmem:[#allocation142_spill] sm:$0xff] %v6281_v5  ;;  %v1952_v0 = vadd.f32 %v1949_v30, %v1933_v25  ;;  %v8128_v34 = vld [vmem:[#allocation180_spill] sm:$0xff]  ;;  %v8131_v30 = vld [vmem:[#allocation93_spill] sm:$0xff] }
 0x24b   :  { %v1972_v52 = vadd.f32 %v8124_v26, %v1953_v15  ;;  %v1540_v62 = vmul.f32 %v6249_v19, %v8125_v20  ;;  %v8127_v22 = vld [vmem:[#allocation158_spill] sm:$0xff]  ;;  %v6287_v60 = vmul.f32 %v8128_v34, %v6253_v16  ;;  %v1802_v15 = vadd.f32 %v6049_v24, %v1783_v40  ;;  %v6297_v26 = vld [vmem:[#allocation3 + $0x58] sm:$0xf]  ;;  %v6301_v21 = vld [vmem:[#allocation3 + $0x69] sm:$0xff] }
 0x24c   :  { %v1524_v11 = vadd.f32 %v1521_v32, %v1505_v54  ;;  %v2025_v31 = vmul.f32 %v8127_v22, %v6251_v42  ;;  %v2026_v54 = vmul.f32 %v8127_v22, %v6264_v57  ;;  %v6295_v32 = vld [vmem:[#allocation3 + $0x53] sm:$0xff]  ;;  %8130 = vst [vmem:[#allocation146_spill] sm:$0xff] %v6297_v26  ;;  %v1559_v20 = vmul.f32 %v6270_v23, %v8131_v30 }
 0x24d   :  { %v1991_v2 = vadd.f32 %v6079_v8, %v1972_v52  ;;  %8129 = vst [vmem:[#allocation145_spill] sm:$0xff] %v6295_v32  ;;  %8132 = vst [vmem:[#allocation147_spill] sm:$0xff] %v6301_v21  ;;  %v8133_v16 = vld [vmem:[#allocation88_spill] sm:$0xff]  ;;  %v1878_v24 = vadd.f32 %v6052_v18, %v1802_v15  ;;  %v6306_v40 = vstv %s6219_s3  ;;  %v6309_v8 = vstv %s6231_s24  ;;  %v6325_v15 = vld [vmem:[#allocation3 + $0x61] sm:$0xff]  ;;  %s6673_s3 = sld [smem:[#allocation11 + $0xbf]] }
 0x24e   :  { %v1543_v25 = vadd.f32 %v1540_v62, %v1524_v11  ;;  %v1971_v42 = vadd.f32 %v8133_v16, %v1952_v0  ;;  %v6314_v57 = vmul.f32 %v8128_v34, %v6281_v5  ;;  %v8134_v11 = vld [vmem:[#allocation171_spill] sm:$0xff]  ;;  %v8135_v16 = vld [vmem:[#allocation121_spill] sm:$0xff]  ;;  %8136 = vst [vmem:[#allocation148_spill] sm:$0xff] %v6325_v15  ;;  %v6334_v5 = vld [vmem:[#allocation3 + $0x70] sm:$0xf]  ;;  %s6685_s24 = sld [smem:[#allocation11 + $0xc0]] }
 0x24f   :  { %v2010_v52 = vadd.f32 %v6188_v47, %v1991_v2  ;;  %v1578_v30 = vmul.f32 %v6306_v40, %v8134_v11  ;;  %v6322_v18 = vmul.f32 %v8135_v16, %v6295_v32  ;;  %v1897_v47 = vadd.f32 %v6113_v61, %v1878_v24  ;;  %8138 = vst [vmem:[#allocation62_spill] sm:$0xff] %v6334_v5 }
 0x250   :  { %v1562_v62 = vadd.f32 %v1559_v20, %v1543_v25  ;;  %v1990_v0 = vadd.f32 %v6070_v27, %v1971_v42  ;;  %v1932_v2 = vmul.f32 %v8115_v43, %v6297_v26  ;;  %v8137_v20 = vld [vmem:[#allocation159_spill] sm:$0xff]  ;;  %v1597_v32 = vmul.f32 %v6309_v8, %v5852_v6  ;;  %v6338_v42 = vld [vmem:[#allocation3 + $0x54] sm:$0xff] }
 0x251   :  { %v2029_v25 = vadd.f32 %v2026_v54, %v2010_v52  ;;  %v2045_v11 = vmul.f32 %v8137_v20, %v6301_v21  ;;  %8139 = vst [vmem:[#allocation169_spill] sm:$0xff] %v6338_v42  ;;  %v1916_v61 = vadd.f32 %v6227_v36, %v1897_v47  ;;  %v6343_v43 = vstv %s6272_s1  ;;  %v6350_v26 = vld [vmem:[#allocation3 + $0x4b] sm:$0xff]  ;;  %v6360_v47 = vld [vmem:[#allocation3 + $0x59] sm:$0xf]  ;;  %s6719_s1 = sld [smem:[#allocation11 + $0xc3]] }
 0x252   :  { %v1581_v50 = vadd.f32 %v1578_v30, %v1562_v62  ;;  %v2009_v27 = vadd.f32 %v6149_v10, %v1990_v0  ;;  %v6346_v24 = vstv %s6262_s4  ;;  %v2044_v52 = vmul.f32 %v8137_v20, %v6325_v15  ;;  %8140 = vst [vmem:[#allocation128_spill] sm:$0xff] %v6350_v26  ;;  %v6352_v62 = vld [vmem:[#allocation3 + $0x4c] sm:$0xff]  ;;  %8142 = vst [vmem:[#allocation122_spill] sm:$0xff] %v6360_v47  ;;  %s6693_s4 = sld [smem:[#allocation11 + $0xc1]] }
 0x253   :  { %v2048_v54 = vadd.f32 %v2045_v11, %v2029_v25  ;;  %8141 = vst [vmem:[#allocation81_spill] sm:$0xff] %v6352_v62  ;;  %v1616_v30 = vmul.f32 %v6343_v43, %v5868_v48  ;;  %v1935_v36 = vadd.f32 %v1932_v2, %v1916_v61  ;;  %v1951_v0 = vmul.f32 %v8117_v63, %v6334_v5  ;;  %v8143_v11 = vld [vmem:[#allocation72_spill] sm:$0xff] }
 0x254   :  { %v1600_v6 = vadd.f32 %v1597_v32, %v1581_v50  ;;  %v2028_v10 = vadd.f32 %v2025_v31, %v2009_v27  ;;  %v6363_v25 = vstv %s6290_s14  ;;  %v8144_v50 = vld [vmem:[#allocation84_spill] sm:$0xff]  ;;  %v6376_v63 = vmul.f32 %v8135_v16, %v6350_v26  ;;  %s3352_s14 = sld [smem:[#allocation11 + $0xc2]] }
 0x255   :  { %v2067_v15 = vadd.f32 %v8143_v11, %v2048_v54  ;;  %v6370_v32 = vmul.f32 %v8144_v50, %v6338_v42  ;;  %v8145_v21 = vld [vmem:[#allocation68_spill] sm:$0xff]  ;;  %v6380_v27 = vmul.f32 %v8144_v50, %v6352_v62  ;;  %v1954_v61 = vadd.f32 %v1951_v0, %v1935_v36  ;;  %v6382_v54 = vld [vmem:[#allocation3 + $0x5a] sm:$0xf]  ;;  %v8162_v42 = vld [vmem:[#allocation126_spill] sm:$0xff] }
 0x256   :  { %v1619_v48 = vadd.f32 %v1616_v30, %v1600_v6  ;;  %v1635_v31 = vmul.f32 %v6346_v24, %v8145_v21  ;;  %v2047_v2 = vadd.f32 %v2044_v52, %v2028_v10  ;;  %8146 = vst [vmem:[#allocation168_spill] sm:$0xff] %v6382_v54  ;;  %v6387_v30 = vld [vmem:[#allocation3 + $0x62] sm:$0xff]  ;;  %v2027_v21 = vmul.f32 %v8127_v22, %v6360_v47  ;;  %v6391_v52 = vld [vmem:[#allocation3 + $0x5b] sm:$0xf]  ;;  %v6395_v5 = vld [vmem:[#allocation3 + $0x6a] sm:$0xff] }
 0x257   :  { %v2086_v6 = vadd.f32 %v6083_v44, %v2067_v15  ;;  %8147 = vst [vmem:[#allocation103_spill] sm:$0xff] %v6387_v30  ;;  %8148 = vst [vmem:[#allocation71_spill] sm:$0xff] %v6391_v52  ;;  %v1654_v11 = vmul.f32 %v6363_v25, %v5756_v55  ;;  %v1973_v0 = vadd.f32 %v6064_v49, %v1954_v61  ;;  %v6400_v62 = vstv %s6318_s21  ;;  %v8149_v49 = vld [vmem:[#allocation119_spill] sm:$0xff]  ;;  %v8157_v26 = vld [vmem:[#allocation116_spill] sm:$0xff]  ;;  %s3356_s21 = sld [smem:[#allocation11 + $0xc4]] }
 0x258   :  { %v1638_v10 = vadd.f32 %v1635_v31, %v1619_v48  ;;  %v2066_v36 = vadd.f32 %v5892_v33, %v2047_v2  ;;  %v6403_v44 = vstv %s6330_s30  ;;  %v6408_v22 = vmul.f32 %v8128_v34, %v6382_v54  ;;  %v6417_v2 = vld [vmem:[#allocation3 + $0x63] sm:$0xff]  ;;  %s6741_s30 = sld [smem:[#allocation11 + $0xc5]] }
 0x259   :  { %v2105_v15 = vadd.f32 %v6202_v17, %v2086_v6  ;;  %v1673_v55 = vmul.f32 %v6400_v62, %v5805_v58  ;;  %v2139_v31 = vmul.f32 %v8149_v49, %v6387_v30  ;;  %8150 = vst [vmem:[#allocation101_spill] sm:$0xff] %v6417_v2  ;;  %v1992_v17 = vadd.f32 %v6121_v38, %v1973_v0  ;;  %v6429_v6 = vld [vmem:[#allocation3 + $0x71] sm:$0xf]  ;;  %v6434_v38 = vld [vmem:[#allocation3 + $0x64] sm:$0xff] }
 0x25a   :  { %v1657_v48 = vadd.f32 %v1654_v11, %v1638_v10  ;;  %v2085_v33 = vadd.f32 %v6074_v29, %v2066_v36  ;;  %v6422_v34 = vmul.f32 %v8135_v16, %v6391_v52  ;;  %v2140_v61 = vmul.f32 %v8149_v49, %v6395_v5  ;;  %8151 = vst [vmem:[#allocation102_spill] sm:$0xff] %v6429_v6  ;;  %v8152_v10 = vld [vmem:[#allocation154_spill] sm:$0xff] }
 0x25b   :  { %v2124_v58 = vadd.f32 %v6314_v57, %v2105_v15  ;;  %v1692_v11 = vmul.f32 %v6403_v44, %v8152_v10  ;;  %8153 = vst [vmem:[#allocation70_spill] sm:$0xff] %v6434_v38  ;;  %v2011_v16 = vadd.f32 %v6239_v7, %v1992_v17  ;;  %v6438_v0 = vstv %s6365_s9  ;;  %v6445_v15 = vld [vmem:[#allocation3 + $0x6b] sm:$0xff]  ;;  %s3362_s9 = sld [smem:[#allocation11 + $0xc7]] }
 0x25c   :  { %v1676_v29 = vadd.f32 %v1673_v55, %v1657_v48  ;;  %v2104_v36 = vadd.f32 %v6153_v28, %v2085_v33  ;;  %v6441_v52 = vstv %s6356_s12  ;;  %8154 = vst [vmem:[#allocation157_spill] sm:$0xff] %v6445_v15  ;;  %v6447_v48 = vld [vmem:[#allocation3 + $0x6c] sm:$0xff]  ;;  %v8156_v33 = vld [vmem:[#allocation174_spill] sm:$0xff]  ;;  %v2046_v47 = vmul.f32 %v8137_v20, %v6429_v6  ;;  %s6751_s12 = sld [smem:[#allocation11 + $0xc6]] }
 0x25d   :  { %v2143_v57 = vadd.f32 %v2140_v61, %v2124_v58  ;;  %v8155_v55 = vld [vmem:[#allocation152_spill] sm:$0xff]  ;;  %v1711_v54 = vmul.f32 %v6438_v0, %v8156_v33  ;;  %v2030_v17 = vadd.f32 %v2027_v21, %v2011_v16  ;;  %v6461_v61 = vstv %s6384_s15  ;;  %s8267_s15 = smov 127  }
 0x25e   :  { %v2234_v10 = vmul.f32 %v8155_v55, %v6417_v2  ;;  %v1695_v28 = vadd.f32 %v1692_v11, %v1676_v29  ;;  %v2123_v7 = vadd.f32 %v6287_v60, %v2104_v36  ;;  %v6458_v58 = vld [vmem:[#allocation3 + $0x72] sm:$0xf]  ;;  %v8158_v2 = vld [vmem:[#allocation89_spill] sm:$0xff]  ;;  %v2235_v20 = vmul.f32 %v8155_v55, %v6445_v15 }
 0x25f   :  { %v2162_v30 = vadd.f32 %v8157_v26, %v2143_v57  ;;  %v6466_v29 = vmul.f32 %v8158_v2, %v6434_v38  ;;  %v8159_v33 = vld [vmem:[#allocation172_spill] sm:$0xff]  ;;  %v6476_v21 = vmul.f32 %v8158_v2, %v6447_v48  ;;  %v2049_v36 = vadd.f32 %v2046_v47, %v2030_v17  ;;  %v8160_v57 = vld [vmem:[#allocation175_spill] sm:$0xff] }
 0x260   :  { %v1714_v11 = vadd.f32 %v1711_v54, %v1695_v28  ;;  %v1730_v60 = vmul.f32 %v6441_v52, %v8159_v33  ;;  %v2142_v26 = vadd.f32 %v2139_v31, %v2123_v7  ;;  %v6478_v16 = vld [vmem:[#allocation3 + $0x73] sm:$0xf]  ;;  %v2141_v54 = vmul.f32 %v8149_v49, %v6458_v58  ;;  %v8161_v33 = vld [vmem:[#allocation151_spill] sm:$0xff] }
 0x261   :  { %v2181_v6 = vadd.f32 %v8160_v57, %v2162_v30  ;;  %v1749_v38 = vmul.f32 %v6461_v61, %v8161_v33  ;;  %v2068_v31 = vadd.f32 %v6134_v3, %v2049_v36  ;;  %v6490_v47 = vstv %s6412_s5  ;;  %v8164_v36 = vld [vmem:[#allocation166_spill] sm:$0xff]  ;;  %v8165_v57 = vld [vmem:[#allocation155_spill] sm:$0xff]  ;;  %s8268_s5 = smov 126  }
 0x262   :  { %v1733_v28 = vadd.f32 %v1730_v60, %v1714_v11  ;;  %v2161_v15 = vadd.f32 %v8162_v42, %v2142_v26  ;;  %v6493_v7 = vstv %s6424_s26  ;;  %v6498_v49 = vmul.f32 %v8155_v55, %v6478_v16  ;;  %v8163_v11 = vld [vmem:[#allocation184_spill] sm:$0xff]  ;;  %s8269_s26 = smov 125  }
 0x263   :  { %v2200_v30 = vadd.f32 %v6206_v4, %v2181_v6  ;;  %v1768_v60 = vmul.f32 %v6490_v47, %v8163_v11  ;;  %v2087_v3 = vadd.f32 %v6140_v12, %v2068_v31  ;;  %v6507_v26 = vstv %s6443_s2  ;;  %v8166_v12 = vld [vmem:[#allocation127_spill] sm:$0xff]  ;;  %v8167_v31 = vld [vmem:[#allocation98_spill] sm:$0xff]  ;;  %s8270_s2 = smov 124  }
 0x264   :  { %v1752_v17 = vadd.f32 %v1749_v38, %v1733_v28  ;;  %v2180_v42 = vadd.f32 %v6096_v9, %v2161_v15  ;;  %v1520_v4 = vmul.f32 %v6246_v53, %v8164_v36  ;;  %v1787_v38 = vmul.f32 %v6493_v7, %v8165_v57 }
 0x265   :  { %v2219_v6 = vadd.f32 %v6322_v18, %v2200_v30  ;;  %v6515_v28 = vstv %s6453_s17  ;;  %v2106_v15 = vadd.f32 %v6257_v56, %v2087_v3  ;;  %v1539_v11 = vmul.f32 %v6249_v19, %v8167_v31  ;;  %v8168_v30 = vld [vmem:[#allocation187_spill] sm:$0xff]  ;;  %s2501_s17 = sld [smem:[#allocation14]] }
 0x266   :  { %v1771_v55 = vadd.f32 %v1768_v60, %v1752_v17  ;;  %v2199_v9 = vadd.f32 %v6165_v37, %v2180_v42  ;;  %v1523_v33 = vadd.f32 %v1520_v4, %v8166_v12  ;;  %v1806_v17 = vmul.f32 %v6507_v26, %v8168_v30  ;;  %v8169_v42 = vld [vmem:[#allocation163_spill] sm:$0xff]  ;;  %v8170_v4 = vld [vmem:[#allocation117_spill] sm:$0xff] }
 0x267   :  { %v2238_v36 = vadd.f32 %v2235_v20, %v2219_v6  ;;  %v6527_v60 = vstv %s6470_s11  ;;  %v2125_v37 = vadd.f32 %v6408_v22, %v2106_v15  ;;  %v1558_v3 = vmul.f32 %v6270_v23, %v8169_v42  ;;  %v3427_v6 = vld [vmem:[#allocation3 + $0x8] sm:$0xff]  ;;  %v8171_v22 = vld [vmem:[#allocation64_spill] sm:$0xff]  ;;  %v8173_v42 = vld [vmem:[#allocation69_spill] sm:$0xff]  ;;  %s3363_s11 = sld [smem:[#allocation14 + $0x1]] }
 0x268   :  { %v1790_v18 = vadd.f32 %v1787_v38, %v1771_v55  ;;  %v2218_v57 = vadd.f32 %v6376_v63, %v2199_v9  ;;  %v1542_v56 = vadd.f32 %v1539_v11, %v1523_v33  ;;  %v1882_v55 = vmul.f32 %v3427_v6, %v6515_v28  ;;  %v8172_v33 = vld [vmem:[#allocation104_spill] sm:$0xff] }
 0x269   :  { %v2257_v12 = vadd.f32 %v8170_v4, %v2238_v36  ;;  %v6538_v38 = vstv %s6485_s16  ;;  %v2144_v63 = vadd.f32 %v2141_v54, %v2125_v37  ;;  %v1577_v15 = vmul.f32 %v6306_v40, %v8171_v22  ;;  %s3364_s16 = sld [smem:[#allocation14 + $0x2]] }
 0x26a   :  { %v1809_v20 = vadd.f32 %v1806_v17, %v1790_v18  ;;  %v2237_v31 = vadd.f32 %v2234_v10, %v2218_v57  ;;  %v1561_v9 = vadd.f32 %v1558_v3, %v1542_v56  ;;  %v1901_v36 = vmul.f32 %v6527_v60, %v8173_v42  ;;  %v8174_v17 = vld [vmem:[#allocation123_spill] sm:$0xff]  ;;  %v8175_v57 = vld [vmem:[#allocation161_spill] sm:$0xff] }
 0x26b   :  { %v2276_v11 = vadd.f32 %v8172_v33, %v2257_v12  ;;  %v6548_v18 = vstv %s6502_s25  ;;  %v2163_v10 = vadd.f32 %v6178_v14, %v2144_v63  ;;  %v1596_v37 = vmul.f32 %v6309_v8, %v8175_v57  ;;  %s3365_s25 = sld [smem:[#allocation14 + $0x3]] }
 0x26c   :  { %v1885_v30 = vadd.f32 %v1882_v55, %v1809_v20  ;;  %v2256_v4 = vadd.f32 %v8174_v17, %v2237_v31  ;;  %v1580_v54 = vadd.f32 %v1577_v15, %v1561_v9  ;;  %v1920_v12 = vmul.f32 %v6538_v38, %v6106_v59  ;;  %v8176_v31 = vld [vmem:[#allocation124_spill] sm:$0xff] }
 0x26d   :  { %v2295_v56 = vadd.f32 %v6216_v46, %v2276_v11  ;;  %v6560_v20 = vstv %s6517_s6  ;;  %v2182_v55 = vadd.f32 %v6181_v1, %v2163_v10  ;;  %v1615_v63 = vmul.f32 %v6343_v43, %v8176_v31  ;;  %v6614_v31 = vld [vmem:[#allocation3 + $0x5c] sm:$0xf]  ;;  %s7003_s6 = sld [smem:[#allocation14 + $0x4]] }
 0x26e   :  { %v1904_v3 = vadd.f32 %v1901_v36, %v1885_v30  ;;  %v2275_v6 = vadd.f32 %v6110_v13, %v2256_v4  ;;  %v1599_v14 = vadd.f32 %v1596_v37, %v1580_v54  ;;  %v1939_v22 = vmul.f32 %v6548_v18, %v6171_v39  ;;  %v8177_v13 = vld [vmem:[#allocation61_spill] sm:$0xff]  ;;  %v8178_v4 = vld [vmem:[#allocation164_spill] sm:$0xff] }
 0x26f   :  { %v2314_v9 = vadd.f32 %v6370_v32, %v2295_v56  ;;  %v6572_v59 = vstv %s6529_s27  ;;  %v2201_v33 = vadd.f32 %v6277_v41, %v2182_v55  ;;  %v1634_v1 = vmul.f32 %v6346_v24, %v8177_v13  ;;  %v6590_v41 = vld [vmem:[#allocation3 + $0x2c] sm:$0xf]  ;;  %v6605_v56 = vld [vmem:[#allocation3 + $0x44] sm:$0xf]  ;;  %s7122_s27 = sld [smem:[#allocation14 + $0x20]] }
 0x270   :  { %v1923_v46 = vadd.f32 %v1920_v12, %v1904_v3  ;;  %v2294_v15 = vadd.f32 %v6169_v51, %v2275_v6  ;;  %v1618_v11 = vadd.f32 %v1615_v63, %v1599_v14  ;;  %v1958_v32 = vmul.f32 %v6560_v20, %v6198_v35  ;;  %v3428_v54 = vld [vmem:[#allocation3 + $0x9] sm:$0xff]  ;;  %v8179_v12 = vld [vmem:[#allocation153_spill] sm:$0xff]  ;;  %v8181_v55 = vld [vmem:[#allocation190_spill] sm:$0xff] }
 0x271   :  { %v6579_v30 = vadd.f32 %v6476_v21, %v2314_v9  ;;  %v6584_v36 = vstv %s6540_s13  ;;  %v2220_v51 = vadd.f32 %v6422_v34, %v2201_v33  ;;  %v1653_v21 = vmul.f32 %v6363_v25, %v8178_v4  ;;  %v8182_v9 = vld [vmem:[#allocation192_spill] sm:$0xff]  ;;  %s7126_s13 = sld [smem:[#allocation14 + $0x21]] }
 0x272   :  { %v1942_v42 = vadd.f32 %v1939_v22, %v1923_v46  ;;  %v2313_v39 = vadd.f32 %v6380_v27, %v2294_v15  ;;  %v1637_v17 = vadd.f32 %v1634_v1, %v1618_v11  ;;  %v1977_v57 = vmul.f32 %v3428_v54, %v6572_v59  ;;  %v6624_v15 = vld [vmem:[#allocation3 + $0x74] sm:$0xf]  ;;  %v8185_v1 = vld [vmem:[#allocation185_spill] sm:$0xff] }
 0x273   :  { %v2344_v10 = vmax.f32 %v6579_v30, 0.0  ;;  %v6599_v37 = vstv %s6550_s10  ;;  %v2239_v34 = vadd.f32 %v6498_v49, %v2220_v51  ;;  %v1672_v6 = vmul.f32 %v6400_v62, %v8179_v12  ;;  %8183 = vst [vmem:[#allocation74_spill] sm:$0xff] %v6624_v15  ;;  %v8184_v11 = vld [vmem:[#allocation100_spill] sm:$0xff]  ;;  %s8271_s10 = sld [smem:[#allocation193_spill]] }
 0x274   :  { %v1961_v35 = vadd.f32 %v1958_v32, %v1942_v42  ;;  %v2332_v27 = vadd.f32 %v6466_v29, %v2313_v39  ;;  %v1656_v3 = vadd.f32 %v1653_v21, %v1637_v17  ;;  %v2274_v14 = vmul.f32 %v8181_v55, %v6590_v41  ;;  %v8186_v39 = vld [vmem:[#allocation114_spill] sm:$0xff]  ;;  %v8187_v21 = vld [vmem:[#allocation135_spill] sm:$0xff] }
 0x275   :  { %2351 = vrot.lane.b32.xlu1 %v2344_v10, %s8180_s18  ;;  %v1996_v29 = vmul.f32 %v6584_v36, %v8182_v9  ;;  %v6619_v49 = vstv %s6562_s22  ;;  %v2258_v22 = vadd.f32 %v6195_v45, %v2239_v34  ;;  %v1691_v13 = vmul.f32 %v6403_v44, %v8184_v11  ;;  %v8190_v55 = vld [vmem:[#allocation63_spill] sm:$0xff]  ;;  %s7009_s22 = sld [smem:[#allocation14 + $0x5]] }
 0x276   :  { %v1980_v63 = vadd.f32 %v1977_v57, %v1961_v35  ;;  %v2343_v46 = vmax.f32 %v2332_v27, 0.0  ;;  %v1675_v33 = vadd.f32 %v1672_v6, %v1656_v3  ;;  %v2293_v42 = vmul.f32 %v8185_v1, %v6605_v56  ;;  %v8189_v27 = vld [vmem:[#allocation141_spill] sm:$0xff]  ;;  %v8191_v9 = vld [vmem:[#allocation147_spill] sm:$0xff]  ;;  %v8194_v1 = vld [vmem:[#allocation182_spill] sm:$0xff] }
 0x277   :  { %v2015_v51 = vmul.f32 %v6599_v37, %v8186_v39  ;;  %v2277_v45 = vadd.f32 %v2274_v14, %v2258_v22  ;;  %v2312_v17 = vmul.f32 %v8144_v50, %v6614_v31  ;;  %v1710_v35 = vmul.f32 %v6438_v0, %v8187_v21  ;;  %v8196_v39 = vld [vmem:[#allocation58_spill] sm:$0xff] }
 0x278   :  { %v1999_v32 = vadd.f32 %v1996_v29, %v1980_v63  ;;  %2349 = vrot.lane.b32.xlu0 %v2343_v46, %s8180_s18  ;;  %v1694_v4 = vadd.f32 %v1691_v13, %v1675_v33  ;;  %v2331_v54 = vmul.f32 %v8158_v2, %v6624_v15  ;;  %v2034_v34 = vmul.f32 %v6619_v49, %v8189_v27  ;;  %v8192_v2 = vld [vmem:[#allocation75_spill] sm:$0xff]  ;;  %v8193_v13 = vld [vmem:[#allocation162_spill] sm:$0xff] }
 0x279   :  { %2363 = vrot.lane.b32.xlu1 %v2343_v46, %s8188_s7  ;;  %v6645_v3 = vstv %s6586_s29  ;;  %v2296_v12 = vadd.f32 %v2293_v42, %v2277_v45  ;;  %v6648_v6 = vstv %s6592_s19  ;;  %v1729_v14 = vmul.f32 %v6441_v52, %v8190_v55  ;;  %v8199_v55 = vld [vmem:[#allocation150_spill] sm:$0xff]  ;;  %v8227_v15 = vld [vmem:[#allocation87_spill] sm:$0xff]  ;;  %s7011_s29 = sld [smem:[#allocation14 + $0x6]] }
 0x27a   :  { %v2018_v57 = vadd.f32 %v2015_v51, %v1999_v32  ;;  %v1713_v50 = vadd.f32 %v1710_v35, %v1694_v4  ;;  %v2053_v29 = vmul.f32 %v6645_v3, %v8191_v9  ;;  %v6655_v46 = vstv %s6601_s20  ;;  %v8195_v32 = vld [vmem:[#allocation181_spill] sm:$0xff]  ;;  %v3429_v4 = vld [vmem:[#allocation3 + $0xa] sm:$0xff]  ;;  %s7015_s19 = sld [smem:[#allocation14 + $0x7]] }
 0x27b   :  { %v1748_v22 = vmul.f32 %v6461_v61, %v8192_v2  ;;  %v2315_v33 = vadd.f32 %v2312_v17, %v2296_v12  ;;  %v1370_v42 = vmul.f32 %v8194_v1, %v8193_v13  ;;  %v1389_v51 = vmul.f32 %v8196_v39, %v8195_v32  ;;  %v8198_v12 = vld [vmem:[#allocation55_spill] sm:$0xff]  ;;  %v8201_v13 = vld [vmem:[#allocation57_spill] sm:$0xff]  ;;  %s7020_s20 = sld [smem:[#allocation14 + $0x8]] }
 0x27c   :  { %v2037_v63 = vadd.f32 %v2034_v34, %v2018_v57  ;;  %v1732_v11 = vadd.f32 %v1729_v14, %v1713_v50  ;;  %v2072_v21 = vmul.f32 %v3429_v4, %v6648_v6  ;;  %v6669_v35 = vstv %s6621_s23  ;;  %v8197_v57 = vld [vmem:[#allocation165_spill] sm:$0xff]  ;;  %v8200_v14 = vld [vmem:[#allocation59_spill] sm:$0xff]  ;;  %s7028_s23 = sld [smem:[#allocation14 + $0xa]] }
 0x27d   :  { %v1767_v27 = vmul.f32 %v6490_v47, %v8197_v57  ;;  %v2334_v17 = vadd.f32 %v2331_v54, %v2315_v33  ;;  %v1373_v50 = vadd.f32 %v1370_v42, %v8198_v12  ;;  %v1408_v9 = vmul.f32 %v8200_v14, %v8199_v55  ;;  %v8202_v1 = vld [vmem:[#allocation79_spill] sm:$0xff]  ;;  %v8203_v33 = vld [vmem:[#allocation76_spill] sm:$0xff]  ;;  %v8209_v14 = vld [vmem:[#allocation142_spill] sm:$0xff] }
 0x27e   :  { %v2056_v45 = vadd.f32 %v2053_v29, %v2037_v63  ;;  %v1751_v34 = vadd.f32 %v1748_v22, %v1732_v11  ;;  %v2091_v63 = vmul.f32 %v6655_v46, %v8201_v13  ;;  %v6681_v29 = vstv %s6632_s28  ;;  %v8204_v11 = vld [vmem:[#allocation183_spill] sm:$0xff]  ;;  %s7032_s28 = sld [smem:[#allocation14 + $0xb]] }
 0x27f   :  { %v1786_v32 = vmul.f32 %v6493_v7, %v8202_v1  ;;  %v2345_v39 = vmax.f32 %v2334_v17, 0.0  ;;  %v1392_v22 = vadd.f32 %v1389_v51, %v1373_v50  ;;  %v1427_v42 = vmul.f32 %v8204_v11, %v8203_v33  ;;  %v8205_v57 = vld [vmem:[#allocation115_spill] sm:$0xff]  ;;  %v8206_v17 = vld [vmem:[#allocation136_spill] sm:$0xff] }
 0x280   :  { %v2075_v2 = vadd.f32 %v2072_v21, %v2056_v45  ;;  %v1770_v54 = vadd.f32 %v1767_v27, %v1751_v34  ;;  %v2110_v45 = vmul.f32 %v6669_v35, %v8205_v57  ;;  %v1805_v12 = vmul.f32 %v6507_v26, %v8206_v17  ;;  %v8207_v51 = vld [vmem:[#allocation67_spill] sm:$0xff]  ;;  %v8208_v34 = vld [vmem:[#allocation56_spill] sm:$0xff] }
 0x281   :  { %2353 = vrot.lane.b32.xlu0 %v2345_v39, %s8180_s18  ;;  %2367 = vrot.lane.b32.xlu1 %v2345_v39, %s8188_s7  ;;  %v1411_v27 = vadd.f32 %v1408_v9, %v1392_v22  ;;  %v1446_v50 = vmul.f32 %v8208_v34, %v8207_v51  ;;  %v6702_v13 = vstv %s6657_s8  ;;  %v6717_v9 = vstv %s6661_s0  ;;  %v8211_v57 = vld [vmem:[#allocation99_spill] sm:$0xff]  ;;  %s7036_s8 = sld [smem:[#allocation14 + $0xc]] }
 0x282   :  { %v2094_v4 = vadd.f32 %v2091_v63, %v2075_v2  ;;  %v1789_v21 = vadd.f32 %v1786_v32, %v1770_v54  ;;  %v2129_v2 = vmul.f32 %v6681_v29, %v8209_v14  ;;  %v8210_v63 = vmov 0.0   ;;  %v3430_v32 = vld [vmem:[#allocation3] sm:$0xff]  ;;  %v8212_v51 = vld [vmem:[#allocation107_spill] sm:$0xff]  ;;  %v8214_v14 = vld [vmem:[#allocation160_spill] sm:$0xff]  ;;  %s7040_s0 = sld [smem:[#allocation14 + $0xd]] }
 0x283   :  { %87 = vst.msk [vmem:[#allocation4 + $0x8] sm:$0xff] %vm85_vm7, %v8210_v63  ;;  %88 = vst.msk [vmem:[#allocation4 + $0x10] sm:$0xff] %vm85_vm7, %v8210_v63  ;;  %v1881_v39 = vmul.f32 %v3430_v32, %v6515_v28  ;;  %v1430_v54 = vadd.f32 %v1427_v42, %v1411_v27  ;;  %v2148_v33 = vmul.f32 %v6702_v13, %v6395_v5  ;;  %v6728_v11 = vstv %s6673_s3  ;;  %v8215_v32 = vld [vmem:[#allocation131_spill] sm:$0xff]  ;;  %s7046_s3 = sld [smem:[#allocation14 + $0xe]] }
 0x284   :  { %v2113_v55 = vadd.f32 %v2110_v45, %v2094_v4  ;;  %86 = vst.msk [vmem:[#allocation4] sm:$0xff] %vm85_vm7, %v8210_v63  ;;  %91 = vst.msk [vmem:[#allocation4 + $0x20] sm:$0xff] %vm85_vm7, %v8210_v63  ;;  %v1808_v1 = vadd.f32 %v1805_v12, %v1789_v21  ;;  %v1900_v45 = vmul.f32 %v6527_v60, %v8211_v57  ;;  %v3431_v12 = vld [vmem:[#allocation3 + $0xb] sm:$0xff]  ;;  %v6734_v27 = vstv %s6685_s24  ;;  %s7051_s24 = sld [smem:[#allocation14 + $0xf]] }
 0x285   :  { %92 = vst.msk [vmem:[#allocation4 + $0x28] sm:$0xff] %vm85_vm7, %v8210_v63  ;;  %93 = vst.msk [vmem:[#allocation4 + $0x30] sm:$0xff] %vm85_vm7, %v8210_v63  ;;  %2365 = vrot.lane.b32.xlu0 %v2344_v10, %s8188_s7  ;;  %v1449_v21 = vadd.f32 %v1446_v50, %v1430_v54  ;;  %v2167_v42 = vmul.f32 %v3431_v12, %v6717_v9  ;;  %v1919_v30 = vmul.f32 %v6538_v38, %v8212_v51  ;;  %v8213_v10 = vld [vmem:[#allocation78_spill] sm:$0xff]  ;;  %v8216_v54 = vld [vmem:[#allocation91_spill] sm:$0xff] }
 0x286   :  { %v2132_v22 = vadd.f32 %v2129_v2, %v2113_v55  ;;  %v1884_v4 = vadd.f32 %v1881_v39, %v1808_v1  ;;  %v2186_v2 = vmul.f32 %v6728_v11, %v8214_v14  ;;  %v6744_v50 = vstv %s6693_s4  ;;  %v8219_v12 = vld [vmem:[#allocation113_spill] sm:$0xff]  ;;  %v8220_v51 = vld [vmem:[#allocation143_spill] sm:$0xff]  ;;  %90 = vst.msk [vmem:[#allocation4 + $0x18] sm:$0xf] %vm89_vm8, %v8210_v63  ;;  %94 = vst.msk [vmem:[#allocation4 + $0x38] sm:$0xf] %vm89_vm8, %v8210_v63 }
 0x287   :  { %v1468_v34 = vadd.f32 %v8213_v10, %v1449_v21  ;;  %v1938_v39 = vmul.f32 %v6548_v18, %v8215_v32  ;;  %v8218_v21 = vld [vmem:[#allocation137_spill] sm:$0xff]  ;;  %v3432_v32 = vld [vmem:[#allocation3 + $0x1] sm:$0xff]  ;;  %s7061_s4 = sld [smem:[#allocation14 + $0x10]] }
 0x288   :  { %v2151_v17 = vadd.f32 %v2148_v33, %v2132_v22  ;;  %v1903_v5 = vadd.f32 %v1900_v45, %v1884_v4  ;;  %v8217_v4 = vld [vmem:[#allocation129_spill] sm:$0xff] }
 0x289   :  { %v1487_v22 = vadd.f32 %v8216_v54, %v1468_v34  ;;  %v2205_v57 = vmul.f32 %v6734_v27, %v8217_v4  ;;  %v8221_v10 = vld [vmem:[#allocation145_spill] sm:$0xff]  ;;  %v6760_v34 = vstv %s3352_s14  ;;  %v8222_v54 = vld [vmem:[#allocation106_spill] sm:$0xff]  ;;  %s7070_s14 = sld [smem:[#allocation14 + $0x12]] }
 0x28a   :  { %v2170_v55 = vadd.f32 %v2167_v42, %v2151_v17  ;;  %v1922_v1 = vadd.f32 %v1919_v30, %v1903_v5  ;;  %v1957_v17 = vmul.f32 %v6560_v20, %v8218_v21  ;;  %v1522_v5 = vmul.f32 %v6246_v53, %v8220_v51  ;;  %v8223_v21 = vld [vmem:[#allocation157_spill] sm:$0xff] }
 0x28b   :  { %v1506_v42 = vadd.f32 %v8219_v12, %v1487_v22  ;;  %v2224_v14 = vmul.f32 %v6744_v50, %v8221_v10  ;;  %v1541_v22 = vmul.f32 %v6249_v19, %v8222_v54  ;;  %v2243_v53 = vmul.f32 %v6760_v34, %v8223_v21  ;;  %v8224_v12 = vld [vmem:[#allocation191_spill] sm:$0xff]  ;;  %v8225_v51 = vld [vmem:[#allocation85_spill] sm:$0xff] }
 0x28c   :  { %v2189_v33 = vadd.f32 %v2186_v2, %v2170_v55  ;;  %v1941_v45 = vadd.f32 %v1938_v39, %v1922_v1  ;;  %v6763_v55 = vstv %s6719_s1  ;;  %v1976_v1 = vmul.f32 %v3432_v32, %v6572_v59  ;;  %v8226_v32 = vld [vmem:[#allocation176_spill] sm:$0xff]  ;;  %s7067_s1 = sld [smem:[#allocation14 + $0x11]] }
 0x28d   :  { %v1525_v39 = vadd.f32 %v1522_v5, %v1506_v42  ;;  %v1560_v10 = vmul.f32 %v6270_v23, %v8225_v51  ;;  %v3433_v5 = vld [vmem:[#allocation3 + $0xc] sm:$0xff]  ;;  %v2014_v54 = vmul.f32 %v6599_v37, %v8226_v32  ;;  %v8231_v32 = vld [vmem:[#allocation130_spill] sm:$0xff] }
 0x28e   :  { %v2208_v30 = vadd.f32 %v2205_v57, %v2189_v33  ;;  %v1960_v2 = vadd.f32 %v1957_v17, %v1941_v45  ;;  %v6770_v33 = vstv %s3356_s21  ;;  %v1995_v45 = vmul.f32 %v6584_v36, %v8224_v12  ;;  %v8228_v12 = vld [vmem:[#allocation92_spill] sm:$0xff]  ;;  %s7080_s21 = sld [smem:[#allocation14 + $0x13]] }
 0x28f   :  { %v1544_v17 = vadd.f32 %v1541_v22, %v1525_v39  ;;  %v2262_v19 = vmul.f32 %v3433_v5, %v6763_v55  ;;  %v2281_v39 = vmul.f32 %v6770_v33, %v8228_v12  ;;  %v6787_v22 = vstv %s6751_s12  ;;  %v8230_v5 = vld [vmem:[#allocation97_spill] sm:$0xff]  ;;  %s3383_s12 = sld [smem:[#allocation14 + $0x15]] }
 0x290   :  { %v2227_v4 = vadd.f32 %v2224_v14, %v2208_v30  ;;  %v1979_v57 = vadd.f32 %v1976_v1, %v1960_v2  ;;  %v6778_v30 = vstv %s6741_s30  ;;  %v1579_v2 = vmul.f32 %v6306_v40, %v8227_v15  ;;  %v8232_v40 = vld [vmem:[#allocation148_spill] sm:$0xff]  ;;  %s7083_s30 = sld [smem:[#allocation14 + $0x14]] }
 0x291   :  { %v1563_v21 = vadd.f32 %v1560_v10, %v1544_v17  ;;  %v2300_v17 = vmul.f32 %v6778_v30, %v8231_v32  ;;  %v2052_v15 = vmul.f32 %v6645_v3, %v8232_v40 }
 0x292   :  { %v2246_v42 = vadd.f32 %v2243_v53, %v2227_v4  ;;  %v1998_v14 = vadd.f32 %v1995_v45, %v1979_v57  ;;  %v8229_v4 = vld [vmem:[#allocation139_spill] sm:$0xff]  ;;  %v1598_v57 = vmul.f32 %v6309_v8, %v8230_v5  ;;  %v8235_v5 = vld [vmem:[#allocation109_spill] sm:$0xff] }
 0x293   :  { %v2033_v53 = vmul.f32 %v6619_v49, %v8229_v4  ;;  %v1582_v51 = vadd.f32 %v1579_v2, %v1563_v21  ;;  %v6801_v21 = vstv %s3362_s9  ;;  %v3434_v8 = vld [vmem:[#allocation3 + $0x2] sm:$0xff]  ;;  %s3384_s9 = sld [smem:[#allocation14 + $0x16]] }
 0x294   :  { %v2265_v1 = vadd.f32 %v2262_v19, %v2246_v42  ;;  %v2017_v23 = vadd.f32 %v2014_v54, %v1998_v14  ;;  %v8233_v19 = vld [vmem:[#allocation73_spill] sm:$0xff] }
 0x295   :  { %v1601_v42 = vadd.f32 %v1598_v57, %v1582_v51  ;;  %v1617_v12 = vmul.f32 %v6343_v43, %v8233_v19  ;;  %v8234_v54 = vld [vmem:[#allocation169_spill] sm:$0xff]  ;;  %v2338_v51 = vmul.f32 %v6801_v21, %v6447_v48  ;;  %v8236_v43 = vld [vmem:[#allocation144_spill] sm:$0xff] }
 0x296   :  { %v2284_v45 = vadd.f32 %v2281_v39, %v2265_v1  ;;  %v2036_v10 = vadd.f32 %v2033_v53, %v2017_v23  ;;  %v2319_v4 = vmul.f32 %v6787_v22, %v8234_v54  ;;  %v2071_v1 = vmul.f32 %v3434_v8, %v6648_v6  ;;  %v8238_v19 = vld [vmem:[#allocation108_spill] sm:$0xff] }
 0x297   :  { %v1620_v39 = vadd.f32 %v1617_v12, %v1601_v42  ;;  %v1636_v23 = vmul.f32 %v6346_v24, %v8235_v5  ;;  %v2109_v42 = vmul.f32 %v6669_v35, %v8238_v19  ;;  %v8239_v24 = vld [vmem:[#allocation83_spill] sm:$0xff] }
 0x298   :  { %v2303_v14 = vadd.f32 %v2300_v17, %v2284_v45  ;;  %v2055_v2 = vadd.f32 %v2052_v15, %v2036_v10  ;;  %v2090_v45 = vmul.f32 %v6655_v46, %v8236_v43  ;;  %v8237_v17 = vld [vmem:[#allocation120_spill] sm:$0xff]  ;;  %v8242_v5 = vld [vmem:[#allocation103_spill] sm:$0xff] }
 0x299   :  { %v1639_v32 = vadd.f32 %v1636_v23, %v1620_v39  ;;  %v1655_v40 = vmul.f32 %v6363_v25, %v8237_v17  ;;  %v2147_v23 = vmul.f32 %v6702_v13, %v8242_v5  ;;  %v3435_v43 = vld [vmem:[#allocation3 + $0x3] sm:$0xff]  ;;  %v8250_v5 = vld [vmem:[#allocation125_spill] sm:$0xff] }
 0x29a   :  { %v2322_v53 = vadd.f32 %v2319_v4, %v2303_v14  ;;  %v2074_v57 = vadd.f32 %v2071_v1, %v2055_v2  ;;  %v1674_v14 = vmul.f32 %v6400_v62, %v8239_v24  ;;  %v8240_v4 = vld [vmem:[#allocation140_spill] sm:$0xff]  ;;  %v8244_v17 = vld [vmem:[#allocation110_spill] sm:$0xff] }
 0x29b   :  { %v1658_v12 = vadd.f32 %v1655_v40, %v1639_v32  ;;  %v2128_v2 = vmul.f32 %v6681_v29, %v8240_v4  ;;  %v8241_v1 = vld [vmem:[#allocation60_spill] sm:$0xff] }
 0x29c   :  { %v6812_v10 = vadd.f32 %v2338_v51, %v2322_v53  ;;  %v2093_v15 = vadd.f32 %v2090_v45, %v2074_v57  ;;  %v1693_v25 = vmul.f32 %v6403_v44, %v8241_v1  ;;  %v8243_v62 = vld [vmem:[#allocation188_spill] sm:$0xff]  ;;  %v2166_v45 = vmul.f32 %v3435_v43, %v6717_v9 }
 0x29d   :  { %v1677_v8 = vadd.f32 %v1674_v14, %v1658_v12  ;;  %v1712_v51 = vmul.f32 %v6438_v0, %v8243_v62  ;;  %v1731_v44 = vmul.f32 %v6441_v52, %v8244_v17  ;;  %v8246_v12 = vld [vmem:[#allocation189_spill] sm:$0xff] }
 0x29e   :  { %v2378_v48 = vmax.f32 %v6812_v10, 0.0  ;;  %v2112_v54 = vadd.f32 %v2109_v42, %v2093_v15  ;;  %v8245_v15 = vld [vmem:[#allocation95_spill] sm:$0xff]  ;;  %v1750_v24 = vmul.f32 %v6461_v61, %v8246_v12  ;;  %v8251_v62 = vld [vmem:[#allocation101_spill] sm:$0xff] }
 0x29f   :  { %v1696_v53 = vadd.f32 %v1693_v25, %v1677_v8  ;;  %v2185_v19 = vmul.f32 %v6728_v11, %v8245_v15  ;;  %v8249_v25 = vld [vmem:[#allocation128_spill] sm:$0xff]  ;;  %v2242_v61 = vmul.f32 %v6760_v34, %v8251_v62  ;;  %v3439_v12 = vld [vmem:[#allocation3 + $0x28] sm:$0xf]  ;;  %v8258_v62 = vld [vmem:[#allocation62_spill] sm:$0xff] }
 0x2a0   :  { %2385 = vrot.lane.b32.xlu1 %v2378_v48, %s8180_s18  ;;  %v2131_v39 = vadd.f32 %v2128_v2, %v2112_v54  ;;  %v8247_v54 = vld [vmem:[#allocation112_spill] sm:$0xff]  ;;  %v8248_v2 = vld [vmem:[#allocation167_spill] sm:$0xff]  ;;  %v2223_v52 = vmul.f32 %v6744_v50, %v8249_v25 }
 0x2a1   :  { %v1715_v32 = vadd.f32 %v1712_v51, %v1696_v53  ;;  %v2204_v0 = vmul.f32 %v6734_v27, %v8247_v54  ;;  %v1769_v8 = vmul.f32 %v6490_v47, %v8248_v2  ;;  %v8253_v54 = vld [vmem:[#allocation177_spill] sm:$0xff] }
 0x2a2   :  { %v2150_v57 = vadd.f32 %v2147_v23, %v2131_v39  ;;  %v1788_v23 = vmul.f32 %v6493_v7, %v8250_v5 }
 0x2a3   :  { %v1734_v42 = vadd.f32 %v1731_v44, %v1715_v32  ;;  %v3436_v32 = vld [vmem:[#allocation3 + $0x4] sm:$0xff]  ;;  %v3437_v44 = vld [vmem:[#allocation3 + $0x10] sm:$0xf] }
 0x2a4   :  { %v2169_v40 = vadd.f32 %v2166_v45, %v2150_v57  ;;  %v8252_v57 = vld [vmem:[#allocation65_spill] sm:$0xff]  ;;  %v2261_v47 = vmul.f32 %v3436_v32, %v6763_v55 }
 0x2a5   :  { %v1753_v4 = vadd.f32 %v1750_v24, %v1734_v42  ;;  %v1807_v43 = vmul.f32 %v6507_v26, %v8252_v57  ;;  %v1902_v24 = vmul.f32 %v3439_v12, %v6527_v60  ;;  %v2299_v26 = vmul.f32 %v6778_v30, %v8253_v54  ;;  %v3443_v54 = vld [vmem:[#allocation3 + $0x2a] sm:$0xf] }
 0x2a6   :  { %v2188_v14 = vadd.f32 %v2185_v19, %v2169_v40  ;;  %v1883_v40 = vmul.f32 %v3437_v44, %v6515_v28  ;;  %v3438_v19 = vld [vmem:[#allocation3 + $0x1c] sm:$0xff] }
 0x2a7   :  { %v1772_v39 = vadd.f32 %v1769_v8, %v1753_v4  ;;  %v2280_v7 = vmul.f32 %v3438_v19, %v6770_v33  ;;  %v8254_v4 = vld [vmem:[#allocation132_spill] sm:$0xff]  ;;  %v8259_v44 = vld [vmem:[#allocation133_spill] sm:$0xff] }
 0x2a8   :  { %v2207_v1 = vadd.f32 %v2204_v0, %v2188_v14  ;;  %v1921_v2 = vmul.f32 %v6538_v38, %v8254_v4  ;;  %v8262_v4 = vld [vmem:[#allocation134_spill] sm:$0xff] }
 0x2a9   :  { %v1791_v51 = vadd.f32 %v1788_v23, %v1772_v39  ;;  %v8257_v23 = vld [vmem:[#allocation70_spill] sm:$0xff] }
 0x2aa   :  { %v2226_v53 = vadd.f32 %v2223_v52, %v2207_v1  ;;  %v8255_v1 = vld [vmem:[#allocation81_spill] sm:$0xff]  ;;  %v8256_v52 = vld [vmem:[#allocation146_spill] sm:$0xff]  ;;  %v2337_v60 = vmul.f32 %v6801_v21, %v8257_v23 }
 0x2ab   :  { %v1810_v17 = vadd.f32 %v1807_v43, %v1791_v51  ;;  %v2318_v28 = vmul.f32 %v6787_v22, %v8255_v1  ;;  %v1940_v39 = vmul.f32 %v6548_v18, %v8256_v52  ;;  %v3440_v43 = vld [vmem:[#allocation3 + $0x11] sm:$0xf]  ;;  %v8264_v23 = vld [vmem:[#allocation138_spill] sm:$0xff] }
 0x2ac   :  { %v2245_v45 = vadd.f32 %v2242_v61, %v2226_v53  ;;  %v1959_v61 = vmul.f32 %v6560_v20, %v8258_v62  ;;  %v1978_v38 = vmul.f32 %v3440_v43, %v6572_v59  ;;  %v8260_v20 = vld [vmem:[#allocation122_spill] sm:$0xff] }
 0x2ad   :  { %v1886_v42 = vadd.f32 %v1883_v40, %v1810_v17  ;;  %v2016_v40 = vmul.f32 %v6599_v37, %v8259_v44  ;;  %v2035_v19 = vmul.f32 %v6619_v49, %v8260_v20  ;;  %v2111_v37 = vmul.f32 %v6669_v35, %v8262_v4 }
 0x2ae   :  { %v2264_v15 = vadd.f32 %v2261_v47, %v2245_v45  ;;  %v3441_v47 = vld [vmem:[#allocation3 + $0x29] sm:$0xf]  ;;  %v2206_v35 = vmul.f32 %v6734_v27, %v8264_v23  ;;  %v2301_v27 = vmul.f32 %v6778_v30, %v6605_v56 }
 0x2af   :  { %v1905_v0 = vadd.f32 %v1902_v24, %v1886_v42  ;;  %v1997_v17 = vmul.f32 %v3441_v47, %v6584_v36  ;;  %v8261_v42 = vld [vmem:[#allocation102_spill] sm:$0xff]  ;;  %v3442_v24 = vld [vmem:[#allocation3 + $0x12] sm:$0xf] }
 0x2b0   :  { %v2283_v14 = vadd.f32 %v2280_v7, %v2264_v15  ;;  %v2054_v59 = vmul.f32 %v6645_v3, %v8261_v42  ;;  %v2073_v36 = vmul.f32 %v3442_v24, %v6648_v6  ;;  %v2149_v3 = vmul.f32 %v6702_v13, %v6458_v58 }
 0x2b1   :  { %v1924_v25 = vadd.f32 %v1921_v2, %v1905_v0  ;;  %v2244_v58 = vmul.f32 %v6760_v34, %v6478_v16  ;;  %v8266_v34 = vld [vmem:[#allocation74_spill] sm:$0xff] }
 0x2b2   :  { %v2302_v8 = vadd.f32 %v2299_v26, %v2283_v14  ;;  %v2092_v26 = vmul.f32 %v3443_v54, %v6655_v46 }
 0x2b3   :  { %v1943_v53 = vadd.f32 %v1940_v39, %v1924_v25  ;;  %v3444_v25 = vld [vmem:[#allocation3 + $0x13] sm:$0xf]  ;;  %v3445_v39 = vld [vmem:[#allocation3 + $0x2b] sm:$0xf] }
 0x2b4   :  { %v2321_v5 = vadd.f32 %v2318_v28, %v2302_v8  ;;  %v8263_v8 = vld [vmem:[#allocation168_spill] sm:$0xff]  ;;  %v2168_v6 = vmul.f32 %v3444_v25, %v6717_v9  ;;  %v2187_v46 = vmul.f32 %v3445_v39, %v6728_v11  ;;  %v2282_v11 = vmul.f32 %v6770_v33, %v6590_v41 }
 0x2b5   :  { %v1962_v57 = vadd.f32 %v1959_v61, %v1943_v53  ;;  %v2130_v49 = vmul.f32 %v6681_v29, %v8263_v8  ;;  %v8265_v53 = vld [vmem:[#allocation71_spill] sm:$0xff]  ;;  %v3446_v61 = vld [vmem:[#allocation3 + $0x14] sm:$0xf] }
 0x2b6   :  { %v2340_v51 = vadd.f32 %v2337_v60, %v2321_v5  ;;  %v2225_v29 = vmul.f32 %v6744_v50, %v8265_v53  ;;  %v2263_v9 = vmul.f32 %v3446_v61, %v6763_v55  ;;  %v2320_v50 = vmul.f32 %v6787_v22, %v6614_v31 }
 0x2b7   :  { %v1981_v32 = vadd.f32 %v1978_v38, %v1962_v57  ;;  %v2339_v55 = vmul.f32 %v6801_v21, %v8266_v34  ;;  %v2413_v38 = vld [vmem:[#allocation4 + $0x18] sm:$0xf]  ;;  %v2524_v61 = vstv %s3364_s16  ;;  %v2535_v34 = vstv %s3365_s25  ;;  %s3391_s16 = sld [smem:[#allocation14 + $0x1d]] }
 0x2b8   :  { %v2377_v45 = vmax.f32 %v2340_v51, 0.0  ;;  %2417 = vst.msk [vmem:[#allocation5 + $0x18] sm:$0xf] %vm89_vm8, %v2413_v38  ;;  %s7116_s25 = sld [smem:[#allocation14 + $0x1e]] }
 0x2b9   :  { %v2000_v18 = vadd.f32 %v1997_v17, %v1981_v32  ;;  %v6924_v32 = vld [vmem:[#allocation4 + $0x38] sm:$0xf] }
 0x2ba   :  { %2383 = vrot.lane.b32.xlu0 %v2377_v45, %s8180_s18  ;;  %2396 = vrot.lane.b32.xlu1 %v2377_v45, %s8188_s7 }
 0x2bb   :  { %v2019_v15 = vadd.f32 %v2016_v40, %v2000_v18 }
 0x2bd   :  { %v2038_v7 = vadd.f32 %v2035_v19, %v2019_v15 }
 0x2bf   :  { %v2057_v12 = vadd.f32 %v2054_v59, %v2038_v7 }
 0x2c1   :  { %v2076_v14 = vadd.f32 %v2073_v36, %v2057_v12 }
 0x2c3   :  { %v2095_v0 = vadd.f32 %v2092_v26, %v2076_v14 }
 0x2c5   :  { %v2114_v2 = vadd.f32 %v2111_v37, %v2095_v0 }
 0x2c7   :  { %v2133_v1 = vadd.f32 %v2130_v49, %v2114_v2 }
 0x2c9   :  { %v2152_v28 = vadd.f32 %v2149_v3, %v2133_v1 }
 0x2cb   :  { %v2171_v52 = vadd.f32 %v2168_v6, %v2152_v28 }
 0x2cd   :  { %v2190_v5 = vadd.f32 %v2187_v46, %v2171_v52 }
 0x2cf   :  { %v2209_v60 = vadd.f32 %v2206_v35, %v2190_v5  ;;  %v2502_v5 = vstv %s2501_s17  ;;  %s3389_s17 = sld [smem:[#allocation14 + $0x1b]] }
 0x2d1   :  { %v2228_v62 = vadd.f32 %v2225_v29, %v2209_v60  ;;  %v2513_v60 = vstv %s3363_s11  ;;  %s3390_s11 = sld [smem:[#allocation14 + $0x1c]] }
 0x2d3   :  { %v2247_v13 = vadd.f32 %v2244_v58, %v2228_v62  ;;  %v2409_v58 = vstv %s8271_s10  ;;  %s7129_s10 = sld [smem:[#allocation14 + $0x22]] }
 0x2d5   :  { %v2266_v51 = vadd.f32 %v2263_v9, %v2247_v13 }
 0x2d7   :  { %v2285_v57 = vadd.f32 %v2282_v11, %v2266_v51 }
 0x2d9   :  { %v2304_v43 = vadd.f32 %v2301_v27, %v2285_v57 }
 0x2db   :  { %v2323_v16 = vadd.f32 %v2320_v50, %v2304_v43 }
 0x2dd   :  { %v2342_v41 = vadd.f32 %v2339_v55, %v2323_v16 }
 0x2df   :  { %v2379_v33 = vmax.f32 %v2342_v41, 0.0 }
 0x2e1   :  { %2387 = vrot.lane.b32.xlu0 %v2379_v33, %s8180_s18  ;;  %2400 = vrot.lane.b32.xlu1 %v2379_v33, %s8188_s7  ;;  %s7024_s18 = sld [smem:[#allocation14 + $0x9]] }
 0x2e5   :  { %2398 = vrot.lane.b32.xlu0 %v2378_v48, %s8188_s7 }
 0x2e7   :  { %v2352_v56 = vpop.permute.xlu1 %2351 }
 0x2e8   :  { %2360 = vst.msk [vmem:[#allocation4 + $0xc] sm:$0xff] %vm2358_vm9, %v2352_v56 }
 0x2ea   :  { %v2350_v31 = vpop.permute.xlu0 %2349 }
 0x2eb   :  { %2359 = vst.msk [vmem:[#allocation4 + $0x4] sm:$0xff] %vm2358_vm9, %v2350_v31  ;;  %v2364_v63 = vpop.permute.xlu1 %2363 }
 0x2ec   :  { %2373 = vst.msk [vmem:[#allocation4 + $0x4] sm:$0xff] %vm2372_vm10, %v2364_v63 }
 0x2f3   :  { %v2410_v30 = vld [vmem:[#allocation4] sm:$0xff]  ;;  %v2354_v22 = vpop.permute.xlu0 %2353  ;;  %v2368_v21 = vpop.permute.xlu1 %2367 }
 0x2f4   :  { %2422 = vrot.lane.b32.xlu0 %v2410_v30, %s8267_s15  ;;  %2414 = vst.msk [vmem:[#allocation5] sm:$0xff] %vm85_vm7, %v2410_v30 }
 0x2f5   :  { %2362 = vst.msk [vmem:[#allocation4 + $0x14] sm:$0xf] %vm2361_vm11, %v2354_v22 }
 0x2f6   :  { %2376 = vst.msk [vmem:[#allocation4 + $0x14] sm:$0xf] %vm2375_vm12, %v2368_v21 }
 0x2f7   :  { %v2366_v10 = vpop.permute.xlu0 %2365 }
 0x2f8   :  { %2374 = vst.msk [vmem:[#allocation4 + $0xc] sm:$0xff] %vm2372_vm10, %v2366_v10 }
 0x2fb   :  { %v6958_v12 = vld [vmem:[#allocation5] sm:$0xff] }
 0x2fc   :  { %v2503_v62 = vmul.f32 %v2502_v5, %v6958_v12 }
 0x2fe   :  { %v2506_v41 = vadd.f32 %v2503_v62, %v2409_v58 }
 0x2ff   :  { %v2412_v48 = vld [vmem:[#allocation4 + $0x10] sm:$0xff]  ;;  %v2411_v45 = vld [vmem:[#allocation4 + $0x8] sm:$0xff] }
 0x300   :  { %2426 = vrot.lane.b32.xlu0 %v2412_v48, %s8267_s15  ;;  %2416 = vst.msk [vmem:[#allocation5 + $0x10] sm:$0xff] %vm85_vm7, %v2412_v48  ;;  %2424 = vrot.lane.b32.xlu1 %v2411_v45, %s8267_s15  ;;  %2415 = vst.msk [vmem:[#allocation5 + $0x8] sm:$0xff] %vm85_vm7, %v2411_v45 }
 0x304   :  { %2443 = vrot.lane.b32.xlu0 %v2411_v45, %s8268_s5  ;;  %2441 = vrot.lane.b32.xlu1 %v2410_v30, %s8268_s5 }
 0x307   :  { %v6928_v47 = vld [vmem:[#allocation5 + $0x11] sm:$0xff]  ;;  %v6950_v19 = vld [vmem:[#allocation5 + $0x1] sm:$0xff]  ;;  %v6974_v8 = vld [vmem:[#allocation5 + $0x9] sm:$0xff] }
 0x308   :  { %2460 = vrot.lane.b32.xlu0 %v2410_v30, %s8269_s26  ;;  %2445 = vrot.lane.b32.xlu1 %v2412_v48, %s8268_s5  ;;  %v6930_v17 = vld [vmem:[#allocation5 + $0x12] sm:$0xff]  ;;  %v6952_v7 = vld [vmem:[#allocation5 + $0x2] sm:$0xff]  ;;  %v6976_v49 = vld [vmem:[#allocation5 + $0xa] sm:$0xff] }
 0x309   :  { %v6932_v18 = vld [vmem:[#allocation5 + $0x13] sm:$0xff]  ;;  %v6954_v42 = vld [vmem:[#allocation5 + $0x3] sm:$0xff]  ;;  %v6978_v1 = vld [vmem:[#allocation5 + $0xb] sm:$0xff] }
 0x30a   :  { %v6934_v44 = vld [vmem:[#allocation5 + $0x14] sm:$0xff]  ;;  %v6956_v59 = vld [vmem:[#allocation5 + $0x4] sm:$0xff]  ;;  %v6980_v3 = vld [vmem:[#allocation5 + $0xc] sm:$0xff] }
 0x30b   :  { %2780 = vst.msk [vmem:[#allocation5 + $0x18] sm:$0xf] %vm89_vm8, %v6924_v32  ;;  %v2499_v37 = vld [vmem:[#allocation5 + $0x8] sm:$0xff]  ;;  %v2500_v2 = vld [vmem:[#allocation5 + $0x10] sm:$0xff] }
 0x30c   :  { %2464 = vrot.lane.b32.xlu0 %v2412_v48, %s8269_s26  ;;  %2462 = vrot.lane.b32.xlu1 %v2411_v45, %s8269_s26  ;;  %v2504_v13 = vmul.f32 %v2502_v5, %v2499_v37  ;;  %v2505_v50 = vmul.f32 %v2502_v5, %v2500_v2 }
 0x310   :  { %2481 = vrot.lane.b32.xlu0 %v2411_v45, %s8270_s2  ;;  %2479 = vrot.lane.b32.xlu1 %v2410_v30, %s8270_s2 }
 0x312   :  { %v2386_v40 = vpop.permute.xlu1 %2385 }
 0x313   :  { %2394 = vst.msk [vmem:[#allocation4 + $0x2c] sm:$0xff] %vm2358_vm9, %v2386_v40 }
 0x314   :  { %2428 = vrot.lane.b32.xlu0 %v2413_v38, %s8267_s15  ;;  %2483 = vrot.lane.b32.xlu1 %v2412_v48, %s8270_s2 }
 0x318   :  { %2466 = vrot.lane.b32.xlu0 %v2413_v38, %s8269_s26  ;;  %2447 = vrot.lane.b32.xlu1 %v2413_v38, %s8268_s5 }
 0x31c   :  { %2485 = vrot.lane.b32.xlu1 %v2413_v38, %s8270_s2  ;;  %v2507_v38 = vadd.f32 %v2504_v13, %v2409_v58 }
 0x32c   :  { %v2384_v15 = vpop.permute.xlu0 %2383  ;;  %v2397_v20 = vpop.permute.xlu1 %2396 }
 0x32d   :  { %2393 = vst.msk [vmem:[#allocation4 + $0x24] sm:$0xff] %vm2358_vm9, %v2384_v15 }
 0x32e   :  { %2405 = vst.msk [vmem:[#allocation4 + $0x24] sm:$0xff] %vm2372_vm10, %v2397_v20  ;;  %v2546_v20 = vstv %s7003_s6  ;;  %s7120_s6 = sld [smem:[#allocation14 + $0x1f]] }
 0x335   :  { %v2773_v24 = vld [vmem:[#allocation4 + $0x20] sm:$0xff] }
 0x336   :  { %2785 = vrot.lane.b32.xlu0 %v2773_v24, %s8267_s15  ;;  %2777 = vst.msk [vmem:[#allocation5] sm:$0xff] %vm85_vm7, %v2773_v24 }
 0x353   :  { %v2388_v36 = vpop.permute.xlu0 %2387  ;;  %v2401_v14 = vpop.permute.xlu1 %2400 }
 0x354   :  { %2395 = vst.msk [vmem:[#allocation4 + $0x34] sm:$0xf] %vm2361_vm11, %v2388_v36 }
 0x355   :  { %2407 = vst.msk [vmem:[#allocation4 + $0x34] sm:$0xf] %vm2375_vm12, %v2401_v14  ;;  %v2557_v14 = vstv %s7009_s22  ;;  %s7134_s22 = sld [smem:[#allocation14 + $0x23]] }
 0x357   :  { %v2399_v54 = vpop.permute.xlu0 %2398 }
 0x358   :  { %2406 = vst.msk [vmem:[#allocation4 + $0x2c] sm:$0xff] %vm2372_vm10, %v2399_v54 }
 0x35f   :  { %v2775_v26 = vld [vmem:[#allocation4 + $0x30] sm:$0xff]  ;;  %v2774_v0 = vld [vmem:[#allocation4 + $0x28] sm:$0xff] }
 0x360   :  { %2789 = vrot.lane.b32.xlu0 %v2775_v26, %s8267_s15  ;;  %2787 = vrot.lane.b32.xlu1 %v2774_v0, %s8267_s15  ;;  %2779 = vst.msk [vmem:[#allocation5 + $0x10] sm:$0xff] %vm85_vm7, %v2775_v26  ;;  %2778 = vst.msk [vmem:[#allocation5 + $0x8] sm:$0xff] %vm85_vm7, %v2774_v0 }
 0x364   :  { %2803 = vrot.lane.b32.xlu0 %v2774_v0, %s8268_s5  ;;  %2801 = vrot.lane.b32.xlu1 %v2773_v24, %s8268_s5 }
 0x366   :  { %v2423_v4 = vpop.permute.xlu0 %2422 }
 0x367   :  { %2436 = vst.msk [vmem:[#allocation5 + $0x20] sm:$0xff] %vm2435_vm13, %v2423_v4 }
 0x368   :  { %2817 = vrot.lane.b32.xlu0 %v2773_v24, %s8269_s26  ;;  %2805 = vrot.lane.b32.xlu1 %v2775_v26, %s8268_s5 }
 0x36c   :  { %2821 = vrot.lane.b32.xlu0 %v2775_v26, %s8269_s26  ;;  %2819 = vrot.lane.b32.xlu1 %v2774_v0, %s8269_s26 }
 0x36e   :  { %v2509_v53 = vld [vmem:[#allocation5 + $0x20] sm:$0xff] }
 0x36f   :  { %v2514_v27 = vmul.f32 %v2513_v60, %v2509_v53 }
 0x370   :  { %2835 = vrot.lane.b32.xlu0 %v2774_v0, %s8270_s2  ;;  %2833 = vrot.lane.b32.xlu1 %v2773_v24, %s8270_s2 }
 0x371   :  { %v2517_v10 = vadd.f32 %v2514_v27, %v2506_v41 }
 0x372   :  { %v2425_v28 = vpop.permute.xlu1 %2424  ;;  %v2427_v25 = vpop.permute.xlu0 %2426 }
 0x373   :  { %2437 = vst.msk [vmem:[#allocation5 + $0x28] sm:$0xff] %vm2435_vm13, %v2425_v28  ;;  %2438 = vst.msk [vmem:[#allocation5 + $0x30] sm:$0xff] %vm2435_vm13, %v2427_v25  ;;  %v2568_v28 = vstv %s7011_s29  ;;  %s7137_s29 = sld [smem:[#allocation14 + $0x24]] }
 0x374   :  { %2791 = vrot.lane.b32.xlu0 %v6924_v32, %s8267_s15  ;;  %2837 = vrot.lane.b32.xlu1 %v2775_v26, %s8270_s2  ;;  %s3385_s15 = sld [smem:[#allocation14 + $0x17]] }
 0x376   :  { %v2442_v6 = vpop.permute.xlu1 %2441  ;;  %v2444_v52 = vpop.permute.xlu0 %2443 }
 0x377   :  { %2455 = vst.msk [vmem:[#allocation5 + $0x40] sm:$0xff] %vm2454_vm14, %v2442_v6  ;;  %2456 = vst.msk [vmem:[#allocation5 + $0x48] sm:$0xff] %vm2454_vm14, %v2444_v52 }
 0x378   :  { %2823 = vrot.lane.b32.xlu0 %v6924_v32, %s8269_s26  ;;  %2807 = vrot.lane.b32.xlu1 %v6924_v32, %s8268_s5  ;;  %s3386_s5 = sld [smem:[#allocation14 + $0x18]] }
 0x379   :  { %s3387_s26 = sld [smem:[#allocation14 + $0x19]] }
 0x37a   :  { %v2446_v39 = vpop.permute.xlu1 %2445  ;;  %v2461_v46 = vpop.permute.xlu0 %2460  ;;  %v2510_v29 = vld [vmem:[#allocation5 + $0x28] sm:$0xff]  ;;  %v2511_v16 = vld [vmem:[#allocation5 + $0x30] sm:$0xff] }
 0x37b   :  { %2457 = vst.msk [vmem:[#allocation5 + $0x50] sm:$0xff] %vm2454_vm14, %v2446_v39  ;;  %v2515_v43 = vmul.f32 %v2513_v60, %v2510_v29  ;;  %v2516_v31 = vmul.f32 %v2513_v60, %v2511_v16  ;;  %v2565_v25 = vld [vmem:[#allocation5 + $0x29] sm:$0xff]  ;;  %v2559_v29 = vmul.f32 %v2557_v14, %v6974_v8  ;;  %v2590_v8 = vstv %s7020_s20  ;;  %s7144_s20 = sld [smem:[#allocation14 + $0x26]] }
 0x37c   :  { %2474 = vst.msk [vmem:[#allocation5 + $0x60] sm:$0xff] %vm2473_vm15, %v2461_v46  ;;  %2839 = vrot.lane.b32.xlu1 %v6924_v32, %s8270_s2  ;;  %v2508_v32 = vadd.f32 %v2505_v50, %v2409_v58  ;;  %v2564_v46 = vld [vmem:[#allocation5 + $0x21] sm:$0xff]  ;;  %s3388_s2 = sld [smem:[#allocation14 + $0x1a]] }
 0x37d   :  { %v2518_v45 = vadd.f32 %v2515_v43, %v2507_v38  ;;  %v2569_v13 = vmul.f32 %v2568_v28, %v2564_v46 }
 0x37e   :  { %v2463_v23 = vpop.permute.xlu1 %2462  ;;  %v2465_v35 = vpop.permute.xlu0 %2464  ;;  %v2520_v9 = vld [vmem:[#allocation5 + $0x40] sm:$0xff]  ;;  %v2521_v51 = vld [vmem:[#allocation5 + $0x48] sm:$0xff]  ;;  %v2519_v54 = vadd.f32 %v2516_v31, %v2508_v32 }
 0x37f   :  { %2475 = vst.msk [vmem:[#allocation5 + $0x68] sm:$0xff] %vm2473_vm15, %v2463_v23  ;;  %2476 = vst.msk [vmem:[#allocation5 + $0x70] sm:$0xff] %vm2473_vm15, %v2465_v35  ;;  %v2525_v33 = vmul.f32 %v2524_v61, %v2520_v9  ;;  %v2526_v56 = vmul.f32 %v2524_v61, %v2521_v51  ;;  %v2558_v23 = vmul.f32 %v2557_v14, %v6950_v19  ;;  %v2579_v9 = vstv %s7015_s19  ;;  %s7141_s19 = sld [smem:[#allocation14 + $0x25]] }
 0x381   :  { %v2528_v12 = vadd.f32 %v2525_v33, %v2517_v10  ;;  %v2529_v24 = vadd.f32 %v2526_v56, %v2518_v45 }
 0x382   :  { %v2480_v11 = vpop.permute.xlu1 %2479  ;;  %v2482_v57 = vpop.permute.xlu0 %2481  ;;  %v2522_v63 = vld [vmem:[#allocation5 + $0x50] sm:$0xff] }
 0x383   :  { %2493 = vst.msk [vmem:[#allocation5 + $0x80] sm:$0xff] %vm2492_vm0, %v2480_v11  ;;  %2494 = vst.msk [vmem:[#allocation5 + $0x88] sm:$0xff] %vm2492_vm0, %v2482_v57  ;;  %v2531_v55 = vld [vmem:[#allocation5 + $0x60] sm:$0xff]  ;;  %v2527_v36 = vmul.f32 %v2524_v61, %v2522_v63  ;;  %v2570_v61 = vmul.f32 %v2568_v28, %v2565_v25  ;;  %v2576_v51 = vld [vmem:[#allocation5 + $0x49] sm:$0xff]  ;;  %v7058_v25 = vstv %s7036_s8  ;;  %s7156_s8 = sld [smem:[#allocation14 + $0x2a]] }
 0x384   :  { %v2536_v48 = vmul.f32 %v2535_v34, %v2531_v55  ;;  %v2575_v57 = vld [vmem:[#allocation5 + $0x41] sm:$0xff]  ;;  %v2560_v55 = vmul.f32 %v2557_v14, %v6928_v47  ;;  %v2581_v63 = vmul.f32 %v2579_v9, %v2576_v51 }
 0x385   :  { %v2530_v35 = vadd.f32 %v2527_v36, %v2519_v54  ;;  %v2580_v31 = vmul.f32 %v2579_v9, %v2575_v57 }
 0x386   :  { %v2532_v30 = vld [vmem:[#allocation5 + $0x68] sm:$0xff]  ;;  %v2484_v22 = vpop.permute.xlu1 %2483  ;;  %v2429_v21 = vpop.permute.xlu0 %2428  ;;  %v2533_v15 = vld [vmem:[#allocation5 + $0x70] sm:$0xff]  ;;  %v2539_v37 = vadd.f32 %v2536_v48, %v2528_v12  ;;  %v7044_v48 = vstv %s7028_s23  ;;  %s7150_s23 = sld [smem:[#allocation14 + $0x28]] }
 0x387   :  { %v2537_v40 = vmul.f32 %v2535_v34, %v2532_v30  ;;  %2495 = vst.msk [vmem:[#allocation5 + $0x90] sm:$0xff] %vm2492_vm0, %v2484_v22  ;;  %v2538_v52 = vmul.f32 %v2535_v34, %v2533_v15  ;;  %v2587_v50 = vld [vmem:[#allocation5 + $0x69] sm:$0xff]  ;;  %v2586_v16 = vld [vmem:[#allocation5 + $0x61] sm:$0xff]  ;;  %v2601_v30 = vstv %s7024_s18  ;;  %v7049_v15 = vstv %s7032_s28  ;;  %s7147_s18 = sld [smem:[#allocation14 + $0x27]] }
 0x388   :  { %2440 = vst.msk [vmem:[#allocation5 + $0x38] sm:$0xf] %vm2439_vm1, %v2429_v21  ;;  %v2592_v10 = vmul.f32 %v2590_v8, %v2587_v50  ;;  %s7153_s28 = sld [smem:[#allocation14 + $0x29]] }
 0x389   :  { %v2540_v6 = vadd.f32 %v2537_v40, %v2529_v24  ;;  %v2541_v27 = vadd.f32 %v2538_v52, %v2530_v35  ;;  %v2591_v40 = vmul.f32 %v2590_v8, %v2586_v16  ;;  %v2620_v24 = vld [vmem:[#allocation5 + $0x2a] sm:$0xff] }
 0x38a   :  { %v2543_v26 = vld [vmem:[#allocation5 + $0x88] sm:$0xff]  ;;  %v2448_v0 = vpop.permute.xlu1 %2447  ;;  %v2467_v4 = vpop.permute.xlu0 %2466  ;;  %v2542_v2 = vld [vmem:[#allocation5 + $0x80] sm:$0xff]  ;;  %v2625_v46 = vmul.f32 %v7049_v15, %v2620_v24  ;;  %v2615_v24 = vmul.f32 %v7044_v48, %v6930_v17  ;;  %v2722_v17 = vstv %s7083_s30  ;;  %s3544_s30 = smov 100  }
 0x38b   :  { %v2548_v39 = vmul.f32 %v2546_v20, %v2543_v26  ;;  %2459 = vst.msk [vmem:[#allocation5 + $0x58] sm:$0xf] %vm2458_vm2, %v2448_v0  ;;  %v2547_v5 = vmul.f32 %v2546_v20, %v2542_v2  ;;  %v2597_v56 = vld [vmem:[#allocation5 + $0x81] sm:$0xff]  ;;  %v2642_v35 = vld [vmem:[#allocation5 + $0x6a] sm:$0xff] }
 0x38c   :  { %2478 = vst.msk [vmem:[#allocation5 + $0x78] sm:$0xf] %vm2477_vm3, %v2467_v4  ;;  %v2602_v12 = vmul.f32 %v2601_v30, %v2597_v56  ;;  %v2619_v0 = vld [vmem:[#allocation5 + $0x22] sm:$0xff]  ;;  %v2613_v4 = vmul.f32 %v7044_v48, %v6952_v7 }
 0x38d   :  { %v2551_v60 = vadd.f32 %v2548_v39, %v2540_v6  ;;  %v2550_v53 = vadd.f32 %v2547_v5, %v2539_v37  ;;  %v2614_v37 = vmul.f32 %v7044_v48, %v6976_v49  ;;  %v2630_v2 = vld [vmem:[#allocation5 + $0x42] sm:$0xff]  ;;  %v2631_v39 = vld [vmem:[#allocation5 + $0x4a] sm:$0xff]  ;;  %v2624_v7 = vmul.f32 %v7049_v15, %v2619_v0 }
 0x38e   :  { %v2544_v62 = vld [vmem:[#allocation5 + $0x90] sm:$0xff]  ;;  %v2486_v58 = vpop.permute.xlu1 %2485  ;;  %v2696_v0 = vld [vmem:[#allocation5 + $0x63] sm:$0xff] }
 0x38f   :  { %v2549_v11 = vmul.f32 %v2546_v20, %v2544_v62  ;;  %2497 = vst.msk [vmem:[#allocation5 + $0x98] sm:$0xf] %vm2496_vm4, %v2486_v58  ;;  %v2561_v19 = vadd.f32 %v2558_v23, %v2550_v53  ;;  %v2562_v43 = vadd.f32 %v2559_v29, %v2551_v60  ;;  %v2566_v41 = vld [vmem:[#allocation5 + $0x31] sm:$0xff]  ;;  %v2598_v22 = vld [vmem:[#allocation5 + $0x89] sm:$0xff]  ;;  %v7064_v23 = vstv %s7040_s0  ;;  %s7159_s0 = sld [smem:[#allocation14 + $0x2b]] }
 0x390   :  { %v2571_v45 = vmul.f32 %v2568_v28, %v2566_v41  ;;  %v2603_v26 = vmul.f32 %v2601_v30, %v2598_v22  ;;  %v2641_v29 = vld [vmem:[#allocation5 + $0x62] sm:$0xff]  ;;  %v2635_v62 = vmul.f32 %v7058_v25, %v2630_v2  ;;  %v7073_v58 = vstv %s7046_s3  ;;  %v2653_v57 = vld [vmem:[#allocation5 + $0x8a] sm:$0xff]  ;;  %s7162_s3 = sld [smem:[#allocation14 + $0x2c]] }
 0x391   :  { %v2552_v34 = vadd.f32 %v2549_v11, %v2541_v27  ;;  %v2572_v33 = vadd.f32 %v2569_v13, %v2561_v19  ;;  %v2573_v38 = vadd.f32 %v2570_v61, %v2562_v43  ;;  %v2652_v13 = vld [vmem:[#allocation5 + $0x82] sm:$0xff]  ;;  %v2636_v61 = vmul.f32 %v7058_v25, %v2631_v39 }
 0x392   :  { %v2577_v20 = vld [vmem:[#allocation5 + $0x51] sm:$0xff]  ;;  %v2647_v27 = vmul.f32 %v7064_v23, %v2642_v35  ;;  %v7078_v43 = vstv %s7051_s24  ;;  %v2646_v16 = vmul.f32 %v7064_v23, %v2641_v29  ;;  %v2658_v56 = vmul.f32 %v7073_v58, %v2653_v57  ;;  %v2707_v2 = vld [vmem:[#allocation5 + $0x83] sm:$0xff]  ;;  %s7165_s24 = sld [smem:[#allocation14 + $0x2d]] }
 0x393   :  { %v2563_v21 = vadd.f32 %v2560_v55, %v2552_v34  ;;  %v2583_v32 = vadd.f32 %v2580_v31, %v2572_v33  ;;  %v2584_v47 = vadd.f32 %v2581_v63, %v2573_v38  ;;  %v2582_v28 = vmul.f32 %v2579_v9, %v2577_v20  ;;  %v2588_v5 = vld [vmem:[#allocation5 + $0x71] sm:$0xff]  ;;  %v2674_v63 = vld [vmem:[#allocation5 + $0x23] sm:$0xff] }
 0x394   :  { %v2593_v9 = vmul.f32 %v2590_v8, %v2588_v5  ;;  %v2657_v8 = vmul.f32 %v7073_v58, %v2652_v13  ;;  %v2675_v31 = vld [vmem:[#allocation5 + $0x2b] sm:$0xff]  ;;  %v2678_v22 = vstv %s7061_s4  ;;  %s7168_s4 = sld [smem:[#allocation14 + $0x2e]] }
 0x395   :  { %v2574_v36 = vadd.f32 %v2571_v45, %v2563_v21  ;;  %v2594_v14 = vadd.f32 %v2591_v40, %v2583_v32  ;;  %v2595_v54 = vadd.f32 %v2592_v10, %v2584_v47  ;;  %v2668_v21 = vmul.f32 %v7078_v43, %v6954_v42  ;;  %v2685_v45 = vld [vmem:[#allocation5 + $0x43] sm:$0xff]  ;;  %v2632_v29 = vld [vmem:[#allocation5 + $0x52] sm:$0xff] }
 0x396   :  { %v2599_v19 = vld [vmem:[#allocation5 + $0x91] sm:$0xff]  ;;  %v2669_v10 = vmul.f32 %v7078_v43, %v6978_v1  ;;  %v2689_v32 = vstv %s7067_s1  ;;  %v2729_v5 = vld [vmem:[#allocation5 + $0x24] sm:$0xff]  ;;  %v2637_v57 = vmul.f32 %v7058_v25, %v2632_v29  ;;  %s7171_s1 = sld [smem:[#allocation14 + $0x2f]] }
 0x397   :  { %v2605_v6 = vadd.f32 %v2602_v12, %v2594_v14  ;;  %v2606_v52 = vadd.f32 %v2603_v26, %v2595_v54  ;;  %v2585_v49 = vadd.f32 %v2582_v28, %v2574_v36  ;;  %v2604_v41 = vmul.f32 %v2601_v30, %v2599_v19  ;;  %v2686_v30 = vld [vmem:[#allocation5 + $0x4b] sm:$0xff]  ;;  %v2753_v29 = vld [vmem:[#allocation5 + $0x74] sm:$0xff] }
 0x398   :  { %v2700_v12 = vstv %s7070_s14  ;;  %v2697_v36 = vld [vmem:[#allocation5 + $0x6b] sm:$0xff]  ;;  %v2679_v14 = vmul.f32 %v2678_v22, %v2674_v63  ;;  %v2680_v54 = vmul.f32 %v2678_v22, %v2675_v31  ;;  %v2690_v1 = vmul.f32 %v2689_v32, %v2685_v45  ;;  %v2676_v31 = vld [vmem:[#allocation5 + $0x33] sm:$0xff]  ;;  %s7174_s14 = sld [smem:[#allocation14 + $0x30]] }
 0x399   :  { %v2616_v60 = vadd.f32 %v2613_v4, %v2605_v6  ;;  %v2617_v53 = vadd.f32 %v2614_v37, %v2606_v52  ;;  %v2596_v50 = vadd.f32 %v2593_v9, %v2585_v49  ;;  %v2621_v4 = vld [vmem:[#allocation5 + $0x32] sm:$0xff]  ;;  %v2711_v37 = vstv %s7080_s21  ;;  %s7177_s21 = sld [smem:[#allocation14 + $0x31]] }
 0x39a   :  { %v2691_v28 = vmul.f32 %v2689_v32, %v2686_v30  ;;  %v2626_v48 = vmul.f32 %v7049_v15, %v2621_v4  ;;  %v2701_v49 = vmul.f32 %v2700_v12, %v2696_v0  ;;  %v2681_v63 = vmul.f32 %v2678_v22, %v2676_v31  ;;  %v2698_v45 = vld [vmem:[#allocation5 + $0x73] sm:$0xff] }
 0x39b   :  { %v2627_v51 = vadd.f32 %v2624_v7, %v2616_v60  ;;  %v2628_v11 = vadd.f32 %v2625_v46, %v2617_v53  ;;  %v2607_v47 = vadd.f32 %v2604_v41, %v2596_v50  ;;  %v2708_v46 = vld [vmem:[#allocation5 + $0x8b] sm:$0xff]  ;;  %v2702_v7 = vmul.f32 %v2700_v12, %v2697_v36 }
 0x39c   :  { %v2654_v41 = vld [vmem:[#allocation5 + $0x92] sm:$0xff]  ;;  %v2744_v22 = vstv %s3384_s9  ;;  %v2864_v31 = vstv %s3388_s2 }
 0x39d   :  { %v2638_v34 = vadd.f32 %v2635_v62, %v2627_v51  ;;  %v2639_v55 = vadd.f32 %v2636_v61, %v2628_v11  ;;  %v2618_v6 = vadd.f32 %v2615_v24, %v2607_v47  ;;  %v2712_v62 = vmul.f32 %v2711_v37, %v2707_v2  ;;  %v2730_v30 = vld [vmem:[#allocation5 + $0x2c] sm:$0xff] }
 0x39e   :  { %v2713_v51 = vmul.f32 %v2711_v37, %v2708_v46  ;;  %v2723_v11 = vmul.f32 %v2722_v17, %v6956_v59  ;;  %v2670_v59 = vmul.f32 %v7078_v43, %v6932_v18  ;;  %v2733_v24 = vstv %s3383_s12  ;;  %v2741_v43 = vld [vmem:[#allocation5 + $0x4c] sm:$0xff]  ;;  %s3545_s12 = smov [#allocation15]  }
 0x39f   :  { %v2649_v33 = vadd.f32 %v2646_v16, %v2638_v34  ;;  %v2650_v38 = vadd.f32 %v2647_v27, %v2639_v55  ;;  %v2629_v13 = vadd.f32 %v2626_v48, %v2618_v6  ;;  %v2724_v27 = vmul.f32 %v2722_v17, %v6980_v3  ;;  %v2643_v16 = vld [vmem:[#allocation5 + $0x72] sm:$0xff]  ;;  %s3149_s9 = sshll.u32 %s3545_s12, 4  ;;  %s3150_s9 = int_to_ptr.vmem [resolvable:$true] %s3149_s9 }
 0x3a0   :  { %v2687_v3 = vld [vmem:[#allocation5 + $0x53] sm:$0xff]  ;;  %v2735_v18 = vmul.f32 %v2733_v24, %v2730_v30  ;;  %p3508_p7 = scmp.lt.s32.totalorder %s3150_s9, %s3150_s9 }
 0x3a1   :  { %v2660_v40 = vadd.f32 %v2657_v8, %v2649_v33  ;;  %v2661_v20 = vadd.f32 %v2658_v56, %v2650_v38  ;;  %v2640_v34 = vadd.f32 %v2637_v57, %v2629_v13  ;;  %v2648_v8 = vmul.f32 %v7064_v23, %v2643_v16  ;;  %v2709_v23 = vld [vmem:[#allocation5 + $0x93] sm:$0xff]  ;;  %v2850_v16 = vld [vmem:[#allocation5 + $0x8] sm:$0xff] }
 0x3a2   :  { %v2659_v38 = vmul.f32 %v7073_v58, %v2654_v41  ;;  %v2714_v58 = vmul.f32 %v2711_v37, %v2709_v23  ;;  %v2752_v2 = vld [vmem:[#allocation5 + $0x6c] sm:$0xff]  ;;  %v2742_v37 = vld [vmem:[#allocation5 + $0x54] sm:$0xff] }
 0x3a3   :  { %v2671_v26 = vadd.f32 %v2668_v21, %v2660_v40  ;;  %v2672_v42 = vadd.f32 %v2669_v10, %v2661_v20  ;;  %v2651_v33 = vadd.f32 %v2648_v8, %v2640_v34  ;;  %v2692_v10 = vmul.f32 %v2689_v32, %v2687_v3  ;;  %v2731_v32 = vld [vmem:[#allocation5 + $0x34] sm:$0xff]  ;;  %v2763_v48 = vld [vmem:[#allocation5 + $0x8c] sm:$0xff] }
 0x3a4   :  { %v2703_v40 = vmul.f32 %v2700_v12, %v2698_v45  ;;  %v2736_v6 = vmul.f32 %v2733_v24, %v2731_v32  ;;  %v2764_v34 = vld [vmem:[#allocation5 + $0x94] sm:$0xff] }
 0x3a5   :  { %v2682_v52 = vadd.f32 %v2679_v14, %v2671_v26  ;;  %v2683_v39 = vadd.f32 %v2680_v54, %v2672_v42  ;;  %v2662_v56 = vadd.f32 %v2659_v38, %v2651_v33  ;;  %v2734_v14 = vmul.f32 %v2733_v24, %v2729_v5  ;;  %v2740_v54 = vld [vmem:[#allocation5 + $0x44] sm:$0xff]  ;;  %v2851_v3 = vld [vmem:[#allocation5 + $0x10] sm:$0xff] }
 0x3a6   :  { %v2725_v26 = vmul.f32 %v2722_v17, %v6934_v44  ;;  %v2745_v12 = vmul.f32 %v2744_v22, %v2740_v54  ;;  %v2875_v24 = vstv %s3389_s17 }
 0x3a7   :  { %v2693_v60 = vadd.f32 %v2690_v1, %v2682_v52  ;;  %v2694_v53 = vadd.f32 %v2691_v28, %v2683_v39  ;;  %v2673_v25 = vadd.f32 %v2670_v59, %v2662_v56  ;;  %v2746_v1 = vmul.f32 %v2744_v22, %v2741_v43  ;;  %v2751_v28 = vld [vmem:[#allocation5 + $0x64] sm:$0xff] }
 0x3a8   :  { %v2786_v35 = vpop.permute.xlu0 %2785  ;;  %v2755_v52 = vstv %s3385_s15  ;;  %s3503_s15 = scalar_lea.vmem %s3150_s9, 768 }
 0x3a9   :  { %2797 = vst.msk [vmem:[#allocation5 + $0x20] sm:$0xff] %vm2435_vm13, %v2786_v35  ;;  %v2704_v61 = vadd.f32 %v2701_v49, %v2693_v60  ;;  %v2705_v9 = vadd.f32 %v2702_v7, %v2694_v53  ;;  %v2684_v21 = vadd.f32 %v2681_v63, %v2673_v25  ;;  %v2756_v44 = vmul.f32 %v2755_v52, %v2751_v28  ;;  %v2762_v49 = vld [vmem:[#allocation5 + $0x84] sm:$0xff]  ;;  %p3504_p6 = scmp.ne.s32.totalorder %s3150_s9, %s3503_s15  ;;  %p3509_p8 = scmp.lt.s32.totalorder %s3503_s15, %s3503_s15 }
 0x3aa   :  { %v2757_v17 = vmul.f32 %v2755_v52, %v2752_v2  ;;  %v2747_v60 = vmul.f32 %v2744_v22, %v2742_v37  ;;  %v2766_v53 = vstv %s3386_s5 }
 0x3ab   :  { %v2715_v19 = vadd.f32 %v2712_v62, %v2704_v61  ;;  %v2716_v50 = vadd.f32 %v2713_v51, %v2705_v9  ;;  %v2695_v47 = vadd.f32 %v2692_v10, %v2684_v21  ;;  %v2768_v57 = vmul.f32 %v2766_v53, %v2763_v48  ;;  %v2904_v48 = vld [vmem:[#allocation5 + $0x1] sm:$0xff]  ;;  %p3510_p9 = por %p3509_p8, %p3508_p7 }
 0x3ac   :  { %v2769_v59 = vmul.f32 %v2766_v53, %v2764_v34 }
 0x3ad   :  { %v2726_v15 = vadd.f32 %v2723_v11, %v2715_v19  ;;  %v2727_v55 = vadd.f32 %v2724_v27, %v2716_v50  ;;  %v2706_v20 = vadd.f32 %v2703_v40, %v2695_v47  ;;  %v2767_v11 = vmul.f32 %v2766_v53, %v2762_v49  ;;  %v2849_v19 = vld [vmem:[#allocation5] sm:$0xff]  ;;  %p3511_p10 = pnand %p3510_p9, %p3504_p6 }
 0x3ae   :  { %v2758_v27 = vmul.f32 %v2755_v52, %v2753_v29  ;;  %v2853_v50 = vstv %s3387_s26  ;;  %v2908_v29 = vstv %s7116_s25 }
 0x3af   :  { %v2717_v36 = vadd.f32 %v2714_v58, %v2706_v20  ;;  %v2737_v42 = vadd.f32 %v2734_v14, %v2726_v15  ;;  %v2738_v0 = vadd.f32 %v2735_v18, %v2727_v55  ;;  %v2854_v38 = vmul.f32 %v2853_v50, %v2849_v19 }
 0x3b0   :  { %v2855_v56 = vmul.f32 %v2853_v50, %v2850_v16  ;;  %v2860_v25 = vld [vmem:[#allocation5 + $0x20] sm:$0xff]  ;;  %v2856_v30 = vmul.f32 %v2853_v50, %v2851_v3 }
 0x3b1   :  { %v2728_v4 = vadd.f32 %v2725_v26, %v2717_v36  ;;  %v2748_v39 = vadd.f32 %v2745_v12, %v2737_v42  ;;  %v2749_v46 = vadd.f32 %v2746_v1, %v2738_v0  ;;  %v2865_v23 = vmul.f32 %v2864_v31, %v2860_v25 }
 0x3b2   :  { %v2886_v0 = vstv %s3390_s11 }
 0x3b3   :  { %v2739_v7 = vadd.f32 %v2736_v6, %v2728_v4  ;;  %v2759_v62 = vadd.f32 %v2756_v44, %v2748_v39  ;;  %v2760_v13 = vadd.f32 %v2757_v17, %v2749_v46 }
 0x3b5   :  { %v2750_v51 = vadd.f32 %v2747_v60, %v2739_v7  ;;  %v2770_v15 = vadd.f32 %v2767_v11, %v2759_v62  ;;  %v2771_v55 = vadd.f32 %v2768_v57, %v2760_v13  ;;  %v2919_v57 = vstv %s7120_s6 }
 0x3b7   :  { %v2761_v33 = vadd.f32 %v2758_v27, %v2750_v51  ;;  %v2857_v21 = vadd.f32 %v2854_v38, %v2770_v15  ;;  %v2858_v10 = vadd.f32 %v2855_v56, %v2771_v55  ;;  %v2909_v15 = vmul.f32 %v2908_v29, %v2904_v48 }
 0x3b9   :  { %v2772_v40 = vadd.f32 %v2769_v59, %v2761_v33  ;;  %v2868_v18 = vadd.f32 %v2865_v23, %v2857_v21  ;;  %v2930_v33 = vstv %s7122_s27  ;;  %v2906_v21 = vld [vmem:[#allocation5 + $0x11] sm:$0xff] }
 0x3bb   :  { %v2859_v26 = vadd.f32 %v2856_v30, %v2772_v40 }
 0x3d2   :  { %v2788_v5 = vpop.permute.xlu1 %2787  ;;  %v2790_v35 = vpop.permute.xlu0 %2789 }
 0x3d3   :  { %2798 = vst.msk [vmem:[#allocation5 + $0x28] sm:$0xff] %vm2435_vm13, %v2788_v5  ;;  %2799 = vst.msk [vmem:[#allocation5 + $0x30] sm:$0xff] %vm2435_vm13, %v2790_v35  ;;  %v2897_v35 = vstv %s3391_s16 }
 0x3d6   :  { %v2802_v61 = vpop.permute.xlu1 %2801  ;;  %v2804_v9 = vpop.permute.xlu0 %2803 }
 0x3d7   :  { %2813 = vst.msk [vmem:[#allocation5 + $0x40] sm:$0xff] %vm2454_vm14, %v2802_v61  ;;  %2814 = vst.msk [vmem:[#allocation5 + $0x48] sm:$0xff] %vm2454_vm14, %v2804_v9  ;;  %v2905_v9 = vld [vmem:[#allocation5 + $0x9] sm:$0xff] }
 0x3d8   :  { %v2910_v55 = vmul.f32 %v2908_v29, %v2905_v9 }
 0x3da   :  { %v2806_v8 = vpop.permute.xlu1 %2805  ;;  %v2818_v41 = vpop.permute.xlu0 %2817  ;;  %v2861_v63 = vld [vmem:[#allocation5 + $0x28] sm:$0xff]  ;;  %v2862_v14 = vld [vmem:[#allocation5 + $0x30] sm:$0xff] }
 0x3db   :  { %2829 = vst.msk [vmem:[#allocation5 + $0x60] sm:$0xff] %vm2473_vm15, %v2818_v41  ;;  %v2866_v20 = vmul.f32 %v2864_v31, %v2861_v63  ;;  %v2867_v4 = vmul.f32 %v2864_v31, %v2862_v14  ;;  %v2915_v27 = vld [vmem:[#allocation5 + $0x21] sm:$0xff]  ;;  %v2916_v19 = vld [vmem:[#allocation5 + $0x29] sm:$0xff]  ;;  %v2952_v14 = vstv %s7129_s10 }
 0x3dc   :  { %2815 = vst.msk [vmem:[#allocation5 + $0x50] sm:$0xff] %vm2454_vm14, %v2806_v8  ;;  %v2920_v25 = vmul.f32 %v2919_v57, %v2915_v27  ;;  %v2921_v63 = vmul.f32 %v2919_v57, %v2916_v19 }
 0x3dd   :  { %v2869_v43 = vadd.f32 %v2866_v20, %v2858_v10  ;;  %v2870_v37 = vadd.f32 %v2867_v4, %v2859_v26 }
 0x3de   :  { %v2820_v45 = vpop.permute.xlu1 %2819  ;;  %v2822_v47 = vpop.permute.xlu0 %2821  ;;  %v2871_v58 = vld [vmem:[#allocation5 + $0x40] sm:$0xff]  ;;  %v2872_v36 = vld [vmem:[#allocation5 + $0x48] sm:$0xff] }
 0x3df   :  { %2830 = vst.msk [vmem:[#allocation5 + $0x68] sm:$0xff] %vm2473_vm15, %v2820_v45  ;;  %2831 = vst.msk [vmem:[#allocation5 + $0x70] sm:$0xff] %vm2473_vm15, %v2822_v47  ;;  %v2876_v32 = vmul.f32 %v2875_v24, %v2871_v58  ;;  %v2877_v42 = vmul.f32 %v2875_v24, %v2872_v36  ;;  %v2926_v41 = vld [vmem:[#allocation5 + $0x41] sm:$0xff]  ;;  %v2941_v45 = vstv %s7126_s13 }
 0x3e0   :  { %v2931_v30 = vmul.f32 %v2930_v33, %v2926_v41 }
 0x3e1   :  { %v2879_v2 = vadd.f32 %v2876_v32, %v2868_v18  ;;  %v2880_v28 = vadd.f32 %v2877_v42, %v2869_v43 }
 0x3e2   :  { %v2834_v54 = vpop.permute.xlu1 %2833  ;;  %v2836_v22 = vpop.permute.xlu0 %2835  ;;  %v2882_v12 = vld [vmem:[#allocation5 + $0x60] sm:$0xff] }
 0x3e3   :  { %2845 = vst.msk [vmem:[#allocation5 + $0x80] sm:$0xff] %vm2492_vm0, %v2834_v54  ;;  %2846 = vst.msk [vmem:[#allocation5 + $0x88] sm:$0xff] %vm2492_vm0, %v2836_v22  ;;  %v2873_v1 = vld [vmem:[#allocation5 + $0x50] sm:$0xff]  ;;  %v2887_v46 = vmul.f32 %v2886_v0, %v2882_v12  ;;  %v2911_v54 = vmul.f32 %v2908_v29, %v2906_v21  ;;  %v2959_v12 = vld [vmem:[#allocation5 + $0x2] sm:$0xff] }
 0x3e4   :  { %v2878_v7 = vmul.f32 %v2875_v24, %v2873_v1  ;;  %v2927_v38 = vld [vmem:[#allocation5 + $0x49] sm:$0xff]  ;;  %v2963_v1 = vstv %s7134_s22 }
 0x3e5   :  { %v2890_v44 = vadd.f32 %v2887_v46, %v2879_v2  ;;  %v2932_v58 = vmul.f32 %v2930_v33, %v2927_v38  ;;  %v2960_v2 = vld [vmem:[#allocation5 + $0xa] sm:$0xff] }
 0x3e6   :  { %v2838_v6 = vpop.permute.xlu1 %2837  ;;  %v2792_v52 = vpop.permute.xlu0 %2791  ;;  %v2883_v39 = vld [vmem:[#allocation5 + $0x68] sm:$0xff]  ;;  %v2884_v49 = vld [vmem:[#allocation5 + $0x70] sm:$0xff]  ;;  %v2881_v62 = vadd.f32 %v2878_v7, %v2870_v37 }
 0x3e7   :  { %2800 = vst.msk [vmem:[#allocation5 + $0x38] sm:$0xf] %vm2439_vm1, %v2792_v52  ;;  %v2888_v5 = vmul.f32 %v2886_v0, %v2883_v39  ;;  %v2889_v50 = vmul.f32 %v2886_v0, %v2884_v49  ;;  %v2937_v10 = vld [vmem:[#allocation5 + $0x61] sm:$0xff]  ;;  %v2938_v47 = vld [vmem:[#allocation5 + $0x69] sm:$0xff]  ;;  %v2964_v49 = vmul.f32 %v2963_v1, %v2959_v12 }
 0x3e8   :  { %2847 = vst.msk [vmem:[#allocation5 + $0x90] sm:$0xff] %vm2492_vm0, %v2838_v6  ;;  %v2942_v32 = vmul.f32 %v2941_v45, %v2937_v10  ;;  %v2943_v0 = vmul.f32 %v2941_v45, %v2938_v47  ;;  %v2971_v7 = vld [vmem:[#allocation5 + $0x2a] sm:$0xff] }
 0x3e9   :  { %v2891_v17 = vadd.f32 %v2888_v5, %v2880_v28  ;;  %v2892_v56 = vadd.f32 %v2889_v50, %v2881_v62  ;;  %v2970_v5 = vld [vmem:[#allocation5 + $0x22] sm:$0xff]  ;;  %v2961_v50 = vld [vmem:[#allocation5 + $0x12] sm:$0xff] }
 0x3ea   :  { %v2808_v60 = vpop.permute.xlu1 %2807  ;;  %v2824_v53 = vpop.permute.xlu0 %2823  ;;  %v2893_v13 = vld [vmem:[#allocation5 + $0x80] sm:$0xff]  ;;  %v2894_v61 = vld [vmem:[#allocation5 + $0x88] sm:$0xff]  ;;  %v2966_v21 = vmul.f32 %v2963_v1, %v2961_v50 }
 0x3eb   :  { %2816 = vst.msk [vmem:[#allocation5 + $0x58] sm:$0xf] %vm2458_vm2, %v2808_v60  ;;  %v2898_v51 = vmul.f32 %v2897_v35, %v2893_v13  ;;  %v2899_v11 = vmul.f32 %v2897_v35, %v2894_v61  ;;  %v2948_v36 = vld [vmem:[#allocation5 + $0x81] sm:$0xff]  ;;  %v2985_v13 = vstv %s7141_s19  ;;  %v2982_v61 = vld [vmem:[#allocation5 + $0x4a] sm:$0xff] }
 0x3ec   :  { %2832 = vst.msk [vmem:[#allocation5 + $0x78] sm:$0xf] %vm2477_vm3, %v2824_v53  ;;  %v2953_v52 = vmul.f32 %v2952_v14, %v2948_v36  ;;  %v2965_v53 = vmul.f32 %v2963_v1, %v2960_v2  ;;  %v2981_v62 = vld [vmem:[#allocation5 + $0x42] sm:$0xff] }
 0x3ed   :  { %v2901_v16 = vadd.f32 %v2898_v51, %v2890_v44  ;;  %v2902_v34 = vadd.f32 %v2899_v11, %v2891_v17 }
 0x3ee   :  { %v2840_v8 = vpop.permute.xlu1 %2839  ;;  %v2917_v23 = vld [vmem:[#allocation5 + $0x31] sm:$0xff] }
 0x3ef   :  { %2848 = vst.msk [vmem:[#allocation5 + $0x98] sm:$0xf] %vm2496_vm4, %v2840_v8  ;;  %v2912_v59 = vadd.f32 %v2909_v15, %v2901_v16  ;;  %v2913_v31 = vadd.f32 %v2910_v55, %v2902_v34  ;;  %v2895_v3 = vld [vmem:[#allocation5 + $0x90] sm:$0xff]  ;;  %v2922_v4 = vmul.f32 %v2919_v57, %v2917_v23  ;;  %v2992_v16 = vld [vmem:[#allocation5 + $0x62] sm:$0xff]  ;;  %v2996_v34 = vstv %s7144_s20 }
 0x3f0   :  { %v2900_v40 = vmul.f32 %v2897_v35, %v2895_v3  ;;  %v2949_v18 = vld [vmem:[#allocation5 + $0x89] sm:$0xff]  ;;  %v2974_v35 = vstv %s7137_s29 }
 0x3f1   :  { %v2923_v20 = vadd.f32 %v2920_v25, %v2912_v59  ;;  %v2924_v24 = vadd.f32 %v2921_v63, %v2913_v31  ;;  %v2954_v39 = vmul.f32 %v2952_v14, %v2949_v18  ;;  %v2975_v57 = vmul.f32 %v2974_v35, %v2970_v5  ;;  %v2993_v15 = vld [vmem:[#allocation5 + $0x6a] sm:$0xff]  ;;  %v2972_v59 = vld [vmem:[#allocation5 + $0x32] sm:$0xff]  ;;  %v3003_v31 = vld [vmem:[#allocation5 + $0x82] sm:$0xff] }
 0x3f2   :  { %v2903_v43 = vadd.f32 %v2900_v40, %v2892_v56  ;;  %v2928_v22 = vld [vmem:[#allocation5 + $0x51] sm:$0xff]  ;;  %v2976_v19 = vmul.f32 %v2974_v35, %v2971_v7  ;;  %v2987_v56 = vmul.f32 %v2985_v13, %v2982_v61  ;;  %v3007_v25 = vstv %s7147_s18 }
 0x3f3   :  { %v2934_v26 = vadd.f32 %v2931_v30, %v2923_v20  ;;  %v2935_v42 = vadd.f32 %v2932_v58, %v2924_v24  ;;  %v2939_v46 = vld [vmem:[#allocation5 + $0x71] sm:$0xff]  ;;  %v2933_v17 = vmul.f32 %v2930_v33, %v2928_v22  ;;  %v2986_v33 = vmul.f32 %v2985_v13, %v2981_v62  ;;  %v3014_v20 = vld [vmem:[#allocation5 + $0x3] sm:$0xff] }
 0x3f4   :  { %v2914_v28 = vadd.f32 %v2911_v54, %v2903_v43  ;;  %v2944_v51 = vmul.f32 %v2941_v45, %v2939_v46  ;;  %v3004_v63 = vld [vmem:[#allocation5 + $0x8a] sm:$0xff]  ;;  %v2997_v45 = vmul.f32 %v2996_v34, %v2992_v16  ;;  %v2998_v40 = vmul.f32 %v2996_v34, %v2993_v15  ;;  %v2983_v23 = vld [vmem:[#allocation5 + $0x52] sm:$0xff] }
 0x3f5   :  { %v2945_v6 = vadd.f32 %v2942_v32, %v2934_v26  ;;  %v2946_v37 = vadd.f32 %v2943_v0, %v2935_v42  ;;  %v3018_v30 = vstv %s7150_s23  ;;  %v3015_v24 = vld [vmem:[#allocation5 + $0xb] sm:$0xff]  ;;  %v2977_v36 = vmul.f32 %v2974_v35, %v2972_v59  ;;  %v3025_v26 = vld [vmem:[#allocation5 + $0x23] sm:$0xff] }
 0x3f6   :  { %v2925_v44 = vadd.f32 %v2922_v4, %v2914_v28  ;;  %v2950_v29 = vld [vmem:[#allocation5 + $0x91] sm:$0xff]  ;;  %v3008_v18 = vmul.f32 %v3007_v25, %v3003_v31  ;;  %v3009_v54 = vmul.f32 %v3007_v25, %v3004_v63  ;;  %v3029_v32 = vstv %s7153_s28 }
 0x3f7   :  { %v2956_v48 = vadd.f32 %v2953_v52, %v2945_v6  ;;  %v2957_v60 = vadd.f32 %v2954_v39, %v2946_v37  ;;  %v2955_v8 = vmul.f32 %v2952_v14, %v2950_v29  ;;  %v2994_v22 = vld [vmem:[#allocation5 + $0x72] sm:$0xff]  ;;  %v2988_v4 = vmul.f32 %v2985_v13, %v2983_v23  ;;  %v3036_v52 = vld [vmem:[#allocation5 + $0x43] sm:$0xff] }
 0x3f8   :  { %v2936_v9 = vadd.f32 %v2933_v17, %v2925_v44  ;;  %v3026_v42 = vld [vmem:[#allocation5 + $0x2b] sm:$0xff]  ;;  %v3019_v1 = vmul.f32 %v3018_v30, %v3014_v20  ;;  %v3020_v28 = vmul.f32 %v3018_v30, %v3015_v24  ;;  %v3040_v37 = vstv %s7156_s8 }
 0x3f9   :  { %v2967_v11 = vadd.f32 %v2964_v49, %v2956_v48  ;;  %v2968_v27 = vadd.f32 %v2965_v53, %v2957_v60  ;;  %v3005_v6 = vld [vmem:[#allocation5 + $0x92] sm:$0xff]  ;;  %v2999_v5 = vmul.f32 %v2996_v34, %v2994_v22  ;;  %v3030_v7 = vmul.f32 %v3029_v32, %v3025_v26  ;;  %v3047_v49 = vld [vmem:[#allocation5 + $0x63] sm:$0xff] }
 0x3fa   :  { %v2947_v55 = vadd.f32 %v2944_v51, %v2936_v9  ;;  %v3037_v39 = vld [vmem:[#allocation5 + $0x4b] sm:$0xff]  ;;  %v3031_v17 = vmul.f32 %v3029_v32, %v3026_v42  ;;  %v3016_v48 = vld [vmem:[#allocation5 + $0x13] sm:$0xff]  ;;  %v3051_v60 = vstv %s7159_s0  ;;  %v3010_v62 = vmul.f32 %v3007_v25, %v3005_v6 }
 0x3fb   :  { %v2978_v41 = vadd.f32 %v2975_v57, %v2967_v11  ;;  %v2979_v38 = vadd.f32 %v2976_v19, %v2968_v27  ;;  %v3048_v53 = vld [vmem:[#allocation5 + $0x6b] sm:$0xff]  ;;  %v3041_v61 = vmul.f32 %v3040_v37, %v3036_v52  ;;  %v3042_v51 = vmul.f32 %v3040_v37, %v3037_v39  ;;  %v3027_v11 = vld [vmem:[#allocation5 + $0x33] sm:$0xff]  ;;  %v3058_v57 = vld [vmem:[#allocation5 + $0x83] sm:$0xff] }
 0x3fc   :  { %v2958_v3 = vadd.f32 %v2955_v8, %v2947_v55  ;;  %v3062_v27 = vstv %s7162_s3  ;;  %v3059_v19 = vld [vmem:[#allocation5 + $0x8b] sm:$0xff]  ;;  %v3021_v16 = vmul.f32 %v3018_v30, %v3016_v48  ;;  %v3052_v15 = vmul.f32 %v3051_v60, %v3047_v49 }
 0x3fd   :  { %v2989_v10 = vadd.f32 %v2986_v33, %v2978_v41  ;;  %v2990_v47 = vadd.f32 %v2987_v56, %v2979_v38  ;;  %v3053_v8 = vmul.f32 %v3051_v60, %v3048_v53  ;;  %v3038_v41 = vld [vmem:[#allocation5 + $0x53] sm:$0xff]  ;;  %v3069_v33 = vld [vmem:[#allocation5 + $0x4] sm:$0xff]  ;;  %v3073_v38 = vstv %s7165_s24 }
 0x3fe   :  { %v2969_v58 = vadd.f32 %v2966_v21, %v2958_v3  ;;  %v3070_v56 = vld [vmem:[#allocation5 + $0xc] sm:$0xff]  ;;  %v3032_v31 = vmul.f32 %v3029_v32, %v3027_v11  ;;  %v3063_v63 = vmul.f32 %v3062_v27, %v3058_v57  ;;  %v3064_v21 = vmul.f32 %v3062_v27, %v3059_v19  ;;  %v3104_v19 = vld [vmem:[#allocation5 + $0x74] sm:$0xff] }
 0x3ff   :  { %v3000_v14 = vadd.f32 %v2997_v45, %v2989_v10  ;;  %v3001_v43 = vadd.f32 %v2998_v40, %v2990_v47  ;;  %v3049_v10 = vld [vmem:[#allocation5 + $0x73] sm:$0xff]  ;;  %v3080_v45 = vld [vmem:[#allocation5 + $0x24] sm:$0xff]  ;;  %v3084_v47 = vstv %s7168_s4  ;;  %v3043_v20 = vmul.f32 %v3040_v37, %v3038_v41 }
 0x400   :  { %v2980_v0 = vadd.f32 %v2977_v36, %v2969_v58  ;;  %v3081_v40 = vld [vmem:[#allocation5 + $0x2c] sm:$0xff]  ;;  %v3074_v24 = vmul.f32 %v3073_v38, %v3069_v33  ;;  %v3075_v36 = vmul.f32 %v3073_v38, %v3070_v56  ;;  %v3054_v26 = vmul.f32 %v3051_v60, %v3049_v10 }
 0x401   :  { %v3011_v12 = vadd.f32 %v3008_v18, %v3000_v14  ;;  %v3012_v2 = vadd.f32 %v3009_v54, %v3001_v43  ;;  %v3060_v14 = vld [vmem:[#allocation5 + $0x93] sm:$0xff]  ;;  %v3091_v18 = vld [vmem:[#allocation5 + $0x44] sm:$0xff]  ;;  %v3095_v43 = vstv %s7171_s1  ;;  %v3085_v42 = vmul.f32 %v3084_v47, %v3080_v45 }
 0x402   :  { %v2991_v46 = vadd.f32 %v2988_v4, %v2980_v0  ;;  %v3092_v54 = vld [vmem:[#allocation5 + $0x4c] sm:$0xff]  ;;  %v3086_v4 = vmul.f32 %v3084_v47, %v3081_v40  ;;  %v3065_v52 = vmul.f32 %v3062_v27, %v3060_v14  ;;  %v3096_v39 = vmul.f32 %v3095_v43, %v3091_v18 }
 0x403   :  { %v3022_v35 = vadd.f32 %v3019_v1, %v3011_v12  ;;  %v3023_v44 = vadd.f32 %v3020_v28, %v3012_v2  ;;  %v3071_v12 = vld [vmem:[#allocation5 + $0x14] sm:$0xff]  ;;  %v3102_v1 = vld [vmem:[#allocation5 + $0x64] sm:$0xff]  ;;  %v3106_v2 = vstv %s7174_s14  ;;  %v3103_v28 = vld [vmem:[#allocation5 + $0x6c] sm:$0xff] }
 0x404   :  { %v3002_v29 = vadd.f32 %v2999_v5, %v2991_v46  ;;  %v3097_v5 = vmul.f32 %v3095_v43, %v3092_v54  ;;  %v3076_v49 = vmul.f32 %v3073_v38, %v3071_v12  ;;  %v3107_v53 = vmul.f32 %v3106_v2, %v3102_v1 }
 0x405   :  { %v3033_v13 = vadd.f32 %v3030_v7, %v3022_v35  ;;  %v3034_v9 = vadd.f32 %v3031_v17, %v3023_v44  ;;  %v3082_v35 = vld [vmem:[#allocation5 + $0x34] sm:$0xff]  ;;  %v3113_v7 = vld [vmem:[#allocation5 + $0x84] sm:$0xff]  ;;  %v3117_v44 = vstv %s7177_s21  ;;  %v3114_v17 = vld [vmem:[#allocation5 + $0x8c] sm:$0xff]  ;;  %v3109_v41 = vmul.f32 %v3106_v2, %v3104_v19 }
 0x406   :  { %v3013_v50 = vadd.f32 %v3010_v62, %v3002_v29  ;;  %v3108_v62 = vmul.f32 %v3106_v2, %v3103_v28  ;;  %v3118_v11 = vmul.f32 %v3117_v44, %v3113_v7  ;;  %v3119_v27 = vmul.f32 %v3117_v44, %v3114_v17 }
 0x407   :  { %v3044_v34 = vadd.f32 %v3041_v61, %v3033_v13  ;;  %v3045_v55 = vadd.f32 %v3042_v51, %v3034_v9  ;;  %v3093_v13 = vld [vmem:[#allocation5 + $0x54] sm:$0xff]  ;;  %v3087_v9 = vmul.f32 %v3084_v47, %v3082_v35 }
 0x408   :  { %v3024_v59 = vadd.f32 %v3021_v16, %v3013_v50  ;;  %v3098_v16 = vmul.f32 %v3095_v43, %v3093_v13 }
 0x409   :  { %v3055_v25 = vadd.f32 %v3052_v15, %v3044_v34  ;;  %v3056_v3 = vadd.f32 %v3053_v8, %v3045_v55  ;;  %v3115_v55 = vld [vmem:[#allocation5 + $0x94] sm:$0xff] }
 0x40a   :  { %v3035_v23 = vadd.f32 %v3032_v31, %v3024_v59  ;;  %v3120_v38 = vmul.f32 %v3117_v44, %v3115_v55 }
 0x40b   :  { %v3066_v30 = vadd.f32 %v3063_v63, %v3055_v25  ;;  %v3067_v58 = vadd.f32 %v3064_v21, %v3056_v3 }
 0x40c   :  { %v3046_v22 = vadd.f32 %v3043_v20, %v3035_v23 }
 0x40d   :  { %v3077_v32 = vadd.f32 %v3074_v24, %v3066_v30  ;;  %v3078_v0 = vadd.f32 %v3075_v36, %v3067_v58 }
 0x40e   :  { %v3057_v6 = vadd.f32 %v3054_v26, %v3046_v22 }
 0x40f   :  { %v3088_v37 = vadd.f32 %v3085_v42, %v3077_v32  ;;  %v3089_v46 = vadd.f32 %v3086_v4, %v3078_v0 }
 0x410   :  { %v3068_v48 = vadd.f32 %v3065_v52, %v3057_v6 }
 0x411   :  { %v3099_v60 = vadd.f32 %v3096_v39, %v3088_v37  ;;  %v3100_v29 = vadd.f32 %v3097_v5, %v3089_v46 }
 0x412   :  { %v3079_v61 = vadd.f32 %v3076_v49, %v3068_v48 }
 0x413   :  { %v3110_v51 = vadd.f32 %v3107_v53, %v3099_v60  ;;  %v3111_v57 = vadd.f32 %v3108_v62, %v3100_v29 }
 0x414   :  { %v3090_v50 = vadd.f32 %v3087_v9, %v3079_v61 }
 0x415   :  { %v3121_v34 = vadd.f32 %v3118_v11, %v3110_v51  ;;  %v3122_v15 = vadd.f32 %v3119_v27, %v3111_v57 }
 0x416   :  { %v3101_v8 = vadd.f32 %v3098_v16, %v3090_v50 }
 0x417   :  { %3131 = vrot.lane.b32.xlu0 %v3121_v34, %s3544_s30  ;;  %3125 = vst.msk [vmem:[#allocation15] sm:$0xff] %vm3124_vm5, %v3121_v34  ;;  %3133 = vrot.lane.b32.xlu1 %v3122_v15, %s3544_s30  ;;  %3126 = vst.msk [vmem:[#allocation15 + $0x8] sm:$0xff] %vm3124_vm5, %v3122_v15 }
 0x418   :  { %v3112_v33 = vadd.f32 %v3109_v41, %v3101_v8 }
 0x41a   :  { %v3123_v56 = vadd.f32 %v3120_v38, %v3112_v33 }
 0x41c   :  { %3135 = vrot.lane.b32.xlu0 %v3123_v56, %s3544_s30  ;;  %3127 = vst.msk [vmem:[#allocation15 + $0x10] sm:$0xff] %vm3124_vm5, %v3123_v56 }
 0x489   :  { %v3134_v59 = vpop.permute.xlu1 %3133  ;;  %v3132_v31 = vpop.permute.xlu0 %3131 }
 0x48a   :  { %3142 = vst.msk [vmem:[#allocation15 + $0x20] sm:$0xff] %vm3124_vm5, %v3134_v59  ;;  %3141 = vst.msk [vmem:[#allocation15 + $0x18] sm:$0xff] %vm3124_vm5, %v3132_v31 }
 0x48e   :  { %v3136_v25 = vpop.permute.xlu0 %3135 }
 0x48f   :  { %3143 = vst.msk [vmem:[#allocation15 + $0x28] sm:$0xff] %vm3124_vm5, %v3136_v25 }
 0x490   :  { %3514 = shalt.err (!%p3511_p10)
}
 0x491   :  { %s8272_s5 = smov 128   ;;  %s8273_s17 = sld [smem:[#allocation194_spill]] }
 0x497   :  { %3155 = dma.vmem_to_hbm [thread:$0]  %s3150_s9, 768, %s8273_s17, [#allocation9], %s8272_s5, %s8272_s5, %s8188_s7  }
 0x498   :  { %3529 = dma.done.wait [#allocation9], 768  }
 0x499   :  { %3530 = vsyncadd [#allocation9], 4294966528 }
 0x49a   :  { %3159 = vsyncpa [#allocation8], 1 }
 0x49b   :  { %3160 = vsyncpa [#allocation9], 1 }
 0x49c   :  { %3161 = vsyncpa [#allocation10], 1 }
 0x49d   :  { %3162 = vsyncpa [#allocation13], 1 }

</bundles_post_ra>
